<compile_context>
chip_gen: v6e
topology: v6e:2x2x1
jax: 0.10.0
libtpu: 0.0.40
codegen_flags: <defaults>
</compile_context>

<pallas_src>
import jax
import jax.numpy as jnp
from jax.experimental import pallas as pl
from jax.experimental.pallas import tpu as pltpu

PMAX = 7                       # max padding / dilation among the branches
DILATIONS = (3, 5, 7)
# off-center tap order: row-major (ky, kx), skipping the center (1, 1)
OFF_TAPS = tuple((ky, kx) for ky in range(3) for kx in range(3)
                 if not (ky == 1 and kx == 1))


def aspp_kernel(xp_ref, wc_ref, b_ref, woff_ref, o_ref, acc_ref):
    _, Hp, Wp, Cin = xp_ref.shape
    _, HW, depth = o_ref.shape
    n_br, _, _, Cq = woff_ref.shape
    H = Hp - 2 * PMAX
    W = Wp - 2 * PMAX

    # Fused lane-dense center matmul: 1x1 conv + shortcut + center tap of
    # every dilated branch, with all biases pre-folded into b_ref.
    center = xp_ref[0, PMAX:PMAX + H, PMAX:PMAX + W, :].reshape(HW, Cin)
    acc_ref[...] = (jnp.dot(center, wc_ref[...],
                            preferred_element_type=jnp.float32) + b_ref[...])

    # Off-center taps: each dilated branch accumulates into its own Cq-wide
    # lane slice of the (HW, depth) scratch — no concatenate in the epilogue.
    for bi in range(n_br):
        d = DILATIONS[bi]
        acc = jnp.zeros((HW, Cq), jnp.float32)
        for ky in range(3):
            h0 = PMAX + (ky - 1) * d
            band = xp_ref[0, h0:h0 + H, :, :]     # hoisted row band (H, Wp, Cin)
            for kx in range(3):
                if ky == 1 and kx == 1:
                    continue                      # center tap already fused above
                w0 = PMAX + (kx - 1) * d
                patch = band[:, w0:w0 + W, :].reshape(HW, Cin)
                ti = OFF_TAPS.index((ky, kx))
                acc = acc + jnp.dot(patch, woff_ref[bi, ti],
                                    preferred_element_type=jnp.float32)
        c0 = (bi + 1) * Cq
        acc_ref[:, c0:c0 + Cq] = acc_ref[:, c0:c0 + Cq] + acc

    # Single full-depth, lane-dense store.
    o_ref[0] = acc_ref[...].astype(o_ref.dtype)


def fuse_params(params):
    """One-time weight prep (not per call).

    Returns:
      w_center: (Cin, depth)  = [w1 | w6_c | w12_c | w18_c] + wsc
      b_all:    (1, depth)    = [b1 | b6 | b12 | b18] + bsc
      w_off:    (3, 8, Cin, Cq) off-center taps of the dilated branches,
                ordered by OFF_TAPS.
    """
    w9s = (params["w6"], params["w12"], params["w18"])
    b9s = (params["b6"], params["b12"], params["b18"])
    w_center = jnp.concatenate([params["w1"]] + [w9[4] for w9 in w9s],
                               axis=1) + params["wsc"]
    b_all = jnp.concatenate([params["b1"]] + list(b9s), axis=1) + params["bsc"]
    off_idx = jnp.array([ky * 3 + kx for (ky, kx) in OFF_TAPS], jnp.int32)
    w_off = jnp.stack([w9[off_idx] for w9 in w9s], axis=0)
    return w_center, b_all, w_off


def aspp_forward(x_nchw, fused):
    """x_nchw: (N, Cin, H, W) float32. Returns (N, depth, H, W)."""
    w_center, b_all, w_off = fused
    N, Cin, H, W = x_nchw.shape
    depth = w_center.shape[1]

    x = jnp.transpose(x_nchw, (0, 2, 3, 1))                   # NHWC
    xp = jnp.pad(x, ((0, 0), (PMAX, PMAX), (PMAX, PMAX), (0, 0)))
    Hp, Wp = H + 2 * PMAX, W + 2 * PMAX

    out_flat = pl.pallas_call(
        aspp_kernel,
        out_shape=jax.ShapeDtypeStruct((N, H * W, depth), x.dtype),
        grid=(N,),
        in_specs=[
            pl.BlockSpec((1, Hp, Wp, Cin), lambda n: (n, 0, 0, 0)),
            pl.BlockSpec(w_center.shape, lambda n: (0, 0)),
            pl.BlockSpec(b_all.shape, lambda n: (0, 0)),
            pl.BlockSpec(w_off.shape, lambda n: (0, 0, 0, 0)),
        ],
        out_specs=pl.BlockSpec((1, H * W, depth), lambda n: (n, 0, 0)),
        scratch_shapes=[pltpu.VMEM((H * W, depth), jnp.float32)],
        compiler_params=pltpu.CompilerParams(
            dimension_semantics=("parallel",)),
    )(xp, w_center, b_all, w_off)

    out = out_flat.reshape(N, H, W, depth)
    return jnp.transpose(out, (0, 3, 1, 2))                   # back to NCHW


def init_params(key, in_channel, depth):
    """Deterministic synthetic parameters (shapes match nn.Conv2d in ASPP)."""
    cq = depth // 4
    ks = jax.random.split(key, 10)
    scale = 0.1
    return {
        # 1x1 conv:  weight (Cin, Cq), bias (1, Cq)
        "w1":  scale * jax.random.normal(ks[0], (in_channel, cq), jnp.float32),
        "b1":  scale * jax.random.normal(ks[1], (1, cq), jnp.float32),
        # dilated 3x3 convs: weight stored as (9, Cin, Cq) = (ky*3+kx, Cin, Cq)
        "w6":  scale * jax.random.normal(ks[2], (9, in_channel, cq), jnp.float32),
        "b6":  scale * jax.random.normal(ks[3], (1, cq), jnp.float32),
        "w12": scale * jax.random.normal(ks[4], (9, in_channel, cq), jnp.float32),
        "b12": scale * jax.random.normal(ks[5], (1, cq), jnp.float32),
        "w18": scale * jax.random.normal(ks[6], (9, in_channel, cq), jnp.float32),
        "b18": scale * jax.random.normal(ks[7], (1, cq), jnp.float32),
        # shortcut 1x1: weight (Cin, depth), bias (1, depth)
        "wsc": scale * jax.random.normal(ks[8], (in_channel, depth), jnp.float32),
        "bsc": scale * jax.random.normal(ks[9], (1, depth), jnp.float32),
    }


def aspp_reference(x_nchw, params):
    """Pure-JAX reference (same math as the PyTorch module), for validation."""
    x = jnp.transpose(x_nchw, (0, 2, 3, 1))                   # NHWC

    def conv1x1(x, w, b):
        return jnp.einsum("nhwc,co->nhwo", x, w) + b.reshape(1, 1, 1, -1)

    def dconv(x, w9, b, d):
        w = w9.reshape(3, 3, w9.shape[1], w9.shape[2])        # HWIO
        y = jax.lax.conv_general_dilated(
            x, w, window_strides=(1, 1), padding=[(d, d), (d, d)],
            rhs_dilation=(d, d),
            dimension_numbers=("NHWC", "HWIO", "NHWC"))
        return y + b.reshape(1, 1, 1, -1)

    shortcut = conv1x1(x, params["wsc"], params["bsc"])
    y1 = conv1x1(x, params["w1"], params["b1"])
    y6 = dconv(x, params["w6"], params["b6"], 3)
    y12 = dconv(x, params["w12"], params["b12"], 5)
    y18 = dconv(x, params["w18"], params["b18"], 7)
    out = jnp.concatenate([y1, y6, y12, y18], axis=-1) + shortcut
    return jnp.transpose(out, (0, 3, 1, 2))


if __name__ == "__main__":
    N, Cin, H, W = 2, 4, 16, 16
    depth = 16

    key = jax.random.PRNGKey(0)
    kx, kp = jax.random.split(key)
    x = jax.random.normal(kx, (N, Cin, H, W), jnp.float32)
    params = init_params(kp, Cin, depth)

    fused = fuse_params(params)        # one-time weight folding
    out = aspp_forward(x, fused)
    out = jax.block_until_ready(out)

    ref = aspp_reference(x, params)
    assert out.shape == (N, depth, H, W)
    assert jnp.allclose(out, ref, atol=1e-4, rtol=1e-4), \
        f"max abs err = {jnp.max(jnp.abs(out - ref))}"

    print("KERNEL_OK")
</pallas_src>

<mosaic_0001>
module attributes {stable_mosaic.version = 11 : i64} {
  func.func @aspp_kernel(%arg0: i32, %arg1: memref<1x30x30x4xf32, #tpu.memory_space<vmem>>, %arg2: memref<4x16xf32, #tpu.memory_space<vmem>>, %arg3: memref<1x16xf32, #tpu.memory_space<vmem>>, %arg4: memref<3x8x4x4xf32, #tpu.memory_space<vmem>>, %arg5: memref<1x256x16xf32, #tpu.memory_space<vmem>>, %arg6: memref<256x16xf32, #tpu.memory_space<vmem>>) attributes {dimension_semantics = [#tpu.dimension_semantics<parallel>], iteration_bounds = array<i64: 2>, scalar_prefetch = 0 : i64, scratch_operands = 1 : i64, tpu.core_type = #tpu.core_type<tc>, window_params = [{transform_indices = @transform_0, window_bounds = array<i64: 1, 30, 30, 4>}, {pipeline_mode = #tpu.pipeline_mode<synchronous>, transform_indices = @transform_1, window_bounds = array<i64: 4, 16>}, {pipeline_mode = #tpu.pipeline_mode<synchronous>, transform_indices = @transform_2, window_bounds = array<i64: 1, 16>}, {pipeline_mode = #tpu.pipeline_mode<synchronous>, transform_indices = @transform_3, window_bounds = array<i64: 3, 8, 4, 4>}, {transform_indices = @transform_4, window_bounds = array<i64: 1, 256, 16>}]} {
    %c0 = arith.constant 0 : index
    %c7 = arith.constant 7 : index
    %c7_0 = arith.constant 7 : index
    %c0_1 = arith.constant 0 : index
    %0 = vector.load %arg1[%c0, %c7, %c7_0, %c0_1] : memref<1x30x30x4xf32, #tpu.memory_space<vmem>>, vector<1x16x16x4xf32>
    %1 = vector.shape_cast %0 : vector<1x16x16x4xf32> to vector<16x16x4xf32>
    %2 = vector.shape_cast %1 : vector<16x16x4xf32> to vector<256x4xf32>
    %c0_2 = arith.constant 0 : index
    %c0_3 = arith.constant 0 : index
    %3 = vector.load %arg2[%c0_2, %c0_3] : memref<4x16xf32, #tpu.memory_space<vmem>>, vector<4x16xf32>
    %cst = arith.constant dense<0.000000e+00> : vector<256x16xf32>
    %4 = tpu.matmul %2, %3, %cst {dimension_numbers = #tpu.dot_dimension_numbers<[1], [0], [0], [1], [0, 0, 1, 1], [], []>} : vector<256x4xf32>, vector<4x16xf32>, vector<256x16xf32> -> vector<256x16xf32>
    %c0_4 = arith.constant 0 : index
    %c0_5 = arith.constant 0 : index
    %5 = vector.load %arg3[%c0_4, %c0_5] : memref<1x16xf32, #tpu.memory_space<vmem>>, vector<1x16xf32>
    %6 = vector.broadcast %5 : vector<1x16xf32> to vector<256x16xf32>
    %7 = arith.addf %4, %6 : vector<256x16xf32>
    %c0_6 = arith.constant 0 : index
    %c0_7 = arith.constant 0 : index
    %8 = vector.load %arg6[%c0_6, %c0_7] : memref<256x16xf32, #tpu.memory_space<vmem>>, vector<256x16xf32>
    tpu.vector_store %arg6[%c0_6, %c0_7], %7 {strides = array<i32>} : memref<256x16xf32, #tpu.memory_space<vmem>>, vector<256x16xf32>,
    %cst_8 = arith.constant 0.000000e+00 : f32
    %9 = vector.broadcast %cst_8 : f32 to vector<256x4xf32>
    %c0_9 = arith.constant 0 : index
    %c4 = arith.constant 4 : index
    %c0_10 = arith.constant 0 : index
    %c0_11 = arith.constant 0 : index
    %10 = vector.load %arg1[%c0_9, %c4, %c0_10, %c0_11] : memref<1x30x30x4xf32, #tpu.memory_space<vmem>>, vector<1x16x30x4xf32>
    %11 = vector.shape_cast %10 : vector<1x16x30x4xf32> to vector<16x30x4xf32>
    %12 = vector.extract_strided_slice %11 {offsets = [0, 4, 0], sizes = [16, 16, 4], strides = [1, 1, 1]} : vector<16x30x4xf32> to vector<16x16x4xf32>
    %13 = vector.shape_cast %12 : vector<16x16x4xf32> to vector<256x4xf32>
    %c0_12 = arith.constant 0 : index
    %c0_13 = arith.constant 0 : index
    %c0_14 = arith.constant 0 : index
    %c0_15 = arith.constant 0 : index
    %14 = vector.load %arg4[%c0_12, %c0_13, %c0_14, %c0_15] : memref<3x8x4x4xf32, #tpu.memory_space<vmem>>, vector<1x1x4x4xf32>
    %15 = vector.shape_cast %14 : vector<1x1x4x4xf32> to vector<4x4xf32>
    %cst_16 = arith.constant dense<0.000000e+00> : vector<256x4xf32>
    %16 = tpu.matmul %13, %15, %cst_16 {dimension_numbers = #tpu.dot_dimension_numbers<[1], [0], [0], [1], [0, 0, 1, 1], [], []>} : vector<256x4xf32>, vector<4x4xf32>, vector<256x4xf32> -> vector<256x4xf32>
    %17 = arith.addf %9, %16 : vector<256x4xf32>
    %18 = vector.extract_strided_slice %11 {offsets = [0, 7, 0], sizes = [16, 16, 4], strides = [1, 1, 1]} : vector<16x30x4xf32> to vector<16x16x4xf32>
    %19 = vector.shape_cast %18 : vector<16x16x4xf32> to vector<256x4xf32>
    %c0_17 = arith.constant 0 : index
    %c1 = arith.constant 1 : index
    %c0_18 = arith.constant 0 : index
    %c0_19 = arith.constant 0 : index
    %20 = vector.load %arg4[%c0_17, %c1, %c0_18, %c0_19] : memref<3x8x4x4xf32, #tpu.memory_space<vmem>>, vector<1x1x4x4xf32>
    %21 = vector.shape_cast %20 : vector<1x1x4x4xf32> to vector<4x4xf32>
    %cst_20 = arith.constant dense<0.000000e+00> : vector<256x4xf32>
    %22 = tpu.matmul %19, %21, %cst_20 {dimension_numbers = #tpu.dot_dimension_numbers<[1], [0], [0], [1], [0, 0, 1, 1], [], []>} : vector<256x4xf32>, vector<4x4xf32>, vector<256x4xf32> -> vector<256x4xf32>
    %23 = arith.addf %17, %22 : vector<256x4xf32>
    %24 = vector.extract_strided_slice %11 {offsets = [0, 10, 0], sizes = [16, 16, 4], strides = [1, 1, 1]} : vector<16x30x4xf32> to vector<16x16x4xf32>
    %25 = vector.shape_cast %24 : vector<16x16x4xf32> to vector<256x4xf32>
    %c0_21 = arith.constant 0 : index
    %c2 = arith.constant 2 : index
    %c0_22 = arith.constant 0 : index
    %c0_23 = arith.constant 0 : index
    %26 = vector.load %arg4[%c0_21, %c2, %c0_22, %c0_23] : memref<3x8x4x4xf32, #tpu.memory_space<vmem>>, vector<1x1x4x4xf32>
    %27 = vector.shape_cast %26 : vector<1x1x4x4xf32> to vector<4x4xf32>
    %cst_24 = arith.constant dense<0.000000e+00> : vector<256x4xf32>
    %28 = tpu.matmul %25, %27, %cst_24 {dimension_numbers = #tpu.dot_dimension_numbers<[1], [0], [0], [1], [0, 0, 1, 1], [], []>} : vector<256x4xf32>, vector<4x4xf32>, vector<256x4xf32> -> vector<256x4xf32>
    %29 = arith.addf %23, %28 : vector<256x4xf32>
    %c0_25 = arith.constant 0 : index
    %c7_26 = arith.constant 7 : index
    %c0_27 = arith.constant 0 : index
    %c0_28 = arith.constant 0 : index
    %30 = vector.load %arg1[%c0_25, %c7_26, %c0_27, %c0_28] : memref<1x30x30x4xf32, #tpu.memory_space<vmem>>, vector<1x16x30x4xf32>
    %31 = vector.shape_cast %30 : vector<1x16x30x4xf32> to vector<16x30x4xf32>
    %32 = vector.extract_strided_slice %31 {offsets = [0, 4, 0], sizes = [16, 16, 4], strides = [1, 1, 1]} : vector<16x30x4xf32> to vector<16x16x4xf32>
    %33 = vector.shape_cast %32 : vector<16x16x4xf32> to vector<256x4xf32>
    %c0_29 = arith.constant 0 : index
    %c3 = arith.constant 3 : index
    %c0_30 = arith.constant 0 : index
    %c0_31 = arith.constant 0 : index
    %34 = vector.load %arg4[%c0_29, %c3, %c0_30, %c0_31] : memref<3x8x4x4xf32, #tpu.memory_space<vmem>>, vector<1x1x4x4xf32>
    %35 = vector.shape_cast %34 : vector<1x1x4x4xf32> to vector<4x4xf32>
    %cst_32 = arith.constant dense<0.000000e+00> : vector<256x4xf32>
    %36 = tpu.matmul %33, %35, %cst_32 {dimension_numbers = #tpu.dot_dimension_numbers<[1], [0], [0], [1], [0, 0, 1, 1], [], []>} : vector<256x4xf32>, vector<4x4xf32>, vector<256x4xf32> -> vector<256x4xf32>
    %37 = arith.addf %29, %36 : vector<256x4xf32>
    %38 = vector.extract_strided_slice %31 {offsets = [0, 10, 0], sizes = [16, 16, 4], strides = [1, 1, 1]} : vector<16x30x4xf32> to vector<16x16x4xf32>
    %39 = vector.shape_cast %38 : vector<16x16x4xf32> to vector<256x4xf32>
    %c0_33 = arith.constant 0 : index
    %c4_34 = arith.constant 4 : index
    %c0_35 = arith.constant 0 : index
    %c0_36 = arith.constant 0 : index
    %40 = vector.load %arg4[%c0_33, %c4_34, %c0_35, %c0_36] : memref<3x8x4x4xf32, #tpu.memory_space<vmem>>, vector<1x1x4x4xf32>
    %41 = vector.shape_cast %40 : vector<1x1x4x4xf32> to vector<4x4xf32>
    %cst_37 = arith.constant dense<0.000000e+00> : vector<256x4xf32>
    %42 = tpu.matmul %39, %41, %cst_37 {dimension_numbers = #tpu.dot_dimension_numbers<[1], [0], [0], [1], [0, 0, 1, 1], [], []>} : vector<256x4xf32>, vector<4x4xf32>, vector<256x4xf32> -> vector<256x4xf32>
    %43 = arith.addf %37, %42 : vector<256x4xf32>
    %c0_38 = arith.constant 0 : index
    %c10 = arith.constant 10 : index
    %c0_39 = arith.constant 0 : index
    %c0_40 = arith.constant 0 : index
    %44 = vector.load %arg1[%c0_38, %c10, %c0_39, %c0_40] : memref<1x30x30x4xf32, #tpu.memory_space<vmem>>, vector<1x16x30x4xf32>
    %45 = vector.shape_cast %44 : vector<1x16x30x4xf32> to vector<16x30x4xf32>
    %46 = vector.extract_strided_slice %45 {offsets = [0, 4, 0], sizes = [16, 16, 4], strides = [1, 1, 1]} : vector<16x30x4xf32> to vector<16x16x4xf32>
    %47 = vector.shape_cast %46 : vector<16x16x4xf32> to vector<256x4xf32>
    %c0_41 = arith.constant 0 : index
    %c5 = arith.constant 5 : index
    %c0_42 = arith.constant 0 : index
    %c0_43 = arith.constant 0 : index
    %48 = vector.load %arg4[%c0_41, %c5, %c0_42, %c0_43] : memref<3x8x4x4xf32, #tpu.memory_space<vmem>>, vector<1x1x4x4xf32>
    %49 = vector.shape_cast %48 : vector<1x1x4x4xf32> to vector<4x4xf32>
    %cst_44 = arith.constant dense<0.000000e+00> : vector<256x4xf32>
    %50 = tpu.matmul %47, %49, %cst_44 {dimension_numbers = #tpu.dot_dimension_numbers<[1], [0], [0], [1], [0, 0, 1, 1], [], []>} : vector<256x4xf32>, vector<4x4xf32>, vector<256x4xf32> -> vector<256x4xf32>
    %51 = arith.addf %43, %50 : vector<256x4xf32>
    %52 = vector.extract_strided_slice %45 {offsets = [0, 7, 0], sizes = [16, 16, 4], strides = [1, 1, 1]} : vector<16x30x4xf32> to vector<16x16x4xf32>
    %53 = vector.shape_cast %52 : vector<16x16x4xf32> to vector<256x4xf32>
    %c0_45 = arith.constant 0 : index
    %c6 = arith.constant 6 : index
    %c0_46 = arith.constant 0 : index
    %c0_47 = arith.constant 0 : index
    %54 = vector.load %arg4[%c0_45, %c6, %c0_46, %c0_47] : memref<3x8x4x4xf32, #tpu.memory_space<vmem>>, vector<1x1x4x4xf32>
    %55 = vector.shape_cast %54 : vector<1x1x4x4xf32> to vector<4x4xf32>
    %cst_48 = arith.constant dense<0.000000e+00> : vector<256x4xf32>
    %56 = tpu.matmul %53, %55, %cst_48 {dimension_numbers = #tpu.dot_dimension_numbers<[1], [0], [0], [1], [0, 0, 1, 1], [], []>} : vector<256x4xf32>, vector<4x4xf32>, vector<256x4xf32> -> vector<256x4xf32>
    %57 = arith.addf %51, %56 : vector<256x4xf32>
    %58 = vector.extract_strided_slice %45 {offsets = [0, 10, 0], sizes = [16, 16, 4], strides = [1, 1, 1]} : vector<16x30x4xf32> to vector<16x16x4xf32>
    %59 = vector.shape_cast %58 : vector<16x16x4xf32> to vector<256x4xf32>
    %c0_49 = arith.constant 0 : index
    %c7_50 = arith.constant 7 : index
    %c0_51 = arith.constant 0 : index
    %c0_52 = arith.constant 0 : index
    %60 = vector.load %arg4[%c0_49, %c7_50, %c0_51, %c0_52] : memref<3x8x4x4xf32, #tpu.memory_space<vmem>>, vector<1x1x4x4xf32>
    %61 = vector.shape_cast %60 : vector<1x1x4x4xf32> to vector<4x4xf32>
    %cst_53 = arith.constant dense<0.000000e+00> : vector<256x4xf32>
    %62 = tpu.matmul %59, %61, %cst_53 {dimension_numbers = #tpu.dot_dimension_numbers<[1], [0], [0], [1], [0, 0, 1, 1], [], []>} : vector<256x4xf32>, vector<4x4xf32>, vector<256x4xf32> -> vector<256x4xf32>
    %63 = arith.addf %57, %62 : vector<256x4xf32>
    %c0_54 = arith.constant 0 : index
    %c4_55 = arith.constant 4 : index
    %64 = vector.load %arg6[%c0_54, %c4_55] : memref<256x16xf32, #tpu.memory_space<vmem>>, vector<256x4xf32>
    %65 = arith.addf %64, %63 : vector<256x4xf32>
    %c0_56 = arith.constant 0 : index
    %c4_57 = arith.constant 4 : index
    %66 = vector.load %arg6[%c0_56, %c4_57] : memref<256x16xf32, #tpu.memory_space<vmem>>, vector<256x4xf32>
    tpu.vector_store %arg6[%c0_56, %c4_57], %65 {strides = array<i32>} : memref<256x16xf32, #tpu.memory_space<vmem>>, vector<256x4xf32>,
    %cst_58 = arith.constant 0.000000e+00 : f32
    %67 = vector.broadcast %cst_58 : f32 to vector<256x4xf32>
    %c0_59 = arith.constant 0 : index
    %c2_60 = arith.constant 2 : index
    %c0_61 = arith.constant 0 : index
    %c0_62 = arith.constant 0 : index
    %68 = vector.load %arg1[%c0_59, %c2_60, %c0_61, %c0_62] : memref<1x30x30x4xf32, #tpu.memory_space<vmem>>, vector<1x16x30x4xf32>
    %69 = vector.shape_cast %68 : vector<1x16x30x4xf32> to vector<16x30x4xf32>
    %70 = vector.extract_strided_slice %69 {offsets = [0, 2, 0], sizes = [16, 16, 4], strides = [1, 1, 1]} : vector<16x30x4xf32> to vector<16x16x4xf32>
    %71 = vector.shape_cast %70 : vector<16x16x4xf32> to vector<256x4xf32>
    %c1_63 = arith.constant 1 : index
    %c0_64 = arith.constant 0 : index
    %c0_65 = arith.constant 0 : index
    %c0_66 = arith.constant 0 : index
    %72 = vector.load %arg4[%c1_63, %c0_64, %c0_65, %c0_66] : memref<3x8x4x4xf32, #tpu.memory_space<vmem>>, vector<1x1x4x4xf32>
    %73 = vector.shape_cast %72 : vector<1x1x4x4xf32> to vector<4x4xf32>
    %cst_67 = arith.constant dense<0.000000e+00> : vector<256x4xf32>
    %74 = tpu.matmul %71, %73, %cst_67 {dimension_numbers = #tpu.dot_dimension_numbers<[1], [0], [0], [1], [0, 0, 1, 1], [], []>} : vector<256x4xf32>, vector<4x4xf32>, vector<256x4xf32> -> vector<256x4xf32>
    %75 = arith.addf %67, %74 : vector<256x4xf32>
    %76 = vector.extract_strided_slice %69 {offsets = [0, 7, 0], sizes = [16, 16, 4], strides = [1, 1, 1]} : vector<16x30x4xf32> to vector<16x16x4xf32>
    %77 = vector.shape_cast %76 : vector<16x16x4xf32> to vector<256x4xf32>
    %c1_68 = arith.constant 1 : index
    %c1_69 = arith.constant 1 : index
    %c0_70 = arith.constant 0 : index
    %c0_71 = arith.constant 0 : index
    %78 = vector.load %arg4[%c1_68, %c1_69, %c0_70, %c0_71] : memref<3x8x4x4xf32, #tpu.memory_space<vmem>>, vector<1x1x4x4xf32>
    %79 = vector.shape_cast %78 : vector<1x1x4x4xf32> to vector<4x4xf32>
    %cst_72 = arith.constant dense<0.000000e+00> : vector<256x4xf32>
    %80 = tpu.matmul %77, %79, %cst_72 {dimension_numbers = #tpu.dot_dimension_numbers<[1], [0], [0], [1], [0, 0, 1, 1], [], []>} : vector<256x4xf32>, vector<4x4xf32>, vector<256x4xf32> -> vector<256x4xf32>
    %81 = arith.addf %75, %80 : vector<256x4xf32>
    %82 = vector.extract_strided_slice %69 {offsets = [0, 12, 0], sizes = [16, 16, 4], strides = [1, 1, 1]} : vector<16x30x4xf32> to vector<16x16x4xf32>
    %83 = vector.shape_cast %82 : vector<16x16x4xf32> to vector<256x4xf32>
    %c1_73 = arith.constant 1 : index
    %c2_74 = arith.constant 2 : index
    %c0_75 = arith.constant 0 : index
    %c0_76 = arith.constant 0 : index
    %84 = vector.load %arg4[%c1_73, %c2_74, %c0_75, %c0_76] : memref<3x8x4x4xf32, #tpu.memory_space<vmem>>, vector<1x1x4x4xf32>
    %85 = vector.shape_cast %84 : vector<1x1x4x4xf32> to vector<4x4xf32>
    %cst_77 = arith.constant dense<0.000000e+00> : vector<256x4xf32>
    %86 = tpu.matmul %83, %85, %cst_77 {dimension_numbers = #tpu.dot_dimension_numbers<[1], [0], [0], [1], [0, 0, 1, 1], [], []>} : vector<256x4xf32>, vector<4x4xf32>, vector<256x4xf32> -> vector<256x4xf32>
    %87 = arith.addf %81, %86 : vector<256x4xf32>
    %c0_78 = arith.constant 0 : index
    %c7_79 = arith.constant 7 : index
    %c0_80 = arith.constant 0 : index
    %c0_81 = arith.constant 0 : index
    %88 = vector.load %arg1[%c0_78, %c7_79, %c0_80, %c0_81] : memref<1x30x30x4xf32, #tpu.memory_space<vmem>>, vector<1x16x30x4xf32>
    %89 = vector.shape_cast %88 : vector<1x16x30x4xf32> to vector<16x30x4xf32>
    %90 = vector.extract_strided_slice %89 {offsets = [0, 2, 0], sizes = [16, 16, 4], strides = [1, 1, 1]} : vector<16x30x4xf32> to vector<16x16x4xf32>
    %91 = vector.shape_cast %90 : vector<16x16x4xf32> to vector<256x4xf32>
    %c1_82 = arith.constant 1 : index
    %c3_83 = arith.constant 3 : index
    %c0_84 = arith.constant 0 : index
    %c0_85 = arith.constant 0 : index
    %92 = vector.load %arg4[%c1_82, %c3_83, %c0_84, %c0_85] : memref<3x8x4x4xf32, #tpu.memory_space<vmem>>, vector<1x1x4x4xf32>
    %93 = vector.shape_cast %92 : vector<1x1x4x4xf32> to vector<4x4xf32>
    %cst_86 = arith.constant dense<0.000000e+00> : vector<256x4xf32>
    %94 = tpu.matmul %91, %93, %cst_86 {dimension_numbers = #tpu.dot_dimension_numbers<[1], [0], [0], [1], [0, 0, 1, 1], [], []>} : vector<256x4xf32>, vector<4x4xf32>, vector<256x4xf32> -> vector<256x4xf32>
    %95 = arith.addf %87, %94 : vector<256x4xf32>
    %96 = vector.extract_strided_slice %89 {offsets = [0, 12, 0], sizes = [16, 16, 4], strides = [1, 1, 1]} : vector<16x30x4xf32> to vector<16x16x4xf32>
    %97 = vector.shape_cast %96 : vector<16x16x4xf32> to vector<256x4xf32>
    %c1_87 = arith.constant 1 : index
    %c4_88 = arith.constant 4 : index
    %c0_89 = arith.constant 0 : index
    %c0_90 = arith.constant 0 : index
    %98 = vector.load %arg4[%c1_87, %c4_88, %c0_89, %c0_90] : memref<3x8x4x4xf32, #tpu.memory_space<vmem>>, vector<1x1x4x4xf32>
    %99 = vector.shape_cast %98 : vector<1x1x4x4xf32> to vector<4x4xf32>
    %cst_91 = arith.constant dense<0.000000e+00> : vector<256x4xf32>
    %100 = tpu.matmul %97, %99, %cst_91 {dimension_numbers = #tpu.dot_dimension_numbers<[1], [0], [0], [1], [0, 0, 1, 1], [], []>} : vector<256x4xf32>, vector<4x4xf32>, vector<256x4xf32> -> vector<256x4xf32>
    %101 = arith.addf %95, %100 : vector<256x4xf32>
    %c0_92 = arith.constant 0 : index
    %c12 = arith.constant 12 : index
    %c0_93 = arith.constant 0 : index
    %c0_94 = arith.constant 0 : index
    %102 = vector.load %arg1[%c0_92, %c12, %c0_93, %c0_94] : memref<1x30x30x4xf32, #tpu.memory_space<vmem>>, vector<1x16x30x4xf32>
    %103 = vector.shape_cast %102 : vector<1x16x30x4xf32> to vector<16x30x4xf32>
    %104 = vector.extract_strided_slice %103 {offsets = [0, 2, 0], sizes = [16, 16, 4], strides = [1, 1, 1]} : vector<16x30x4xf32> to vector<16x16x4xf32>
    %105 = vector.shape_cast %104 : vector<16x16x4xf32> to vector<256x4xf32>
    %c1_95 = arith.constant 1 : index
    %c5_96 = arith.constant 5 : index
    %c0_97 = arith.constant 0 : index
    %c0_98 = arith.constant 0 : index
    %106 = vector.load %arg4[%c1_95, %c5_96, %c0_97, %c0_98] : memref<3x8x4x4xf32, #tpu.memory_space<vmem>>, vector<1x1x4x4xf32>
    %107 = vector.shape_cast %106 : vector<1x1x4x4xf32> to vector<4x4xf32>
    %cst_99 = arith.constant dense<0.000000e+00> : vector<256x4xf32>
    %108 = tpu.matmul %105, %107, %cst_99 {dimension_numbers = #tpu.dot_dimension_numbers<[1], [0], [0], [1], [0, 0, 1, 1], [], []>} : vector<256x4xf32>, vector<4x4xf32>, vector<256x4xf32> -> vector<256x4xf32>
    %109 = arith.addf %101, %108 : vector<256x4xf32>
    %110 = vector.extract_strided_slice %103 {offsets = [0, 7, 0], sizes = [16, 16, 4], strides = [1, 1, 1]} : vector<16x30x4xf32> to vector<16x16x4xf32>
    %111 = vector.shape_cast %110 : vector<16x16x4xf32> to vector<256x4xf32>
    %c1_100 = arith.constant 1 : index
    %c6_101 = arith.constant 6 : index
    %c0_102 = arith.constant 0 : index
    %c0_103 = arith.constant 0 : index
    %112 = vector.load %arg4[%c1_100, %c6_101, %c0_102, %c0_103] : memref<3x8x4x4xf32, #tpu.memory_space<vmem>>, vector<1x1x4x4xf32>
    %113 = vector.shape_cast %112 : vector<1x1x4x4xf32> to vector<4x4xf32>
    %cst_104 = arith.constant dense<0.000000e+00> : vector<256x4xf32>
    %114 = tpu.matmul %111, %113, %cst_104 {dimension_numbers = #tpu.dot_dimension_numbers<[1], [0], [0], [1], [0, 0, 1, 1], [], []>} : vector<256x4xf32>, vector<4x4xf32>, vector<256x4xf32> -> vector<256x4xf32>
    %115 = arith.addf %109, %114 : vector<256x4xf32>
    %116 = vector.extract_strided_slice %103 {offsets = [0, 12, 0], sizes = [16, 16, 4], strides = [1, 1, 1]} : vector<16x30x4xf32> to vector<16x16x4xf32>
    %117 = vector.shape_cast %116 : vector<16x16x4xf32> to vector<256x4xf32>
    %c1_105 = arith.constant 1 : index
    %c7_106 = arith.constant 7 : index
    %c0_107 = arith.constant 0 : index
    %c0_108 = arith.constant 0 : index
    %118 = vector.load %arg4[%c1_105, %c7_106, %c0_107, %c0_108] : memref<3x8x4x4xf32, #tpu.memory_space<vmem>>, vector<1x1x4x4xf32>
    %119 = vector.shape_cast %118 : vector<1x1x4x4xf32> to vector<4x4xf32>
    %cst_109 = arith.constant dense<0.000000e+00> : vector<256x4xf32>
    %120 = tpu.matmul %117, %119, %cst_109 {dimension_numbers = #tpu.dot_dimension_numbers<[1], [0], [0], [1], [0, 0, 1, 1], [], []>} : vector<256x4xf32>, vector<4x4xf32>, vector<256x4xf32> -> vector<256x4xf32>
    %121 = arith.addf %115, %120 : vector<256x4xf32>
    %c0_110 = arith.constant 0 : index
    %c8 = arith.constant 8 : index
    %122 = vector.load %arg6[%c0_110, %c8] : memref<256x16xf32, #tpu.memory_space<vmem>>, vector<256x4xf32>
    %123 = arith.addf %122, %121 : vector<256x4xf32>
    %c0_111 = arith.constant 0 : index
    %c8_112 = arith.constant 8 : index
    %124 = vector.load %arg6[%c0_111, %c8_112] : memref<256x16xf32, #tpu.memory_space<vmem>>, vector<256x4xf32>
    tpu.vector_store %arg6[%c0_111, %c8_112], %123 {strides = array<i32>} : memref<256x16xf32, #tpu.memory_space<vmem>>, vector<256x4xf32>,
    %cst_113 = arith.constant 0.000000e+00 : f32
    %125 = vector.broadcast %cst_113 : f32 to vector<256x4xf32>
    %c0_114 = arith.constant 0 : index
    %c0_115 = arith.constant 0 : index
    %c0_116 = arith.constant 0 : index
    %c0_117 = arith.constant 0 : index
    %126 = vector.load %arg1[%c0_114, %c0_115, %c0_116, %c0_117] : memref<1x30x30x4xf32, #tpu.memory_space<vmem>>, vector<1x16x30x4xf32>
    %127 = vector.shape_cast %126 : vector<1x16x30x4xf32> to vector<16x30x4xf32>
    %128 = vector.extract_strided_slice %127 {offsets = [0, 0, 0], sizes = [16, 16, 4], strides = [1, 1, 1]} : vector<16x30x4xf32> to vector<16x16x4xf32>
    %129 = vector.shape_cast %128 : vector<16x16x4xf32> to vector<256x4xf32>
    %c2_118 = arith.constant 2 : index
    %c0_119 = arith.constant 0 : index
    %c0_120 = arith.constant 0 : index
    %c0_121 = arith.constant 0 : index
    %130 = vector.load %arg4[%c2_118, %c0_119, %c0_120, %c0_121] : memref<3x8x4x4xf32, #tpu.memory_space<vmem>>, vector<1x1x4x4xf32>
    %131 = vector.shape_cast %130 : vector<1x1x4x4xf32> to vector<4x4xf32>
    %cst_122 = arith.constant dense<0.000000e+00> : vector<256x4xf32>
    %132 = tpu.matmul %129, %131, %cst_122 {dimension_numbers = #tpu.dot_dimension_numbers<[1], [0], [0], [1], [0, 0, 1, 1], [], []>} : vector<256x4xf32>, vector<4x4xf32>, vector<256x4xf32> -> vector<256x4xf32>
    %133 = arith.addf %125, %132 : vector<256x4xf32>
    %134 = vector.extract_strided_slice %127 {offsets = [0, 7, 0], sizes = [16, 16, 4], strides = [1, 1, 1]} : vector<16x30x4xf32> to vector<16x16x4xf32>
    %135 = vector.shape_cast %134 : vector<16x16x4xf32> to vector<256x4xf32>
    %c2_123 = arith.constant 2 : index
    %c1_124 = arith.constant 1 : index
    %c0_125 = arith.constant 0 : index
    %c0_126 = arith.constant 0 : index
    %136 = vector.load %arg4[%c2_123, %c1_124, %c0_125, %c0_126] : memref<3x8x4x4xf32, #tpu.memory_space<vmem>>, vector<1x1x4x4xf32>
    %137 = vector.shape_cast %136 : vector<1x1x4x4xf32> to vector<4x4xf32>
    %cst_127 = arith.constant dense<0.000000e+00> : vector<256x4xf32>
    %138 = tpu.matmul %135, %137, %cst_127 {dimension_numbers = #tpu.dot_dimension_numbers<[1], [0], [0], [1], [0, 0, 1, 1], [], []>} : vector<256x4xf32>, vector<4x4xf32>, vector<256x4xf32> -> vector<256x4xf32>
    %139 = arith.addf %133, %138 : vector<256x4xf32>
    %140 = vector.extract_strided_slice %127 {offsets = [0, 14, 0], sizes = [16, 16, 4], strides = [1, 1, 1]} : vector<16x30x4xf32> to vector<16x16x4xf32>
    %141 = vector.shape_cast %140 : vector<16x16x4xf32> to vector<256x4xf32>
    %c2_128 = arith.constant 2 : index
    %c2_129 = arith.constant 2 : index
    %c0_130 = arith.constant 0 : index
    %c0_131 = arith.constant 0 : index
    %142 = vector.load %arg4[%c2_128, %c2_129, %c0_130, %c0_131] : memref<3x8x4x4xf32, #tpu.memory_space<vmem>>, vector<1x1x4x4xf32>
    %143 = vector.shape_cast %142 : vector<1x1x4x4xf32> to vector<4x4xf32>
    %cst_132 = arith.constant dense<0.000000e+00> : vector<256x4xf32>
    %144 = tpu.matmul %141, %143, %cst_132 {dimension_numbers = #tpu.dot_dimension_numbers<[1], [0], [0], [1], [0, 0, 1, 1], [], []>} : vector<256x4xf32>, vector<4x4xf32>, vector<256x4xf32> -> vector<256x4xf32>
    %145 = arith.addf %139, %144 : vector<256x4xf32>
    %c0_133 = arith.constant 0 : index
    %c7_134 = arith.constant 7 : index
    %c0_135 = arith.constant 0 : index
    %c0_136 = arith.constant 0 : index
    %146 = vector.load %arg1[%c0_133, %c7_134, %c0_135, %c0_136] : memref<1x30x30x4xf32, #tpu.memory_space<vmem>>, vector<1x16x30x4xf32>
    %147 = vector.shape_cast %146 : vector<1x16x30x4xf32> to vector<16x30x4xf32>
    %148 = vector.extract_strided_slice %147 {offsets = [0, 0, 0], sizes = [16, 16, 4], strides = [1, 1, 1]} : vector<16x30x4xf32> to vector<16x16x4xf32>
    %149 = vector.shape_cast %148 : vector<16x16x4xf32> to vector<256x4xf32>
    %c2_137 = arith.constant 2 : index
    %c3_138 = arith.constant 3 : index
    %c0_139 = arith.constant 0 : index
    %c0_140 = arith.constant 0 : index
    %150 = vector.load %arg4[%c2_137, %c3_138, %c0_139, %c0_140] : memref<3x8x4x4xf32, #tpu.memory_space<vmem>>, vector<1x1x4x4xf32>
    %151 = vector.shape_cast %150 : vector<1x1x4x4xf32> to vector<4x4xf32>
    %cst_141 = arith.constant dense<0.000000e+00> : vector<256x4xf32>
    %152 = tpu.matmul %149, %151, %cst_141 {dimension_numbers = #tpu.dot_dimension_numbers<[1], [0], [0], [1], [0, 0, 1, 1], [], []>} : vector<256x4xf32>, vector<4x4xf32>, vector<256x4xf32> -> vector<256x4xf32>
    %153 = arith.addf %145, %152 : vector<256x4xf32>
    %154 = vector.extract_strided_slice %147 {offsets = [0, 14, 0], sizes = [16, 16, 4], strides = [1, 1, 1]} : vector<16x30x4xf32> to vector<16x16x4xf32>
    %155 = vector.shape_cast %154 : vector<16x16x4xf32> to vector<256x4xf32>
    %c2_142 = arith.constant 2 : index
    %c4_143 = arith.constant 4 : index
    %c0_144 = arith.constant 0 : index
    %c0_145 = arith.constant 0 : index
    %156 = vector.load %arg4[%c2_142, %c4_143, %c0_144, %c0_145] : memref<3x8x4x4xf32, #tpu.memory_space<vmem>>, vector<1x1x4x4xf32>
    %157 = vector.shape_cast %156 : vector<1x1x4x4xf32> to vector<4x4xf32>
    %cst_146 = arith.constant dense<0.000000e+00> : vector<256x4xf32>
    %158 = tpu.matmul %155, %157, %cst_146 {dimension_numbers = #tpu.dot_dimension_numbers<[1], [0], [0], [1], [0, 0, 1, 1], [], []>} : vector<256x4xf32>, vector<4x4xf32>, vector<256x4xf32> -> vector<256x4xf32>
    %159 = arith.addf %153, %158 : vector<256x4xf32>
    %c0_147 = arith.constant 0 : index
    %c14 = arith.constant 14 : index
    %c0_148 = arith.constant 0 : index
    %c0_149 = arith.constant 0 : index
    %160 = vector.load %arg1[%c0_147, %c14, %c0_148, %c0_149] : memref<1x30x30x4xf32, #tpu.memory_space<vmem>>, vector<1x16x30x4xf32>
    %161 = vector.shape_cast %160 : vector<1x16x30x4xf32> to vector<16x30x4xf32>
    %162 = vector.extract_strided_slice %161 {offsets = [0, 0, 0], sizes = [16, 16, 4], strides = [1, 1, 1]} : vector<16x30x4xf32> to vector<16x16x4xf32>
    %163 = vector.shape_cast %162 : vector<16x16x4xf32> to vector<256x4xf32>
    %c2_150 = arith.constant 2 : index
    %c5_151 = arith.constant 5 : index
    %c0_152 = arith.constant 0 : index
    %c0_153 = arith.constant 0 : index
    %164 = vector.load %arg4[%c2_150, %c5_151, %c0_152, %c0_153] : memref<3x8x4x4xf32, #tpu.memory_space<vmem>>, vector<1x1x4x4xf32>
    %165 = vector.shape_cast %164 : vector<1x1x4x4xf32> to vector<4x4xf32>
    %cst_154 = arith.constant dense<0.000000e+00> : vector<256x4xf32>
    %166 = tpu.matmul %163, %165, %cst_154 {dimension_numbers = #tpu.dot_dimension_numbers<[1], [0], [0], [1], [0, 0, 1, 1], [], []>} : vector<256x4xf32>, vector<4x4xf32>, vector<256x4xf32> -> vector<256x4xf32>
    %167 = arith.addf %159, %166 : vector<256x4xf32>
    %168 = vector.extract_strided_slice %161 {offsets = [0, 7, 0], sizes = [16, 16, 4], strides = [1, 1, 1]} : vector<16x30x4xf32> to vector<16x16x4xf32>
    %169 = vector.shape_cast %168 : vector<16x16x4xf32> to vector<256x4xf32>
    %c2_155 = arith.constant 2 : index
    %c6_156 = arith.constant 6 : index
    %c0_157 = arith.constant 0 : index
    %c0_158 = arith.constant 0 : index
    %170 = vector.load %arg4[%c2_155, %c6_156, %c0_157, %c0_158] : memref<3x8x4x4xf32, #tpu.memory_space<vmem>>, vector<1x1x4x4xf32>
    %171 = vector.shape_cast %170 : vector<1x1x4x4xf32> to vector<4x4xf32>
    %cst_159 = arith.constant dense<0.000000e+00> : vector<256x4xf32>
    %172 = tpu.matmul %169, %171, %cst_159 {dimension_numbers = #tpu.dot_dimension_numbers<[1], [0], [0], [1], [0, 0, 1, 1], [], []>} : vector<256x4xf32>, vector<4x4xf32>, vector<256x4xf32> -> vector<256x4xf32>
    %173 = arith.addf %167, %172 : vector<256x4xf32>
    %174 = vector.extract_strided_slice %161 {offsets = [0, 14, 0], sizes = [16, 16, 4], strides = [1, 1, 1]} : vector<16x30x4xf32> to vector<16x16x4xf32>
    %175 = vector.shape_cast %174 : vector<16x16x4xf32> to vector<256x4xf32>
    %c2_160 = arith.constant 2 : index
    %c7_161 = arith.constant 7 : index
    %c0_162 = arith.constant 0 : index
    %c0_163 = arith.constant 0 : index
    %176 = vector.load %arg4[%c2_160, %c7_161, %c0_162, %c0_163] : memref<3x8x4x4xf32, #tpu.memory_space<vmem>>, vector<1x1x4x4xf32>
    %177 = vector.shape_cast %176 : vector<1x1x4x4xf32> to vector<4x4xf32>
    %cst_164 = arith.constant dense<0.000000e+00> : vector<256x4xf32>
    %178 = tpu.matmul %175, %177, %cst_164 {dimension_numbers = #tpu.dot_dimension_numbers<[1], [0], [0], [1], [0, 0, 1, 1], [], []>} : vector<256x4xf32>, vector<4x4xf32>, vector<256x4xf32> -> vector<256x4xf32>
    %179 = arith.addf %173, %178 : vector<256x4xf32>
    %c0_165 = arith.constant 0 : index
    %c12_166 = arith.constant 12 : index
    %180 = vector.load %arg6[%c0_165, %c12_166] : memref<256x16xf32, #tpu.memory_space<vmem>>, vector<256x4xf32>
    %181 = arith.addf %180, %179 : vector<256x4xf32>
    %c0_167 = arith.constant 0 : index
    %c12_168 = arith.constant 12 : index
    %182 = vector.load %arg6[%c0_167, %c12_168] : memref<256x16xf32, #tpu.memory_space<vmem>>, vector<256x4xf32>
    tpu.vector_store %arg6[%c0_167, %c12_168], %181 {strides = array<i32>} : memref<256x16xf32, #tpu.memory_space<vmem>>, vector<256x4xf32>,
    %c0_169 = arith.constant 0 : index
    %c0_170 = arith.constant 0 : index
    %183 = vector.load %arg6[%c0_169, %c0_170] : memref<256x16xf32, #tpu.memory_space<vmem>>, vector<256x16xf32>
    %c0_171 = arith.constant 0 : index
    %c0_172 = arith.constant 0 : index
    %c0_173 = arith.constant 0 : index
    %184 = vector.load %arg5[%c0_171, %c0_172, %c0_173] : memref<1x256x16xf32, #tpu.memory_space<vmem>>, vector<1x256x16xf32>
    %185 = vector.shape_cast %184 : vector<1x256x16xf32> to vector<256x16xf32>
    %186 = vector.shape_cast %183 : vector<256x16xf32> to vector<1x256x16xf32>
    tpu.vector_store %arg5[%c0_171, %c0_172, %c0_173], %186 {strides = array<i32>} : memref<1x256x16xf32, #tpu.memory_space<vmem>>, vector<1x256x16xf32>,
    return
  }
  func.func @transform_0(%arg0: i32) -> (i32, i32, i32, i32) {
    %c0_i32 = arith.constant 0 : i32
    %c0_i32_0 = arith.constant 0 : i32
    %c0_i32_1 = arith.constant 0 : i32
    %c0_i32_2 = arith.constant 0 : i32
    return %arg0, %c0_i32, %c0_i32_0, %c0_i32_1 : i32, i32, i32, i32
  }
  func.func @transform_1(%arg0: i32) -> (i32, i32) {
    %c0_i32 = arith.constant 0 : i32
    %c0_i32_0 = arith.constant 0 : i32
    %c0_i32_1 = arith.constant 0 : i32
    return %c0_i32, %c0_i32_0 : i32, i32
  }
  func.func @transform_2(%arg0: i32) -> (i32, i32) {
    %c0_i32 = arith.constant 0 : i32
    %c0_i32_0 = arith.constant 0 : i32
    %c0_i32_1 = arith.constant 0 : i32
    return %c0_i32, %c0_i32_0 : i32, i32
  }
  func.func @transform_3(%arg0: i32) -> (i32, i32, i32, i32) {
    %c0_i32 = arith.constant 0 : i32
    %c0_i32_0 = arith.constant 0 : i32
    %c0_i32_1 = arith.constant 0 : i32
    %c0_i32_2 = arith.constant 0 : i32
    %c0_i32_3 = arith.constant 0 : i32
    return %c0_i32, %c0_i32_0, %c0_i32_1, %c0_i32_2 : i32, i32, i32, i32
  }
  func.func @transform_4(%arg0: i32) -> (i32, i32, i32) {
    %c0_i32 = arith.constant 0 : i32
    %c0_i32_0 = arith.constant 0 : i32
    %c0_i32_1 = arith.constant 0 : i32
    return %arg0, %c0_i32, %c0_i32_0 : i32, i32, i32
  }
}

</mosaic_0001>

<bundles_post_ra>
// kernel: tpu_custom_call.1
= control target key start
LH: loop header
LB: loop body
LE: loop exit
PB: predicated region body
PF: predicated region fallthrough
CT: control target
= control target key end

     0   :  { %s15472_s15 = smov 0   ;;  %s20664_s0 = inlined_call_operand.vmem [shape: f32[2,30,30,4], index: 0, kind: input, shape index: {}]   ;;  %s20665_s1 = inlined_call_operand.vmem [shape: f32[4,16], index: 1, kind: input, shape index: {}]   ;;  %s20666_s2 = inlined_call_operand.vmem [shape: f32[1,16], index: 2, kind: input, shape index: {}]   ;;  %s20667_s3 = inlined_call_operand.vmem [shape: f32[3,8,4,4], index: 3, kind: input, shape index: {}]   ;;  %s20668_s4 = inlined_call_operand.vmem [shape: f32[2,256,16], index: 4, kind: output, shape index: {}]  }
   0x1 LB: > { %s11863_s16 = sadd.s32 4294967295, %s15442_s15   ;;  %p11867_p0 = scmp.ge.s32.totalorder %s15442_s15, 1  ;;  %s15442_s15 = sphi %s15472_s15, %s14_s15  }
   0x2   : > { %p162_p1 = scmp.lt.s32.totalorder %s15442_s15, 3 }
   0x4   : > { %p163_p2 = pnand %p11867_p0, %p162_p1 }
   0x6   : > { %166 = sbr.rel (%p163_p2) target bundleno = 1142 (0x476), region = 36 }
   0xb   : > { %v231_v0 = vld [vmem:[%s20665_s1] sm:$0xf]  ;;  %vm336_vm0 = vcmask 1043456   ;;  %p188_p3 = scmp.lt.s32.totalorder %s11863_s16, 1  ;;  %v12001_v1 = vld [vmem:[%s20667_s3 + $0x4] sm:$0xf] }
   0xc   : > { %15342 = vmatprep.subr.msk.mxu1 %vm336_vm0, %v231_v0  ;;  %14092 = vmatprep.subr.msk.mxu0 %vm336_vm0, %v231_v0  ;;  %v791_v2 = vld [vmem:[%s20667_s3] sm:$0xf]  ;;  %vm239_vm1 = vcmask 31744   ;;  %v15516_v9 = vld [vmem:[%s20667_s3 + $0x8] sm:$0xf]  ;;  %vm792_vm2 = vcmask 1040384  }
   0xd   : > { %15343 = vmatpush3.msk.msra.mxu1 %vm336_vm0, %v231_v0  ;;  %14093 = vmatpush3.msk.msra.mxu0 %vm336_vm0, %v231_v0  ;;  %s21305_s16 = smov (!%p188_p3, %s11863_s16), 1  ;;  %v15521_v10 = vld [vmem:[%s20667_s3 + $0xc] sm:$0xf]  ;;  %vm1475_vm3 = vcmask 1045504   ;;  %vm565_vm4 = vcmask 130048   ;;  %s15444_s12 = smov 4  }
   0xe   : > { %14142 = vmatprep.subr.msk.mxu1 %vm336_vm0, %v12001_v1  ;;  %14192 = vmatprep.subr.msk.mxu0 %vm336_vm0, %v791_v2  ;;  %s15344_s23 = smul.u32 960, %s21305_s16  ;;  %vm4361_vm5 = vcmask 64544   ;;  %vm8985_vm6 = vcmask 1041408   ;;  %s15445_s28 = smov 8   ;;  %vm8156_vm7 = vcmask 97344   ;;  %vm11711_vm8 = vcmask 130144  }
   0xf   : > { %s13266_s29 = sshll.u32 %s21305_s16, 8 }
  0x10   : > { %s15501_s26 = scalar_lea.vmem %s20664_s0, %s15344_s23  ;;  %s20566_s6 = scalar_lea.vmem %s20668_s4, %s13266_s29 }
  0x11   : > { %v11871_v3 = vld [vmem:[%s15501_s26 + $0xe7] sm:$0xff]  ;;  %v11872_v5 = vld [vmem:[%s15501_s26 + $0xef] sm:$0xff] }
  0x12   : > { %v11887_v4 = vld [vmem:[%s15501_s26 + $0x1e7] sm:$0xff]  ;;  %14094 = vmatprep.mubr.msk.f32.mxu0 %vm239_vm1, %v11871_v3  ;;  %v11888_v6 = vld [vmem:[%s15501_s26 + $0x1ef] sm:$0xff] }
  0x13   : > { %14118 = vmatprep.mubr.msk.f32.mxu1 %vm239_vm1, %v11887_v4  ;;  %v11873_v7 = vld [vmem:[%s15501_s26 + $0x107] sm:$0xff]  ;;  %14095 = vmatmul.mubr.msk.f32.vlgmr.msra.gmra.mxu0 %vm239_vm1, %v11872_v5  ;;  %v11874_v11 = vld [vmem:[%s15501_s26 + $0x10f] sm:$0xff] }
  0x14   : > { %v11889_v8 = vld [vmem:[%s15501_s26 + $0x207] sm:$0xff]  ;;  %14119 = vmatmul.mubr.msk.f32.vlgmr.msra.gmra.mxu1 %vm239_vm1, %v11888_v6  ;;  %14193 = vmatpush3.msk.msra.mxu0 %vm336_vm0, %v791_v2  ;;  %v11890_v12 = vld [vmem:[%s15501_s26 + $0x20f] sm:$0xff] }
  0x15   : > { %14143 = vmatpush3.msk.msra.mxu1 %vm336_vm0, %v12001_v1  ;;  %14097 = vmatprep.mubr.msk.f32.mxu0 %vm239_vm1, %v11873_v7  ;;  %v11875_v13 = vld [vmem:[%s15501_s26 + $0x127] sm:$0xff]  ;;  %v11876_v15 = vld [vmem:[%s15501_s26 + $0x12f] sm:$0xff] }
  0x16   : > { %14121 = vmatprep.mubr.msk.f32.mxu1 %vm239_vm1, %v11889_v8  ;;  %v11891_v14 = vld [vmem:[%s15501_s26 + $0x227] sm:$0xff]  ;;  %14242 = vmatprep.subr.msk.mxu1 %vm336_vm0, %v15516_v9  ;;  %v11892_v16 = vld [vmem:[%s15501_s26 + $0x22f] sm:$0xff] }
  0x17   : > { %14292 = vmatprep.subr.msk.mxu0 %vm336_vm0, %v15521_v10  ;;  %14098 = vmatmul.mubr.msk.f32.gmra.mxu0 %vm239_vm1, %v11874_v11  ;;  %v11877_v17 = vld [vmem:[%s15501_s26 + $0x147] sm:$0xff]  ;;  %v11878_v19 = vld [vmem:[%s15501_s26 + $0x14f] sm:$0xff] }
  0x18   : > { %14122 = vmatmul.mubr.msk.f32.gmra.mxu1 %vm239_vm1, %v11890_v12  ;;  %14100 = vmatprep.mubr.msk.f32.mxu0 %vm239_vm1, %v11875_v13  ;;  %v11893_v18 = vld [vmem:[%s15501_s26 + $0x247] sm:$0xff]  ;;  %v11894_v20 = vld [vmem:[%s15501_s26 + $0x24f] sm:$0xff] }
  0x19   : > { %14124 = vmatprep.mubr.msk.f32.mxu1 %vm239_vm1, %v11891_v14  ;;  %v11879_v21 = vld [vmem:[%s15501_s26 + $0x167] sm:$0xff]  ;;  %v11880_v23 = vld [vmem:[%s15501_s26 + $0x16f] sm:$0xff] }
  0x1a   : > { %v11895_v22 = vld [vmem:[%s15501_s26 + $0x267] sm:$0xff]  ;;  %v11896_v24 = vld [vmem:[%s15501_s26 + $0x26f] sm:$0xff] }
  0x1b   : > { %14101 = vmatmul.mubr.msk.f32.gmra.mxu0 %vm239_vm1, %v11876_v15  ;;  %v11881_v25 = vld [vmem:[%s15501_s26 + $0x187] sm:$0xff]  ;;  %v11882_v27 = vld [vmem:[%s15501_s26 + $0x18f] sm:$0xff] }
  0x1c   : > { %14125 = vmatmul.mubr.msk.f32.gmra.mxu1 %vm239_vm1, %v11892_v16  ;;  %14103 = vmatprep.mubr.msk.f32.mxu0 %vm239_vm1, %v11877_v17  ;;  %v11897_v26 = vld [vmem:[%s15501_s26 + $0x287] sm:$0xff]  ;;  %v11898_v28 = vld [vmem:[%s15501_s26 + $0x28f] sm:$0xff] }
  0x1d   : > { %14127 = vmatprep.mubr.msk.f32.mxu1 %vm239_vm1, %v11893_v18  ;;  %v11883_v29 = vld [vmem:[%s15501_s26 + $0x1a7] sm:$0xff]  ;;  %v11884_v33 = vld [vmem:[%s15501_s26 + $0x1af] sm:$0xff] }
  0x1e   : > { %v11899_v30 = vld [vmem:[%s15501_s26 + $0x2a7] sm:$0xff]  ;;  %v11900_v34 = vld [vmem:[%s15501_s26 + $0x2af] sm:$0xff] }
  0x1f   : > { %14104 = vmatmul.mubr.msk.f32.gmra.mxu0 %vm239_vm1, %v11878_v19  ;;  %v11937_v31 = vld [vmem:[%s15501_s26 + $0x80] sm:$0xff]  ;;  %v15569_v32 = vld [vmem:[%s15501_s26 + $0x88] sm:$0xff]  ;;  %v15578_v35 = vld [vmem:[%s15501_s26 + $0x90] sm:$0xff] }
  0x20   : > { %14128 = vmatmul.mubr.msk.f32.gmra.mxu1 %vm239_vm1, %v11894_v20  ;;  %14106 = vmatprep.mubr.msk.f32.mxu0 %vm239_vm1, %v11879_v21  ;;  %v11885_v36 = vld [vmem:[%s15501_s26 + $0x1c7] sm:$0xff]  ;;  %v793_v38 = vrot.slane %v11937_v31, 7  ;;  %v794_v39 = vrot.slane %v15569_v32, 7  ;;  %v711_v40 = vrot.slane %v11937_v31, 4  ;;  %v712_v41 = vrot.slane %v15569_v32, 4  ;;  %v11886_v45 = vld [vmem:[%s15501_s26 + $0x1cf] sm:$0xff] }
  0x21   : > { %14130 = vmatprep.mubr.msk.f32.mxu1 %vm239_vm1, %v11895_v22  ;;  %v11901_v37 = vld [vmem:[%s15501_s26 + $0x2c7] sm:$0xff]  ;;  %v796_v42 = vrot.slane %v15578_v35, 7  ;;  %v11902_v46 = vld [vmem:[%s15501_s26 + $0x2cf] sm:$0xff]  ;;  %v714_v47 = vrot.slane %v15578_v35, 4 }
  0x22   : > { %v11941_v43 = vld [vmem:[%s15501_s26 + $0xa0] sm:$0xff]  ;;  %v15589_v44 = vld [vmem:[%s15501_s26 + $0xa8] sm:$0xff]  ;;  %v15597_v48 = vld [vmem:[%s15501_s26 + $0xb0] sm:$0xff]  ;;  %v795_v49 = vsel %vm792_vm2, %v793_v38, %v794_v39  ;;  %v713_v50 = vsel %vm336_vm0, %v711_v40, %v712_v41 }
  0x23   : > { %14107 = vmatmul.mubr.msk.f32.gmra.mxu0 %vm239_vm1, %v11880_v23  ;;  %v11945_v51 = vld [vmem:[%s15501_s26 + $0xc0] sm:$0xff]  ;;  %v15603_v52 = vld [vmem:[%s15501_s26 + $0xc8] sm:$0xff]  ;;  %v798_v53 = vrot.slane %v11941_v43, 7  ;;  %v799_v54 = vrot.slane %v15589_v44, 7  ;;  %v716_v55 = vrot.slane %v11941_v43, 4  ;;  %v717_v56 = vrot.slane %v15589_v44, 4 }
  0x24   : > { %14131 = vmatmul.mubr.msk.f32.gmra.mxu1 %vm239_vm1, %v11896_v24  ;;  %14109 = vmatprep.mubr.msk.f32.mxu0 %vm239_vm1, %v11881_v25  ;;  %v797_v57 = vsel %vm792_vm2, %v794_v39, %v796_v42  ;;  %v801_v58 = vrot.slane %v15597_v48, 7  ;;  %v715_v59 = vsel %vm336_vm0, %v712_v41, %v714_v47  ;;  %v719_v60 = vrot.slane %v15597_v48, 4  ;;  %v15617_v63 = vld [vmem:[%s15501_s26 + $0xd0] sm:$0xff]  ;;  %v11949_v2 = vld [vmem:[%s15501_s26 + $0xe0] sm:$0xff]  ;;  %v15624_v5 = vld [vmem:[%s15501_s26 + $0xe8] sm:$0xff] }
  0x25   : > { %14133 = vmatprep.mubr.msk.f32.mxu1 %vm239_vm1, %v11897_v26  ;;  %v803_v61 = vrot.slane %v11945_v51, 7  ;;  %v804_v62 = vrot.slane %v15603_v52, 7  ;;  %v721_v0 = vrot.slane %v11945_v51, 4  ;;  %v722_v1 = vrot.slane %v15603_v52, 4  ;;  %v15633_v8 = vld [vmem:[%s20667_s3 + $0x10] sm:$0xf] }
  0x26   : > { %v800_v3 = vsel %vm792_vm2, %v798_v53, %v799_v54  ;;  %v718_v4 = vsel %vm336_vm0, %v716_v55, %v717_v56  ;;  %v806_v6 = vrot.slane %v15617_v63, 7  ;;  %v724_v7 = vrot.slane %v15617_v63, 4  ;;  %v15638_v11 = vld [vmem:[%s20667_s3 + $0x14] sm:$0xf]  ;;  %v11953_v19 = vld [vmem:[%s15501_s26 + $0x100] sm:$0xff]  ;;  %v15657_v20 = vld [vmem:[%s15501_s26 + $0x108] sm:$0xff] }
  0x27   : > { %14110 = vmatmul.mubr.msk.f32.gmra.mxu0 %vm239_vm1, %v11882_v27  ;;  %v802_v12 = vsel %vm792_vm2, %v799_v54, %v801_v58  ;;  %v720_v13 = vsel %vm336_vm0, %v717_v56, %v719_v60  ;;  %v805_v14 = vsel %vm792_vm2, %v803_v61, %v804_v62  ;;  %v808_v15 = vrot.slane %v11949_v2, 7  ;;  %v15648_v16 = vld [vmem:[%s15501_s26 + $0xf0] sm:$0xff] }
  0x28   : > { %14134 = vmatmul.mubr.msk.f32.gmra.mxu1 %vm239_vm1, %v11898_v28  ;;  %14112 = vmatprep.mubr.msk.f32.mxu0 %vm239_vm1, %v11883_v29  ;;  %v723_v17 = vsel %vm336_vm0, %v721_v0, %v722_v1  ;;  %v726_v18 = vrot.slane %v11949_v2, 4  ;;  %v807_v21 = vsel %vm792_vm2, %v804_v62, %v806_v6  ;;  %v725_v22 = vsel %vm336_vm0, %v722_v1, %v724_v7  ;;  %v15674_v29 = vld [vmem:[%s15501_s26 + $0x110] sm:$0xff]  ;;  %v11965_v0 = vld [vmem:[%s15501_s26 + $0x160] sm:$0xff]  ;;  %v15731_v1 = vld [vmem:[%s15501_s26 + $0x168] sm:$0xff] }
  0x29   : > { %14136 = vmatprep.mubr.msk.f32.mxu1 %vm239_vm1, %v11899_v30  ;;  %v811_v23 = vrot.slane %v15648_v16, 7  ;;  %v729_v24 = vrot.slane %v15648_v16, 4  ;;  %v813_v25 = vrot.slane %v11953_v19, 7  ;;  %v814_v26 = vrot.slane %v15657_v20, 7  ;;  %v15700_v42 = vld [vmem:[%s15501_s26 + $0x130] sm:$0xff] }
  0x2a   : > { %v731_v27 = vrot.slane %v11953_v19, 4  ;;  %v732_v28 = vrot.slane %v15657_v20, 4  ;;  %v734_v38 = vrot.slane %v15674_v29, 4  ;;  %v821_v54 = vrot.slane %v15700_v42, 7  ;;  %v15723_v60 = vld [vmem:[%s15501_s26 + $0x150] sm:$0xff] }
  0x2b   : > { %14113 = vmatmul.mubr.msk.f32.gmra.mxu0 %vm239_vm1, %v11884_v33  ;;  %v11957_v33 = vld [vmem:[%s15501_s26 + $0x120] sm:$0xff]  ;;  %v815_v40 = vsel %vm792_vm2, %v813_v25, %v814_v26  ;;  %v739_v55 = vrot.slane %v15700_v42, 4 }
  0x2c   : > { %14137 = vmatmul.mubr.msk.f32.gmra.mxu1 %vm239_vm1, %v11900_v34  ;;  %14115 = vmatprep.mubr.msk.f32.mxu0 %vm239_vm1, %v11885_v36  ;;  %v15682_v34 = vld [vmem:[%s15501_s26 + $0x128] sm:$0xff]  ;;  %v15697_v41 = vsel %vm336_vm0, %v731_v27, %v732_v28  ;;  %v818_v43 = vrot.slane %v11957_v33, 7  ;;  %v15713_v53 = vsel %vm336_vm0, %v732_v28, %v734_v38  ;;  %v15773_v28 = vld [vmem:[%s15501_s26 + $0x190] sm:$0xff] }
  0x2d   : > { %14139 = vmatprep.mubr.msk.f32.mxu1 %vm239_vm1, %v11901_v37  ;;  %v816_v37 = vrot.slane %v15674_v29, 7  ;;  %v737_v47 = vrot.slane %v15682_v34, 4 }
  0x2f   : > { %14116 = vmatmul.mubr.msk.f32.gmra.mxu0 %vm239_vm1, %v11886_v45  ;;  %v819_v45 = vrot.slane %v15682_v34, 7  ;;  %v817_v51 = vsel %vm792_vm2, %v814_v26, %v816_v37  ;;  %v15743_v6 = vsel %vm336_vm0, %v737_v47, %v739_v55  ;;  %v15781_v37 = vld [vmem:[%s15501_s26 + $0x1a8] sm:$0xff] }
  0x30   : > { %14140 = vmatmul.mubr.msk.f32.gmra.mxu1 %vm239_vm1, %v11902_v46  ;;  %14194 = vmatprep.mubr.msk.f32.mxu0 %vm239_vm1, %v713_v50  ;;  %v736_v46 = vrot.slane %v11957_v33, 4  ;;  %v15706_v50 = vld [vmem:[%s15501_s26 + $0x148] sm:$0xff] }
  0x31   : > { %14144 = vmatprep.mubr.msk.f32.mxu1 %vm239_vm1, %v795_v49  ;;  %v11961_v49 = vld [vmem:[%s15501_s26 + $0x140] sm:$0xff]  ;;  %v820_v61 = vsel %vm792_vm2, %v818_v43, %v819_v45  ;;  %v822_v2 = vsel %vm792_vm2, %v819_v45, %v821_v54  ;;  %v754_v43 = vrot.slane %v15773_v28, 4  ;;  %v839_v54 = vrot.slane %v15781_v37, 7 }
  0x32   : > { %v823_v56 = vrot.slane %v11961_v49, 7  ;;  %v741_v58 = vrot.slane %v11961_v49, 4  ;;  %v15727_v62 = vsel %vm336_vm0, %v736_v46, %v737_v47  ;;  %v15800_v49 = vld [vmem:[%s15501_s26 + $0x1b0] sm:$0xff] }
  0x33   : > { %14195 = vmatmul.mubr.msk.f32.vlgmr.msra.gmra.mxu0 %vm239_vm1, %v715_v59  ;;  %v742_v59 = vrot.slane %v15706_v50, 4 }
  0x34   : > { %14145 = vmatmul.mubr.msk.f32.vlgmr.msra.gmra.mxu1 %vm239_vm1, %v797_v57  ;;  %14293 = vmatpush3.msk.msra.mxu0 %vm336_vm0, %v15521_v10  ;;  %v727_v10 = vrot.slane %v15624_v5, 4  ;;  %v824_v57 = vrot.slane %v15706_v50, 7 }
  0x35   : > { %14243 = vmatpush3.msk.msra.mxu1 %vm336_vm0, %v15516_v9  ;;  %14147 = vmatprep.mubr.msk.f32.mxu1 %vm239_vm1, %v800_v3  ;;  %v809_v9 = vrot.slane %v15624_v5, 7  ;;  %v826_v3 = vrot.slane %v15723_v60, 7 }
  0x36   : > { %14197 = vmatprep.mubr.msk.f32.mxu0 %vm239_vm1, %v718_v4  ;;  %14342 = vmatprep.subr.msk.mxu1 %vm336_vm0, %v15633_v8  ;;  %v15678_v31 = vsel %vm336_vm0, %v726_v18, %v727_v10  ;;  %v15693_v39 = vsel %vm336_vm0, %v727_v10, %v729_v24  ;;  %v744_v4 = vrot.slane %v15723_v60, 4  ;;  %v825_v7 = vsel %vm792_vm2, %v823_v56, %v824_v57  ;;  %v11969_v18 = vld [vmem:[%s15501_s26 + $0x180] sm:$0xff]  ;;  %v15756_v10 = vld [vmem:[%s15501_s26 + $0x188] sm:$0xff] }
  0x37   : > { %14392 = vmatprep.subr.msk.mxu0 %vm336_vm0, %v15638_v11  ;;  %14198 = vmatmul.mubr.msk.f32.gmra.mxu0 %vm239_vm1, %v720_v13  ;;  %v810_v30 = vsel %vm792_vm2, %v808_v15, %v809_v9  ;;  %v812_v36 = vsel %vm792_vm2, %v809_v9, %v811_v23  ;;  %v15750_v13 = vld [vmem:[%s15501_s26 + $0x170] sm:$0xff]  ;;  %v829_v15 = vrot.slane %v15731_v1, 7  ;;  %v747_v9 = vrot.slane %v15731_v1, 4 }
  0x38   : > { %14148 = vmatmul.mubr.msk.f32.gmra.mxu1 %vm239_vm1, %v802_v12  ;;  %14200 = vmatprep.mubr.msk.f32.mxu0 %vm239_vm1, %v723_v17  ;;  %v15747_v12 = vsel %vm336_vm0, %v741_v58, %v742_v59  ;;  %v746_v17 = vrot.slane %v11965_v0, 4  ;;  %v827_v19 = vsel %vm792_vm2, %v824_v57, %v826_v3  ;;  %v749_v23 = vrot.slane %v15750_v13, 4  ;;  %v11977_v57 = vld [vmem:[%s15501_s26 + $0x1c0] sm:$0xff]  ;;  %v15806_v58 = vld [vmem:[%s15501_s26 + $0x1c8] sm:$0xff] }
  0x39   : > { %14150 = vmatprep.mubr.msk.f32.mxu1 %vm239_vm1, %v805_v14  ;;  %v828_v14 = vrot.slane %v11965_v0, 7  ;;  %v833_v24 = vrot.slane %v11969_v18, 7  ;;  %v834_v25 = vrot.slane %v15756_v10, 7  ;;  %v751_v26 = vrot.slane %v11969_v18, 4  ;;  %v11981_v18 = vld [vmem:[%s15501_s26 + $0x1e0] sm:$0xff] }
  0x3a   : > { %v752_v27 = vrot.slane %v15756_v10, 4  ;;  %v15777_v33 = vsel %vm336_vm0, %v746_v17, %v747_v9  ;;  %v15793_v45 = vsel %vm336_vm0, %v747_v9, %v749_v23  ;;  %v757_v56 = vrot.slane %v15781_v37, 4 }
  0x3b   : > { %14201 = vmatmul.mubr.msk.f32.gmra.mxu0 %vm239_vm1, %v725_v22  ;;  %v831_v22 = vrot.slane %v15750_v13, 7  ;;  %v835_v46 = vsel %vm792_vm2, %v833_v24, %v834_v25  ;;  %v841_v0 = vrot.slane %v15800_v49, 7  ;;  %v843_v3 = vrot.slane %v11977_v57, 7 }
  0x3c   : > { %14151 = vmatmul.mubr.msk.f32.gmra.mxu1 %vm239_vm1, %v807_v21  ;;  %14203 = vmatprep.mubr.msk.f32.mxu0 %vm239_vm1, %v15678_v31  ;;  %v15763_v21 = vsel %vm336_vm0, %v742_v59, %v744_v4  ;;  %v15797_v47 = vsel %vm336_vm0, %v751_v26, %v752_v27  ;;  %v844_v4 = vrot.slane %v15806_v58, 7 }
  0x3d   : > { %14153 = vmatprep.mubr.msk.f32.mxu1 %vm239_vm1, %v810_v30  ;;  %v830_v30 = vsel %vm792_vm2, %v828_v14, %v829_v15  ;;  %v832_v38 = vsel %vm792_vm2, %v829_v15, %v831_v22  ;;  %v762_v14 = vrot.slane %v15806_v58, 4  ;;  %v15823_v15 = vld [vmem:[%s15501_s26 + $0x1d0] sm:$0xff]  ;;  %v842_v22 = vsel %vm792_vm2, %v839_v54, %v841_v0 }
  0x3e   : > { %v846_v23 = vrot.slane %v15823_v15, 7  ;;  %v764_v24 = vrot.slane %v15823_v15, 4  ;;  %v845_v26 = vsel %vm792_vm2, %v843_v3, %v844_v4 }
  0x3f   : > { %14204 = vmatmul.mubr.msk.f32.gmra.mxu0 %vm239_vm1, %v15693_v39 }
  0x40   : > { %14154 = vmatmul.mubr.msk.f32.gmra.mxu1 %vm239_vm1, %v812_v36  ;;  %14206 = vmatprep.mubr.msk.f32.mxu0 %vm239_vm1, %v15697_v41  ;;  %v11973_v36 = vld [vmem:[%s15501_s26 + $0x1a0] sm:$0xff] }
  0x41   : > { %14156 = vmatprep.mubr.msk.f32.mxu1 %vm239_vm1, %v815_v40  ;;  %v836_v40 = vrot.slane %v15773_v28, 7  ;;  %v756_v55 = vrot.slane %v11973_v36, 4 }
  0x43   : > { %14207 = vmatmul.mubr.msk.f32.gmra.mxu0 %vm239_vm1, %v15713_v53  ;;  %v837_v59 = vsel %vm792_vm2, %v834_v25, %v836_v40  ;;  %v15827_v9 = vsel %vm336_vm0, %v756_v55, %v757_v56  ;;  %v766_v40 = vrot.slane %v11981_v18, 4  ;;  %v15863_v55 = vsel %vm336_vm0, %v762_v14, %v764_v24 }
  0x44   : > { %14157 = vmatmul.mubr.msk.f32.gmra.mxu1 %vm239_vm1, %v817_v51  ;;  %14209 = vmatprep.mubr.msk.f32.mxu0 %vm239_vm1, %v15727_v62  ;;  %v838_v51 = vrot.slane %v11973_v36, 7  ;;  %v848_v36 = vrot.slane %v11981_v18, 7  ;;  %v15881_v18 = vld [vmem:[%s15501_s26 + $0x228] sm:$0xff] }
  0x45   : > { %14159 = vmatprep.mubr.msk.f32.mxu1 %vm239_vm1, %v820_v61  ;;  %v15813_v61 = vsel %vm336_vm0, %v752_v27, %v754_v43  ;;  %20768 = vst [vmem:[#allocation6_spill] sm:$0xff] %v15881_v18 }
  0x46   : > { %v840_v17 = vsel %vm792_vm2, %v838_v51, %v839_v54  ;;  %v15856_v51 = vld [vmem:[%s15501_s26 + $0x208] sm:$0xff]  ;;  %v847_v54 = vsel %vm792_vm2, %v844_v4, %v846_v23  ;;  %v15873_v4 = vld [vmem:[%s15501_s26 + $0x210] sm:$0xff] }
  0x47   : > { %14210 = vmatmul.mubr.msk.f32.gmra.mxu0 %vm239_vm1, %v15743_v6  ;;  %20766 = vst [vmem:[#allocation4_spill] sm:$0xff] %v15856_v51  ;;  %v854_v0 = vrot.slane %v15856_v51, 7  ;;  %v772_v3 = vrot.slane %v15856_v51, 4  ;;  %20767 = vst [vmem:[#allocation5_spill] sm:$0xff] %v15873_v4  ;;  %v856_v23 = vrot.slane %v15873_v4, 7  ;;  %v774_v24 = vrot.slane %v15873_v4, 4 }
  0x48   : > { %14160 = vmatmul.mubr.msk.f32.gmra.mxu1 %vm239_vm1, %v822_v2  ;;  %14212 = vmatprep.mubr.msk.f32.mxu0 %vm239_vm1, %v15747_v12  ;;  %v759_v2 = vrot.slane %v15800_v49, 4  ;;  %v777_v4 = vrot.slane %v15881_v18, 4  ;;  %v15906_v51 = vld [vmem:[%s15501_s26 + $0x248] sm:$0xff] }
  0x49   : > { %14162 = vmatprep.mubr.msk.f32.mxu1 %vm239_vm1, %v825_v7  ;;  %v761_v7 = vrot.slane %v11977_v57, 4  ;;  %20770 = vst [vmem:[#allocation8_spill] sm:$0xff] %v15906_v51 }
  0x4a   : > { %v15843_v25 = vsel %vm336_vm0, %v757_v56, %v759_v2 }
  0x4b   : > { %14213 = vmatmul.mubr.msk.f32.gmra.mxu0 %vm239_vm1, %v15763_v21  ;;  %v15847_v27 = vsel %vm336_vm0, %v761_v7, %v762_v14 }
  0x4c   : > { %14163 = vmatmul.mubr.msk.f32.gmra.mxu1 %vm239_vm1, %v827_v19  ;;  %14215 = vmatprep.mubr.msk.f32.mxu0 %vm239_vm1, %v15777_v33  ;;  %v15831_v19 = vld [vmem:[%s15501_s26 + $0x1e8] sm:$0xff] }
  0x4d   : > { %14165 = vmatprep.mubr.msk.f32.mxu1 %vm239_vm1, %v830_v30  ;;  %v15850_v30 = vld [vmem:[%s15501_s26 + $0x1f0] sm:$0xff]  ;;  %v767_v43 = vrot.slane %v15831_v19, 4 }
  0x4e   : > { %20765 = vst [vmem:[#allocation3_spill] sm:$0xff] %v15850_v30  ;;  %v851_v56 = vrot.slane %v15850_v30, 7  ;;  %v769_v57 = vrot.slane %v15850_v30, 4  ;;  %v782_v30 = vrot.slane %v15906_v51, 4 }
  0x4f   : > { %14216 = vmatmul.mubr.msk.f32.gmra.mxu0 %vm239_vm1, %v15793_v45  ;;  %v15877_v14 = vsel %vm336_vm0, %v766_v40, %v767_v43 }
  0x50   : > { %14166 = vmatmul.mubr.msk.f32.gmra.mxu1 %vm239_vm1, %v832_v38  ;;  %14218 = vmatprep.mubr.msk.f32.mxu0 %vm239_vm1, %v15797_v47  ;;  %v849_v38 = vrot.slane %v15831_v19, 7 }
  0x51   : > { %14168 = vmatprep.mubr.msk.f32.mxu1 %vm239_vm1, %v835_v46  ;;  %v11985_v46 = vld [vmem:[%s15501_s26 + $0x200] sm:$0xff] }
  0x52   : > { %v771_v2 = vrot.slane %v11985_v46, 4  ;;  %v850_v7 = vsel %vm792_vm2, %v848_v36, %v849_v38 }
  0x53   : > { %14219 = vmatmul.mubr.msk.f32.gmra.mxu0 %vm239_vm1, %v15813_v61 }
  0x54   : > { %14169 = vmatmul.mubr.msk.f32.gmra.mxu1 %vm239_vm1, %v837_v59  ;;  %14221 = vmatprep.mubr.msk.f32.mxu0 %vm239_vm1, %v15827_v9  ;;  %v853_v59 = vrot.slane %v11985_v46, 7  ;;  %v15897_v40 = vsel %vm336_vm0, %v771_v2, %v772_v3  ;;  %v15900_v46 = vld [vmem:[%s15501_s26 + $0x230] sm:$0xff] }
  0x55   : > { %14171 = vmatprep.mubr.msk.f32.mxu1 %vm239_vm1, %v840_v17  ;;  %v11989_v17 = vld [vmem:[%s15501_s26 + $0x220] sm:$0xff]  ;;  %20769 = vst [vmem:[#allocation7_spill] sm:$0xff] %v15900_v46  ;;  %v779_v2 = vrot.slane %v15900_v46, 4 }
  0x56   : > { %v855_v36 = vsel %vm792_vm2, %v853_v59, %v854_v0  ;;  %v861_v59 = vrot.slane %v15900_v46, 7  ;;  %v15931_v46 = vld [vmem:[%s15501_s26 + $0x268] sm:$0xff] }
  0x57   : > { %14222 = vmatmul.mubr.msk.f32.gmra.mxu0 %vm239_vm1, %v15843_v25  ;;  %20773 = vst [vmem:[#allocation11_spill] sm:$0xff] %v15931_v46 }
  0x58   : > { %14172 = vmatmul.mubr.msk.f32.gmra.mxu1 %vm239_vm1, %v842_v22  ;;  %14224 = vmatprep.mubr.msk.f32.mxu0 %vm239_vm1, %v15847_v27  ;;  %v852_v22 = vsel %vm792_vm2, %v849_v38, %v851_v56  ;;  %v858_v38 = vrot.slane %v11989_v17, 7  ;;  %v776_v56 = vrot.slane %v11989_v17, 4 }
  0x59   : > { %14174 = vmatprep.mubr.msk.f32.mxu1 %vm239_vm1, %v845_v26  ;;  %v15893_v26 = vsel %vm336_vm0, %v767_v43, %v769_v57  ;;  %v857_v43 = vsel %vm792_vm2, %v854_v0, %v856_v23  ;;  %v15913_v57 = vsel %vm336_vm0, %v772_v3, %v774_v24  ;;  %v15927_v23 = vld [vmem:[%s15501_s26 + $0x250] sm:$0xff]  ;;  %v11997_v24 = vld [vmem:[%s15501_s26 + $0x260] sm:$0xff] }
  0x5a   : > { %20771 = vst [vmem:[#allocation9_spill] sm:$0xff] %v15913_v57  ;;  %v15924_v3 = vsel %vm336_vm0, %v776_v56, %v777_v4  ;;  %20772 = vst [vmem:[#allocation10_spill] sm:$0xff] %v15927_v23 }
  0x5b   : > { %14225 = vmatmul.mubr.msk.f32.gmra.mxu0 %vm239_vm1, %v15863_v55 }
  0x5c   : > { %14175 = vmatmul.mubr.msk.f32.gmra.mxu1 %vm239_vm1, %v847_v54  ;;  %14227 = vmatprep.mubr.msk.f32.mxu0 %vm239_vm1, %v15877_v14  ;;  %v859_v54 = vrot.slane %v15881_v18, 7 }
  0x5d   : > { %14177 = vmatprep.mubr.msk.f32.mxu1 %vm239_vm1, %v850_v7  ;;  %v11993_v7 = vld [vmem:[%s15501_s26 + $0x240] sm:$0xff] }
  0x5e   : > { %v863_v17 = vrot.slane %v11993_v7, 7  ;;  %v781_v18 = vrot.slane %v11993_v7, 4  ;;  %v860_v0 = vsel %vm792_vm2, %v858_v38, %v859_v54  ;;  %v15938_v7 = vsel %vm336_vm0, %v777_v4, %v779_v2  ;;  %v15952_v2 = vld [vmem:[%s15501_s26 + $0x270] sm:$0xff] }
  0x5f   : > { %14228 = vmatmul.mubr.msk.f32.gmra.mxu0 %vm239_vm1, %v15893_v26  ;;  %v786_v4 = vrot.slane %v11997_v24, 4 }
  0x60   : > { %14178 = vmatmul.mubr.msk.f32.gmra.mxu1 %vm239_vm1, %v852_v22  ;;  %14230 = vmatprep.mubr.msk.f32.mxu0 %vm239_vm1, %v15897_v40  ;;  %v864_v22 = vrot.slane %v15906_v51, 7  ;;  %v15945_v56 = vsel %vm336_vm0, %v781_v18, %v782_v30  ;;  %v784_v51 = vrot.slane %v15927_v23, 4 }
  0x61   : > { %14180 = vmatprep.mubr.msk.f32.mxu1 %vm239_vm1, %v855_v36  ;;  %v862_v36 = vsel %vm792_vm2, %v859_v54, %v861_v59  ;;  %20774 = vst [vmem:[#allocation12_spill] sm:$0xff] %v15945_v56  ;;  %v869_v54 = vrot.slane %v15931_v46, 7  ;;  %v787_v59 = vrot.slane %v15931_v46, 4 }
  0x62   : > { %v865_v38 = vsel %vm792_vm2, %v863_v17, %v864_v22  ;;  %v15962_v17 = vsel %vm336_vm0, %v782_v30, %v784_v51 }
  0x63   : > { %14231 = vmatmul.mubr.msk.f32.gmra.mxu0 %vm239_vm1, %v15913_v57  ;;  %v868_v57 = vrot.slane %v11997_v24, 7  ;;  %v789_v24 = vrot.slane %v15952_v2, 4  ;;  %v15968_v46 = vsel %vm336_vm0, %v786_v4, %v787_v59  ;;  %v1486_v4 = vrot.slane %v15603_v52, 2  ;;  %v16009_v52 = vld [vmem:[%s20667_s3 + $0x1c] sm:$0xf] }
  0x64   : > { %14181 = vmatmul.mubr.msk.f32.gmra.mxu1 %vm239_vm1, %v857_v43  ;;  %14233 = vmatprep.mubr.msk.f32.mxu0 %vm239_vm1, %v15924_v3  ;;  %v866_v43 = vrot.slane %v15927_v23, 7  ;;  %20775 = vst [vmem:[#allocation13_spill] sm:$0xff] %v15968_v46  ;;  %v1477_v23 = vrot.slane %v15578_v35, 2 }
  0x65   : > { %14183 = vmatprep.mubr.msk.f32.mxu1 %vm239_vm1, %v860_v0  ;;  %v871_v0 = vrot.slane %v15952_v2, 7  ;;  %v15981_v51 = vsel %vm336_vm0, %v787_v59, %v789_v24  ;;  %v1487_v59 = vrot.slane %v15617_v63, 2  ;;  %v16042_v24 = vrot.slane %v15674_v29, 2 }
  0x66   : > { %v867_v18 = vsel %vm792_vm2, %v864_v22, %v866_v43  ;;  %20776 = vst [vmem:[#allocation14_spill] sm:$0xff] %v15981_v51  ;;  %v1481_v22 = vrot.slane %v15589_v44, 2  ;;  %v1482_v43 = vrot.slane %v15597_v48, 2  ;;  %v11948_v44 = vld [vmem:[%s15501_s26 + $0xd8] sm:$0x3f] }
  0x67   : > { %14234 = vmatmul.mubr.msk.f32.gmra.mxu0 %vm239_vm1, %v15938_v7  ;;  %v872_v30 = vsel %vm792_vm2, %v869_v54, %v871_v0  ;;  %v16022_v0 = vrot.slane %v15648_v16, 2 }
  0x68   : > { %14184 = vmatmul.mubr.msk.f32.gmra.mxu1 %vm239_vm1, %v862_v36  ;;  %14236 = vmatprep.mubr.msk.f32.mxu0 %vm239_vm1, %v15945_v56  ;;  %v870_v36 = vsel %vm792_vm2, %v868_v57, %v869_v54  ;;  %v11940_v56 = vld [vmem:[%s15501_s26 + $0x98] sm:$0x3f]  ;;  %v1483_v48 = vsel %vm1475_vm3, %v1481_v22, %v1482_v43 }
  0x69   : > { %14186 = vmatprep.mubr.msk.f32.mxu1 %vm239_vm1, %v865_v38  ;;  %v1476_v38 = vrot.slane %v15569_v32, 2  ;;  %v1479_v32 = vrot.slane %v11940_v56, 2  ;;  %v11944_v57 = vld [vmem:[%s15501_s26 + $0xb8] sm:$0x3f] }
  0x6a   : > { %v1484_v56 = vrot.slane %v11944_v57, 2  ;;  %v11964_v57 = vld [vmem:[%s15501_s26 + $0x158] sm:$0x3f] }
  0x6b   : > { %14237 = vmatmul.mubr.msk.f32.gmra.mxu0 %vm239_vm1, %v15962_v17  ;;  %v1478_v35 = vsel %vm1475_vm3, %v1476_v38, %v1477_v23  ;;  %v1480_v54 = vsel %vm1475_vm3, %v1477_v23, %v1479_v32  ;;  %v1489_v23 = vrot.slane %v11948_v44, 2  ;;  %v16060_v38 = vrot.slane %v15700_v42, 2 }
  0x6c   : > { %14187 = vmatmul.mubr.msk.f32.gmra.mxu1 %vm239_vm1, %v867_v18  ;;  %14239 = vmatprep.mubr.msk.f32.mxu0 %vm239_vm1, %v15968_v46  ;;  %v1485_v63 = vsel %vm1475_vm3, %v1482_v43, %v1484_v56  ;;  %v1491_v18 = vrot.slane %v15624_v5, 2  ;;  %v1506_v32 = vrot.slane %v15706_v50, 2  ;;  %v1509_v50 = vrot.slane %v11964_v57, 2  ;;  %v11968_v56 = vld [vmem:[%s15501_s26 + $0x178] sm:$0x3f]  ;;  %v20779_v57 = vld [vmem:[#allocation4_spill] sm:$0xff] }
  0x6d   : > { %14189 = vmatprep.mubr.msk.f32.mxu1 %vm239_vm1, %v870_v36  ;;  %v1490_v5 = vsel %vm1475_vm3, %v1487_v59, %v1489_v23  ;;  %v11956_v36 = vld [vmem:[%s15501_s26 + $0x118] sm:$0x3f]  ;;  %v1511_v43 = vrot.slane %v15731_v1, 2  ;;  %v1514_v1 = vrot.slane %v11968_v56, 2  ;;  %v16114_v44 = vrot.slane %v15773_v28, 2 }
  0x6e   : > { %v16038_v16 = vsel %vm1475_vm3, %v1491_v18, %v16022_v0  ;;  %v1521_v23 = vrot.slane %v15781_v37, 2  ;;  %v11976_v18 = vld [vmem:[%s15501_s26 + $0x1b8] sm:$0x3f] }
  0x6f   : > { %14240 = vmatmul.mubr.msk.f32.gmra.mxu0 %vm239_vm1, %v15981_v51  ;;  %v1524_v37 = vrot.slane %v11976_v18, 2  ;;  %v11988_v56 = vld [vmem:[%s15501_s26 + $0x218] sm:$0x3f] }
  0x70   : > { %14190 = vmatmul.mubr.msk.f32.gmra.mxu1 %vm239_vm1, %v872_v30  ;;  %14294 = vmatprep.mubr.msk.f32.mxu0 %vm239_vm1, %v15678_v31  ;;  %v16004_v31 = vld [vmem:[%s20667_s3 + $0x18] sm:$0xf] }
  0x71   : > { %14244 = vmatprep.mubr.msk.f32.mxu1 %vm239_vm1, %v1478_v35  ;;  %v16078_v35 = vrot.slane %v15723_v60, 2  ;;  %v20785_v18 = vld [vmem:[#allocation6_spill] sm:$0xff] }
  0x73   : > { %14295 = vmatmul.mubr.msk.f32.vlgmr.msra.gmra.mxu0 %vm239_vm1, %v15693_v39  ;;  %v1488_v39 = vsel %vm1475_vm3, %v1486_v4, %v1487_v59  ;;  %v16092_v60 = vsel %vm1475_vm3, %v1506_v32, %v16078_v35  ;;  %v1510_v4 = vsel %vm1475_vm3, %v16078_v35, %v1509_v50  ;;  %v1516_v59 = vrot.slane %v15756_v10, 2  ;;  %v20780_v50 = vld [vmem:[#allocation5_spill] sm:$0xff] }
  0x74   : > { %14245 = vmatmul.mubr.msk.f32.vlgmr.msra.gmra.mxu1 %vm239_vm1, %v1480_v54  ;;  %14393 = vmatpush3.msk.msra.mxu0 %vm336_vm0, %v15638_v11  ;;  %v16096_v54 = vrot.slane %v15750_v13, 2 }
  0x75   : > { %14343 = vmatpush3.msk.msra.mxu1 %vm336_vm0, %v15633_v8  ;;  %14247 = vmatprep.mubr.msk.f32.mxu1 %vm239_vm1, %v1483_v48  ;;  %v11952_v8 = vld [vmem:[%s15501_s26 + $0xf8] sm:$0x3f]  ;;  %v16128_v28 = vsel %vm1475_vm3, %v1516_v59, %v16114_v44 }
  0x76   : > { %14297 = vmatprep.mubr.msk.f32.mxu0 %vm239_vm1, %v15697_v41  ;;  %14442 = vmatprep.subr.msk.mxu1 %vm336_vm0, %v16004_v31  ;;  %v1494_v11 = vrot.slane %v11952_v8, 2  ;;  %v1496_v41 = vrot.slane %v15657_v20, 2  ;;  %v1499_v20 = vrot.slane %v11956_v36, 2  ;;  %v16110_v13 = vsel %vm1475_vm3, %v1511_v43, %v16096_v54  ;;  %v11972_v48 = vld [vmem:[%s15501_s26 + $0x198] sm:$0x3f] }
  0x77   : > { %14492 = vmatprep.subr.msk.mxu0 %vm336_vm0, %v16009_v52  ;;  %14298 = vmatmul.mubr.msk.f32.gmra.mxu0 %vm239_vm1, %v15713_v53  ;;  %v1519_v10 = vrot.slane %v11972_v48, 2  ;;  %v16186_v43 = vrot.slane %v20780_v50, 2  ;;  %v11992_v59 = vld [vmem:[%s15501_s26 + $0x238] sm:$0x3f]  ;;  %v16198_v48 = vld [vmem:[%s15501_s26 + $0x290] sm:$0xff] }
  0x78   : > { %14248 = vmatmul.mubr.msk.f32.gmra.mxu1 %vm239_vm1, %v1485_v63  ;;  %14300 = vmatprep.mubr.msk.f32.mxu0 %vm239_vm1, %v15727_v62  ;;  %v1495_v53 = vsel %vm1475_vm3, %v16022_v0, %v1494_v11  ;;  %v16056_v29 = vsel %vm1475_vm3, %v1496_v41, %v16042_v24  ;;  %v1501_v62 = vrot.slane %v15682_v34, 2  ;;  %v1500_v30 = vsel %vm1475_vm3, %v16042_v24, %v1499_v20  ;;  %v11980_v41 = vld [vmem:[%s15501_s26 + $0x1d8] sm:$0x3f]  ;;  %v20777_v20 = vld [vmem:[#allocation3_spill] sm:$0xff] }
  0x79   : > { %14250 = vmatprep.mubr.msk.f32.mxu1 %vm239_vm1, %v1488_v39  ;;  %v1515_v63 = vsel %vm1475_vm3, %v16096_v54, %v1514_v1  ;;  %v16132_v39 = vrot.slane %v15800_v49, 2  ;;  %v1520_v8 = vsel %vm1475_vm3, %v16114_v44, %v1519_v10  ;;  %v16150_v11 = vrot.slane %v15823_v15, 2  ;;  %20781 = vst [vmem:[#allocation3_spill] sm:$0xff] %v16186_v43  ;;  %v16191_v1 = vld [vmem:[%s15501_s26 + $0x288] sm:$0xff]  ;;  %20783 = vst [vmem:[#allocation4_spill] sm:$0xff] %v16198_v48 }
  0x7a   : > { %v16074_v42 = vsel %vm1475_vm3, %v1501_v62, %v16060_v38  ;;  %v16168_v62 = vrot.slane %v20777_v20, 2  ;;  %v16217_v20 = vld [vmem:[%s15501_s26 + $0x2a8] sm:$0xff] }
  0x7b   : > { %14301 = vmatmul.mubr.msk.f32.gmra.mxu0 %vm239_vm1, %v15743_v6  ;;  %v11960_v6 = vld [vmem:[%s15501_s26 + $0x138] sm:$0x3f]  ;;  %v16146_v49 = vsel %vm1475_vm3, %v1521_v23, %v16132_v39  ;;  %v1525_v36 = vsel %vm1475_vm3, %v16132_v39, %v1524_v37  ;;  %v1539_v23 = vrot.slane %v11988_v56, 2  ;;  %20789 = vst [vmem:[#allocation6_spill] sm:$0xff] %v16217_v20 }
  0x7c   : > { %14251 = vmatmul.mubr.msk.f32.gmra.mxu1 %vm239_vm1, %v1490_v5  ;;  %14303 = vmatprep.mubr.msk.f32.mxu0 %vm239_vm1, %v15747_v12  ;;  %v1504_v34 = vrot.slane %v11960_v6, 2  ;;  %v1526_v5 = vrot.slane %v15806_v58, 2  ;;  %v1529_v58 = vrot.slane %v11980_v41, 2  ;;  %v11984_v6 = vld [vmem:[%s15501_s26 + $0x1f8] sm:$0x3f] }
  0x7d   : > { %14253 = vmatprep.mubr.msk.f32.mxu1 %vm239_vm1, %v16038_v16  ;;  %v1540_v56 = vsel %vm1475_vm3, %v16186_v43, %v1539_v23 }
  0x7e   : > { %v1505_v22 = vsel %vm1475_vm3, %v16060_v38, %v1504_v34  ;;  %v16164_v15 = vsel %vm1475_vm3, %v1526_v5, %v16150_v11  ;;  %v1534_v34 = vrot.slane %v11984_v6, 2  ;;  %v20787_v5 = vld [vmem:[#allocation7_spill] sm:$0xff]  ;;  %v1544_v6 = vrot.slane %v11992_v59, 2 }
  0x7f   : > { %14304 = vmatmul.mubr.msk.f32.gmra.mxu0 %vm239_vm1, %v15763_v21  ;;  %v16212_v41 = vrot.slane %v20787_v5, 2  ;;  %v2065_v59 = vrot.slane %v16217_v20, 4  ;;  %v16255_v20 = vld [vmem:[%s15501_s26 + $0x2e0] sm:$0xff] }
  0x80   : > { %14254 = vmatmul.mubr.msk.f32.gmra.mxu1 %vm239_vm1, %v1495_v53  ;;  %14306 = vmatprep.mubr.msk.f32.mxu0 %vm239_vm1, %v15777_v33  ;;  %v1531_v53 = vrot.slane %v15831_v19, 2  ;;  %v1530_v19 = vsel %vm1475_vm3, %v16150_v11, %v1529_v58  ;;  %v1535_v10 = vsel %vm1475_vm3, %v16168_v62, %v1534_v34  ;;  %v2060_v58 = vrot.slane %v16191_v1, 4  ;;  %v20790_v34 = vld [vmem:[#allocation8_spill] sm:$0xff]  ;;  %20796 = vst [vmem:[#allocation16_spill] sm:$0xff] %v16255_v20 }
  0x81   : > { %14256 = vmatprep.mubr.msk.f32.mxu1 %vm239_vm1, %v16056_v29 }
  0x82   : > { %v16182_v32 = vsel %vm1475_vm3, %v1531_v53, %v16168_v62  ;;  %v12158_v53 = vld [vmem:[%s15501_s26 + $0x2a0] sm:$0xff] }
  0x83   : > { %14307 = vmatmul.mubr.msk.f32.gmra.mxu0 %vm239_vm1, %v15793_v45 }
  0x84   : > { %14257 = vmatmul.mubr.msk.f32.gmra.mxu1 %vm239_vm1, %v1500_v30  ;;  %14309 = vmatprep.mubr.msk.f32.mxu0 %vm239_vm1, %v15797_v47  ;;  %v20778_v30 = vld [vmem:[#allocation9_spill] sm:$0xff] }
  0x85   : > { %14259 = vmatprep.mubr.msk.f32.mxu1 %vm239_vm1, %v16074_v42  ;;  %20782 = vst [vmem:[#allocation9_spill] sm:$0xff] %v16191_v1  ;;  %v16258_v1 = vld [vmem:[%s15501_s26 + $0x2e8] sm:$0xff] }
  0x86   : > { %20797 = vst [vmem:[#allocation17_spill] sm:$0xff] %v16258_v1 }
  0x87   : > { %14310 = vmatmul.mubr.msk.f32.gmra.mxu0 %vm239_vm1, %v15813_v61 }
  0x88   : > { %14260 = vmatmul.mubr.msk.f32.gmra.mxu1 %vm239_vm1, %v1505_v22  ;;  %14312 = vmatprep.mubr.msk.f32.mxu0 %vm239_vm1, %v15827_v9  ;;  %v1536_v22 = vrot.slane %v20779_v57, 2  ;;  %v1546_v57 = vrot.slane %v20790_v34, 2  ;;  %v16243_v34 = vld [vmem:[%s15501_s26 + $0x2b0] sm:$0xff] }
  0x89   : > { %14262 = vmatprep.mubr.msk.f32.mxu1 %vm239_vm1, %v16092_v60 }
  0x8a   : > { %v16209_v37 = vsel %vm1475_vm3, %v1536_v22, %v16186_v43  ;;  %v20791_v22 = vld [vmem:[#allocation10_spill] sm:$0xff] }
  0x8b   : > { %14313 = vmatmul.mubr.msk.f32.gmra.mxu0 %vm239_vm1, %v15843_v25  ;;  %20786 = vst [vmem:[#allocation5_spill] sm:$0xff] %v16209_v37  ;;  %v16225_v50 = vrot.slane %v20791_v22, 2  ;;  %20794 = vst [vmem:[#allocation10_spill] sm:$0xff] %v16243_v34  ;;  %v12162_v22 = vld [vmem:[%s15501_s26 + $0x2c0] sm:$0xff] }
  0x8c   : > { %14263 = vmatmul.mubr.msk.f32.gmra.mxu1 %vm239_vm1, %v1510_v4  ;;  %14315 = vmatprep.mubr.msk.f32.mxu0 %vm239_vm1, %v15847_v27  ;;  %v12154_v4 = vld [vmem:[%s15501_s26 + $0x280] sm:$0xff] }
  0x8d   : > { %14265 = vmatprep.mubr.msk.f32.mxu1 %vm239_vm1, %v16110_v13 }
  0x8f   : > { %14316 = vmatmul.mubr.msk.f32.gmra.mxu0 %vm239_vm1, %v15863_v55 }
  0x90   : > { %14266 = vmatmul.mubr.msk.f32.gmra.mxu1 %vm239_vm1, %v1515_v63  ;;  %14318 = vmatprep.mubr.msk.f32.mxu0 %vm239_vm1, %v15877_v14  ;;  %v20784_v63 = vld [vmem:[#allocation12_spill] sm:$0xff] }
  0x91   : > { %14268 = vmatprep.mubr.msk.f32.mxu1 %vm239_vm1, %v16128_v28  ;;  %20788 = vst [vmem:[#allocation12_spill] sm:$0xff] %v16212_v41 }
  0x93   : > { %14319 = vmatmul.mubr.msk.f32.gmra.mxu0 %vm239_vm1, %v15893_v26 }
  0x94   : > { %14269 = vmatmul.mubr.msk.f32.gmra.mxu1 %vm239_vm1, %v1520_v8  ;;  %14321 = vmatprep.mubr.msk.f32.mxu0 %vm239_vm1, %v15897_v40  ;;  %v1541_v8 = vrot.slane %v20785_v18, 2 }
  0x95   : > { %14271 = vmatprep.mubr.msk.f32.mxu1 %vm239_vm1, %v16146_v49 }
  0x96   : > { %v16237_v18 = vsel %vm1475_vm3, %v1541_v8, %v16212_v41  ;;  %v16265_v8 = vsel %vm1475_vm3, %v1546_v57, %v16225_v50  ;;  %v2067_v57 = vrot.slane %v16243_v34, 4  ;;  %v16333_v34 = vld [vmem:[%s15501_s26 + $0x320] sm:$0xff] }
  0x97   : > { %14322 = vmatmul.mubr.msk.f32.gmra.mxu0 %vm239_vm1, %v20778_v30  ;;  %20792 = vst [vmem:[#allocation7_spill] sm:$0xff] %v16237_v18 }
  0x98   : > { %14272 = vmatmul.mubr.msk.f32.gmra.mxu1 %vm239_vm1, %v1525_v36  ;;  %14324 = vmatprep.mubr.msk.f32.mxu0 %vm239_vm1, %v15924_v3  ;;  %v2059_v36 = vrot.slane %v12154_v4, 4  ;;  %v2064_v4 = vrot.slane %v12158_v53, 4  ;;  %v16252_v53 = vld [vmem:[%s15501_s26 + $0x2c8] sm:$0xff] }
  0x99   : > { %14274 = vmatprep.mubr.msk.f32.mxu1 %vm239_vm1, %v16164_v15  ;;  %20795 = vst [vmem:[#allocation15_spill] sm:$0xff] %v16252_v53  ;;  %v2070_v43 = vrot.slane %v16252_v53, 4 }
  0x9a   : > { %v16240_v5 = vsel %vm336_vm0, %v2059_v36, %v2060_v58 }
  0x9b   : > { %14325 = vmatmul.mubr.msk.f32.gmra.mxu0 %vm239_vm1, %v15938_v7  ;;  %20793 = vst [vmem:[#allocation8_spill] sm:$0xff] %v16240_v5 }
  0x9c   : > { %14275 = vmatmul.mubr.msk.f32.gmra.mxu1 %vm239_vm1, %v1530_v19  ;;  %14327 = vmatprep.mubr.msk.f32.mxu0 %vm239_vm1, %v20784_v63  ;;  %v2062_v19 = vrot.slane %v16198_v48, 4  ;;  %v1545_v48 = vsel %vm1475_vm3, %v16212_v41, %v1544_v6  ;;  %v3406_v6 = vrot.slane %v16255_v20, 7  ;;  %v16283_v20 = vrot.slane %v15952_v2, 2 }
  0x9d   : > { %14277 = vmatprep.mubr.msk.f32.mxu1 %vm239_vm1, %v16182_v32 }
  0x9e   : > { %v16249_v23 = vsel %vm336_vm0, %v2060_v58, %v2062_v19  ;;  %v16268_v58 = vld [vmem:[%s15501_s26 + $0x2f0] sm:$0xff]  ;;  %v3407_v19 = vrot.slane %v16258_v1, 7  ;;  %v2069_v1 = vrot.slane %v12162_v22, 4 }
  0x9f   : > { %14328 = vmatmul.mubr.msk.f32.gmra.mxu0 %vm239_vm1, %v15962_v17  ;;  %v16308_v22 = vld [vmem:[%s15501_s26 + $0x310] sm:$0xff] }
  0xa0   : > { %14278 = vmatmul.mubr.msk.f32.gmra.mxu1 %vm239_vm1, %v1535_v10  ;;  %14330 = vmatprep.mubr.msk.f32.mxu0 %vm239_vm1, %v15968_v46  ;;  %v11996_v10 = vld [vmem:[%s15501_s26 + $0x258] sm:$0x3f]  ;;  %v16288_v46 = vld [vmem:[%s15501_s26 + $0x2d0] sm:$0xff]  ;;  %v16326_v53 = vsel %vm336_vm0, %v2069_v1, %v2070_v43  ;;  %v3416_v1 = vrot.slane %v16333_v34, 7 }
  0xa1   : > { %14280 = vmatprep.mubr.msk.f32.mxu1 %vm239_vm1, %v16209_v37  ;;  %v1549_v36 = vrot.slane %v11996_v10, 2  ;;  %v20798_v10 = vld [vmem:[#allocation11_spill] sm:$0xff]  ;;  %v16297_v37 = vld [vmem:[%s15501_s26 + $0x308] sm:$0xff] }
  0xa2   : > { %v1551_v41 = vrot.slane %v20798_v10, 2  ;;  %20801 = vst [vmem:[#allocation19_spill] sm:$0xff] %v16297_v37 }
  0xa3   : > { %14331 = vmatmul.mubr.msk.f32.gmra.mxu0 %vm239_vm1, %v15981_v51  ;;  %v3409_v51 = vrot.slane %v16268_v58, 7  ;;  %v1550_v2 = vsel %vm1475_vm3, %v16225_v50, %v1549_v36  ;;  %v3414_v36 = vrot.slane %v16308_v22, 7 }
  0xa4   : > { %14281 = vmatmul.mubr.msk.f32.gmra.mxu1 %vm239_vm1, %v1540_v56  ;;  %14333 = vmatprep.mubr.msk.f32.mxu0 %vm239_vm1, %v16240_v5  ;;  %v16277_v56 = vsel %vm336_vm0, %v2064_v4, %v2065_v59  ;;  %v16291_v5 = vsel %vm792_vm2, %v3406_v6, %v3407_v19  ;;  %v16294_v4 = vld [vmem:[%s15501_s26 + $0x300] sm:$0xff] }
  0xa5   : > { %14283 = vmatprep.mubr.msk.f32.mxu1 %vm239_vm1, %v16237_v18  ;;  %v12000_v18 = vld [vmem:[%s15501_s26 + $0x278] sm:$0x3f]  ;;  %20799 = vst [vmem:[#allocation11_spill] sm:$0xff] %v16291_v5  ;;  %20800 = vst [vmem:[#allocation18_spill] sm:$0xff] %v16294_v4  ;;  %v16300_v10 = vsel %vm792_vm2, %v3407_v19, %v3409_v51  ;;  %v3411_v6 = vrot.slane %v16294_v4, 7  ;;  %v3412_v5 = vrot.slane %v16297_v37, 7  ;;  %v16317_v51 = vsel %vm336_vm0, %v2065_v59, %v2067_v57 }
  0xa6   : > { %20802 = vst [vmem:[#allocation20_spill] sm:$0xff] %v16300_v10  ;;  %v2072_v19 = vrot.slane %v16288_v46, 4  ;;  %v16323_v10 = vsel %vm1475_vm3, %v1551_v41, %v16283_v20  ;;  %v12105_v37 = vld [vmem:[%s15501_s26 + $0xf8] sm:$0x3f]  ;;  %v16336_v59 = vld [vmem:[%s15501_s26 + $0x328] sm:$0xff]  ;;  %v16345_v41 = vld [vmem:[%s15501_s26 + $0x330] sm:$0xff] }
  0xa7   : > { %14334 = vmatmul.mubr.msk.f32.gmra.mxu0 %vm239_vm1, %v16249_v23  ;;  %v16330_v4 = vsel %vm792_vm2, %v3411_v6, %v3412_v5  ;;  %20804 = vst [vmem:[#allocation22_spill] sm:$0xff] %v16336_v59  ;;  %v3417_v57 = vrot.slane %v16336_v59, 7  ;;  %v2419_v6 = vrot.slane %v12105_v37, 2 }
  0xa8   : > { %14284 = vmatmul.mubr.msk.f32.gmra.mxu1 %vm239_vm1, %v1545_v48  ;;  %14336 = vmatprep.mubr.msk.f32.mxu0 %vm239_vm1, %v16277_v56  ;;  %v1554_v48 = vrot.slane %v12000_v18, 2  ;;  %20803 = vst [vmem:[#allocation21_spill] sm:$0xff] %v16330_v4  ;;  %v16339_v18 = vsel %vm792_vm2, %v3412_v5, %v3414_v36  ;;  %v3419_v36 = vrot.slane %v16345_v41, 7 }
  0xa9   : > { %14286 = vmatprep.mubr.msk.f32.mxu1 %vm239_vm1, %v16265_v8  ;;  %20805 = vst [vmem:[#allocation23_spill] sm:$0xff] %v16339_v18  ;;  %v12109_v18 = vld [vmem:[%s15501_s26 + $0x118] sm:$0x3f]  ;;  %v16361_v4 = vsel %vm792_vm2, %v3416_v1, %v3417_v57 }
  0xaa   : > { %v1555_v5 = vsel %vm1475_vm3, %v16283_v20, %v1554_v48  ;;  %v16364_v59 = vsel %vm792_vm2, %v3417_v57, %v3419_v36  ;;  %v2424_v37 = vrot.slane %v12109_v18, 2  ;;  %v12113_v48 = vld [vmem:[%s15501_s26 + $0x138] sm:$0x3f] }
  0xab   : > { %14337 = vmatmul.mubr.msk.f32.gmra.mxu0 %vm239_vm1, %v16317_v51  ;;  %v12149_v18 = vld [vmem:[%s15501_s26 + $0x258] sm:$0x3f] }
  0xac   : > { %14287 = vmatmul.mubr.msk.f32.gmra.mxu1 %vm239_vm1, %v1550_v2  ;;  %14339 = vmatprep.mubr.msk.f32.mxu0 %vm239_vm1, %v16326_v53  ;;  %v16356_v2 = vsel %vm336_vm0, %v2070_v43, %v2072_v19  ;;  %v2420_v43 = vsel %vm1475_vm3, %v16022_v0, %v2419_v6  ;;  %v16382_v19 = vld [vmem:[%s20667_s3 + $0x24] sm:$0xf]  ;;  %v12117_v0 = vld [vmem:[%s15501_s26 + $0x158] sm:$0x3f] }
  0xad   : > { %14289 = vmatprep.mubr.msk.f32.mxu1 %vm239_vm1, %v16323_v10  ;;  %v20809_v6 = vld [vmem:[#allocation14_spill] sm:$0xff] }
  0xae   : > { %v12153_v36 = vld [vmem:[%s15501_s26 + $0x278] sm:$0x3f] }
  0xaf   : > { %14340 = vmatmul.mubr.msk.f32.gmra.mxu0 %vm239_vm1, %v16356_v2 }
  0xb0   : > { %14290 = vmatmul.mubr.msk.f32.gmra.mxu1 %vm239_vm1, %v1555_v5  ;;  %14394 = vmatprep.mubr.msk.f32.mxu0 %vm239_vm1, %v15747_v12  ;;  %v2425_v12 = vsel %vm1475_vm3, %v16042_v24, %v2424_v37  ;;  %v12125_v24 = vld [vmem:[%s15501_s26 + $0x198] sm:$0x3f] }
  0xb1   : > { %14344 = vmatprep.mubr.msk.f32.mxu1 %vm239_vm1, %v16038_v16  ;;  %v16387_v16 = vld [vmem:[%s20667_s3 + $0x20] sm:$0xf] }
  0xb3   : > { %14395 = vmatmul.mubr.msk.f32.vlgmr.msra.gmra.mxu0 %vm239_vm1, %v15763_v21  ;;  %v2429_v21 = vrot.slane %v12113_v48, 2  ;;  %v20810_v48 = vld [vmem:[#allocation7_spill] sm:$0xff] }
  0xb4   : > { %14345 = vmatmul.mubr.msk.f32.vlgmr.msra.gmra.mxu1 %vm239_vm1, %v2420_v43  ;;  %14493 = vmatpush3.msk.msra.mxu0 %vm336_vm0, %v16009_v52  ;;  %v12121_v52 = vld [vmem:[%s15501_s26 + $0x178] sm:$0x3f] }
  0xb5   : > { %14443 = vmatpush3.msk.msra.mxu1 %vm336_vm0, %v16004_v31  ;;  %14347 = vmatprep.mubr.msk.f32.mxu1 %vm239_vm1, %v16056_v29  ;;  %v2434_v31 = vrot.slane %v12117_v0, 2  ;;  %v12129_v29 = vld [vmem:[%s15501_s26 + $0x1b8] sm:$0x3f] }
  0xb6   : > { %14397 = vmatprep.mubr.msk.f32.mxu0 %vm239_vm1, %v15777_v33  ;;  %14542 = vmatprep.subr.msk.mxu1 %vm336_vm0, %v16382_v19  ;;  %v2430_v33 = vsel %vm1475_vm3, %v16060_v38, %v2429_v21  ;;  %v12133_v38 = vld [vmem:[%s15501_s26 + $0x1d8] sm:$0x3f]  ;;  %v20812_v21 = vld [vmem:[#allocation12_spill] sm:$0xff] }
  0xb7   : > { %14592 = vmatprep.subr.msk.mxu0 %vm336_vm0, %v16387_v16  ;;  %14398 = vmatmul.mubr.msk.f32.gmra.mxu0 %vm239_vm1, %v15793_v45  ;;  %v2435_v45 = vsel %vm1475_vm3, %v16078_v35, %v2434_v31  ;;  %v12141_v35 = vld [vmem:[%s15501_s26 + $0x218] sm:$0x3f] }
  0xb8   : > { %14348 = vmatmul.mubr.msk.f32.gmra.mxu1 %vm239_vm1, %v2425_v12  ;;  %14400 = vmatprep.mubr.msk.f32.mxu0 %vm239_vm1, %v15797_v47  ;;  %v2439_v47 = vrot.slane %v12121_v52, 2  ;;  %v20811_v12 = vld [vmem:[#allocation8_spill] sm:$0xff] }
  0xb9   : > { %14350 = vmatprep.mubr.msk.f32.mxu1 %vm239_vm1, %v16074_v42  ;;  %v12137_v42 = vld [vmem:[%s15501_s26 + $0x1f8] sm:$0x3f] }
  0xbb   : > { %14401 = vmatmul.mubr.msk.f32.gmra.mxu0 %vm239_vm1, %v15813_v61  ;;  %v2440_v61 = vsel %vm1475_vm3, %v16096_v54, %v2439_v47  ;;  %v16476_v54 = vld [vmem:[%s20666_s2] ss:$0 sm:$0xff] }
  0xbc   : > { %14351 = vmatmul.mubr.msk.f32.gmra.mxu1 %vm239_vm1, %v2430_v33  ;;  %14403 = vmatprep.mubr.msk.f32.mxu0 %vm239_vm1, %v15827_v9  ;;  %v2444_v9 = vrot.slane %v12125_v24, 2  ;;  %v2474_v33 = vrot.slane %v12149_v18, 2  ;;  %v2479_v24 = vrot.slane %v12153_v36, 2  ;;  %v3008_v36 = vrot.slane %v16308_v22, 4 }
  0xbd   : > { %14353 = vmatprep.mubr.msk.f32.mxu1 %vm239_vm1, %v16092_v60 }
  0xbf   : > { %14404 = vmatmul.mubr.msk.f32.gmra.mxu0 %vm239_vm1, %v15843_v25  ;;  %v2445_v25 = vsel %vm1475_vm3, %v16114_v44, %v2444_v9 }
  0xc0   : > { %14354 = vmatmul.mubr.msk.f32.gmra.mxu1 %vm239_vm1, %v2435_v45  ;;  %14406 = vmatprep.mubr.msk.f32.mxu0 %vm239_vm1, %v15847_v27  ;;  %v2449_v27 = vrot.slane %v12129_v29, 2 }
  0xc1   : > { %14356 = vmatprep.mubr.msk.f32.mxu1 %vm239_vm1, %v16110_v13  ;;  %v12145_v13 = vld [vmem:[%s15501_s26 + $0x238] sm:$0x3f] }
  0xc3   : > { %14407 = vmatmul.mubr.msk.f32.gmra.mxu0 %vm239_vm1, %v15863_v55  ;;  %v2450_v55 = vsel %vm1475_vm3, %v16132_v39, %v2449_v27  ;;  %v2475_v27 = vsel %vm1475_vm3, %v16225_v50, %v2474_v33  ;;  %v12165_v33 = vld [vmem:[%s15501_s26 + $0x2d8] sm:$0x3f] }
  0xc4   : > { %14357 = vmatmul.mubr.msk.f32.gmra.mxu1 %vm239_vm1, %v2440_v61  ;;  %14409 = vmatprep.mubr.msk.f32.mxu0 %vm239_vm1, %v15877_v14  ;;  %v2454_v14 = vrot.slane %v12133_v38, 2  ;;  %v12157_v38 = vld [vmem:[%s15501_s26 + $0x298] sm:$0x3f] }
  0xc5   : > { %14359 = vmatprep.mubr.msk.f32.mxu1 %vm239_vm1, %v16128_v28 }
  0xc7   : > { %14410 = vmatmul.mubr.msk.f32.gmra.mxu0 %vm239_vm1, %v15893_v26  ;;  %v2455_v26 = vsel %vm1475_vm3, %v16150_v11, %v2454_v14  ;;  %v20807_v11 = vld [vmem:[#allocation13_spill] sm:$0xff] }
  0xc8   : > { %14360 = vmatmul.mubr.msk.f32.gmra.mxu1 %vm239_vm1, %v2445_v25  ;;  %14412 = vmatprep.mubr.msk.f32.mxu0 %vm239_vm1, %v15897_v40  ;;  %v2459_v40 = vrot.slane %v12137_v42, 2  ;;  %v20813_v14 = vld [vmem:[#allocation9_spill] sm:$0xff] }
  0xc9   : > { %14362 = vmatprep.mubr.msk.f32.mxu1 %vm239_vm1, %v16146_v49  ;;  %v20806_v49 = vld [vmem:[#allocation5_spill] sm:$0xff]  ;;  %v2481_v42 = vrot.slane %v20813_v14, 2 }
  0xca   : > { %v2460_v60 = vsel %vm1475_vm3, %v16168_v62, %v2459_v40 }
  0xcb   : > { %14413 = vmatmul.mubr.msk.f32.gmra.mxu0 %vm239_vm1, %v20778_v30  ;;  %v2469_v30 = vrot.slane %v12145_v13, 2 }
  0xcc   : > { %14363 = vmatmul.mubr.msk.f32.gmra.mxu1 %vm239_vm1, %v2450_v55  ;;  %14415 = vmatprep.mubr.msk.f32.mxu0 %vm239_vm1, %v15924_v3  ;;  %v2464_v3 = vrot.slane %v12141_v35, 2  ;;  %v20815_v35 = vld [vmem:[#allocation16_spill] sm:$0xff] }
  0xcd   : > { %14365 = vmatprep.mubr.msk.f32.mxu1 %vm239_vm1, %v16164_v15  ;;  %v20808_v15 = vld [vmem:[#allocation3_spill] sm:$0xff]  ;;  %v2470_v0 = vsel %vm1475_vm3, %v20812_v21, %v2469_v30  ;;  %v12161_v30 = vld [vmem:[%s15501_s26 + $0x2b8] sm:$0x3f] }
  0xce   : > { %v2465_v62 = vsel %vm1475_vm3, %v20808_v15, %v2464_v3  ;;  %v20816_v3 = vld [vmem:[#allocation17_spill] sm:$0xff]  ;;  %v20818_v15 = vld [vmem:[#allocation10_spill] sm:$0xff] }
  0xcf   : > { %14416 = vmatmul.mubr.msk.f32.gmra.mxu0 %vm239_vm1, %v15938_v7  ;;  %v3001_v13 = vrot.slane %v20816_v3, 4 }
  0xd0   : > { %14366 = vmatmul.mubr.msk.f32.gmra.mxu1 %vm239_vm1, %v2455_v26  ;;  %14418 = vmatprep.mubr.msk.f32.mxu0 %vm239_vm1, %v20784_v63  ;;  %v20814_v26 = vld [vmem:[#allocation4_spill] sm:$0xff] }
  0xd1   : > { %14368 = vmatprep.mubr.msk.f32.mxu1 %vm239_vm1, %v16182_v32  ;;  %v16529_v40 = vrot.slane %v20814_v26, 2  ;;  %v15356_v26 = vld [vmem:[%s15501_s26 + $0x140] sm:$0xff] }
  0xd3   : > { %v14096_v44 = vpop.f32.mrf.mxu0  ;;  %14419 = vmatmul.mubr.msk.f32.gmra.mxu0 %vm239_vm1, %v15962_v17 }
  0xd4   : > { %v14120_v7 = vpop.f32.mrf.mxu1  ;;  %14369 = vmatmul.mubr.msk.f32.gmra.mxu1 %vm239_vm1, %v2460_v60  ;;  %v412_v28 = vadd.f32 %v14096_v44, %v16476_v54  ;;  %14421 = vmatprep.mubr.msk.f32.mxu0 %vm239_vm1, %v20807_v11  ;;  %v3000_v60 = vrot.slane %v20815_v35, 4  ;;  %v3341_v35 = vrot.slane %v15356_v26, 7 }
  0xd5   : > { %v492_v39 = vadd.f32 %v14120_v7, %v16476_v54  ;;  %14371 = vmatprep.mubr.msk.f32.mxu1 %vm239_vm1, %v20806_v49  ;;  %v406_v32 = vpop.f32.mrf.mxu0  ;;  %v20817_v49 = vld [vmem:[#allocation6_spill] sm:$0xff] }
  0xd6   : > { %v486_v63 = vpop.f32.mrf.mxu1  ;;  %567 = vst.msk [vmem:[#allocation2 + $0x8] sm:$0xff] %vm565_vm4, %v412_v28  ;;  %v407_v17 = vadd.f32 %v16476_v54, %v406_v32  ;;  %v2484_v28 = vrot.slane %v12157_v38, 2  ;;  %v2486_v11 = vrot.slane %v20817_v49, 2 }
  0xd7   : > { %583 = vst.msk [vmem:[#allocation2 + $0x88] sm:$0xff] %vm565_vm4, %v492_v39  ;;  %v487_v1 = vadd.f32 %v16476_v54, %v486_v63  ;;  %v14099_v57 = vpop.f32.mrf.mxu0  ;;  %14422 = vmatmul.mubr.msk.f32.gmra.mxu0 %vm239_vm1, %v20809_v6  ;;  %v3003_v39 = vrot.slane %v16268_v58, 4  ;;  %v20819_v58 = vld [vmem:[#allocation18_spill] sm:$0xff]  ;;  %v20820_v63 = vld [vmem:[#allocation19_spill] sm:$0xff]  ;;  %v2489_v6 = vrot.slane %v12161_v30, 2 }
  0xd8   : > { %v14123_v5 = vpop.f32.mrf.mxu1  ;;  %14372 = vmatmul.mubr.msk.f32.gmra.mxu1 %vm239_vm1, %v2465_v62  ;;  %566 = vst.msk [vmem:[#allocation2] sm:$0xff] %vm565_vm4, %v407_v17  ;;  %v422_v43 = vadd.f32 %v14099_v57, %v16476_v54  ;;  %14424 = vmatprep.mubr.msk.f32.mxu0 %vm239_vm1, %v20811_v12  ;;  %v16545_v62 = vrot.slane %v20818_v15, 2  ;;  %v3006_v18 = vrot.slane %v20820_v63, 4  ;;  %v16560_v57 = vsel %vm1475_vm3, %v2481_v42, %v16529_v40 }
  0xd9   : > { %582 = vst.msk [vmem:[#allocation2 + $0x80] sm:$0xff] %vm565_vm4, %v487_v1  ;;  %v502_v37 = vadd.f32 %v14123_v5, %v16476_v54  ;;  %14374 = vmatprep.mubr.msk.f32.mxu1 %vm239_vm1, %v20810_v48  ;;  %v416_v31 = vpop.f32.mrf.mxu0  ;;  %v3002_v5 = vsel %vm336_vm0, %v3000_v60, %v3001_v13  ;;  %v2485_v48 = vsel %vm1475_vm3, %v16529_v40, %v2484_v28  ;;  %v3013_v42 = vrot.slane %v16345_v41, 4  ;;  %v15357_v60 = vld [vmem:[%s15501_s26 + $0x148] sm:$0xff] }
  0xda   : > { %v496_v52 = vpop.f32.mrf.mxu1  ;;  %569 = vst.msk [vmem:[#allocation2 + $0x18] sm:$0xff] %vm565_vm4, %v422_v43  ;;  %v417_v45 = vadd.f32 %v16476_v54, %v416_v31  ;;  %v3004_v12 = vsel %vm336_vm0, %v3001_v13, %v3003_v39  ;;  %v16576_v21 = vsel %vm1475_vm3, %v2486_v11, %v16545_v62  ;;  %v2490_v38 = vsel %vm1475_vm3, %v16545_v62, %v2489_v6 }
  0xdb   : > { %585 = vst.msk [vmem:[#allocation2 + $0x98] sm:$0xff] %vm565_vm4, %v502_v37  ;;  %v497_v47 = vadd.f32 %v16476_v54, %v496_v52  ;;  %v14102_v61 = vpop.f32.mrf.mxu0  ;;  %14425 = vmatmul.mubr.msk.f32.gmra.mxu0 %vm239_vm1, %v16249_v23  ;;  %v3342_v3 = vrot.slane %v15357_v60, 7 }
  0xdc   : > { %v14126_v9 = vpop.f32.mrf.mxu1  ;;  %14375 = vmatmul.mubr.msk.f32.gmra.mxu1 %vm239_vm1, %v2470_v0  ;;  %568 = vst.msk [vmem:[#allocation2 + $0x10] sm:$0xff] %vm565_vm4, %v417_v45  ;;  %v432_v29 = vadd.f32 %v14102_v61, %v16476_v54  ;;  %14427 = vmatprep.mubr.msk.f32.mxu0 %vm239_vm1, %v16277_v56  ;;  %v2480_v56 = vsel %vm1475_vm3, %v16283_v20, %v2479_v24  ;;  %v20821_v45 = vld [vmem:[#allocation15_spill] sm:$0xff]  ;;  %v16589_v24 = vrot.slane %v16288_v46, 2  ;;  %v3010_v61 = vrot.slane %v16333_v34, 4 }
  0xdd   : > { %584 = vst.msk [vmem:[#allocation2 + $0x90] sm:$0xff] %vm565_vm4, %v497_v47  ;;  %v512_v25 = vadd.f32 %v14126_v9, %v16476_v54  ;;  %14377 = vmatprep.mubr.msk.f32.mxu1 %vm239_vm1, %v16265_v8  ;;  %v426_v55 = vpop.f32.mrf.mxu0  ;;  %v2491_v47 = vrot.slane %v20821_v45, 2  ;;  %v20822_v9 = vld [vmem:[#allocation22_spill] sm:$0xff]  ;;  %v3009_v46 = vsel %vm336_vm0, %v3006_v18, %v3008_v36  ;;  %v2494_v34 = vrot.slane %v12165_v33, 2  ;;  %v15361_v33 = vld [vmem:[%s15501_s26 + $0x170] sm:$0xff] }
  0xde   : > { %v506_v23 = vpop.f32.mrf.mxu1  ;;  %571 = vst.msk [vmem:[#allocation2 + $0x28] sm:$0xff] %vm565_vm4, %v432_v29  ;;  %v427_v8 = vadd.f32 %v16476_v54, %v426_v55  ;;  %v3011_v29 = vrot.slane %v20822_v9, 4  ;;  %v12237_v55 = vld [vmem:[%s15501_s26 + $0x158] sm:$0x3f]  ;;  %v3343_v63 = vsel %vm792_vm2, %v3341_v35, %v3342_v3  ;;  %v15362_v9 = vld [vmem:[%s15501_s26 + $0x180] sm:$0xff] }
  0xdf   : > { %587 = vst.msk [vmem:[#allocation2 + $0xa8] sm:$0xff] %vm565_vm4, %v512_v25  ;;  %v507_v50 = vadd.f32 %v16476_v54, %v506_v23  ;;  %v14105_v44 = vpop.f32.mrf.mxu0  ;;  %14428 = vmatmul.mubr.msk.f32.gmra.mxu0 %vm239_vm1, %v16317_v51  ;;  %v3005_v51 = vrot.slane %v20819_v58, 4  ;;  %v16616_v28 = vsel %vm1475_vm3, %v2491_v47, %v16589_v24  ;;  %v3766_v11 = vrot.slane %v12237_v55, 2 }
  0xe0   : > { %v14129_v7 = vpop.f32.mrf.mxu1  ;;  %14378 = vmatmul.mubr.msk.f32.gmra.mxu1 %vm239_vm1, %v2475_v27  ;;  %570 = vst.msk [vmem:[#allocation2 + $0x20] sm:$0xff] %vm565_vm4, %v427_v8  ;;  %v442_v20 = vadd.f32 %v14105_v44, %v16476_v54  ;;  %14430 = vmatprep.mubr.msk.f32.mxu0 %vm239_vm1, %v16326_v53  ;;  %v3012_v39 = vsel %vm336_vm0, %v3010_v61, %v3011_v29  ;;  %v3349_v47 = vrot.slane %v15361_v33, 7 }
  0xe1   : > { %586 = vst.msk [vmem:[#allocation2 + $0xa0] sm:$0xff] %vm565_vm4, %v507_v50  ;;  %v522_v32 = vadd.f32 %v14129_v7, %v16476_v54  ;;  %14380 = vmatprep.mubr.msk.f32.mxu1 %vm239_vm1, %v16323_v10  ;;  %v436_v17 = vpop.f32.mrf.mxu0  ;;  %v3763_v50 = vrot.slane %v15357_v60, 2  ;;  %v2495_v58 = vsel %vm1475_vm3, %v16589_v24, %v2494_v34  ;;  %v12245_v34 = vld [vmem:[%s15501_s26 + $0x198] sm:$0x3f] }
  0xe2   : > { %v516_v1 = vpop.f32.mrf.mxu1  ;;  %573 = vst.msk [vmem:[#allocation2 + $0x38] sm:$0xff] %vm565_vm4, %v442_v20  ;;  %v437_v10 = vadd.f32 %v16476_v54, %v436_v17 }
  0xe3   : > { %589 = vst.msk [vmem:[#allocation2 + $0xb8] sm:$0xff] %vm565_vm4, %v522_v32  ;;  %v517_v53 = vadd.f32 %v16476_v54, %v516_v1  ;;  %v14108_v43 = vpop.f32.mrf.mxu0  ;;  %14431 = vmatmul.mubr.msk.f32.gmra.mxu0 %vm239_vm1, %v16356_v2  ;;  %v3007_v2 = vsel %vm336_vm0, %v3005_v51, %v3006_v18  ;;  %v3014_v51 = vsel %vm336_vm0, %v3011_v29, %v3013_v42  ;;  %v3351_v29 = vrot.slane %v15362_v9, 7 }
  0xe4   : > { %v14132_v37 = vpop.f32.mrf.mxu1  ;;  %14381 = vmatmul.mubr.msk.f32.gmra.mxu1 %vm239_vm1, %v2480_v56  ;;  %572 = vst.msk [vmem:[#allocation2 + $0x30] sm:$0xff] %vm565_vm4, %v437_v10  ;;  %v452_v22 = vadd.f32 %v14108_v43, %v16476_v54  ;;  %14433 = vmatprep.mubr.msk.f32.mxu0 %vm239_vm1, %v3002_v5  ;;  %v15358_v56 = vld [vmem:[%s15501_s26 + $0x150] sm:$0xff]  ;;  %v12241_v5 = vld [vmem:[%s15501_s26 + $0x178] sm:$0x3f]  ;;  %v15359_v43 = vld [vmem:[%s15501_s26 + $0x160] sm:$0xff] }
  0xe5   : > { %588 = vst.msk [vmem:[#allocation2 + $0xb0] sm:$0xff] %vm565_vm4, %v517_v53  ;;  %v532_v0 = vadd.f32 %v14132_v37, %v16476_v54  ;;  %14383 = vmatprep.mubr.msk.f32.mxu1 %vm239_vm1, %v16560_v57  ;;  %v446_v31 = vpop.f32.mrf.mxu0  ;;  %v3764_v41 = vrot.slane %v15358_v56, 2  ;;  %v3344_v49 = vrot.slane %v15358_v56, 7  ;;  %v3346_v37 = vrot.slane %v15359_v43, 7 }
  0xe6   : > { %v526_v52 = vpop.f32.mrf.mxu1  ;;  %575 = vst.msk [vmem:[#allocation2 + $0x48] sm:$0xff] %vm565_vm4, %v452_v22  ;;  %v447_v25 = vadd.f32 %v16476_v54, %v446_v31  ;;  %v3769_v31 = vrot.slane %v15361_v33, 2  ;;  %v3771_v61 = vrot.slane %v12241_v5, 2  ;;  %v15370_v33 = vld [vmem:[%s15501_s26 + $0x1d0] sm:$0xff] }
  0xe7   : > { %591 = vst.msk [vmem:[#allocation2 + $0xc8] sm:$0xff] %vm565_vm4, %v532_v0  ;;  %v527_v27 = vadd.f32 %v16476_v54, %v526_v52  ;;  %v14111_v23 = vpop.f32.mrf.mxu0  ;;  %14434 = vmatmul.mubr.msk.f32.gmra.mxu0 %vm239_vm1, %v3004_v12  ;;  %v3765_v1 = vsel %vm1475_vm3, %v3763_v50, %v3764_v41  ;;  %v3345_v6 = vsel %vm792_vm2, %v3342_v3, %v3344_v49 }
  0xe8   : > { %v14135_v14 = vpop.f32.mrf.mxu1  ;;  %14384 = vmatmul.mubr.msk.f32.gmra.mxu1 %vm239_vm1, %v2485_v48  ;;  %574 = vst.msk [vmem:[#allocation2 + $0x40] sm:$0xff] %vm565_vm4, %v447_v25  ;;  %v462_v13 = vadd.f32 %v14111_v23, %v16476_v54  ;;  %14436 = vmatprep.mubr.msk.f32.mxu0 %vm239_vm1, %v3007_v2  ;;  %v3767_v36 = vsel %vm1475_vm3, %v3764_v41, %v3766_v11  ;;  %v15360_v48 = vld [vmem:[%s15501_s26 + $0x168] sm:$0xff]  ;;  %v15364_v23 = vld [vmem:[%s15501_s26 + $0x190] sm:$0xff] }
  0xe9   : > { %590 = vst.msk [vmem:[#allocation2 + $0xc0] sm:$0xff] %vm565_vm4, %v527_v27  ;;  %v542_v8 = vadd.f32 %v14135_v14, %v16476_v54  ;;  %14386 = vmatprep.mubr.msk.f32.mxu1 %vm239_vm1, %v16576_v21  ;;  %v456_v44 = vpop.f32.mrf.mxu0  ;;  %v3347_v12 = vrot.slane %v15360_v48, 7  ;;  %v3768_v2 = vrot.slane %v15360_v48, 2  ;;  %v15363_v25 = vld [vmem:[%s15501_s26 + $0x188] sm:$0xff]  ;;  %v3774_v14 = vrot.slane %v15364_v23, 2 }
  0xea   : > { %v536_v7 = vpop.f32.mrf.mxu1  ;;  %577 = vst.msk [vmem:[#allocation2 + $0x58] sm:$0xff] %vm565_vm4, %v462_v13  ;;  %v457_v15 = vadd.f32 %v16476_v54, %v456_v44  ;;  %v3352_v27 = vrot.slane %v15363_v25, 7  ;;  %v3773_v55 = vrot.slane %v15363_v25, 2  ;;  %v3772_v44 = vsel %vm1475_vm3, %v3769_v31, %v3771_v61 }
  0xeb   : > { %593 = vst.msk [vmem:[#allocation2 + $0xd8] sm:$0xff] %vm565_vm4, %v542_v8  ;;  %v537_v30 = vadd.f32 %v16476_v54, %v536_v7  ;;  %v14114_v20 = vpop.f32.mrf.mxu0  ;;  %14437 = vmatmul.mubr.msk.f32.gmra.mxu0 %vm239_vm1, %v3009_v46  ;;  %v3348_v35 = vsel %vm792_vm2, %v3346_v37, %v3347_v12  ;;  %v3770_v13 = vsel %vm1475_vm3, %v3768_v2, %v3769_v31  ;;  %v3354_v8 = vrot.slane %v15364_v23, 7  ;;  %v15368_v37 = vld [vmem:[%s15501_s26 + $0x1c0] sm:$0xff] }
  0xec   : > { %v14138_v32 = vpop.f32.mrf.mxu1  ;;  %14387 = vmatmul.mubr.msk.f32.gmra.mxu1 %vm239_vm1, %v2490_v38  ;;  %576 = vst.msk [vmem:[#allocation2 + $0x50] sm:$0xff] %vm565_vm4, %v457_v15  ;;  %v472_v18 = vadd.f32 %v14114_v20, %v16476_v54  ;;  %14439 = vmatprep.mubr.msk.f32.mxu0 %vm239_vm1, %v3012_v39  ;;  %v3350_v41 = vsel %vm792_vm2, %v3347_v12, %v3349_v47  ;;  %v3776_v7 = vrot.slane %v12245_v34, 2  ;;  %v16677_v39 = vld [vmem:[%s20667_s3 + $0x2c] sm:$0xf]  ;;  %v3361_v48 = vrot.slane %v15368_v37, 7 }
  0xed   : > { %592 = vst.msk [vmem:[#allocation2 + $0xd0] sm:$0xff] %vm565_vm4, %v537_v30  ;;  %v552_v17 = vadd.f32 %v14138_v32, %v16476_v54  ;;  %14389 = vmatprep.mubr.msk.f32.mxu1 %vm239_vm1, %v16616_v28  ;;  %v466_v10 = vpop.f32.mrf.mxu0  ;;  %v3353_v11 = vsel %vm792_vm2, %v3351_v29, %v3352_v27  ;;  %v3775_v15 = vsel %vm1475_vm3, %v3773_v55, %v3774_v14  ;;  %v12249_v30 = vld [vmem:[%s15501_s26 + $0x1b8] sm:$0x3f]  ;;  %v3784_v31 = vrot.slane %v15370_v33, 2 }
  0xee   : > { %v546_v53 = vpop.f32.mrf.mxu1  ;;  %579 = vst.msk [vmem:[#allocation2 + $0x68] sm:$0xff] %vm565_vm4, %v472_v18  ;;  %v467_v22 = vadd.f32 %v16476_v54, %v466_v10  ;;  %v3355_v5 = vsel %vm792_vm2, %v3352_v27, %v3354_v8  ;;  %v3781_v43 = vrot.slane %v12249_v30, 2  ;;  %v3364_v25 = vrot.slane %v15370_v33, 7  ;;  %v15372_v8 = vld [vmem:[%s15501_s26 + $0x1e8] sm:$0xff] }
  0xef   : > { %595 = vst.msk [vmem:[#allocation2 + $0xe8] sm:$0xff] %vm565_vm4, %v552_v17  ;;  %v547_v0 = vadd.f32 %v16476_v54, %v546_v53  ;;  %v14117_v52 = vpop.f32.mrf.mxu0  ;;  %14440 = vmatmul.mubr.msk.f32.gmra.mxu0 %vm239_vm1, %v3014_v51  ;;  %v15367_v17 = vld [vmem:[%s15501_s26 + $0x1b0] sm:$0xff] }
  0xf0   : > { %v14141_v45 = vpop.f32.mrf.mxu1  ;;  %14390 = vmatmul.mubr.msk.f32.gmra.mxu1 %vm239_vm1, %v2495_v58  ;;  %578 = vst.msk [vmem:[#allocation2 + $0x60] sm:$0xff] %vm565_vm4, %v467_v22  ;;  %v482_v38 = vadd.f32 %v14117_v52, %v16476_v54  ;;  %14494 = vmatprep.mubr.msk.f32.mxu0 %vm239_vm1, %v3765_v1  ;;  %v15365_v58 = vld [vmem:[%s15501_s26 + $0x1a0] sm:$0xff]  ;;  %v3779_v1 = vrot.slane %v15367_v17, 2  ;;  %v15369_v22 = vld [vmem:[%s15501_s26 + $0x1c8] sm:$0xff]  ;;  %v12253_v52 = vld [vmem:[%s15501_s26 + $0x1d8] sm:$0x3f] }
  0xf1   : > { %594 = vst.msk [vmem:[#allocation2 + $0xe0] sm:$0xff] %vm565_vm4, %v547_v0  ;;  %v562_v46 = vadd.f32 %v14141_v45, %v16476_v54  ;;  %14444 = vmatprep.mubr.msk.f32.mxu1 %vm239_vm1, %v3343_v63  ;;  %v476_v42 = vpop.f32.mrf.mxu0  ;;  %v3356_v51 = vrot.slane %v15365_v58, 7  ;;  %v15366_v63 = vld [vmem:[%s15501_s26 + $0x1a8] sm:$0xff]  ;;  %v3362_v0 = vrot.slane %v15369_v22, 7  ;;  %v3783_v2 = vrot.slane %v15369_v22, 2 }
  0xf2   : > { %v556_v26 = vpop.f32.mrf.mxu1  ;;  %581 = vst.msk [vmem:[#allocation2 + $0x78] sm:$0xff] %vm565_vm4, %v482_v38  ;;  %v477_v60 = vadd.f32 %v16476_v54, %v476_v42  ;;  %v3357_v18 = vrot.slane %v15366_v63, 7  ;;  %v3782_v55 = vsel %vm1475_vm3, %v3779_v1, %v3781_v43  ;;  %v3786_v23 = vrot.slane %v12253_v52, 2 }
  0xf3   : > { %597 = vst.msk [vmem:[#allocation2 + $0xf8] sm:$0xff] %vm565_vm4, %v562_v46  ;;  %v557_v3 = vadd.f32 %v16476_v54, %v556_v26  ;;  %v14196_v56 = vpop.f32.mrf.mxu0  ;;  %14495 = vmatmul.mubr.msk.f32.vlgmr.msra.gmra.mxu0 %vm239_vm1, %v3767_v36  ;;  %v16672_v54 = vld [vmem:[%s20667_s3 + $0x28] sm:$0xf]  ;;  %v3359_v36 = vrot.slane %v15367_v17, 7  ;;  %v3363_v34 = vsel %vm792_vm2, %v3361_v48, %v3362_v0  ;;  %v3785_v42 = vsel %vm1475_vm3, %v3783_v2, %v3784_v31  ;;  %v12257_v26 = vld [vmem:[%s15501_s26 + $0x1f8] sm:$0x3f] }
  0xf4   : > { %v14146_v50 = vpop.f32.mrf.mxu1  ;;  %14445 = vmatmul.mubr.msk.f32.vlgmr.msra.gmra.mxu1 %vm239_vm1, %v3345_v6  ;;  %580 = vst.msk [vmem:[#allocation2 + $0x70] sm:$0xff] %vm565_vm4, %v477_v60  ;;  %14593 = vmatpush3.msk.msra.mxu0 %vm336_vm0, %v16387_v16  ;;  %v3777_v6 = vsel %vm1475_vm3, %v3774_v14, %v3776_v7  ;;  %v3358_v61 = vsel %vm792_vm2, %v3356_v51, %v3357_v18  ;;  %v3791_v58 = vrot.slane %v12257_v26, 2  ;;  %v15374_v51 = vld [vmem:[%s15501_s26 + $0x200] sm:$0xff] }
  0xf5   : > { %596 = vst.msk [vmem:[#allocation2 + $0xf0] sm:$0xff] %vm565_vm4, %v557_v3  ;;  %v16681_v49 = vadd.f32 %v14196_v56, %v14146_v50  ;;  %14543 = vmatpush3.msk.msra.mxu1 %vm336_vm0, %v16382_v19  ;;  %v1300_v32 = vpop.f32.mrf.mxu0  ;;  %14447 = vmatprep.mubr.msk.f32.mxu1 %vm239_vm1, %v3348_v35  ;;  %v3778_v19 = vrot.slane %v15366_v63, 2  ;;  %v3360_v46 = vsel %vm792_vm2, %v3357_v18, %v3359_v36  ;;  %v15371_v3 = vld [vmem:[%s15501_s26 + $0x1e0] sm:$0xff]  ;;  %v3367_v50 = vrot.slane %v15372_v8, 7 }
  0xf6   : > { %v1008_v20 = vpop.f32.mrf.mxu1  ;;  %14497 = vmatprep.mubr.msk.f32.mxu0 %vm239_vm1, %v3770_v13  ;;  %14642 = vmatprep.subr.msk.mxu1 %vm336_vm0, %v16672_v54  ;;  %v3366_v13 = vrot.slane %v15371_v3, 7  ;;  %v3788_v56 = vrot.slane %v15372_v8, 2  ;;  %v3371_v63 = vrot.slane %v15374_v51, 7 }
  0xf7   : > { %v16695_v16 = vadd.f32 %v1300_v32, %v1008_v20  ;;  %14692 = vmatprep.subr.msk.mxu0 %vm336_vm0, %v16677_v39  ;;  %v14199_v53 = vpop.f32.mrf.mxu0  ;;  %14498 = vmatmul.mubr.msk.f32.gmra.mxu0 %vm239_vm1, %v3772_v44  ;;  %v3780_v9 = vsel %vm1475_vm3, %v3778_v19, %v3779_v1  ;;  %v3787_v20 = vsel %vm1475_vm3, %v3784_v31, %v3786_v23  ;;  %v15375_v19 = vld [vmem:[%s15501_s26 + $0x208] sm:$0xff] }
  0xf8   : > { %v14149_v10 = vpop.f32.mrf.mxu1  ;;  %14448 = vmatmul.mubr.msk.f32.gmra.mxu1 %vm239_vm1, %v3350_v41  ;;  %14500 = vmatprep.mubr.msk.f32.mxu0 %vm239_vm1, %v3775_v15  ;;  %v15373_v41 = vld [vmem:[%s15501_s26 + $0x1f0] sm:$0xff]  ;;  %v3372_v17 = vrot.slane %v15375_v19, 7  ;;  %v3793_v1 = vrot.slane %v15375_v19, 2  ;;  %v3368_v43 = vsel %vm792_vm2, %v3366_v13, %v3367_v50 }
  0xf9   : > { %v16706_v12 = vadd.f32 %v14199_v53, %v14149_v10  ;;  %14450 = vmatprep.mubr.msk.f32.mxu1 %vm239_vm1, %v3353_v11  ;;  %v1310_v47 = vpop.f32.mrf.mxu0  ;;  %v3789_v44 = vrot.slane %v15373_v41, 2  ;;  %v3365_v11 = vsel %vm792_vm2, %v3362_v0, %v3364_v25  ;;  %v3369_v32 = vrot.slane %v15373_v41, 7  ;;  %v12261_v53 = vld [vmem:[%s15501_s26 + $0x218] sm:$0x3f]  ;;  %v15380_v41 = vld [vmem:[%s15501_s26 + $0x240] sm:$0xff] }
  0xfa   : > { %v1018_v45 = vpop.f32.mrf.mxu1  ;;  %v3796_v52 = vrot.slane %v12261_v53, 2 }
  0xfb   : > { %v16715_v29 = vadd.f32 %v1310_v47, %v1018_v45  ;;  %v14202_v38 = vpop.f32.mrf.mxu0  ;;  %14501 = vmatmul.mubr.msk.f32.gmra.mxu0 %vm239_vm1, %v3777_v6  ;;  %v3790_v37 = vsel %vm1475_vm3, %v3788_v56, %v3789_v44  ;;  %v3370_v33 = vsel %vm792_vm2, %v3367_v50, %v3369_v32  ;;  %v3792_v31 = vsel %vm1475_vm3, %v3789_v44, %v3791_v58  ;;  %v15382_v32 = vld [vmem:[%s15501_s26 + $0x250] sm:$0xff] }
  0xfc   : > { %v14152_v27 = vpop.f32.mrf.mxu1  ;;  %14451 = vmatmul.mubr.msk.f32.gmra.mxu1 %vm239_vm1, %v3355_v5  ;;  %14503 = vmatprep.mubr.msk.f32.mxu0 %vm239_vm1, %v3780_v9  ;;  %v15376_v5 = vld [vmem:[%s15501_s26 + $0x210] sm:$0xff]  ;;  %v3373_v47 = vsel %vm792_vm2, %v3371_v63, %v3372_v17  ;;  %v12265_v9 = vld [vmem:[%s15501_s26 + $0x238] sm:$0x3f]  ;;  %v3381_v44 = vrot.slane %v15380_v41, 7  ;;  %v3804_v58 = vrot.slane %v15382_v32, 2 }
  0xfd   : > { %v16721_v14 = vadd.f32 %v14202_v38, %v14152_v27  ;;  %14453 = vmatprep.mubr.msk.f32.mxu1 %vm239_vm1, %v3358_v61  ;;  %v1320_v60 = vpop.f32.mrf.mxu0  ;;  %v3794_v10 = vrot.slane %v15376_v5, 2  ;;  %v3374_v22 = vrot.slane %v15376_v5, 7  ;;  %v15377_v38 = vld [vmem:[%s15501_s26 + $0x220] sm:$0xff]  ;;  %v3801_v56 = vrot.slane %v12265_v9, 2 }
  0xfe   : > { %v1028_v35 = vpop.f32.mrf.mxu1 }
  0xff   : > { %v16731_v7 = vadd.f32 %v1320_v60, %v1028_v35  ;;  %v14205_v30 = vpop.f32.mrf.mxu0  ;;  %14504 = vmatmul.mubr.msk.f32.gmra.mxu0 %vm239_vm1, %v3782_v55  ;;  %v3795_v61 = vsel %vm1475_vm3, %v3793_v1, %v3794_v10  ;;  %v15378_v55 = vld [vmem:[%s15501_s26 + $0x228] sm:$0xff]  ;;  %v3375_v60 = vsel %vm792_vm2, %v3372_v17, %v3374_v22  ;;  %v3797_v8 = vsel %vm1475_vm3, %v3794_v10, %v3796_v52  ;;  %v12269_v1 = vld [vmem:[%s15501_s26 + $0x258] sm:$0x3f]  ;;  %v15383_v52 = vld [vmem:[%s15501_s26 + $0x260] sm:$0xff] }
 0x100   : > { %v14155_v15 = vpop.f32.mrf.mxu1  ;;  %14454 = vmatmul.mubr.msk.f32.gmra.mxu1 %vm239_vm1, %v3360_v46  ;;  %14506 = vmatprep.mubr.msk.f32.mxu0 %vm239_vm1, %v3785_v42  ;;  %v3376_v46 = vrot.slane %v15377_v38, 7  ;;  %v3377_v23 = vrot.slane %v15378_v55, 7  ;;  %v15379_v42 = vld [vmem:[%s15501_s26 + $0x230] sm:$0xff] }
 0x101   : > { %v16738_v18 = vadd.f32 %v14205_v30, %v14155_v15  ;;  %14456 = vmatprep.mubr.msk.f32.mxu1 %vm239_vm1, %v3363_v34  ;;  %v1330_v36 = vpop.f32.mrf.mxu0  ;;  %v3798_v34 = vrot.slane %v15378_v55, 2  ;;  %v3799_v26 = vrot.slane %v15379_v42, 2  ;;  %v3379_v50 = vrot.slane %v15379_v42, 7  ;;  %v15381_v15 = vld [vmem:[%s15501_s26 + $0x248] sm:$0xff] }
 0x102   : > { %v1038_v6 = vpop.f32.mrf.mxu1  ;;  %v3382_v30 = vrot.slane %v15381_v15, 7  ;;  %v3378_v19 = vsel %vm792_vm2, %v3376_v46, %v3377_v23  ;;  %v12273_v46 = vld [vmem:[%s15501_s26 + $0x278] sm:$0x3f] }
 0x103   : > { %v16747_v48 = vadd.f32 %v1330_v36, %v1038_v6  ;;  %v14208_v2 = vpop.f32.mrf.mxu0  ;;  %14507 = vmatmul.mubr.msk.f32.gmra.mxu0 %vm239_vm1, %v3787_v20  ;;  %v3803_v20 = vrot.slane %v15381_v15, 2  ;;  %v3800_v17 = vsel %vm1475_vm3, %v3798_v34, %v3799_v26  ;;  %v3380_v6 = vsel %vm792_vm2, %v3377_v23, %v3379_v50 }
 0x104   : > { %v14158_v0 = vpop.f32.mrf.mxu1  ;;  %14457 = vmatmul.mubr.msk.f32.gmra.mxu1 %vm239_vm1, %v3365_v11  ;;  %14509 = vmatprep.mubr.msk.f32.mxu0 %vm239_vm1, %v3790_v37  ;;  %v3802_v36 = vsel %vm1475_vm3, %v3799_v26, %v3801_v56  ;;  %v3383_v22 = vsel %vm792_vm2, %v3381_v44, %v3382_v30  ;;  %v15386_v44 = vld [vmem:[%s15501_s26 + $0x280] sm:$0xff] }
 0x105   : > { %v16753_v45 = vadd.f32 %v14208_v2, %v14158_v0  ;;  %14459 = vmatprep.mubr.msk.f32.mxu1 %vm239_vm1, %v3368_v43  ;;  %v1340_v27 = vpop.f32.mrf.mxu0  ;;  %v3384_v43 = vrot.slane %v15382_v32, 7  ;;  %v3805_v0 = vsel %vm1475_vm3, %v3803_v20, %v3804_v58  ;;  %v3806_v2 = vrot.slane %v12269_v1, 2  ;;  %v15387_v20 = vld [vmem:[%s15501_s26 + $0x288] sm:$0xff] }
 0x106   : > { %v1048_v25 = vpop.f32.mrf.mxu1  ;;  %v3391_v15 = vrot.slane %v15386_v44, 7  ;;  %v3392_v32 = vrot.slane %v15387_v20, 7 }
 0x107   : > { %v16763_v35 = vadd.f32 %v1340_v27, %v1048_v25  ;;  %v14211_v13 = vpop.f32.mrf.mxu0  ;;  %14510 = vmatmul.mubr.msk.f32.gmra.mxu0 %vm239_vm1, %v3792_v31  ;;  %v15385_v27 = vld [vmem:[%s15501_s26 + $0x270] sm:$0xff] }
 0x108   : > { %v14161_v3 = vpop.f32.mrf.mxu1  ;;  %14460 = vmatmul.mubr.msk.f32.gmra.mxu1 %vm239_vm1, %v3370_v33  ;;  %14512 = vmatprep.mubr.msk.f32.mxu0 %vm239_vm1, %v3795_v61  ;;  %v15384_v61 = vld [vmem:[%s15501_s26 + $0x268] sm:$0xff]  ;;  %v3809_v38 = vrot.slane %v15385_v27, 2  ;;  %v3389_v42 = vrot.slane %v15385_v27, 7 }
 0x109   : > { %v16770_v11 = vadd.f32 %v14211_v13, %v14161_v3  ;;  %14462 = vmatprep.mubr.msk.f32.mxu1 %vm239_vm1, %v3373_v47  ;;  %v1350_v63 = vpop.f32.mrf.mxu0  ;;  %v3386_v47 = vrot.slane %v15383_v52, 7  ;;  %v3387_v9 = vrot.slane %v15384_v61, 7  ;;  %v3808_v25 = vrot.slane %v15384_v61, 2  ;;  %v12281_v52 = vld [vmem:[%s15501_s26 + $0x2b8] sm:$0x3f] }
 0x10a   : > { %v1058_v51 = vpop.f32.mrf.mxu1  ;;  %v3807_v3 = vsel %vm1475_vm3, %v3804_v58, %v3806_v2  ;;  %v3811_v13 = vrot.slane %v12273_v46, 2 }
 0x10b   : > { %v16779_v5 = vadd.f32 %v1350_v63, %v1058_v51  ;;  %v14214_v53 = vpop.f32.mrf.mxu0  ;;  %14513 = vmatmul.mubr.msk.f32.gmra.mxu0 %vm239_vm1, %v3797_v8  ;;  %v3388_v56 = vsel %vm792_vm2, %v3386_v47, %v3387_v9  ;;  %v3810_v41 = vsel %vm1475_vm3, %v3808_v25, %v3809_v38  ;;  %v12277_v51 = vld [vmem:[%s15501_s26 + $0x298] sm:$0x3f]  ;;  %v3390_v58 = vsel %vm792_vm2, %v3387_v9, %v3389_v42  ;;  %v15391_v25 = vld [vmem:[%s15501_s26 + $0x2b0] sm:$0xff] }
 0x10c   : > { %v14164_v10 = vpop.f32.mrf.mxu1  ;;  %14463 = vmatmul.mubr.msk.f32.gmra.mxu1 %vm239_vm1, %v3375_v60  ;;  %14515 = vmatprep.mubr.msk.f32.mxu0 %vm239_vm1, %v3800_v17  ;;  %v3385_v60 = vsel %vm792_vm2, %v3382_v30, %v3384_v43  ;;  %v3812_v1 = vsel %vm1475_vm3, %v3809_v38, %v3811_v13  ;;  %v3399_v27 = vrot.slane %v15391_v25, 7  ;;  %v15392_v13 = vld [vmem:[%s15501_s26 + $0x2c0] sm:$0xff] }
 0x10d   : > { %v16785_v37 = vadd.f32 %v14214_v53, %v14164_v10  ;;  %14465 = vmatprep.mubr.msk.f32.mxu1 %vm239_vm1, %v3378_v19  ;;  %v1360_v31 = vpop.f32.mrf.mxu0  ;;  %v15388_v10 = vld [vmem:[%s15501_s26 + $0x290] sm:$0xff] }
 0x10e   : > { %v1068_v33 = vpop.f32.mrf.mxu1  ;;  %v3394_v53 = vrot.slane %v15388_v10, 7 }
 0x10f   : > { %v16795_v55 = vadd.f32 %v1360_v31, %v1068_v33  ;;  %v14217_v34 = vpop.f32.mrf.mxu0  ;;  %14516 = vmatmul.mubr.msk.f32.gmra.mxu0 %vm239_vm1, %v3802_v36  ;;  %v15390_v33 = vld [vmem:[%s15501_s26 + $0x2a8] sm:$0xff] }
 0x110   : > { %v14167_v23 = vpop.f32.mrf.mxu1  ;;  %14466 = vmatmul.mubr.msk.f32.gmra.mxu1 %vm239_vm1, %v3380_v6  ;;  %14518 = vmatprep.mubr.msk.f32.mxu0 %vm239_vm1, %v3805_v0  ;;  %v3816_v6 = vrot.slane %v12277_v51, 2  ;;  %v15389_v0 = vld [vmem:[%s15501_s26 + $0x2a0] sm:$0xff]  ;;  %v3397_v31 = vrot.slane %v15390_v33, 7  ;;  %v3395_v46 = vsel %vm792_vm2, %v3392_v32, %v3394_v53  ;;  %v15394_v51 = vld [vmem:[%s15501_s26 + $0x2d0] sm:$0xff]  ;;  %v15395_v53 = vld [vmem:[%s15501_s26 + $0x2e8] sm:$0xff] }
 0x111   : > { %v16799_v26 = vadd.f32 %v14217_v34, %v14167_v23  ;;  %14468 = vmatprep.mubr.msk.f32.mxu1 %vm239_vm1, %v3383_v22  ;;  %v1370_v50 = vpop.f32.mrf.mxu0  ;;  %v3393_v22 = vsel %vm792_vm2, %v3391_v15, %v3392_v32  ;;  %v3396_v2 = vrot.slane %v15389_v0, 7  ;;  %v3821_v34 = vrot.slane %v12281_v52, 2 }
 0x112   : > { %v1078_v8 = vpop.f32.mrf.mxu1  ;;  %v3817_v23 = vsel %vm1475_vm3, %v16529_v40, %v3816_v6  ;;  %v3400_v40 = vsel %vm792_vm2, %v3397_v31, %v3399_v27  ;;  %v3828_v6 = vrot.slane %v15395_v53, 2 }
 0x113   : > { %v16810_v63 = vadd.f32 %v1370_v50, %v1078_v8  ;;  %v14220_v30 = vpop.f32.mrf.mxu0  ;;  %14519 = vmatmul.mubr.msk.f32.gmra.mxu0 %vm239_vm1, %v3807_v3  ;;  %v3398_v3 = vsel %vm792_vm2, %v3396_v2, %v3397_v31  ;;  %v3401_v8 = vrot.slane %v15392_v13, 7  ;;  %v15393_v50 = vld [vmem:[%s15501_s26 + $0x2c8] sm:$0xff]  ;;  %v3822_v32 = vsel %vm1475_vm3, %v16545_v62, %v3821_v34  ;;  %v15398_v34 = vld [vmem:[%s15501_s26 + $0x310] sm:$0xff] }
 0x114   : > { %v14170_v19 = vpop.f32.mrf.mxu1  ;;  %14469 = vmatmul.mubr.msk.f32.gmra.mxu1 %vm239_vm1, %v3385_v60  ;;  %14521 = vmatprep.mubr.msk.f32.mxu0 %vm239_vm1, %v3810_v41  ;;  %v12285_v41 = vld [vmem:[%s15501_s26 + $0x2d8] sm:$0x3f] }
 0x115   : > { %v16815_v17 = vadd.f32 %v14220_v30, %v14170_v19  ;;  %14471 = vmatprep.mubr.msk.f32.mxu1 %vm239_vm1, %v3388_v56  ;;  %v1380_v43 = vpop.f32.mrf.mxu0  ;;  %v3402_v56 = vrot.slane %v15393_v50, 7  ;;  %v3404_v19 = vrot.slane %v15394_v51, 7  ;;  %v3826_v30 = vrot.slane %v12285_v41, 2 }
 0x116   : > { %v1088_v36 = vpop.f32.mrf.mxu1 }
 0x117   : > { %v16825_v47 = vadd.f32 %v1380_v43, %v1088_v36  ;;  %v14223_v9 = vpop.f32.mrf.mxu0  ;;  %14522 = vmatmul.mubr.msk.f32.gmra.mxu0 %vm239_vm1, %v3812_v1  ;;  %v3403_v10 = vsel %vm792_vm2, %v3401_v8, %v3402_v56  ;;  %v15396_v36 = vld [vmem:[%s15501_s26 + $0x2f0] sm:$0xff]  ;;  %v3405_v33 = vsel %vm792_vm2, %v3402_v56, %v3404_v19  ;;  %v3827_v31 = vsel %vm1475_vm3, %v16589_v24, %v3826_v30  ;;  %v20823_v8 = vld [vmem:[#allocation11_spill] sm:$0xff]  ;;  %v15399_v56 = vld [vmem:[%s15501_s26 + $0x328] sm:$0xff] }
 0x118   : > { %v14173_v61 = vpop.f32.mrf.mxu1  ;;  %14472 = vmatmul.mubr.msk.f32.gmra.mxu1 %vm239_vm1, %v3390_v58  ;;  %14524 = vmatprep.mubr.msk.f32.mxu0 %vm239_vm1, %v16560_v57  ;;  %v3829_v43 = vrot.slane %v15396_v36, 2  ;;  %v3838_v41 = vrot.slane %v15399_v56, 2  ;;  %v12400_v30 = vld [vmem:[%s15501_s26 + $0x40] sm:$0xff]  ;;  %v20824_v36 = vld [vmem:[#allocation20_spill] sm:$0xff] }
 0x119   : > { %v16830_v38 = vadd.f32 %v14223_v9, %v14173_v61  ;;  %14474 = vmatprep.mubr.msk.f32.mxu1 %vm239_vm1, %v3393_v22  ;;  %v1390_v60 = vpop.f32.mrf.mxu0  ;;  %v12289_v22 = vld [vmem:[%s15501_s26 + $0x2f8] sm:$0x3f] }
 0x11a   : > { %v1098_v42 = vpop.f32.mrf.mxu1  ;;  %v3831_v52 = vrot.slane %v12289_v22, 2  ;;  %v12293_v61 = vld [vmem:[%s15501_s26 + $0x318] sm:$0x3f]  ;;  %v3830_v27 = vsel %vm1475_vm3, %v3828_v6, %v3829_v43 }
 0x11b   : > { %v16842_v44 = vadd.f32 %v1390_v60, %v1098_v42  ;;  %v14226_v15 = vpop.f32.mrf.mxu0  ;;  %14525 = vmatmul.mubr.msk.f32.gmra.mxu0 %vm239_vm1, %v3817_v23  ;;  %v3834_v42 = vrot.slane %v15398_v34, 2  ;;  %v3836_v24 = vrot.slane %v12293_v61, 2 }
 0x11c   : > { %v14176_v57 = vpop.f32.mrf.mxu1  ;;  %14475 = vmatmul.mubr.msk.f32.gmra.mxu1 %vm239_vm1, %v3395_v46  ;;  %14527 = vmatprep.mubr.msk.f32.mxu0 %vm239_vm1, %v16576_v21  ;;  %v15397_v46 = vld [vmem:[%s15501_s26 + $0x308] sm:$0xff]  ;;  %v3832_v50 = vsel %vm1475_vm3, %v3829_v43, %v3831_v52 }
 0x11d   : > { %v16847_v20 = vadd.f32 %v14226_v15, %v14176_v57  ;;  %14477 = vmatprep.mubr.msk.f32.mxu1 %vm239_vm1, %v3398_v3  ;;  %v1400_v1 = vpop.f32.mrf.mxu0  ;;  %v3833_v23 = vrot.slane %v15397_v46, 2  ;;  %v15400_v57 = vld [vmem:[%s15501_s26 + $0x330] sm:$0xff]  ;;  %v3837_v43 = vsel %vm1475_vm3, %v3834_v42, %v3836_v24  ;;  %v20826_v24 = vld [vmem:[#allocation23_spill] sm:$0xff] }
 0x11e   : > { %v1108_v58 = vpop.f32.mrf.mxu1  ;;  %v3839_v15 = vrot.slane %v15400_v57, 2  ;;  %v16929_v57 = vld [vmem:[%s15501_s26 + $0x70] sm:$0xff] }
 0x11f   : > { %v16859_v0 = vadd.f32 %v1400_v1, %v1108_v58  ;;  %v14229_v2 = vpop.f32.mrf.mxu0  ;;  %14528 = vmatmul.mubr.msk.f32.gmra.mxu0 %vm239_vm1, %v3822_v32  ;;  %v3835_v19 = vsel %vm1475_vm3, %v3833_v23, %v3834_v42  ;;  %v16891_v58 = vld [vmem:[%s15501_s26 + $0x48] sm:$0xff]  ;;  %v12404_v42 = vld [vmem:[%s15501_s26 + $0x60] sm:$0xff] }
 0x120   : > { %v14179_v21 = vpop.f32.mrf.mxu1  ;;  %14478 = vmatmul.mubr.msk.f32.gmra.mxu1 %vm239_vm1, %v3400_v40  ;;  %14530 = vmatprep.mubr.msk.f32.mxu0 %vm239_vm1, %v16616_v28  ;;  %v12297_v40 = vld [vmem:[%s15501_s26 + $0x338] sm:$0x3f]  ;;  %v4590_v52 = vrot.slane %v16891_v58, 7 }
 0x121   : > { %v16863_v62 = vadd.f32 %v14229_v2, %v14179_v21  ;;  %14480 = vmatprep.mubr.msk.f32.mxu1 %vm239_vm1, %v3403_v10  ;;  %v1410_v25 = vpop.f32.mrf.mxu0  ;;  %v16896_v10 = vld [vmem:[%s15501_s26 + $0x50] sm:$0xff]  ;;  %v3841_v22 = vrot.slane %v12297_v40, 2  ;;  %v12408_v40 = vld [vmem:[%s15501_s26 + $0x80] sm:$0xff] }
 0x122   : > { %v1118_v9 = vpop.f32.mrf.mxu1  ;;  %v20825_v2 = vld [vmem:[#allocation21_spill] sm:$0xff]  ;;  %v4592_v46 = vrot.slane %v16896_v10, 7  ;;  %v4510_v23 = vrot.slane %v16896_v10, 2 }
 0x123   : > { %v16875_v60 = vadd.f32 %v1410_v25, %v1118_v9  ;;  %v14232_v3 = vpop.f32.mrf.mxu0  ;;  %14531 = vmatmul.mubr.msk.f32.gmra.mxu0 %vm239_vm1, %v3827_v31  ;;  %v4589_v31 = vrot.slane %v12400_v30, 7  ;;  %v4507_v25 = vrot.slane %v12400_v30, 2  ;;  %v3842_v56 = vsel %vm1475_vm3, %v3839_v15, %v3841_v22 }
 0x124   : > { %v14182_v28 = vpop.f32.mrf.mxu1  ;;  %14481 = vmatmul.mubr.msk.f32.gmra.mxu1 %vm239_vm1, %v3405_v33  ;;  %14533 = vmatprep.mubr.msk.f32.mxu0 %vm239_vm1, %v3830_v27  ;;  %v3840_v33 = vsel %vm1475_vm3, %v3838_v41, %v3839_v15  ;;  %v4508_v27 = vrot.slane %v16891_v58, 2  ;;  %v4512_v22 = vrot.slane %v12404_v42, 2 }
 0x125   : > { %v16879_v13 = vadd.f32 %v14232_v3, %v14182_v28  ;;  %14483 = vmatprep.mubr.msk.f32.mxu1 %vm239_vm1, %v20823_v8  ;;  %v1420_v51 = vpop.f32.mrf.mxu0  ;;  %v16919_v8 = vld [vmem:[%s15501_s26 + $0x68] sm:$0xff]  ;;  %v4591_v41 = vsel %vm792_vm2, %v4589_v31, %v4590_v52 }
 0x126   : > { %v1128_v32 = vpop.f32.mrf.mxu1  ;;  %v4509_v30 = vsel %vm1475_vm3, %v4507_v25, %v4508_v27  ;;  %v4595_v15 = vrot.slane %v16919_v8, 7 }
 0x127   : > { %v16893_v1 = vadd.f32 %v1420_v51, %v1128_v32  ;;  %v14235_v6 = vpop.f32.mrf.mxu0  ;;  %14534 = vmatmul.mubr.msk.f32.gmra.mxu0 %vm239_vm1, %v3832_v50  ;;  %v16933_v32 = vld [vmem:[%s15501_s26 + $0x88] sm:$0xff] }
 0x128   : > { %v14185_v53 = vpop.f32.mrf.mxu1  ;;  %14484 = vmatmul.mubr.msk.f32.gmra.mxu1 %vm239_vm1, %v20824_v36  ;;  %14536 = vmatprep.mubr.msk.f32.mxu0 %vm239_vm1, %v3835_v19  ;;  %v16939_v36 = vld [vmem:[%s15501_s26 + $0x90] sm:$0xff]  ;;  %v4600_v25 = vrot.slane %v16933_v32, 7 }
 0x129   : > { %v16902_v21 = vadd.f32 %v14235_v6, %v14185_v53  ;;  %14486 = vmatprep.mubr.msk.f32.mxu1 %vm239_vm1, %v20825_v2  ;;  %v1430_v9 = vpop.f32.mrf.mxu0  ;;  %v4593_v53 = vsel %vm792_vm2, %v4590_v52, %v4592_v46  ;;  %v4511_v6 = vsel %vm1475_vm3, %v4508_v27, %v4510_v23  ;;  %v4513_v2 = vrot.slane %v16919_v8, 2 }
 0x12a   : > { %v1138_v61 = vpop.f32.mrf.mxu1  ;;  %v4597_v52 = vrot.slane %v16929_v57, 7  ;;  %v4517_v46 = vrot.slane %v12408_v40, 2  ;;  %v4602_v23 = vrot.slane %v16939_v36, 7 }
 0x12b   : > { %v16912_v34 = vadd.f32 %v1430_v9, %v1138_v61  ;;  %v14238_v3 = vpop.f32.mrf.mxu0  ;;  %14537 = vmatmul.mubr.msk.f32.gmra.mxu0 %vm239_vm1, %v3837_v43  ;;  %v4515_v61 = vrot.slane %v16929_v57, 2  ;;  %v4599_v9 = vrot.slane %v12408_v40, 7 }
 0x12c   : > { %v14188_v28 = vpop.f32.mrf.mxu1  ;;  %14487 = vmatmul.mubr.msk.f32.gmra.mxu1 %vm239_vm1, %v20826_v24  ;;  %14539 = vmatprep.mubr.msk.f32.mxu0 %vm239_vm1, %v3840_v33 }
 0x12d   : > { %v16921_v50 = vadd.f32 %v14238_v3, %v14188_v28  ;;  %14489 = vmatprep.mubr.msk.f32.mxu1 %vm239_vm1, %v16361_v4  ;;  %v1440_v19 = vpop.f32.mrf.mxu0  ;;  %v4594_v4 = vrot.slane %v12404_v42, 7 }
 0x12e   : > { %v1148_v51 = vpop.f32.mrf.mxu1 }
 0x12f   : > { %v16941_v43 = vadd.f32 %v1440_v19, %v1148_v51  ;;  %v14241_v31 = vpop.f32.mrf.mxu0  ;;  %14540 = vmatmul.mubr.msk.f32.gmra.mxu0 %vm239_vm1, %v3842_v56  ;;  %v4596_v24 = vsel %vm792_vm2, %v4594_v4, %v4595_v15  ;;  %v4514_v56 = vsel %vm1475_vm3, %v4512_v22, %v4513_v2  ;;  %v4520_v51 = vrot.slane %v16939_v36, 2  ;;  %v12412_v19 = vld [vmem:[%s15501_s26 + $0xa0] sm:$0xff] }
 0x130   : > { %v14191_v33 = vpop.f32.mrf.mxu1  ;;  %14490 = vmatmul.mubr.msk.f32.gmra.mxu1 %vm239_vm1, %v16364_v59  ;;  %14594 = vmatprep.mubr.msk.f32.mxu0 %vm239_vm1, %v4509_v30  ;;  %v4518_v59 = vrot.slane %v16933_v32, 2  ;;  %v4516_v4 = vsel %vm1475_vm3, %v4513_v2, %v4515_v61  ;;  %v4601_v22 = vsel %vm792_vm2, %v4599_v9, %v4600_v25  ;;  %v16989_v2 = vld [vmem:[%s15501_s26 + $0xb0] sm:$0xff]  ;;  %v16993_v61 = vld [vmem:[%s15501_s26 + $0xc8] sm:$0xff] }
 0x131   : > { %v16951_v27 = vadd.f32 %v14241_v31, %v14191_v33  ;;  %14544 = vmatprep.mubr.msk.f32.mxu1 %vm239_vm1, %v4591_v41  ;;  %v1450_v28 = vpop.f32.mrf.mxu0  ;;  %v16964_v41 = vld [vmem:[%s15501_s26 + $0xa8] sm:$0xff]  ;;  %v4598_v33 = vsel %vm792_vm2, %v4595_v15, %v4597_v52  ;;  %v16974_v31 = vld [vmem:[%s20667_s3 + $0x30] sm:$0xf]  ;;  %v4603_v15 = vsel %vm792_vm2, %v4600_v25, %v4602_v23  ;;  %20830 = vst [vmem:[#allocation14_spill] sm:$0xff] %v16989_v2  ;;  %v12416_v52 = vld [vmem:[%s15501_s26 + $0xc0] sm:$0xff] }
 0x132   : > { %v1158_v42 = vpop.f32.mrf.mxu1  ;;  %20827 = vst [vmem:[#allocation5_spill] sm:$0xff] %v16964_v41  ;;  %20828 = vst [vmem:[#allocation13_spill] sm:$0xff] %v16974_v31  ;;  %v4521_v23 = vsel %vm1475_vm3, %v4518_v59, %v4520_v51 }
 0x133   : > { %v16957_v3 = vadd.f32 %v1450_v28, %v1158_v42  ;;  %v14296_v30 = vpop.f32.mrf.mxu0  ;;  %14595 = vmatmul.mubr.msk.f32.vlgmr.msra.gmra.mxu0 %vm239_vm1, %v4511_v6  ;;  %v16979_v42 = vld [vmem:[%s20667_s3 + $0x34] sm:$0xf]  ;;  %v4519_v6 = vsel %vm1475_vm3, %v4517_v46, %v4518_v59  ;;  %v4523_v46 = vrot.slane %v16964_v41, 2 }
 0x134   : > { %v14246_v40 = vpop.f32.mrf.mxu1  ;;  %14545 = vmatmul.mubr.msk.f32.vlgmr.msra.gmra.mxu1 %vm239_vm1, %v4593_v53  ;;  %20829 = vst [vmem:[#allocation3_spill] sm:$0xff] %v16979_v42  ;;  %14693 = vmatpush3.msk.msra.mxu0 %vm336_vm0, %v16677_v39  ;;  %v4522_v39 = vrot.slane %v12412_v19, 2  ;;  %v17013_v59 = vld [vmem:[%s15501_s26 + $0xd0] sm:$0xff] }
 0x135   : > { %v1851_v53 = vadd.f32 %v14246_v40, %v16681_v49  ;;  %14643 = vmatpush3.msk.msra.mxu1 %vm336_vm0, %v16672_v54  ;;  %v2209_v28 = vpop.f32.mrf.mxu0  ;;  %14547 = vmatprep.mubr.msk.f32.mxu1 %vm239_vm1, %v4596_v24  ;;  %v4604_v49 = vrot.slane %v12412_v19, 7  ;;  %v4605_v54 = vrot.slane %v16964_v41, 7  ;;  %v4607_v19 = vrot.slane %v16989_v2, 7 }
 0x136   : > { %v1691_v9 = vpop.f32.mrf.mxu1  ;;  %14597 = vmatprep.mubr.msk.f32.mxu0 %vm239_vm1, %v4514_v56  ;;  %14742 = vmatprep.subr.msk.mxu1 %vm336_vm0, %v16974_v31 }
 0x137   : > { %v16999_v40 = vadd.f32 %v14296_v30, %v1851_v53  ;;  %v1850_v25 = vadd.f32 %v1691_v9, %v16695_v16  ;;  %14792 = vmatprep.subr.msk.mxu0 %vm336_vm0, %v16979_v42  ;;  %v14299_v56 = vpop.f32.mrf.mxu0  ;;  %14598 = vmatmul.mubr.msk.f32.gmra.mxu0 %vm239_vm1, %v4516_v4  ;;  %v4525_v30 = vrot.slane %v16989_v2, 2  ;;  %v4609_v53 = vrot.slane %v12416_v52, 7 }
 0x138   : > { %v14249_v24 = vpop.f32.mrf.mxu1  ;;  %14548 = vmatmul.mubr.msk.f32.gmra.mxu1 %vm239_vm1, %v4598_v33  ;;  %v4610_v16 = vrot.slane %v16993_v61, 7  ;;  %14600 = vmatprep.mubr.msk.f32.mxu0 %vm239_vm1, %v4519_v6  ;;  %v4527_v33 = vrot.slane %v12416_v52, 2  ;;  %v4528_v4 = vrot.slane %v16993_v61, 2  ;;  %v4606_v41 = vsel %vm792_vm2, %v4604_v49, %v4605_v54  ;;  %v17030_v6 = vld [vmem:[%s15501_s26 + $0xe8] sm:$0xff] }
 0x139   : > { %20831 = vst [vmem:[#allocation7_spill] sm:$0xff] %v16999_v40  ;;  %v17015_v51 = vadd.f32 %v2209_v28, %v1850_v25  ;;  %v1853_v9 = vadd.f32 %v14249_v24, %v16706_v12  ;;  %14550 = vmatprep.mubr.msk.f32.mxu1 %vm239_vm1, %v4601_v22  ;;  %v2219_v2 = vpop.f32.mrf.mxu0  ;;  %v4524_v42 = vsel %vm1475_vm3, %v4522_v39, %v4523_v46  ;;  %v4612_v25 = vrot.slane %v17013_v59, 7  ;;  %v12420_v22 = vld [vmem:[%s15501_s26 + $0xe0] sm:$0xff] }
 0x13a   : > { %v1701_v40 = vpop.f32.mrf.mxu1  ;;  %v4530_v12 = vrot.slane %v17013_v59, 2  ;;  %v4608_v49 = vsel %vm792_vm2, %v4605_v54, %v4607_v19  ;;  %v4611_v39 = vsel %vm792_vm2, %v4609_v53, %v4610_v16 }
 0x13b   : > { %20832 = vst [vmem:[#allocation8_spill] sm:$0xff] %v17015_v51  ;;  %v17023_v31 = vadd.f32 %v14299_v56, %v1853_v9  ;;  %v1852_v28 = vadd.f32 %v1701_v40, %v16715_v29  ;;  %v14302_v24 = vpop.f32.mrf.mxu0  ;;  %14601 = vmatmul.mubr.msk.f32.gmra.mxu0 %vm239_vm1, %v4521_v23  ;;  %v4526_v29 = vsel %vm1475_vm3, %v4523_v46, %v4525_v30  ;;  %v17048_v23 = vld [vmem:[%s15501_s26 + $0x108] sm:$0xff]  ;;  %v4614_v46 = vrot.slane %v12420_v22, 7 }
 0x13c   : > { %v14252_v52 = vpop.f32.mrf.mxu1  ;;  %14551 = vmatmul.mubr.msk.f32.gmra.mxu1 %vm239_vm1, %v4603_v15  ;;  %14603 = vmatprep.mubr.msk.f32.mxu0 %vm239_vm1, %v4524_v42  ;;  %v4529_v9 = vsel %vm1475_vm3, %v4527_v33, %v4528_v4  ;;  %v12424_v15 = vld [vmem:[%s15501_s26 + $0x100] sm:$0xff]  ;;  %v4532_v30 = vrot.slane %v12420_v22, 2  ;;  %v4613_v42 = vsel %vm792_vm2, %v4610_v16, %v4612_v25  ;;  %v4531_v33 = vsel %vm1475_vm3, %v4528_v4, %v4530_v12 }
 0x13d   : > { %20833 = vst [vmem:[#allocation12_spill] sm:$0xff] %v17023_v31  ;;  %v17037_v40 = vadd.f32 %v2219_v2, %v1852_v28  ;;  %v1855_v56 = vadd.f32 %v14252_v52, %v16721_v14  ;;  %14553 = vmatprep.mubr.msk.f32.mxu1 %vm239_vm1, %v4606_v41  ;;  %v17044_v31 = vld [vmem:[%s15501_s26 + $0xf0] sm:$0xff]  ;;  %v2229_v19 = vpop.f32.mrf.mxu0  ;;  %v4615_v2 = vrot.slane %v17030_v6, 7  ;;  %v4533_v14 = vrot.slane %v17030_v6, 2 }
 0x13e   : > { %20835 = vst [vmem:[#allocation4_spill] sm:$0xff] %v17044_v31  ;;  %v1711_v54 = vpop.f32.mrf.mxu1  ;;  %v4535_v22 = vrot.slane %v17044_v31, 2  ;;  %v4619_v51 = vrot.slane %v12424_v15, 7  ;;  %v4537_v4 = vrot.slane %v12424_v15, 2  ;;  %v4538_v25 = vrot.slane %v17048_v23, 2  ;;  %v17082_v15 = vld [vmem:[%s15501_s26 + $0x128] sm:$0xff] }
 0x13f   : > { %20834 = vst [vmem:[#allocation9_spill] sm:$0xff] %v17037_v40  ;;  %v17052_v53 = vadd.f32 %v14302_v24, %v1855_v56  ;;  %v1854_v41 = vadd.f32 %v1711_v54, %v16731_v7  ;;  %v14305_v52 = vpop.f32.mrf.mxu0  ;;  %14604 = vmatmul.mubr.msk.f32.gmra.mxu0 %vm239_vm1, %v4526_v29  ;;  %v4617_v40 = vrot.slane %v17044_v31, 7  ;;  %v4620_v24 = vrot.slane %v17048_v23, 7  ;;  %v17063_v56 = vld [vmem:[%s15501_s26 + $0x110] sm:$0xff]  ;;  %20838 = vst [vmem:[#allocation6_spill] sm:$0xff] %v17082_v15 }
 0x140   : > { %v14255_v28 = vpop.f32.mrf.mxu1  ;;  %14554 = vmatmul.mubr.msk.f32.gmra.mxu1 %vm239_vm1, %v4608_v49  ;;  %20836 = vst [vmem:[#allocation16_spill] sm:$0xff] %v17063_v56  ;;  %14606 = vmatprep.mubr.msk.f32.mxu0 %vm239_vm1, %v4529_v9  ;;  %v4616_v29 = vsel %vm792_vm2, %v4614_v46, %v4615_v2  ;;  %v17073_v54 = vsel %vm1475_vm3, %v4532_v30, %v4533_v14  ;;  %v12428_v9 = vld [vmem:[%s15501_s26 + $0x120] sm:$0xff] }
 0x141   : > { %v17065_v7 = vadd.f32 %v2229_v19, %v1854_v41  ;;  %v1857_v16 = vadd.f32 %v14255_v28, %v16738_v18  ;;  %14556 = vmatprep.mubr.msk.f32.mxu1 %vm239_vm1, %v4611_v39  ;;  %v2239_v49 = vpop.f32.mrf.mxu0  ;;  %v4622_v18 = vrot.slane %v17063_v56, 7  ;;  %v4540_v39 = vrot.slane %v17063_v56, 2 }
 0x142   : > { %v1721_v12 = vpop.f32.mrf.mxu1  ;;  %v4618_v46 = vsel %vm792_vm2, %v4615_v2, %v4617_v40  ;;  %v4621_v30 = vsel %vm792_vm2, %v4619_v51, %v4620_v24  ;;  %v12432_v40 = vld [vmem:[%s15501_s26 + $0x140] sm:$0xff]  ;;  %v17105_v2 = vld [vmem:[%s15501_s26 + $0x148] sm:$0xff]  ;;  %v4624_v51 = vrot.slane %v12428_v9, 7 }
 0x143   : > { %20837 = vst [vmem:[#allocation17_spill] sm:$0xff] %v17065_v7  ;;  %v17075_v31 = vadd.f32 %v14305_v52, %v1857_v16  ;;  %v1856_v19 = vadd.f32 %v1721_v12, %v16747_v48  ;;  %v14308_v28 = vpop.f32.mrf.mxu0  ;;  %14607 = vmatmul.mubr.msk.f32.gmra.mxu0 %vm239_vm1, %v4531_v33  ;;  %v17088_v48 = vsel %vm1475_vm3, %v4533_v14, %v4535_v22  ;;  %v17101_v33 = vld [vmem:[%s15501_s26 + $0x130] sm:$0xff]  ;;  %20841 = vst [vmem:[#allocation19_spill] sm:$0xff] %v17105_v2 }
 0x144   : > { %v14258_v41 = vpop.f32.mrf.mxu1  ;;  %14557 = vmatmul.mubr.msk.f32.gmra.mxu1 %vm239_vm1, %v4613_v42  ;;  %14609 = vmatprep.mubr.msk.f32.mxu0 %vm239_vm1, %v17073_v54  ;;  %v17098_v42 = vsel %vm1475_vm3, %v4537_v4, %v4538_v25  ;;  %20840 = vst [vmem:[#allocation18_spill] sm:$0xff] %v17101_v33  ;;  %v4625_v12 = vrot.slane %v17082_v15, 7  ;;  %v4623_v4 = vsel %vm792_vm2, %v4620_v24, %v4622_v18  ;;  %v4547_v18 = vrot.slane %v12432_v40, 2 }
 0x145   : > { %v17091_v52 = vadd.f32 %v2239_v49, %v1856_v19  ;;  %v1859_v16 = vadd.f32 %v14258_v41, %v16753_v45  ;;  %14559 = vmatprep.mubr.msk.f32.mxu1 %vm239_vm1, %v4616_v29  ;;  %v2249_v22 = vpop.f32.mrf.mxu0  ;;  %v4542_v45 = vrot.slane %v12428_v9, 2  ;;  %v4543_v49 = vrot.slane %v17082_v15, 2 }
 0x146   : > { %v1731_v14 = vpop.f32.mrf.mxu1  ;;  %v17114_v41 = vsel %vm1475_vm3, %v4538_v25, %v4540_v39  ;;  %v4627_v9 = vrot.slane %v17101_v33, 7  ;;  %v4545_v15 = vrot.slane %v17101_v33, 2  ;;  %v4548_v39 = vrot.slane %v17105_v2, 2 }
 0x147   : > { %20839 = vst [vmem:[#allocation10_spill] sm:$0xff] %v17091_v52  ;;  %v17109_v29 = vadd.f32 %v14308_v28, %v1859_v16  ;;  %v1858_v19 = vadd.f32 %v1731_v14, %v16763_v35  ;;  %v14311_v7 = vpop.f32.mrf.mxu0  ;;  %14610 = vmatmul.mubr.msk.f32.gmra.mxu0 %vm239_vm1, %v17088_v48  ;;  %v4629_v28 = vrot.slane %v12432_v40, 7  ;;  %v4630_v16 = vrot.slane %v17105_v2, 7  ;;  %v17123_v35 = vld [vmem:[%s15501_s26 + $0x150] sm:$0xff]  ;;  %v17143_v40 = vld [vmem:[%s15501_s26 + $0x168] sm:$0xff] }
 0x148   : > { %v14261_v52 = vpop.f32.mrf.mxu1  ;;  %14560 = vmatmul.mubr.msk.f32.gmra.mxu1 %vm239_vm1, %v4618_v46  ;;  %20843 = vst [vmem:[#allocation22_spill] sm:$0xff] %v17123_v35  ;;  %14612 = vmatprep.mubr.msk.f32.mxu0 %vm239_vm1, %v17098_v42  ;;  %v4626_v33 = vsel %vm792_vm2, %v4624_v51, %v4625_v12  ;;  %20846 = vst [vmem:[#allocation21_spill] sm:$0xff] %v17143_v40 }
 0x149   : > { %20842 = vst [vmem:[#allocation15_spill] sm:$0xff] %v17109_v29  ;;  %v17125_v24 = vadd.f32 %v2249_v22, %v1858_v19  ;;  %v1861_v25 = vadd.f32 %v14261_v52, %v16770_v11  ;;  %14562 = vmatprep.mubr.msk.f32.mxu1 %vm239_vm1, %v4621_v30  ;;  %v2259_v14 = vpop.f32.mrf.mxu0  ;;  %v17134_v29 = vsel %vm1475_vm3, %v4542_v45, %v4543_v49  ;;  %v4632_v11 = vrot.slane %v17123_v35, 7  ;;  %v12436_v52 = vld [vmem:[%s15501_s26 + $0x160] sm:$0xff] }
 0x14a   : > { %v1741_v46 = vpop.f32.mrf.mxu1  ;;  %v4550_v30 = vrot.slane %v17123_v35, 2  ;;  %v4631_v51 = vsel %vm792_vm2, %v4629_v28, %v4630_v16  ;;  %v4634_v28 = vrot.slane %v12436_v52, 7 }
 0x14b   : > { %20844 = vst [vmem:[#allocation11_spill] sm:$0xff] %v17125_v24  ;;  %v17136_v56 = vadd.f32 %v14311_v7, %v1861_v25  ;;  %v1860_v22 = vadd.f32 %v1741_v46, %v16779_v5  ;;  %v14314_v24 = vpop.f32.mrf.mxu0  ;;  %14613 = vmatmul.mubr.msk.f32.gmra.mxu0 %vm239_vm1, %v17114_v41  ;;  %v4628_v7 = vsel %vm792_vm2, %v4625_v12, %v4627_v9  ;;  %v17163_v46 = vld [vmem:[%s15501_s26 + $0x170] sm:$0xff]  ;;  %v12440_v12 = vld [vmem:[%s15501_s26 + $0x180] sm:$0xff]  ;;  %v17167_v9 = vld [vmem:[%s15501_s26 + $0x188] sm:$0xff] }
 0x14c   : > { %v14264_v19 = vpop.f32.mrf.mxu1  ;;  %14563 = vmatmul.mubr.msk.f32.gmra.mxu1 %vm239_vm1, %v4623_v4  ;;  %v17150_v5 = vsel %vm1475_vm3, %v4543_v49, %v4545_v15  ;;  %14615 = vmatprep.mubr.msk.f32.mxu0 %vm239_vm1, %v17134_v29  ;;  %v17160_v4 = vsel %vm1475_vm3, %v4547_v18, %v4548_v39  ;;  %20848 = vst [vmem:[#allocation24_spill] sm:$0xff] %v17163_v46  ;;  %20849 = vst [vmem:[#allocation25_spill] sm:$0xff] %v17167_v9 }
 0x14d   : > { %20845 = vst [vmem:[#allocation20_spill] sm:$0xff] %v17136_v56  ;;  %v17153_v45 = vadd.f32 %v2259_v14, %v1860_v22  ;;  %v1863_v25 = vadd.f32 %v14264_v19, %v16785_v37  ;;  %14565 = vmatprep.mubr.msk.f32.mxu1 %vm239_vm1, %v4626_v33  ;;  %v2269_v49 = vpop.f32.mrf.mxu0  ;;  %v4635_v14 = vrot.slane %v17143_v40, 7  ;;  %v4552_v37 = vrot.slane %v12436_v52, 2 }
 0x14e   : > { %v1751_v15 = vpop.f32.mrf.mxu1  ;;  %v4553_v33 = vrot.slane %v17143_v40, 2  ;;  %v4633_v18 = vsel %vm792_vm2, %v4630_v16, %v4632_v11  ;;  %v4637_v52 = vrot.slane %v17163_v46, 7  ;;  %v4555_v40 = vrot.slane %v17163_v46, 2 }
 0x14f   : > { %20847 = vst [vmem:[#allocation23_spill] sm:$0xff] %v17153_v45  ;;  %v17171_v22 = vadd.f32 %v14314_v24, %v1863_v25  ;;  %v1862_v19 = vadd.f32 %v1751_v15, %v16795_v55  ;;  %v17176_v45 = vsel %vm1475_vm3, %v4548_v39, %v4550_v30  ;;  %v14317_v2 = vpop.f32.mrf.mxu0  ;;  %14616 = vmatmul.mubr.msk.f32.gmra.mxu0 %vm239_vm1, %v17150_v5  ;;  %v4639_v24 = vrot.slane %v12440_v12, 7  ;;  %v17185_v55 = vld [vmem:[%s15501_s26 + $0x190] sm:$0xff] }
 0x150   : > { %v14267_v35 = vpop.f32.mrf.mxu1  ;;  %14566 = vmatmul.mubr.msk.f32.gmra.mxu1 %vm239_vm1, %v4628_v7  ;;  %v4640_v25 = vrot.slane %v17167_v9, 7  ;;  %20851 = vst [vmem:[#allocation27_spill] sm:$0xff] %v17185_v55  ;;  %14618 = vmatprep.mubr.msk.f32.mxu0 %vm239_vm1, %v17160_v4  ;;  %v4557_v11 = vrot.slane %v12440_v12, 2  ;;  %v4558_v30 = vrot.slane %v17167_v9, 2  ;;  %v4636_v46 = vsel %vm792_vm2, %v4634_v28, %v4635_v14  ;;  %v17205_v12 = vld [vmem:[%s15501_s26 + $0x1a8] sm:$0xff] }
 0x151   : > { %20850 = vst [vmem:[#allocation26_spill] sm:$0xff] %v17171_v22  ;;  %v17187_v16 = vadd.f32 %v2269_v49, %v1862_v19  ;;  %v1865_v39 = vadd.f32 %v14267_v35, %v16799_v26  ;;  %14568 = vmatprep.mubr.msk.f32.mxu1 %vm239_vm1, %v4631_v51  ;;  %v2279_v15 = vpop.f32.mrf.mxu0  ;;  %v17196_v22 = vsel %vm1475_vm3, %v4552_v37, %v4553_v33  ;;  %v4642_v26 = vrot.slane %v17185_v55, 7  ;;  %v12444_v51 = vld [vmem:[%s15501_s26 + $0x1a0] sm:$0xff] }
 0x152   : > { %v1761_v7 = vpop.f32.mrf.mxu1  ;;  %v4560_v35 = vrot.slane %v17185_v55, 2  ;;  %20854 = vst [vmem:[#allocation30_spill] sm:$0xff] %v17205_v12  ;;  %v4641_v28 = vsel %vm792_vm2, %v4639_v24, %v4640_v25  ;;  %v4644_v24 = vrot.slane %v12444_v51, 7 }
 0x153   : > { %20852 = vst [vmem:[#allocation28_spill] sm:$0xff] %v17187_v16  ;;  %v17198_v56 = vadd.f32 %v14317_v2, %v1865_v39  ;;  %v1864_v49 = vadd.f32 %v1761_v7, %v16810_v63  ;;  %v14320_v16 = vpop.f32.mrf.mxu0  ;;  %14619 = vmatmul.mubr.msk.f32.gmra.mxu0 %vm239_vm1, %v17176_v45  ;;  %v4638_v2 = vsel %vm792_vm2, %v4635_v14, %v4637_v52  ;;  %v17225_v7 = vld [vmem:[%s15501_s26 + $0x1b0] sm:$0xff]  ;;  %v12448_v14 = vld [vmem:[%s15501_s26 + $0x1c0] sm:$0xff]  ;;  %v17229_v52 = vld [vmem:[%s15501_s26 + $0x1c8] sm:$0xff] }
 0x154   : > { %v14270_v19 = vpop.f32.mrf.mxu1  ;;  %14569 = vmatmul.mubr.msk.f32.gmra.mxu1 %vm239_vm1, %v4633_v18  ;;  %v17212_v63 = vsel %vm1475_vm3, %v4553_v33, %v4555_v40  ;;  %14621 = vmatprep.mubr.msk.f32.mxu0 %vm239_vm1, %v17196_v22  ;;  %v17222_v18 = vsel %vm1475_vm3, %v4557_v11, %v4558_v30  ;;  %20856 = vst [vmem:[#allocation32_spill] sm:$0xff] %v17225_v7 }
 0x155   : > { %20853 = vst [vmem:[#allocation29_spill] sm:$0xff] %v17198_v56  ;;  %v17215_v37 = vadd.f32 %v2279_v15, %v1864_v49  ;;  %v1867_v39 = vadd.f32 %v14270_v19, %v16815_v17  ;;  %14571 = vmatprep.mubr.msk.f32.mxu1 %vm239_vm1, %v4636_v46  ;;  %v2289_v33 = vpop.f32.mrf.mxu0  ;;  %v4645_v15 = vrot.slane %v17205_v12, 7  ;;  %v4562_v17 = vrot.slane %v12444_v51, 2 }
 0x156   : > { %v1771_v40 = vpop.f32.mrf.mxu1  ;;  %v4563_v46 = vrot.slane %v17205_v12, 2  ;;  %v4643_v11 = vsel %vm792_vm2, %v4640_v25, %v4642_v26  ;;  %v4647_v51 = vrot.slane %v17225_v7, 7  ;;  %v4565_v12 = vrot.slane %v17225_v7, 2 }
 0x157   : > { %20855 = vst [vmem:[#allocation31_spill] sm:$0xff] %v17215_v37  ;;  %v17233_v49 = vadd.f32 %v14320_v16, %v1867_v39  ;;  %v1866_v19 = vadd.f32 %v1771_v40, %v16825_v47  ;;  %v17238_v37 = vsel %vm1475_vm3, %v4558_v30, %v4560_v35  ;;  %v14323_v9 = vpop.f32.mrf.mxu0  ;;  %14622 = vmatmul.mubr.msk.f32.gmra.mxu0 %vm239_vm1, %v17212_v63  ;;  %v4649_v16 = vrot.slane %v12448_v14, 7  ;;  %v17247_v47 = vld [vmem:[%s15501_s26 + $0x1d0] sm:$0xff] }
 0x158   : > { %v14273_v55 = vpop.f32.mrf.mxu1  ;;  %14572 = vmatmul.mubr.msk.f32.gmra.mxu1 %vm239_vm1, %v4638_v2  ;;  %v4650_v39 = vrot.slane %v17229_v52, 7  ;;  %20858 = vst [vmem:[#allocation34_spill] sm:$0xff] %v17247_v47  ;;  %14624 = vmatprep.mubr.msk.f32.mxu0 %vm239_vm1, %v17222_v18  ;;  %v4567_v26 = vrot.slane %v12448_v14, 2  ;;  %v4568_v35 = vrot.slane %v17229_v52, 2  ;;  %v4646_v7 = vsel %vm792_vm2, %v4644_v24, %v4645_v15  ;;  %v17267_v14 = vld [vmem:[%s15501_s26 + $0x1e8] sm:$0xff] }
 0x159   : > { %20857 = vst [vmem:[#allocation33_spill] sm:$0xff] %v17233_v49  ;;  %v17249_v25 = vadd.f32 %v2289_v33, %v1866_v19  ;;  %v1869_v30 = vadd.f32 %v14273_v55, %v16830_v38  ;;  %14574 = vmatprep.mubr.msk.f32.mxu1 %vm239_vm1, %v4641_v28  ;;  %v2299_v40 = vpop.f32.mrf.mxu0  ;;  %v17258_v49 = vsel %vm1475_vm3, %v4562_v17, %v4563_v46  ;;  %v4652_v38 = vrot.slane %v17247_v47, 7  ;;  %v12452_v28 = vld [vmem:[%s15501_s26 + $0x1e0] sm:$0xff] }
 0x15a   : > { %v1781_v2 = vpop.f32.mrf.mxu1  ;;  %v4570_v55 = vrot.slane %v17247_v47, 2  ;;  %20861 = vst [vmem:[#allocation37_spill] sm:$0xff] %v17267_v14  ;;  %v4651_v24 = vsel %vm792_vm2, %v4649_v16, %v4650_v39  ;;  %v4654_v16 = vrot.slane %v12452_v28, 7 }
 0x15b   : > { %20859 = vst [vmem:[#allocation35_spill] sm:$0xff] %v17249_v25  ;;  %v17260_v56 = vadd.f32 %v14323_v9, %v1869_v30  ;;  %v1868_v33 = vadd.f32 %v1781_v2, %v16842_v44  ;;  %v14326_v25 = vpop.f32.mrf.mxu0  ;;  %14625 = vmatmul.mubr.msk.f32.gmra.mxu0 %vm239_vm1, %v17238_v37  ;;  %v4648_v9 = vsel %vm792_vm2, %v4645_v15, %v4647_v51  ;;  %v17287_v2 = vld [vmem:[%s15501_s26 + $0x1f0] sm:$0xff]  ;;  %v12456_v15 = vld [vmem:[%s15501_s26 + $0x200] sm:$0xff]  ;;  %v17291_v51 = vld [vmem:[%s15501_s26 + $0x208] sm:$0xff] }
 0x15c   : > { %v14276_v19 = vpop.f32.mrf.mxu1  ;;  %14575 = vmatmul.mubr.msk.f32.gmra.mxu1 %vm239_vm1, %v4643_v11  ;;  %v17274_v44 = vsel %vm1475_vm3, %v4563_v46, %v4565_v12  ;;  %14627 = vmatprep.mubr.msk.f32.mxu0 %vm239_vm1, %v17258_v49  ;;  %v17284_v11 = vsel %vm1475_vm3, %v4567_v26, %v4568_v35  ;;  %20863 = vst [vmem:[#allocation39_spill] sm:$0xff] %v17287_v2  ;;  %20864 = vst [vmem:[#allocation40_spill] sm:$0xff] %v17291_v51 }
 0x15d   : > { %20860 = vst [vmem:[#allocation36_spill] sm:$0xff] %v17260_v56  ;;  %v17277_v17 = vadd.f32 %v2299_v40, %v1868_v33  ;;  %v1871_v30 = vadd.f32 %v14276_v19, %v16847_v20  ;;  %14577 = vmatprep.mubr.msk.f32.mxu1 %vm239_vm1, %v4646_v7  ;;  %v2309_v46 = vpop.f32.mrf.mxu0  ;;  %v4655_v40 = vrot.slane %v17267_v14, 7  ;;  %v4572_v33 = vrot.slane %v12452_v28, 2 }
 0x15e   : > { %v1791_v12 = vpop.f32.mrf.mxu1  ;;  %v4573_v20 = vrot.slane %v17267_v14, 2  ;;  %v4653_v26 = vsel %vm792_vm2, %v4650_v39, %v4652_v38  ;;  %v4657_v28 = vrot.slane %v17287_v2, 7  ;;  %v4577_v38 = vrot.slane %v12456_v15, 2 }
 0x15f   : > { %20862 = vst [vmem:[#allocation38_spill] sm:$0xff] %v17277_v17  ;;  %v17295_v7 = vadd.f32 %v14326_v25, %v1871_v30  ;;  %v1870_v19 = vadd.f32 %v1791_v12, %v16859_v0  ;;  %v17300_v17 = vsel %vm1475_vm3, %v4568_v35, %v4570_v55  ;;  %v14329_v56 = vpop.f32.mrf.mxu0  ;;  %14628 = vmatmul.mubr.msk.f32.gmra.mxu0 %vm239_vm1, %v17274_v44  ;;  %v4575_v25 = vrot.slane %v17287_v2, 2 }
 0x160   : > { %v14279_v47 = vpop.f32.mrf.mxu1  ;;  %14578 = vmatmul.mubr.msk.f32.gmra.mxu1 %vm239_vm1, %v4648_v9  ;;  %v4659_v30 = vrot.slane %v12456_v15, 7  ;;  %v4660_v0 = vrot.slane %v17291_v51, 7  ;;  %14630 = vmatprep.mubr.msk.f32.mxu0 %vm239_vm1, %v17284_v11  ;;  %v4578_v55 = vrot.slane %v17291_v51, 2  ;;  %v17316_v9 = vld [vmem:[%s15501_s26 + $0x210] sm:$0xff]  ;;  %v4656_v14 = vsel %vm792_vm2, %v4654_v16, %v4655_v40 }
 0x161   : > { %20865 = vst [vmem:[#allocation41_spill] sm:$0xff] %v17295_v7  ;;  %v17308_v39 = vadd.f32 %v2309_v46, %v1870_v19  ;;  %v1873_v35 = vadd.f32 %v14279_v47, %v16863_v62  ;;  %14580 = vmatprep.mubr.msk.f32.mxu1 %vm239_vm1, %v4651_v24  ;;  %20867 = vst [vmem:[#allocation43_spill] sm:$0xff] %v17316_v9  ;;  %v2319_v2 = vpop.f32.mrf.mxu0  ;;  %v17320_v7 = vsel %vm1475_vm3, %v4572_v33, %v4573_v20  ;;  %v12460_v47 = vld [vmem:[%s15501_s26 + $0x220] sm:$0xff]  ;;  %v17327_v24 = vld [vmem:[%s15501_s26 + $0x228] sm:$0xff] }
 0x162   : > { %v1801_v12 = vpop.f32.mrf.mxu1  ;;  %v4658_v16 = vsel %vm792_vm2, %v4655_v40, %v4657_v28  ;;  %v17334_v33 = vsel %vm1475_vm3, %v4573_v20, %v4575_v25  ;;  %v4580_v40 = vrot.slane %v17316_v9, 2  ;;  %v17349_v20 = vld [vmem:[%s15501_s26 + $0x230] sm:$0xff] }
 0x163   : > { %20866 = vst [vmem:[#allocation42_spill] sm:$0xff] %v17308_v39  ;;  %v17322_v46 = vadd.f32 %v14329_v56, %v1873_v35  ;;  %v1872_v62 = vadd.f32 %v1801_v12, %v16875_v60  ;;  %v14332_v19 = vpop.f32.mrf.mxu0  ;;  %14631 = vmatmul.mubr.msk.f32.gmra.mxu0 %vm239_vm1, %v17300_v17  ;;  %v4661_v56 = vsel %vm792_vm2, %v4659_v30, %v4660_v0  ;;  %v4662_v60 = vrot.slane %v17316_v9, 7 }
 0x164   : > { %v14282_v15 = vpop.f32.mrf.mxu1  ;;  %14581 = vmatmul.mubr.msk.f32.gmra.mxu1 %vm239_vm1, %v4653_v26  ;;  %14633 = vmatprep.mubr.msk.f32.mxu0 %vm239_vm1, %v17320_v7  ;;  %v17345_v26 = vsel %vm1475_vm3, %v4577_v38, %v4578_v55  ;;  %v4664_v30 = vrot.slane %v12460_v47, 7  ;;  %v4667_v9 = vrot.slane %v17349_v20, 7 }
 0x165   : > { %v17338_v35 = vadd.f32 %v2319_v2, %v1872_v62  ;;  %v1875_v12 = vadd.f32 %v14282_v15, %v16879_v13  ;;  %14583 = vmatprep.mubr.msk.f32.mxu1 %vm239_vm1, %v4656_v14  ;;  %v2329_v25 = vpop.f32.mrf.mxu0  ;;  %v4665_v2 = vrot.slane %v17327_v24, 7  ;;  %v4582_v62 = vrot.slane %v12460_v47, 2 }
 0x166   : > { %v1811_v28 = vpop.f32.mrf.mxu1  ;;  %v4583_v13 = vrot.slane %v17327_v24, 2  ;;  %v4663_v39 = vsel %vm792_vm2, %v4660_v0, %v4662_v60 }
 0x167   : > { %20868 = vst [vmem:[#allocation44_spill] sm:$0xff] %v17338_v35  ;;  %v17353_v14 = vadd.f32 %v14332_v19, %v1875_v12  ;;  %v1874_v15 = vadd.f32 %v1811_v28, %v16893_v1  ;;  %v14335_v38 = vpop.f32.mrf.mxu0  ;;  %14634 = vmatmul.mubr.msk.f32.gmra.mxu0 %vm239_vm1, %v17334_v33  ;;  %v17368_v1 = vsel %vm1475_vm3, %v4578_v55, %v4580_v40  ;;  %v4585_v19 = vrot.slane %v17349_v20, 2 }
 0x168   : > { %v14285_v35 = vpop.f32.mrf.mxu1  ;;  %14584 = vmatmul.mubr.msk.f32.gmra.mxu1 %vm239_vm1, %v4658_v16  ;;  %14636 = vmatprep.mubr.msk.f32.mxu0 %vm239_vm1, %v17345_v26  ;;  %v12403_v16 = vld [vmem:[%s15501_s26 + $0x58] sm:$0x3f]  ;;  %v4666_v0 = vsel %vm792_vm2, %v4664_v30, %v4665_v2  ;;  %v17374_v60 = vsel %vm1475_vm3, %v4582_v62, %v4583_v13  ;;  %v4668_v30 = vsel %vm792_vm2, %v4665_v2, %v4667_v9 }
 0x169   : > { %v17361_v51 = vadd.f32 %v2329_v25, %v1874_v15  ;;  %v1877_v47 = vadd.f32 %v14285_v35, %v16902_v21  ;;  %14586 = vmatprep.mubr.msk.f32.mxu1 %vm239_vm1, %v4661_v56  ;;  %v2339_v28 = vpop.f32.mrf.mxu0  ;;  %v5271_v21 = vrot.slane %v16891_v58, 4  ;;  %v5272_v56 = vrot.slane %v16896_v10, 4  ;;  %v12407_v9 = vld [vmem:[%s15501_s26 + $0x78] sm:$0x3f] }
 0x16a   : > { %v1821_v12 = vpop.f32.mrf.mxu1  ;;  %v5274_v62 = vrot.slane %v12403_v16, 4  ;;  %v5277_v16 = vrot.slane %v16929_v57, 4 }
 0x16b   : > { %20869 = vst [vmem:[#allocation45_spill] sm:$0xff] %v17361_v51  ;;  %v17378_v35 = vadd.f32 %v14335_v38, %v1877_v47  ;;  %v1876_v55 = vadd.f32 %v1821_v12, %v16912_v34  ;;  %v14338_v25 = vpop.f32.mrf.mxu0  ;;  %14637 = vmatmul.mubr.msk.f32.gmra.mxu0 %vm239_vm1, %v17368_v1  ;;  %v17392_v34 = vsel %vm1475_vm3, %v4583_v13, %v4585_v19  ;;  %v17402_v12 = vld [vmem:[%s15501_s26 + $0x180] sm:$0xff] }
 0x16c   : > { %v14288_v40 = vpop.f32.mrf.mxu1  ;;  %14587 = vmatmul.mubr.msk.f32.gmra.mxu1 %vm239_vm1, %v4663_v39  ;;  %14639 = vmatprep.mubr.msk.f32.mxu0 %vm239_vm1, %v17374_v60  ;;  %v5273_v38 = vsel %vm336_vm0, %v5271_v21, %v5272_v56  ;;  %v17412_v21 = vld [vmem:[%s15501_s26 + $0x190] sm:$0xff] }
 0x16d   : > { %v17385_v58 = vadd.f32 %v2339_v28, %v1876_v55  ;;  %v1879_v10 = vadd.f32 %v14288_v40, %v16921_v50  ;;  %14589 = vmatprep.mubr.msk.f32.mxu1 %vm239_vm1, %v4666_v0  ;;  %v2349_v15 = vpop.f32.mrf.mxu0  ;;  %v5276_v50 = vrot.slane %v16919_v8, 4  ;;  %v17405_v28 = vld [vmem:[%s15501_s26 + $0x188] sm:$0xff]  ;;  %v5275_v0 = vsel %vm336_vm0, %v5272_v56, %v5274_v62 }
 0x16e   : > { %v1831_v39 = vpop.f32.mrf.mxu1  ;;  %v7136_v8 = vrot.slane %v17402_v12, 7  ;;  %v7137_v57 = vrot.slane %v17405_v28, 7  ;;  %v5279_v40 = vrot.slane %v12407_v9, 4  ;;  %v7139_v56 = vrot.slane %v17412_v21, 7  ;;  %v17437_v9 = vld [vmem:[%s15501_s26 + $0x1a8] sm:$0xff] }
 0x16f   : > { %20870 = vst [vmem:[#allocation46_spill] sm:$0xff] %v17385_v58  ;;  %v17396_v2 = vadd.f32 %v14338_v25, %v1879_v10  ;;  %v1878_v47 = vadd.f32 %v1831_v39, %v16941_v43  ;;  %v14341_v19 = vpop.f32.mrf.mxu0  ;;  %14640 = vmatmul.mubr.msk.f32.gmra.mxu0 %vm239_vm1, %v17392_v34  ;;  %v5281_v62 = vrot.slane %v16933_v32, 4  ;;  %v5282_v10 = vrot.slane %v16939_v36, 4  ;;  %v12411_v39 = vld [vmem:[%s15501_s26 + $0x98] sm:$0x3f] }
 0x170   : > { %v14291_v13 = vpop.f32.mrf.mxu1  ;;  %14590 = vmatmul.mubr.msk.f32.gmra.mxu1 %vm239_vm1, %v4668_v30  ;;  %14694 = vmatprep.mubr.msk.f32.mxu0 %vm239_vm1, %v17073_v54  ;;  %v17434_v54 = vld [vmem:[%s15501_s26 + $0x1a0] sm:$0xff]  ;;  %v17443_v32 = vsel %vm792_vm2, %v7137_v57, %v7139_v56  ;;  %v5284_v56 = vrot.slane %v12411_v39, 4  ;;  %v12415_v58 = vld [vmem:[%s15501_s26 + $0xb8] sm:$0x3f] }
 0x171   : > { %v17416_v43 = vadd.f32 %v2349_v15, %v1878_v47  ;;  %v1881_v55 = vadd.f32 %v14291_v13, %v16951_v27  ;;  %14644 = vmatprep.mubr.msk.f32.mxu1 %vm239_vm1, %v5273_v38  ;;  %v2359_v30 = vpop.f32.mrf.mxu0  ;;  %v17427_v15 = vsel %vm792_vm2, %v7136_v8, %v7137_v57  ;;  %v5278_v47 = vsel %vm336_vm0, %v5276_v50, %v5277_v16  ;;  %v17440_v13 = vld [vmem:[%s15501_s26 + $0x1b0] sm:$0xff]  ;;  %v17460_v50 = vld [vmem:[%s20667_s3 + $0x3c] sm:$0xf] }
 0x172   : > { %v1841_v25 = vpop.f32.mrf.mxu1  ;;  %20872 = vst [vmem:[#allocation48_spill] sm:$0xff] %v17427_v15  ;;  %20873 = vst [vmem:[#allocation49_spill] sm:$0xff] %v17443_v32  ;;  %v7142_v8 = vrot.slane %v17437_v9, 7  ;;  %v5285_v39 = vsel %vm336_vm0, %v5282_v10, %v5284_v56 }
 0x173   : > { %20871 = vst [vmem:[#allocation47_spill] sm:$0xff] %v17416_v43  ;;  %v17429_v27 = vadd.f32 %v14341_v19, %v1881_v55  ;;  %v1880_v38 = vadd.f32 %v1841_v25, %v16957_v3  ;;  %v17447_v43 = vpop.f32.mrf.mxu0  ;;  %14695 = vmatmul.mubr.msk.f32.vlgmr.msra.gmra.mxu0 %vm239_vm1, %v17088_v48  ;;  %v17455_v3 = vld [vmem:[%s20667_s3 + $0x38] sm:$0xf]  ;;  %v7141_v19 = vrot.slane %v17434_v54, 7  ;;  %v20876_v48 = vld [vmem:[#allocation3_spill] sm:$0xff]  ;;  %v5280_v55 = vsel %vm336_vm0, %v5277_v16, %v5279_v40 }
 0x174   : > { %v17445_v36 = vpop.f32.mrf.mxu1  ;;  %14645 = vmatmul.mubr.msk.f32.vlgmr.msra.gmra.mxu1 %vm239_vm1, %v5275_v0  ;;  %v20875_v0 = vld [vmem:[#allocation13_spill] sm:$0xff]  ;;  %14793 = vmatpush3.msk.msra.mxu0 %vm336_vm0, %v20876_v48  ;;  %v7144_v25 = vrot.slane %v17440_v13, 7 }
 0x175   : > { %v17464_v57 = vadd.f32 %v2359_v30, %v1880_v38  ;;  %14743 = vmatpush3.msk.msra.mxu1 %vm336_vm0, %v20875_v0  ;;  %v17474_v15 = vpop.f32.mrf.mxu0  ;;  %14647 = vmatprep.mubr.msk.f32.mxu1 %vm239_vm1, %v5278_v47  ;;  %v5283_v30 = vsel %vm336_vm0, %v5281_v62, %v5282_v10  ;;  %v20877_v38 = vld [vmem:[#allocation5_spill] sm:$0xff]  ;;  %v17484_v16 = vsel %vm792_vm2, %v7141_v19, %v7142_v8  ;;  %v5289_v47 = vrot.slane %v12415_v58, 4 }
 0x176   : > { %v17472_v32 = vpop.f32.mrf.mxu1  ;;  %14697 = vmatprep.mubr.msk.f32.mxu0 %vm239_vm1, %v17098_v42  ;;  %v5286_v0 = vrot.slane %v20877_v38, 4  ;;  %20879 = vst [vmem:[#allocation13_spill] sm:$0xff] %v17484_v16  ;;  %14842 = vmatprep.subr.msk.mxu1 %vm336_vm0, %v17455_v3  ;;  %v17498_v62 = vsel %vm792_vm2, %v7142_v8, %v7144_v25  ;;  %v5291_v38 = vrot.slane %v16993_v61, 4  ;;  %v12419_v8 = vld [vmem:[%s15501_s26 + $0xd8] sm:$0x3f] }
 0x177   : > { %20874 = vst [vmem:[#allocation50_spill] sm:$0xff] %v17464_v57  ;;  %v20878_v57 = vld [vmem:[#allocation14_spill] sm:$0xff]  ;;  %14892 = vmatprep.subr.msk.mxu0 %vm336_vm0, %v17460_v50  ;;  %v17492_v42 = vpop.f32.mrf.mxu0  ;;  %14698 = vmatmul.mubr.msk.f32.gmra.mxu0 %vm239_vm1, %v17114_v41  ;;  %20880 = vst [vmem:[#allocation3_spill] sm:$0xff] %v17498_v62  ;;  %v5292_v41 = vrot.slane %v17013_v59, 4  ;;  %v5294_v58 = vrot.slane %v12419_v8, 4 }
 0x178   : > { %v5287_v48 = vrot.slane %v20878_v57, 4  ;;  %v17490_v40 = vpop.f32.mrf.mxu1  ;;  %14648 = vmatmul.mubr.msk.f32.gmra.mxu1 %vm239_vm1, %v5280_v55  ;;  %14700 = vmatprep.mubr.msk.f32.mxu0 %vm239_vm1, %v17134_v29 }
 0x179   : > { %14650 = vmatprep.mubr.msk.f32.mxu1 %vm239_vm1, %v5283_v30  ;;  %v17506_v57 = vpop.f32.mrf.mxu0  ;;  %v5293_v56 = vsel %vm336_vm0, %v5291_v38, %v5292_v41 }
 0x17a   : > { %v17504_v19 = vpop.f32.mrf.mxu1  ;;  %v5288_v55 = vsel %vm336_vm0, %v5286_v0, %v5287_v48  ;;  %v5290_v61 = vsel %vm336_vm0, %v5287_v48, %v5289_v47  ;;  %v5296_v0 = vrot.slane %v17030_v6, 4  ;;  %v5295_v6 = vsel %vm336_vm0, %v5292_v41, %v5294_v58  ;;  %v20884_v58 = vld [vmem:[#allocation15_spill] sm:$0xff] }
 0x17b   : > { %v14402_v30 = vpop.f32.mrf.mxu0  ;;  %14701 = vmatmul.mubr.msk.f32.gmra.mxu0 %vm239_vm1, %v17150_v5 }
 0x17c   : > { %v14352_v25 = vpop.f32.mrf.mxu1  ;;  %14651 = vmatmul.mubr.msk.f32.gmra.mxu1 %vm239_vm1, %v5285_v39  ;;  %14703 = vmatprep.mubr.msk.f32.mxu0 %vm239_vm1, %v17160_v4  ;;  %v20881_v39 = vld [vmem:[#allocation4_spill] sm:$0xff] }
 0x17d   : > { %v2795_v29 = vadd.f32 %v14352_v25, %v17052_v53  ;;  %14653 = vmatprep.mubr.msk.f32.mxu1 %vm239_vm1, %v5288_v55  ;;  %v17522_v10 = vpop.f32.mrf.mxu0  ;;  %v17527_v5 = vrot.slane %v20881_v39, 4  ;;  %v12423_v53 = vld [vmem:[%s15501_s26 + $0xf8] sm:$0x3f] }
 0x17e   : > { %v17520_v59 = vpop.f32.mrf.mxu1  ;;  %v5299_v47 = vrot.slane %v12423_v53, 4 }
 0x17f   : > { %v17530_v55 = vadd.f32 %v14402_v30, %v2795_v29  ;;  %v14405_v4 = vpop.f32.mrf.mxu0  ;;  %14704 = vmatmul.mubr.msk.f32.gmra.mxu0 %vm239_vm1, %v17176_v45  ;;  %v17546_v30 = vsel %vm336_vm0, %v5296_v0, %v17527_v5  ;;  %v5301_v45 = vrot.slane %v17048_v23, 4  ;;  %v20882_v29 = vld [vmem:[#allocation16_spill] sm:$0xff] }
 0x180   : > { %v14355_v25 = vpop.f32.mrf.mxu1  ;;  %14654 = vmatmul.mubr.msk.f32.gmra.mxu1 %vm239_vm1, %v5290_v61  ;;  %14706 = vmatprep.mubr.msk.f32.mxu0 %vm239_vm1, %v17196_v22  ;;  %v12427_v61 = vld [vmem:[%s15501_s26 + $0x118] sm:$0x3f]  ;;  %v5300_v23 = vsel %vm336_vm0, %v17527_v5, %v5299_v47 }
 0x181   : > { %v2797_v48 = vadd.f32 %v14355_v25, %v17075_v31  ;;  %14656 = vmatprep.mubr.msk.f32.mxu1 %vm239_vm1, %v5293_v56  ;;  %v17542_v8 = vpop.f32.mrf.mxu0  ;;  %v17550_v31 = vrot.slane %v20882_v29, 4  ;;  %v5304_v0 = vrot.slane %v12427_v61, 4  ;;  %v20890_v61 = vld [vmem:[#allocation20_spill] sm:$0xff] }
 0x182   : > { %v17540_v38 = vpop.f32.mrf.mxu1 }
 0x183   : > { %v17553_v56 = vadd.f32 %v14405_v4, %v2797_v48  ;;  %v14408_v41 = vpop.f32.mrf.mxu0  ;;  %14707 = vmatmul.mubr.msk.f32.gmra.mxu0 %vm239_vm1, %v17212_v63  ;;  %v17571_v63 = vsel %vm336_vm0, %v5301_v45, %v17550_v31  ;;  %v20887_v4 = vld [vmem:[#allocation6_spill] sm:$0xff]  ;;  %v5305_v45 = vsel %vm336_vm0, %v17550_v31, %v5304_v0 }
 0x184   : > { %v14358_v22 = vpop.f32.mrf.mxu1  ;;  %14657 = vmatmul.mubr.msk.f32.gmra.mxu1 %vm239_vm1, %v5295_v6  ;;  %14709 = vmatprep.mubr.msk.f32.mxu0 %vm239_vm1, %v17222_v18  ;;  %v5306_v48 = vrot.slane %v20887_v4, 4  ;;  %v20888_v6 = vld [vmem:[#allocation18_spill] sm:$0xff] }
 0x185   : > { %20883 = vst [vmem:[#allocation5_spill] sm:$0xff] %v17553_v56  ;;  %v2799_v39 = vadd.f32 %v14358_v22, %v20884_v58  ;;  %14659 = vmatprep.mubr.msk.f32.mxu1 %vm239_vm1, %v17546_v30  ;;  %v17567_v25 = vpop.f32.mrf.mxu0  ;;  %v17575_v29 = vrot.slane %v20888_v6, 4  ;;  %v12431_v22 = vld [vmem:[%s15501_s26 + $0x138] sm:$0x3f]  ;;  %v17688_v56 = vld [vmem:[%s15501_s26 + $0x268] sm:$0xff] }
 0x186   : > { %v17565_v53 = vpop.f32.mrf.mxu1  ;;  %20886 = vst [vmem:[#allocation4_spill] sm:$0xff] %v17567_v25 }
 0x187   : > { %20885 = vst [vmem:[#allocation14_spill] sm:$0xff] %v17565_v53  ;;  %v17578_v18 = vadd.f32 %v14408_v41, %v2799_v39  ;;  %v14411_v47 = vpop.f32.mrf.mxu0  ;;  %14710 = vmatmul.mubr.msk.f32.gmra.mxu0 %vm239_vm1, %v17238_v37  ;;  %v5309_v41 = vrot.slane %v12431_v22, 4  ;;  %v12435_v39 = vld [vmem:[%s15501_s26 + $0x158] sm:$0x3f]  ;;  %v17597_v37 = vsel %vm336_vm0, %v5306_v48, %v17575_v29 }
 0x188   : > { %v14361_v58 = vpop.f32.mrf.mxu1  ;;  %14660 = vmatmul.mubr.msk.f32.gmra.mxu1 %vm239_vm1, %v5300_v23  ;;  %14712 = vmatprep.mubr.msk.f32.mxu0 %vm239_vm1, %v17258_v49  ;;  %v20893_v23 = vld [vmem:[#allocation19_spill] sm:$0xff]  ;;  %v5314_v22 = vrot.slane %v12435_v39, 4  ;;  %v20900_v39 = vld [vmem:[#allocation24_spill] sm:$0xff] }
 0x189   : > { %20889 = vst [vmem:[#allocation16_spill] sm:$0xff] %v17578_v18  ;;  %v2801_v62 = vadd.f32 %v14361_v58, %v20890_v61  ;;  %14662 = vmatprep.mubr.msk.f32.mxu1 %vm239_vm1, %v17571_v63  ;;  %v17593_v6 = vpop.f32.mrf.mxu0  ;;  %v5311_v58 = vrot.slane %v20893_v23, 4  ;;  %v20894_v61 = vld [vmem:[#allocation22_spill] sm:$0xff] }
 0x18a   : > { %v17591_v4 = vpop.f32.mrf.mxu1  ;;  %20892 = vst [vmem:[#allocation6_spill] sm:$0xff] %v17593_v6  ;;  %v17601_v16 = vrot.slane %v20894_v61, 4  ;;  %v20896_v6 = vld [vmem:[#allocation26_spill] sm:$0xff] }
 0x18b   : > { %20891 = vst [vmem:[#allocation15_spill] sm:$0xff] %v17591_v4  ;;  %v17603_v49 = vadd.f32 %v14411_v47, %v2801_v62  ;;  %v14414_v0 = vpop.f32.mrf.mxu0  ;;  %14713 = vmatmul.mubr.msk.f32.gmra.mxu0 %vm239_vm1, %v17274_v44  ;;  %v5310_v62 = vsel %vm336_vm0, %v17575_v29, %v5309_v41  ;;  %v20899_v44 = vld [vmem:[#allocation21_spill] sm:$0xff]  ;;  %v12439_v23 = vld [vmem:[%s15501_s26 + $0x178] sm:$0x3f] }
 0x18c   : > { %v14364_v51 = vpop.f32.mrf.mxu1  ;;  %14663 = vmatmul.mubr.msk.f32.gmra.mxu1 %vm239_vm1, %v5305_v45  ;;  %14715 = vmatprep.mubr.msk.f32.mxu0 %vm239_vm1, %v17284_v11  ;;  %v17621_v45 = vsel %vm336_vm0, %v5311_v58, %v17601_v16  ;;  %v5315_v58 = vsel %vm336_vm0, %v17601_v16, %v5314_v22 }
 0x18d   : > { %20895 = vst [vmem:[#allocation18_spill] sm:$0xff] %v17603_v49  ;;  %v2803_v18 = vadd.f32 %v14364_v51, %v20896_v6  ;;  %14665 = vmatprep.mubr.msk.f32.mxu1 %vm239_vm1, %v17597_v37  ;;  %v17617_v47 = vpop.f32.mrf.mxu0  ;;  %v5316_v51 = vrot.slane %v20899_v44, 4  ;;  %v17625_v6 = vrot.slane %v20900_v39, 4 }
 0x18e   : > { %v17615_v48 = vpop.f32.mrf.mxu1  ;;  %20898 = vst [vmem:[#allocation19_spill] sm:$0xff] %v17617_v47  ;;  %v20902_v47 = vld [vmem:[#allocation29_spill] sm:$0xff] }
 0x18f   : > { %20897 = vst [vmem:[#allocation20_spill] sm:$0xff] %v17615_v48  ;;  %v17628_v61 = vadd.f32 %v14414_v0, %v2803_v18  ;;  %v14417_v41 = vpop.f32.mrf.mxu0  ;;  %14716 = vmatmul.mubr.msk.f32.gmra.mxu0 %vm239_vm1, %v17300_v17  ;;  %v5319_v18 = vrot.slane %v12439_v23, 4  ;;  %v20903_v0 = vld [vmem:[#allocation25_spill] sm:$0xff]  ;;  %v17651_v22 = vsel %vm336_vm0, %v5316_v51, %v17625_v6  ;;  %v17657_v23 = vld [vmem:[%s15501_s26 + $0x248] sm:$0xff] }
 0x190   : > { %v14367_v11 = vpop.f32.mrf.mxu1  ;;  %14666 = vmatmul.mubr.msk.f32.gmra.mxu1 %vm239_vm1, %v5310_v62  ;;  %14718 = vmatprep.mubr.msk.f32.mxu0 %vm239_vm1, %v17320_v7  ;;  %v5321_v39 = vrot.slane %v20903_v0, 4  ;;  %v12443_v62 = vld [vmem:[%s15501_s26 + $0x198] sm:$0x3f]  ;;  %20908 = vst [vmem:[#allocation29_spill] sm:$0xff] %v17651_v22  ;;  %v12610_v7 = vld [vmem:[%s15501_s26 + $0x240] sm:$0xff]  ;;  %v5845_v25 = vrot.slane %v17657_v23, 2 }
 0x191   : > { %20901 = vst [vmem:[#allocation22_spill] sm:$0xff] %v17628_v61  ;;  %v2805_v44 = vadd.f32 %v14367_v11, %v20902_v47  ;;  %14668 = vmatprep.mubr.msk.f32.mxu1 %vm239_vm1, %v17621_v45  ;;  %v20904_v61 = vld [vmem:[#allocation27_spill] sm:$0xff]  ;;  %v17647_v17 = vpop.f32.mrf.mxu0  ;;  %v5320_v51 = vsel %vm336_vm0, %v17625_v6, %v5319_v18 }
 0x192   : > { %v17642_v49 = vrot.slane %v20904_v61, 4  ;;  %v17645_v48 = vpop.f32.mrf.mxu1  ;;  %20907 = vst [vmem:[#allocation24_spill] sm:$0xff] %v17647_v17  ;;  %20910 = vst [vmem:[#allocation27_spill] sm:$0xff] %v17657_v23  ;;  %v5324_v61 = vrot.slane %v12443_v62, 4  ;;  %v20911_v17 = vld [vmem:[#allocation33_spill] sm:$0xff]  ;;  %v12614_v18 = vld [vmem:[%s15501_s26 + $0x260] sm:$0xff] }
 0x193   : > { %20906 = vst [vmem:[#allocation21_spill] sm:$0xff] %v17645_v48  ;;  %v17653_v47 = vadd.f32 %v14417_v41, %v2805_v44  ;;  %v14420_v0 = vpop.f32.mrf.mxu0  ;;  %14719 = vmatmul.mubr.msk.f32.gmra.mxu0 %vm239_vm1, %v17334_v33  ;;  %v17675_v44 = vld [vmem:[%s15501_s26 + $0x250] sm:$0xff] }
 0x194   : > { %20905 = vst [vmem:[#allocation26_spill] sm:$0xff] %v17642_v49  ;;  %v14370_v11 = vpop.f32.mrf.mxu1  ;;  %14669 = vmatmul.mubr.msk.f32.gmra.mxu1 %vm239_vm1, %v5315_v58  ;;  %14721 = vmatprep.mubr.msk.f32.mxu0 %vm239_vm1, %v17345_v26  ;;  %v17671_v41 = vsel %vm336_vm0, %v5321_v39, %v17642_v49  ;;  %v12447_v58 = vld [vmem:[%s15501_s26 + $0x1b8] sm:$0x3f]  ;;  %20913 = vst [vmem:[#allocation51_spill] sm:$0xff] %v17675_v44  ;;  %v5844_v26 = vrot.slane %v12610_v7, 2 }
 0x195   : > { %20909 = vst [vmem:[#allocation25_spill] sm:$0xff] %v17653_v47  ;;  %v2807_v48 = vadd.f32 %v14370_v11, %v20911_v17  ;;  %14671 = vmatprep.mubr.msk.f32.mxu1 %vm239_vm1, %v17651_v22  ;;  %20912 = vst [vmem:[#allocation33_spill] sm:$0xff] %v17671_v41  ;;  %v17679_v62 = vpop.f32.mrf.mxu0  ;;  %v20916_v17 = vld [vmem:[#allocation30_spill] sm:$0xff]  ;;  %v20917_v47 = vld [vmem:[#allocation32_spill] sm:$0xff]  ;;  %v5329_v7 = vrot.slane %v12447_v58, 4 }
 0x196   : > { %v17677_v33 = vpop.f32.mrf.mxu1  ;;  %20915 = vst [vmem:[#allocation53_spill] sm:$0xff] %v17679_v62  ;;  %v5326_v11 = vrot.slane %v20916_v17, 4  ;;  %v17683_v4 = vrot.slane %v20917_v47, 4  ;;  %20919 = vst [vmem:[#allocation32_spill] sm:$0xff] %v17688_v56  ;;  %v5325_v47 = vsel %vm336_vm0, %v17642_v49, %v5324_v61  ;;  %v5847_v17 = vrot.slane %v17675_v44, 2 }
 0x197   : > { %20914 = vst [vmem:[#allocation52_spill] sm:$0xff] %v17677_v33  ;;  %v17690_v39 = vadd.f32 %v14420_v0, %v2807_v48  ;;  %v14423_v53 = vpop.f32.mrf.mxu0  ;;  %14722 = vmatmul.mubr.msk.f32.gmra.mxu0 %vm239_vm1, %v17368_v1  ;;  %v5331_v62 = vrot.slane %v17229_v52, 4  ;;  %v20921_v48 = vld [vmem:[#allocation36_spill] sm:$0xff]  ;;  %v20922_v1 = vld [vmem:[#allocation34_spill] sm:$0xff]  ;;  %v5850_v61 = vrot.slane %v17688_v56, 2  ;;  %v20937_v33 = vld [vmem:[#allocation39_spill] sm:$0xff] }
 0x198   : > { %20918 = vst [vmem:[#allocation30_spill] sm:$0xff] %v17683_v4  ;;  %v14373_v22 = vpop.f32.mrf.mxu1  ;;  %14672 = vmatmul.mubr.msk.f32.gmra.mxu1 %vm239_vm1, %v5320_v51  ;;  %14724 = vmatprep.mubr.msk.f32.mxu0 %vm239_vm1, %v17374_v60  ;;  %v17705_v51 = vrot.slane %v20922_v1, 4  ;;  %v12451_v58 = vld [vmem:[%s15501_s26 + $0x1d8] sm:$0x3f]  ;;  %v17715_v52 = vsel %vm336_vm0, %v5326_v11, %v17683_v4  ;;  %v17727_v1 = vld [vmem:[%s15501_s26 + $0x288] sm:$0xff]  ;;  %v5330_v11 = vsel %vm336_vm0, %v17683_v4, %v5329_v7 }
 0x199   : > { %20920 = vst [vmem:[#allocation54_spill] sm:$0xff] %v17690_v39  ;;  %v2809_v0 = vadd.f32 %v14373_v22, %v20921_v48  ;;  %14674 = vmatprep.mubr.msk.f32.mxu1 %vm239_vm1, %v17671_v41  ;;  %v5849_v39 = vrot.slane %v12614_v18, 2  ;;  %v17711_v44 = vpop.f32.mrf.mxu0  ;;  %20925 = vst [vmem:[#allocation55_spill] sm:$0xff] %v17715_v52  ;;  %v17718_v22 = vsel %vm1475_vm3, %v5844_v26, %v5845_v25  ;;  %v17721_v48 = vld [vmem:[%s15501_s26 + $0x270] sm:$0xff]  ;;  %v12618_v18 = vld [vmem:[%s15501_s26 + $0x280] sm:$0xff] }
 0x19a   : > { %v17709_v23 = vpop.f32.mrf.mxu1  ;;  %20924 = vst [vmem:[#allocation34_spill] sm:$0xff] %v17711_v44  ;;  %20926 = vst [vmem:[#allocation56_spill] sm:$0xff] %v17718_v22  ;;  %v17735_v26 = vsel %vm1475_vm3, %v5845_v25, %v5847_v17  ;;  %v5852_v25 = vrot.slane %v17721_v48, 2  ;;  %v12455_v7 = vld [vmem:[%s15501_s26 + $0x1f8] sm:$0x3f]  ;;  %v17752_v17 = vld [vmem:[%s15501_s26 + $0x290] sm:$0xff] }
 0x19b   : > { %20923 = vst [vmem:[#allocation36_spill] sm:$0xff] %v17709_v23  ;;  %20927 = vst [vmem:[#allocation57_spill] sm:$0xff] %v17721_v48  ;;  %v17723_v60 = vadd.f32 %v14423_v53, %v2809_v0  ;;  %v14426_v23 = vpop.f32.mrf.mxu0  ;;  %14725 = vmatmul.mubr.msk.f32.gmra.mxu0 %vm239_vm1, %v17392_v34  ;;  %v5334_v53 = vrot.slane %v12451_v58, 4  ;;  %v20930_v0 = vld [vmem:[#allocation41_spill] sm:$0xff]  ;;  %v17744_v34 = vsel %vm336_vm0, %v5331_v62, %v17705_v51  ;;  %v5855_v62 = vrot.slane %v17727_v1, 2  ;;  %v17767_v48 = vld [vmem:[%s15501_s26 + $0x2a8] sm:$0xff] }
 0x19c   : > { %20929 = vst [vmem:[#allocation59_spill] sm:$0xff] %v17727_v1  ;;  %v14376_v56 = vpop.f32.mrf.mxu1  ;;  %14675 = vmatmul.mubr.msk.f32.gmra.mxu1 %vm239_vm1, %v5325_v47  ;;  %14727 = vmatprep.mubr.msk.f32.mxu0 %vm239_vm1, %v17718_v22  ;;  %20931 = vst [vmem:[#allocation41_spill] sm:$0xff] %v17744_v34  ;;  %v17747_v47 = vsel %vm1475_vm3, %v5849_v39, %v5850_v61  ;;  %v17760_v22 = vrot.slane %v20937_v33, 4  ;;  %v12622_v39 = vld [vmem:[%s15501_s26 + $0x2a0] sm:$0xff] }
 0x19d   : > { %20928 = vst [vmem:[#allocation58_spill] sm:$0xff] %v17723_v60  ;;  %v2811_v60 = vadd.f32 %v14376_v56, %v20930_v0  ;;  %14677 = vmatprep.mubr.msk.f32.mxu1 %vm239_vm1, %v17715_v52  ;;  %20932 = vst [vmem:[#allocation60_spill] sm:$0xff] %v17747_v47  ;;  %v17756_v58 = vpop.f32.mrf.mxu0  ;;  %v20936_v0 = vld [vmem:[#allocation37_spill] sm:$0xff]  ;;  %v5854_v52 = vrot.slane %v12618_v18, 2  ;;  %v5335_v33 = vsel %vm336_vm0, %v17705_v51, %v5334_v53  ;;  %v5339_v18 = vrot.slane %v12455_v7, 4  ;;  %v20941_v53 = vld [vmem:[#allocation43_spill] sm:$0xff] }
 0x19e   : > { %20933 = vst [vmem:[#allocation61_spill] sm:$0xff] %v17752_v17  ;;  %v17754_v56 = vpop.f32.mrf.mxu1  ;;  %20935 = vst [vmem:[#allocation63_spill] sm:$0xff] %v17756_v58  ;;  %v5336_v44 = vrot.slane %v20936_v0, 4  ;;  %v5857_v0 = vrot.slane %v17752_v17, 2  ;;  %v17785_v1 = vrot.slane %v20941_v53, 4  ;;  %v12626_v53 = vld [vmem:[%s15501_s26 + $0x2c0] sm:$0xff] }
 0x19f   : > { %20934 = vst [vmem:[#allocation62_spill] sm:$0xff] %v17754_v56  ;;  %v17763_v4 = vadd.f32 %v14426_v23, %v2811_v60  ;;  %20939 = vst [vmem:[#allocation39_spill] sm:$0xff] %v17767_v48  ;;  %v14429_v49 = vpop.f32.mrf.mxu0  ;;  %14728 = vmatmul.mubr.msk.f32.gmra.mxu0 %vm239_vm1, %v17735_v26  ;;  %v17781_v60 = vsel %vm1475_vm3, %v5850_v61, %v5852_v25  ;;  %v12459_v7 = vld [vmem:[%s15501_s26 + $0x218] sm:$0x3f]  ;;  %v5859_v56 = vrot.slane %v12622_v39, 2  ;;  %v5860_v61 = vrot.slane %v17767_v48, 2 }
 0x1a0   : > { %v14379_v41 = vpop.f32.mrf.mxu1  ;;  %14678 = vmatmul.mubr.msk.f32.gmra.mxu1 %vm239_vm1, %v5330_v11  ;;  %14730 = vmatprep.mubr.msk.f32.mxu0 %vm239_vm1, %v17747_v47  ;;  %v20940_v11 = vld [vmem:[#allocation40_spill] sm:$0xff]  ;;  %v17801_v25 = vld [vmem:[%s15501_s26 + $0x2b0] sm:$0xff] }
 0x1a1   : > { %20938 = vst [vmem:[#allocation37_spill] sm:$0xff] %v17763_v4  ;;  %v2813_v23 = vadd.f32 %v14379_v41, %v17322_v46  ;;  %14680 = vmatprep.mubr.msk.f32.mxu1 %vm239_vm1, %v17744_v34  ;;  %v5341_v4 = vrot.slane %v20940_v11, 4  ;;  %v17790_v58 = vpop.f32.mrf.mxu0  ;;  %v17794_v46 = vsel %vm336_vm0, %v5336_v44, %v17760_v22  ;;  %v17797_v41 = vsel %vm1475_vm3, %v5854_v52, %v5855_v62  ;;  %v17807_v47 = vld [vmem:[%s15501_s26 + $0x2c8] sm:$0xff] }
 0x1a2   : > { %v17788_v17 = vpop.f32.mrf.mxu1  ;;  %20943 = vst [vmem:[#allocation43_spill] sm:$0xff] %v17790_v58  ;;  %20944 = vst [vmem:[#allocation64_spill] sm:$0xff] %v17801_v25  ;;  %v5340_v44 = vsel %vm336_vm0, %v17760_v22, %v5339_v18  ;;  %v17815_v52 = vsel %vm1475_vm3, %v5855_v62, %v5857_v0  ;;  %v5346_v18 = vrot.slane %v17327_v24, 4  ;;  %v5864_v0 = vrot.slane %v12626_v53, 2  ;;  %v17841_v58 = vld [vmem:[%s15501_s26 + $0x2d0] sm:$0xff] }
 0x1a3   : > { %20942 = vst [vmem:[#allocation40_spill] sm:$0xff] %v17788_v17  ;;  %v17803_v11 = vadd.f32 %v14429_v49, %v2813_v23  ;;  %20946 = vst [vmem:[#allocation66_spill] sm:$0xff] %v17807_v47  ;;  %v14432_v34 = vpop.f32.mrf.mxu0  ;;  %14731 = vmatmul.mubr.msk.f32.gmra.mxu0 %vm239_vm1, %v17781_v60  ;;  %v5344_v49 = vrot.slane %v12459_v7, 4  ;;  %v5862_v23 = vrot.slane %v17801_v25, 2  ;;  %v5865_v7 = vrot.slane %v17807_v47, 2 }
 0x1a4   : > { %v14382_v17 = vpop.f32.mrf.mxu1  ;;  %14681 = vmatmul.mubr.msk.f32.gmra.mxu1 %vm239_vm1, %v5335_v33  ;;  %14733 = vmatprep.mubr.msk.f32.mxu0 %vm239_vm1, %v17797_v41  ;;  %v17824_v33 = vsel %vm336_vm0, %v5341_v4, %v17785_v1  ;;  %v12463_v4 = vld [vmem:[%s15501_s26 + $0x238] sm:$0x3f]  ;;  %20947 = vst [vmem:[#allocation67_spill] sm:$0xff] %v17841_v58 }
 0x1a5   : > { %20945 = vst [vmem:[#allocation65_spill] sm:$0xff] %v17803_v11  ;;  %v2815_v39 = vadd.f32 %v14382_v17, %v17353_v14  ;;  %14683 = vmatprep.mubr.msk.f32.mxu1 %vm239_vm1, %v17794_v46  ;;  %v17830_v62 = vpop.f32.mrf.mxu0  ;;  %v17833_v14 = vsel %vm1475_vm3, %v5859_v56, %v5860_v61  ;;  %v17836_v17 = vrot.slane %v17349_v20, 4  ;;  %v5345_v20 = vsel %vm336_vm0, %v17785_v1, %v5344_v49 }
 0x1a6   : > { %v17828_v11 = vpop.f32.mrf.mxu1  ;;  %v5349_v53 = vrot.slane %v12463_v4, 4  ;;  %v17869_v49 = vsel %vm1475_vm3, %v5864_v0, %v5865_v7  ;;  %v12573_v0 = vld [vmem:[%s15501_s26 + $0x118] sm:$0x3f] }
 0x1a7   : > { %v17843_v25 = vadd.f32 %v14432_v34, %v2815_v39  ;;  %v14435_v48 = vpop.f32.mrf.mxu0  ;;  %14734 = vmatmul.mubr.msk.f32.gmra.mxu0 %vm239_vm1, %v17815_v52  ;;  %v17856_v34 = vsel %vm1475_vm3, %v5860_v61, %v5862_v23  ;;  %v12569_v39 = vld [vmem:[%s15501_s26 + $0xf8] sm:$0x3f]  ;;  %v6731_v61 = vrot.slane %v17405_v28, 2 }
 0x1a8   : > { %v14385_v24 = vpop.f32.mrf.mxu1  ;;  %14684 = vmatmul.mubr.msk.f32.gmra.mxu1 %vm239_vm1, %v5340_v44  ;;  %14736 = vmatprep.mubr.msk.f32.mxu0 %vm239_vm1, %v17833_v14  ;;  %v5867_v44 = vrot.slane %v17841_v58, 2 }
 0x1a9   : > { %20948 = vst [vmem:[#allocation68_spill] sm:$0xff] %v17843_v25  ;;  %v2817_v56 = vadd.f32 %v14385_v24, %v17378_v35  ;;  %14686 = vmatprep.mubr.msk.f32.mxu1 %vm239_vm1, %v17824_v33  ;;  %v17862_v47 = vpop.f32.mrf.mxu0  ;;  %v17866_v35 = vsel %vm336_vm0, %v5346_v18, %v17836_v17  ;;  %v6730_v24 = vrot.slane %v17402_v12, 2  ;;  %v6214_v18 = vrot.slane %v12569_v39, 4 }
 0x1aa   : > { %v17860_v25 = vpop.f32.mrf.mxu1  ;;  %20950 = vst [vmem:[#allocation70_spill] sm:$0xff] %v17862_v47  ;;  %v5350_v12 = vsel %vm336_vm0, %v17836_v17, %v5349_v53  ;;  %v17886_v28 = vsel %vm1475_vm3, %v5865_v7, %v5867_v44  ;;  %v6735_v39 = vrot.slane %v17434_v54, 2  ;;  %v17902_v7 = vld [vmem:[%s15501_s26 + $0x1c0] sm:$0xff] }
 0x1ab   : > { %20949 = vst [vmem:[#allocation69_spill] sm:$0xff] %v17860_v25  ;;  %v17873_v23 = vadd.f32 %v14435_v48, %v2817_v56  ;;  %v14438_v58 = vpop.f32.mrf.mxu0  ;;  %14737 = vmatmul.mubr.msk.f32.gmra.mxu0 %vm239_vm1, %v17856_v34  ;;  %v6733_v48 = vrot.slane %v17412_v21, 2  ;;  %v17905_v21 = vld [vmem:[%s15501_s26 + $0x1c8] sm:$0xff]  ;;  %v6215_v54 = vsel %vm336_vm0, %v17527_v5, %v6214_v18 }
 0x1ac   : > { %v14388_v4 = vpop.f32.mrf.mxu1  ;;  %14687 = vmatmul.mubr.msk.f32.gmra.mxu1 %vm239_vm1, %v5345_v20  ;;  %14739 = vmatprep.mubr.msk.f32.mxu0 %vm239_vm1, %v17869_v49 }
 0x1ad   : > { %20951 = vst [vmem:[#allocation71_spill] sm:$0xff] %v17873_v23  ;;  %v2819_v47 = vadd.f32 %v14388_v4, %v17396_v2  ;;  %14689 = vmatprep.mubr.msk.f32.mxu1 %vm239_vm1, %v17866_v35  ;;  %v17892_v56 = vpop.f32.mrf.mxu0  ;;  %v6732_v2 = vsel %vm1475_vm3, %v6730_v24, %v6731_v61  ;;  %v6736_v4 = vrot.slane %v17437_v9, 2  ;;  %v20953_v23 = vld [vmem:[#allocation7_spill] sm:$0xff]  ;;  %v6219_v9 = vrot.slane %v12573_v0, 4 }
 0x1ae   : > { %v17890_v20 = vpop.f32.mrf.mxu1  ;;  %v2791_v53 = vadd.f32 %v17445_v36, %v20953_v23  ;;  %v6738_v36 = vrot.slane %v17440_v13, 2 }
 0x1af   : > { %20952 = vst [vmem:[#allocation72_spill] sm:$0xff] %v17890_v20  ;;  %v17899_v25 = vadd.f32 %v14438_v58, %v2819_v47  ;;  %v14441_v20 = vpop.f32.mrf.mxu0  ;;  %14740 = vmatmul.mubr.msk.f32.gmra.mxu0 %vm239_vm1, %v17886_v28  ;;  %v12577_v47 = vld [vmem:[%s15501_s26 + $0x138] sm:$0x3f]  ;;  %v20955_v58 = vld [vmem:[#allocation8_spill] sm:$0xff]  ;;  %v6737_v13 = vsel %vm1475_vm3, %v6735_v39, %v6736_v4  ;;  %v6220_v39 = vsel %vm336_vm0, %v17550_v31, %v6219_v9  ;;  %v20958_v31 = vld [vmem:[#allocation9_spill] sm:$0xff] }
 0x1b0   : > { %v14391_v44 = vpop.f32.mrf.mxu1  ;;  %14690 = vmatmul.mubr.msk.f32.gmra.mxu1 %vm239_vm1, %v5350_v12  ;;  %v2790_v24 = vadd.f32 %v17472_v32, %v20955_v58  ;;  %14794 = vmatprep.mubr.msk.f32.mxu0 %vm239_vm1, %v6732_v2  ;;  %v6734_v12 = vsel %vm1475_vm3, %v6731_v61, %v6733_v48  ;;  %v6740_v32 = vrot.slane %v17902_v7, 2  ;;  %v3310_v0 = vadd.f32 %v17447_v43, %v2791_v53  ;;  %v17937_v48 = vld [vmem:[%s15501_s26 + $0x1e0] sm:$0xff] }
 0x1b1   : > { %20954 = vst [vmem:[#allocation7_spill] sm:$0xff] %v17899_v25  ;;  %v2821_v23 = vadd.f32 %v14391_v44, %v17429_v27  ;;  %14744 = vmatprep.mubr.msk.f32.mxu1 %vm239_vm1, %v17546_v30  ;;  %v17922_v25 = vld [vmem:[%s15501_s26 + $0x1d0] sm:$0xff]  ;;  %v17926_v18 = vpop.f32.mrf.mxu0  ;;  %v6741_v27 = vrot.slane %v17905_v21, 2  ;;  %v20957_v30 = vld [vmem:[#allocation12_spill] sm:$0xff]  ;;  %v6224_v61 = vrot.slane %v12577_v47, 4  ;;  %v6739_v43 = vsel %vm1475_vm3, %v6736_v4, %v6738_v36 }
 0x1b2   : > { %v17924_v5 = vpop.f32.mrf.mxu1  ;;  %20956 = vst [vmem:[#allocation8_spill] sm:$0xff] %v17926_v18  ;;  %v2793_v2 = vadd.f32 %v17490_v40, %v20957_v30  ;;  %v6743_v53 = vrot.slane %v17922_v25, 2  ;;  %v17946_v40 = vld [vmem:[%s15501_s26 + $0x1e8] sm:$0xff]  ;;  %v3309_v47 = vadd.f32 %v17474_v15, %v2790_v24  ;;  %v2792_v4 = vadd.f32 %v17504_v19, %v20958_v31  ;;  %v12581_v36 = vld [vmem:[%s15501_s26 + $0x158] sm:$0x3f]  ;;  %v17972_v24 = vld [vmem:[%s15501_s26 + $0x1f0] sm:$0xff] }
 0x1b3   : > { %v17934_v44 = vadd.f32 %v14441_v20, %v2821_v23  ;;  %v14496_v18 = vpop.f32.mrf.mxu0  ;;  %14795 = vmatmul.mubr.msk.f32.vlgmr.msra.gmra.mxu0 %vm239_vm1, %v6734_v12  ;;  %v17951_v20 = vld [vmem:[%s20667_s3 + $0x44] sm:$0xf]  ;;  %v6742_v15 = vsel %vm1475_vm3, %v6740_v32, %v6741_v27  ;;  %v6745_v19 = vrot.slane %v17937_v48, 2  ;;  %v17980_v31 = vld [vmem:[%s15501_s26 + $0x208] sm:$0xff]  ;;  %v6229_v32 = vrot.slane %v12581_v36, 4 }
 0x1b4   : > { %v14446_v58 = vpop.f32.mrf.mxu1  ;;  %14745 = vmatmul.mubr.msk.f32.vlgmr.msra.gmra.mxu1 %vm239_vm1, %v6215_v54  ;;  %v17956_v54 = vld [vmem:[%s20667_s3 + $0x40] sm:$0xf]  ;;  %14893 = vmatpush3.msk.msra.mxu0 %vm336_vm0, %v17460_v50  ;;  %v6746_v50 = vrot.slane %v17946_v40, 2 }
 0x1b5   : > { %v3716_v9 = vadd.f32 %v14446_v58, %v3310_v0  ;;  %14843 = vmatpush3.msk.msra.mxu1 %vm336_vm0, %v17455_v3  ;;  %v3978_v12 = vpop.f32.mrf.mxu0  ;;  %14747 = vmatprep.mubr.msk.f32.mxu1 %vm239_vm1, %v17571_v63  ;;  %v3312_v0 = vadd.f32 %v17492_v42, %v2793_v2  ;;  %v17977_v58 = vld [vmem:[%s15501_s26 + $0x200] sm:$0xff]  ;;  %v6225_v42 = vsel %vm336_vm0, %v17575_v29, %v6224_v61  ;;  %v18000_v29 = vld [vmem:[%s15501_s26 + $0x210] sm:$0xff] }
 0x1b6   : > { %v3556_v23 = vpop.f32.mrf.mxu1  ;;  %14797 = vmatprep.mubr.msk.f32.mxu0 %vm239_vm1, %v6737_v13  ;;  %14942 = vmatprep.subr.msk.mxu1 %vm336_vm0, %v17951_v20  ;;  %v3311_v2 = vadd.f32 %v17506_v57, %v2792_v4  ;;  %v6750_v57 = vrot.slane %v17977_v58, 2 }
 0x1b7   : > { %v4138_v3 = vadd.f32 %v14496_v18, %v3716_v9  ;;  %v3715_v30 = vadd.f32 %v3556_v23, %v3309_v47  ;;  %14992 = vmatprep.subr.msk.mxu0 %vm336_vm0, %v17956_v54  ;;  %v14499_v13 = vpop.f32.mrf.mxu0  ;;  %14798 = vmatmul.mubr.msk.f32.gmra.mxu0 %vm239_vm1, %v6739_v43  ;;  %v6744_v18 = vsel %vm1475_vm3, %v6741_v27, %v6743_v53  ;;  %v20959_v47 = vld [vmem:[#allocation17_spill] sm:$0xff]  ;;  %v12585_v43 = vld [vmem:[%s15501_s26 + $0x178] sm:$0x3f] }
 0x1b8   : > { %v14449_v63 = vpop.f32.mrf.mxu1  ;;  %14748 = vmatmul.mubr.msk.f32.gmra.mxu1 %vm239_vm1, %v6220_v39  ;;  %v2794_v9 = vadd.f32 %v17520_v59, %v20959_v47  ;;  %v6748_v39 = vrot.slane %v17972_v24, 2  ;;  %14800 = vmatprep.mubr.msk.f32.mxu0 %vm239_vm1, %v6742_v15  ;;  %v6751_v59 = vrot.slane %v17980_v31, 2  ;;  %v6230_v15 = vsel %vm336_vm0, %v17601_v16, %v6229_v32 }
 0x1b9   : > { %v3718_v23 = vadd.f32 %v14449_v63, %v3312_v0  ;;  %4235 = vrot.lane.b32.xlu0 %v4138_v3, %s15444_s12  ;;  %14750 = vmatprep.mubr.msk.f32.mxu1 %vm239_vm1, %v17597_v37  ;;  %v3988_v61 = vpop.f32.mrf.mxu0  ;;  %v4137_v53 = vadd.f32 %v3978_v12, %v3715_v30  ;;  %v6747_v37 = vsel %vm1475_vm3, %v6745_v19, %v6746_v50  ;;  %v18007_v0 = vld [vmem:[%s15501_s26 + $0x220] sm:$0xff]  ;;  %v6234_v47 = vrot.slane %v12585_v43, 4  ;;  %v18015_v30 = vld [vmem:[%s15501_s26 + $0x228] sm:$0xff]  ;;  %v20960_v19 = vld [vmem:[#allocation10_spill] sm:$0xff] }
 0x1ba   : > { %v3566_v27 = vpop.f32.mrf.mxu1  ;;  %v6753_v12 = vrot.slane %v18000_v29, 2 }
 0x1bb   : > { %v4140_v4 = vadd.f32 %v14499_v13, %v3718_v23  ;;  %v3717_v36 = vadd.f32 %v3566_v27, %v3311_v2  ;;  %v14502_v63 = vpop.f32.mrf.mxu0  ;;  %14801 = vmatmul.mubr.msk.f32.gmra.mxu0 %vm239_vm1, %v6744_v18  ;;  %v3313_v13 = vadd.f32 %v17522_v10, %v2794_v9  ;;  %v2796_v2 = vadd.f32 %v17540_v38, %v20960_v19  ;;  %v12589_v18 = vld [vmem:[%s15501_s26 + $0x198] sm:$0x3f]  ;;  %v18025_v23 = vld [vmem:[%s15501_s26 + $0x230] sm:$0xff] }
 0x1bc   : > { %v14452_v3 = vpop.f32.mrf.mxu1  ;;  %14751 = vmatmul.mubr.msk.f32.gmra.mxu1 %vm239_vm1, %v6225_v42  ;;  %v6749_v42 = vsel %vm1475_vm3, %v6746_v50, %v6748_v39  ;;  %14803 = vmatprep.mubr.msk.f32.mxu0 %vm239_vm1, %v6747_v37  ;;  %v6752_v10 = vsel %vm1475_vm3, %v6750_v57, %v6751_v59  ;;  %v6755_v38 = vrot.slane %v18007_v0, 2  ;;  %v6756_v50 = vrot.slane %v18015_v30, 2  ;;  %v20962_v37 = vld [vmem:[#allocation14_spill] sm:$0xff]  ;;  %v20963_v19 = vld [vmem:[#allocation29_spill] sm:$0xff] }
 0x1bd   : > { %4239 = vrot.lane.b32.xlu1 %v4140_v4, %s15444_s12  ;;  %4233 = vrot.lane.b32.xlu0 %v4137_v53, %s15444_s12  ;;  %v3998_v32 = vpop.f32.mrf.mxu0  ;;  %v4139_v9 = vadd.f32 %v3988_v61, %v3717_v36  ;;  %v3720_v43 = vadd.f32 %v14452_v3, %v17530_v55  ;;  %v6754_v57 = vsel %vm1475_vm3, %v6751_v59, %v6753_v12  ;;  %v6239_v4 = vrot.slane %v12589_v18, 4  ;;  %v20961_v36 = vld [vmem:[#allocation11_spill] sm:$0xff]  ;;  %v20964_v59 = vld [vmem:[#allocation5_spill] sm:$0xff] }
 0x1be   : > { %v3576_v16 = vpop.f32.mrf.mxu1  ;;  %14753 = vmatprep.mubr.msk.f32.mxu1 %vm239_vm1, %v17621_v45  ;;  %v6235_v45 = vsel %vm336_vm0, %v17625_v6, %v6234_v47  ;;  %v6758_v61 = vrot.slane %v18025_v23, 2  ;;  %v3315_v55 = vadd.f32 %v17542_v8, %v2796_v2  ;;  %v2798_v3 = vadd.f32 %v20962_v37, %v20961_v36 }
 0x1bf   : > { %v3719_v27 = vadd.f32 %v3576_v16, %v3313_v13  ;;  %v14505_v53 = vpop.f32.mrf.mxu0  ;;  %14804 = vmatmul.mubr.msk.f32.gmra.mxu0 %vm239_vm1, %v6749_v42  ;;  %v4142_v6 = vadd.f32 %v14502_v63, %v3720_v43  ;;  %v6757_v8 = vsel %vm1475_vm3, %v6755_v38, %v6756_v50  ;;  %v20966_v43 = vld [vmem:[#allocation4_spill] sm:$0xff]  ;;  %v20969_v38 = vld [vmem:[#allocation33_spill] sm:$0xff] }
 0x1c0   : > { %v14455_v39 = vpop.f32.mrf.mxu1  ;;  %14754 = vmatmul.mubr.msk.f32.gmra.mxu1 %vm239_vm1, %v6230_v15  ;;  %v12593_v15 = vld [vmem:[%s15501_s26 + $0x1b8] sm:$0x3f]  ;;  %14806 = vmatprep.mubr.msk.f32.mxu0 %vm239_vm1, %v6752_v10  ;;  %v6759_v10 = vsel %vm1475_vm3, %v6756_v50, %v6758_v61  ;;  %v20970_v50 = vld [vmem:[#allocation16_spill] sm:$0xff] }
 0x1c1   : > { %v4141_v13 = vadd.f32 %v3998_v32, %v3719_v27  ;;  %4237 = vrot.lane.b32.xlu1 %v4139_v9, %s15444_s12  ;;  %14756 = vmatprep.mubr.msk.f32.mxu1 %vm239_vm1, %v20963_v19  ;;  %v4008_v16 = vpop.f32.mrf.mxu0  ;;  %v3722_v47 = vadd.f32 %v14455_v39, %v20964_v59  ;;  %v20965_v32 = vld [vmem:[#allocation26_spill] sm:$0xff]  ;;  %v6244_v63 = vrot.slane %v12593_v15, 4  ;;  %v3317_v27 = vadd.f32 %v20966_v43, %v2798_v3  ;;  %v20967_v39 = vld [vmem:[#allocation23_spill] sm:$0xff] }
 0x1c2   : > { %v3586_v42 = vpop.f32.mrf.mxu1  ;;  %v6240_v9 = vsel %vm336_vm0, %v20965_v32, %v6239_v4  ;;  %v20972_v59 = vld [vmem:[#allocation6_spill] sm:$0xff]  ;;  %v20974_v32 = vld [vmem:[#allocation20_spill] sm:$0xff] }
 0x1c3   : > { %v3721_v12 = vadd.f32 %v3586_v42, %v3315_v55  ;;  %4241 = vrot.lane.b32.xlu0 %v4141_v13, %s15444_s12  ;;  %v14508_v18 = vpop.f32.mrf.mxu0  ;;  %14807 = vmatmul.mubr.msk.f32.gmra.mxu0 %vm239_vm1, %v6754_v57  ;;  %v20968_v55 = vld [vmem:[#allocation15_spill] sm:$0xff]  ;;  %v4144_v4 = vadd.f32 %v14505_v53, %v3722_v47  ;;  %v20971_v42 = vld [vmem:[#allocation30_spill] sm:$0xff] }
 0x1c4   : > { %v14458_v2 = vpop.f32.mrf.mxu1  ;;  %14757 = vmatmul.mubr.msk.f32.gmra.mxu1 %vm239_vm1, %v6235_v45  ;;  %v2800_v36 = vadd.f32 %v20968_v55, %v20967_v39  ;;  %v12597_v45 = vld [vmem:[%s15501_s26 + $0x1d8] sm:$0x3f]  ;;  %14809 = vmatprep.mubr.msk.f32.mxu0 %vm239_vm1, %v6757_v8  ;;  %v20973_v8 = vld [vmem:[#allocation28_spill] sm:$0xff] }
 0x1c5   : > { %v4143_v37 = vadd.f32 %v4008_v16, %v3721_v12  ;;  %4243 = vrot.lane.b32.xlu1 %v4142_v6, %s15444_s12  ;;  %14759 = vmatprep.mubr.msk.f32.mxu1 %vm239_vm1, %v20969_v38  ;;  %v4018_v57 = vpop.f32.mrf.mxu0  ;;  %v3724_v61 = vadd.f32 %v14458_v2, %v20970_v50  ;;  %v6245_v16 = vsel %vm336_vm0, %v20971_v42, %v6244_v63  ;;  %v6249_v6 = vrot.slane %v12597_v45, 4  ;;  %v20975_v2 = vld [vmem:[#allocation55_spill] sm:$0xff]  ;;  %v12601_v43 = vld [vmem:[%s15501_s26 + $0x1f8] sm:$0x3f]  ;;  %v20976_v39 = vld [vmem:[#allocation56_spill] sm:$0xff] }
 0x1c6   : > { %v3596_v13 = vpop.f32.mrf.mxu1  ;;  %v3319_v12 = vadd.f32 %v20972_v59, %v2800_v36  ;;  %v2802_v53 = vadd.f32 %v20974_v32, %v20973_v8  ;;  %v20977_v63 = vld [vmem:[#allocation18_spill] sm:$0xff]  ;;  %v20980_v50 = vld [vmem:[#allocation21_spill] sm:$0xff] }
 0x1c7   : > { %v3723_v19 = vadd.f32 %v3596_v13, %v3317_v27  ;;  %4245 = vrot.lane.b32.xlu0 %v4143_v37, %s15444_s12  ;;  %v14511_v15 = vpop.f32.mrf.mxu0  ;;  %14810 = vmatmul.mubr.msk.f32.gmra.mxu0 %vm239_vm1, %v6759_v10  ;;  %v4146_v10 = vadd.f32 %v14508_v18, %v3724_v61  ;;  %v6250_v45 = vsel %vm336_vm0, %v17705_v51, %v6249_v6  ;;  %v6254_v13 = vrot.slane %v12601_v43, 4  ;;  %v20979_v18 = vld [vmem:[#allocation31_spill] sm:$0xff]  ;;  %v12605_v42 = vld [vmem:[%s15501_s26 + $0x218] sm:$0x3f] }
 0x1c8   : > { %v14461_v3 = vpop.f32.mrf.mxu1  ;;  %14760 = vmatmul.mubr.msk.f32.gmra.mxu1 %vm239_vm1, %v6240_v9  ;;  %14812 = vmatprep.mubr.msk.f32.mxu0 %vm239_vm1, %v20976_v39  ;;  %v2804_v61 = vadd.f32 %v20980_v50, %v20979_v18  ;;  %v20983_v6 = vld [vmem:[#allocation22_spill] sm:$0xff]  ;;  %v6259_v43 = vrot.slane %v12605_v42, 4  ;;  %v20985_v39 = vld [vmem:[#allocation35_spill] sm:$0xff]  ;;  %v18121_v50 = vld [vmem:[%s15501_s26 + $0x2f0] sm:$0xff] }
 0x1c9   : > { %v4145_v47 = vadd.f32 %v4018_v57, %v3723_v19  ;;  %4247 = vrot.lane.b32.xlu1 %v4144_v4, %s15444_s12  ;;  %14762 = vmatprep.mubr.msk.f32.mxu1 %vm239_vm1, %v20975_v2  ;;  %v4028_v9 = vpop.f32.mrf.mxu0  ;;  %v3726_v55 = vadd.f32 %v14461_v3, %v20977_v63  ;;  %v20978_v57 = vld [vmem:[#allocation19_spill] sm:$0xff]  ;;  %v20981_v3 = vld [vmem:[#allocation41_spill] sm:$0xff]  ;;  %v6255_v2 = vsel %vm336_vm0, %v17760_v22, %v6254_v13  ;;  %v12613_v18 = vld [vmem:[%s15501_s26 + $0x258] sm:$0x3f] }
 0x1ca   : > { %v3606_v27 = vpop.f32.mrf.mxu1  ;;  %v3321_v4 = vadd.f32 %v20978_v57, %v2802_v53  ;;  %v18112_v22 = vld [vmem:[%s15501_s26 + $0x2e0] sm:$0xff]  ;;  %v20989_v42 = vld [vmem:[#allocation53_spill] sm:$0xff] }
 0x1cb   : > { %v3725_v36 = vadd.f32 %v3606_v27, %v3319_v12  ;;  %4249 = vrot.lane.b32.xlu0 %v4145_v47, %s15444_s12  ;;  %v14514_v38 = vpop.f32.mrf.mxu0  ;;  %14813 = vmatmul.mubr.msk.f32.gmra.mxu0 %vm239_vm1, %v17735_v26  ;;  %v20982_v26 = vld [vmem:[#allocation60_spill] sm:$0xff]  ;;  %v4148_v51 = vadd.f32 %v14511_v15, %v3726_v55 }
 0x1cc   : > { %v14464_v37 = vpop.f32.mrf.mxu1  ;;  %14763 = vmatmul.mubr.msk.f32.gmra.mxu1 %vm239_vm1, %v6245_v16  ;;  %v12609_v16 = vld [vmem:[%s15501_s26 + $0x238] sm:$0x3f]  ;;  %14815 = vmatprep.mubr.msk.f32.mxu0 %vm239_vm1, %v20982_v26  ;;  %v20984_v27 = vld [vmem:[#allocation24_spill] sm:$0xff] }
 0x1cd   : > { %v4147_v19 = vadd.f32 %v4028_v9, %v3725_v36  ;;  %4251 = vrot.lane.b32.xlu1 %v4146_v10, %s15444_s12  ;;  %14765 = vmatprep.mubr.msk.f32.mxu1 %vm239_vm1, %v20981_v3  ;;  %v4038_v12 = vpop.f32.mrf.mxu0  ;;  %v3728_v8 = vadd.f32 %v14464_v37, %v20983_v6  ;;  %v6264_v15 = vrot.slane %v12609_v16, 4  ;;  %v3323_v9 = vadd.f32 %v20984_v27, %v2804_v61  ;;  %v20986_v10 = vld [vmem:[#allocation52_spill] sm:$0xff] }
 0x1ce   : > { %v3616_v59 = vpop.f32.mrf.mxu1  ;;  %v2806_v63 = vadd.f32 %v20986_v10, %v20985_v39 }
 0x1cf   : > { %v3727_v32 = vadd.f32 %v3616_v59, %v3321_v4  ;;  %4253 = vrot.lane.b32.xlu0 %v4147_v19, %s15444_s12  ;;  %v14517_v47 = vpop.f32.mrf.mxu0  ;;  %14816 = vmatmul.mubr.msk.f32.gmra.mxu0 %vm239_vm1, %v17781_v60  ;;  %v4150_v37 = vadd.f32 %v14514_v38, %v3728_v8  ;;  %v18117_v4 = vld [vmem:[%s15501_s26 + $0x2e8] sm:$0xff]  ;;  %v6265_v38 = vsel %vm336_vm0, %v17836_v17, %v6264_v15  ;;  %v20988_v19 = vld [vmem:[#allocation27_spill] sm:$0xff]  ;;  %v20990_v59 = vld [vmem:[#allocation38_spill] sm:$0xff]  ;;  %v6269_v15 = vrot.slane %v12613_v18, 4 }
 0x1d0   : > { %v14467_v53 = vpop.f32.mrf.mxu1  ;;  %14766 = vmatmul.mubr.msk.f32.gmra.mxu1 %vm239_vm1, %v6250_v45  ;;  %14818 = vmatprep.mubr.msk.f32.mxu0 %vm239_vm1, %v17797_v41  ;;  %v20987_v45 = vld [vmem:[#allocation25_spill] sm:$0xff]  ;;  %v6260_v41 = vsel %vm336_vm0, %v17785_v1, %v6259_v43  ;;  %v6266_v3 = vrot.slane %v20988_v19, 4  ;;  %v3325_v16 = vadd.f32 %v20989_v42, %v2806_v63  ;;  %v18141_v1 = vld [vmem:[%s15501_s26 + $0x300] sm:$0xff]  ;;  %v18144_v8 = vld [vmem:[%s15501_s26 + $0x308] sm:$0xff]  ;;  %v6786_v43 = vrot.slane %v18117_v4, 2 }
 0x1d1   : > { %v4149_v55 = vadd.f32 %v4038_v12, %v3727_v32  ;;  %4255 = vrot.lane.b32.xlu1 %v4148_v51, %s15444_s12  ;;  %14768 = vmatprep.mubr.msk.f32.mxu1 %vm239_vm1, %v17794_v46  ;;  %v4048_v36 = vpop.f32.mrf.mxu0  ;;  %v3730_v13 = vadd.f32 %v14467_v53, %v20987_v45  ;;  %v20991_v12 = vld [vmem:[#allocation36_spill] sm:$0xff]  ;;  %v12617_v17 = vld [vmem:[%s15501_s26 + $0x278] sm:$0x3f]  ;;  %v6791_v45 = vrot.slane %v18144_v8, 2 }
 0x1d2   : > { %v3626_v60 = vpop.f32.mrf.mxu1  ;;  %v2808_v26 = vadd.f32 %v20991_v12, %v20990_v59  ;;  %v20994_v63 = vld [vmem:[#allocation32_spill] sm:$0xff]  ;;  %v20998_v19 = vld [vmem:[#allocation62_spill] sm:$0xff] }
 0x1d3   : > { %v3729_v57 = vadd.f32 %v3626_v60, %v3323_v9  ;;  %4257 = vrot.lane.b32.xlu0 %v4149_v55, %s15444_s12  ;;  %v14520_v61 = vpop.f32.mrf.mxu0  ;;  %14819 = vmatmul.mubr.msk.f32.gmra.mxu0 %vm239_vm1, %v17815_v52  ;;  %v20992_v52 = vld [vmem:[#allocation51_spill] sm:$0xff]  ;;  %v4152_v27 = vadd.f32 %v14517_v47, %v3730_v13  ;;  %v20993_v9 = vld [vmem:[#allocation54_spill] sm:$0xff]  ;;  %v6271_v55 = vrot.slane %v20994_v63, 4  ;;  %v6790_v47 = vrot.slane %v18141_v1, 2  ;;  %v21003_v63 = vld [vmem:[#allocation44_spill] sm:$0xff] }
 0x1d4   : > { %v14470_v46 = vpop.f32.mrf.mxu1  ;;  %14769 = vmatmul.mubr.msk.f32.gmra.mxu1 %vm239_vm1, %v6255_v2  ;;  %v18138_v6 = vrot.slane %v20992_v52, 4  ;;  %14821 = vmatprep.mubr.msk.f32.mxu0 %vm239_vm1, %v17833_v14  ;;  %v6785_v2 = vrot.slane %v18112_v22, 2  ;;  %v20995_v14 = vld [vmem:[#allocation57_spill] sm:$0xff]  ;;  %v6274_v13 = vrot.slane %v12617_v17, 4  ;;  %v20999_v17 = vld [vmem:[#allocation58_spill] sm:$0xff] }
 0x1d5   : > { %v4151_v51 = vadd.f32 %v4048_v36, %v3729_v57  ;;  %4259 = vrot.lane.b32.xlu1 %v4150_v37, %s15444_s12  ;;  %14771 = vmatprep.mubr.msk.f32.mxu1 %vm239_vm1, %v17824_v33  ;;  %v4058_v53 = vpop.f32.mrf.mxu0  ;;  %v6788_v33 = vrot.slane %v18121_v50, 2  ;;  %v3732_v39 = vadd.f32 %v14470_v46, %v20993_v9  ;;  %v18159_v37 = vrot.slane %v20995_v14, 4  ;;  %v20996_v57 = vld [vmem:[#allocation34_spill] sm:$0xff] }
 0x1d6   : > { %v3636_v32 = vpop.f32.mrf.mxu1  ;;  %v3327_v18 = vadd.f32 %v20996_v57, %v2808_v26  ;;  %v20997_v46 = vld [vmem:[#allocation42_spill] sm:$0xff]  ;;  %v18176_v12 = vsel %vm336_vm0, %v6266_v3, %v18138_v6  ;;  %v6787_v26 = vsel %vm1475_vm3, %v6785_v2, %v6786_v43  ;;  %v6792_v2 = vsel %vm1475_vm3, %v6790_v47, %v6791_v45 }
 0x1d7   : > { %v3731_v10 = vadd.f32 %v3636_v32, %v3325_v16  ;;  %4261 = vrot.lane.b32.xlu0 %v4151_v51, %s15444_s12  ;;  %v14523_v36 = vpop.f32.mrf.mxu0  ;;  %14822 = vmatmul.mubr.msk.f32.gmra.mxu0 %vm239_vm1, %v17856_v34  ;;  %v2810_v42 = vadd.f32 %v20998_v19, %v20997_v46  ;;  %v18170_v34 = vld [vmem:[%s15501_s26 + $0x310] sm:$0xff]  ;;  %v6270_v51 = vsel %vm336_vm0, %v18138_v6, %v6269_v15 }
 0x1d8   : > { %v14473_v60 = vpop.f32.mrf.mxu1  ;;  %14772 = vmatmul.mubr.msk.f32.gmra.mxu1 %vm239_vm1, %v6260_v41  ;;  %14824 = vmatprep.mubr.msk.f32.mxu0 %vm239_vm1, %v17869_v49  ;;  %v4154_v52 = vadd.f32 %v14520_v61, %v3732_v39  ;;  %v18188_v49 = vld [vmem:[%s15501_s26 + $0x328] sm:$0xff]  ;;  %v18195_v61 = vsel %vm336_vm0, %v6271_v55, %v18159_v37  ;;  %v6793_v15 = vrot.slane %v18170_v34, 2  ;;  %v21002_v39 = vld [vmem:[#allocation63_spill] sm:$0xff] }
 0x1d9   : > { %v4153_v16 = vadd.f32 %v4058_v53, %v3731_v10  ;;  %4263 = vrot.lane.b32.xlu1 %v4152_v27, %s15444_s12  ;;  %14774 = vmatprep.mubr.msk.f32.mxu1 %vm239_vm1, %v17866_v35  ;;  %v4068_v59 = vpop.f32.mrf.mxu0  ;;  %v3734_v35 = vadd.f32 %v14473_v60, %v20999_v17  ;;  %v6789_v53 = vsel %vm1475_vm3, %v6786_v43, %v6788_v33  ;;  %v18185_v27 = vld [vmem:[%s15501_s26 + $0x320] sm:$0xff]  ;;  %v12621_v33 = vld [vmem:[%s15501_s26 + $0x298] sm:$0x3f]  ;;  %v21004_v60 = vld [vmem:[#allocation40_spill] sm:$0xff] }
 0x1da   : > { %v3646_v41 = vpop.f32.mrf.mxu1  ;;  %21000 = vst [vmem:[#allocation12_spill] sm:$0xff] %v18185_v27  ;;  %21001 = vst [vmem:[#allocation9_spill] sm:$0xff] %v18188_v49  ;;  %v6275_v43 = vsel %vm336_vm0, %v18159_v37, %v6274_v13  ;;  %v3329_v10 = vadd.f32 %v21002_v39, %v2810_v42  ;;  %v21006_v13 = vld [vmem:[#allocation59_spill] sm:$0xff]  ;;  %v6795_v19 = vrot.slane %v18185_v27, 2  ;;  %v6796_v42 = vrot.slane %v18188_v49, 2 }
 0x1db   : > { %v3733_v32 = vadd.f32 %v3646_v41, %v3327_v18  ;;  %4265 = vrot.lane.b32.xlu0 %v4153_v16, %s15444_s12  ;;  %v14526_v9 = vpop.f32.mrf.mxu0  ;;  %14825 = vmatmul.mubr.msk.f32.gmra.mxu0 %vm239_vm1, %v17886_v28  ;;  %v18209_v28 = vld [vmem:[%s15501_s26 + $0x330] sm:$0xff]  ;;  %v6276_v57 = vrot.slane %v21006_v13, 4  ;;  %v4156_v16 = vadd.f32 %v14523_v36, %v3734_v35  ;;  %v6279_v17 = vrot.slane %v12621_v33, 4  ;;  %v12701_v49 = vld [vmem:[%s15501_s26 + $0x198] sm:$0x3f] }
 0x1dc   : > { %v14476_v3 = vpop.f32.mrf.mxu1  ;;  %14775 = vmatmul.mubr.msk.f32.gmra.mxu1 %vm239_vm1, %v6265_v38  ;;  %v2812_v38 = vadd.f32 %v21004_v60, %v21003_v63  ;;  %21005 = vst [vmem:[#allocation17_spill] sm:$0xff] %v18209_v28  ;;  %14827 = vmatprep.mubr.msk.f32.mxu0 %vm239_vm1, %v6787_v26  ;;  %v21007_v18 = vld [vmem:[#allocation61_spill] sm:$0xff]  ;;  %v18224_v26 = vld [vmem:[%s15501_s26 + $0x348] sm:$0xff]  ;;  %v6794_v36 = vsel %vm1475_vm3, %v6791_v45, %v6793_v15  ;;  %v6798_v35 = vrot.slane %v18209_v28, 2  ;;  %v12625_v45 = vld [vmem:[%s15501_s26 + $0x2b8] sm:$0x3f] }
 0x1dd   : > { %v4155_v14 = vadd.f32 %v4068_v59, %v3733_v32  ;;  %4267 = vrot.lane.b32.xlu1 %v4154_v52, %s15444_s12  ;;  %14777 = vmatprep.mubr.msk.f32.mxu1 %vm239_vm1, %v18176_v12  ;;  %v4078_v47 = vpop.f32.mrf.mxu0  ;;  %v18214_v46 = vrot.slane %v21007_v18, 4  ;;  %v21008_v41 = vld [vmem:[#allocation37_spill] sm:$0xff]  ;;  %v18221_v32 = vld [vmem:[%s15501_s26 + $0x340] sm:$0xff]  ;;  %21010 = vst [vmem:[#allocation11_spill] sm:$0xff] %v18224_v26  ;;  %v21012_v60 = vld [vmem:[#allocation64_spill] sm:$0xff] }
 0x1de   : > { %v3656_v55 = vpop.f32.mrf.mxu1  ;;  %v3736_v59 = vadd.f32 %v14476_v3, %v21008_v41  ;;  %21009 = vst [vmem:[#allocation10_spill] sm:$0xff] %v18221_v32  ;;  %v21011_v3 = vld [vmem:[#allocation39_spill] sm:$0xff]  ;;  %v18232_v33 = vrot.slane %v21012_v60, 4  ;;  %v21014_v13 = vld [vmem:[#allocation45_spill] sm:$0xff] }
 0x1df   : > { %v3735_v52 = vadd.f32 %v3656_v55, %v3329_v10  ;;  %4269 = vrot.lane.b32.xlu0 %v4155_v14, %s15444_s12  ;;  %v14529_v63 = vpop.f32.mrf.mxu0  ;;  %14828 = vmatmul.mubr.msk.f32.gmra.mxu0 %vm239_vm1, %v6789_v53  ;;  %v6281_v10 = vrot.slane %v21011_v3, 4  ;;  %v21013_v14 = vld [vmem:[#allocation43_spill] sm:$0xff]  ;;  %v2814_v18 = vadd.f32 %v17828_v11, %v21014_v13  ;;  %v6797_v11 = vsel %vm1475_vm3, %v6795_v19, %v6796_v42  ;;  %v21016_v3 = vld [vmem:[#allocation65_spill] sm:$0xff] }
 0x1e0   : > { %v14479_v39 = vpop.f32.mrf.mxu1  ;;  %14778 = vmatmul.mubr.msk.f32.gmra.mxu1 %vm239_vm1, %v6270_v51  ;;  %v3331_v55 = vadd.f32 %v21013_v14, %v2812_v38  ;;  %v18242_v51 = vld [vmem:[%s15501_s26 + $0x350] sm:$0xff]  ;;  %14830 = vmatprep.mubr.msk.f32.mxu0 %vm239_vm1, %v6792_v2  ;;  %v18247_v38 = vsel %vm336_vm0, %v6276_v57, %v18214_v46  ;;  %v6280_v2 = vsel %vm336_vm0, %v18214_v46, %v6279_v17  ;;  %v18257_v13 = vld [vmem:[%s15501_s26 + $0x360] sm:$0xff]  ;;  %v18268_v17 = vld [vmem:[%s15501_s26 + $0x368] sm:$0xff] }
 0x1e1   : > { %v4157_v41 = vadd.f32 %v4078_v47, %v3735_v52  ;;  %4271 = vrot.lane.b32.xlu1 %v4156_v16, %s15444_s12  ;;  %14780 = vmatprep.mubr.msk.f32.mxu1 %vm239_vm1, %v18195_v61  ;;  %21015 = vst [vmem:[#allocation14_spill] sm:$0xff] %v18242_v51  ;;  %v4088_v15 = vpop.f32.mrf.mxu0  ;;  %v6800_v47 = vrot.slane %v18221_v32, 2  ;;  %v6801_v16 = vrot.slane %v18224_v26, 2  ;;  %v4158_v52 = vadd.f32 %v14526_v9, %v3736_v59 }
 0x1e2   : > { %v3666_v53 = vpop.f32.mrf.mxu1  ;;  %v3738_v60 = vadd.f32 %v14479_v39, %v21016_v3  ;;  %v6799_v9 = vsel %vm1475_vm3, %v6796_v42, %v6798_v35  ;;  %v18264_v59 = vsel %vm336_vm0, %v6281_v10, %v18232_v33  ;;  %v6284_v39 = vrot.slane %v12625_v45, 4  ;;  %v21018_v3 = vld [vmem:[#allocation69_spill] sm:$0xff]  ;;  %v21021_v45 = vld [vmem:[#allocation67_spill] sm:$0xff] }
 0x1e3   : > { %v3737_v14 = vadd.f32 %v3666_v53, %v3331_v55  ;;  %4273 = vrot.lane.b32.xlu0 %v4157_v41, %s15444_s12  ;;  %v14532_v19 = vpop.f32.mrf.mxu0  ;;  %14831 = vmatmul.mubr.msk.f32.gmra.mxu0 %vm239_vm1, %v6794_v36  ;;  %v6803_v55 = vrot.slane %v18242_v51, 2  ;;  %v3333_v41 = vadd.f32 %v17830_v62, %v2814_v18  ;;  %v21017_v53 = vld [vmem:[#allocation46_spill] sm:$0xff]  ;;  %v18278_v42 = vld [vmem:[%s15501_s26 + $0x370] sm:$0xff]  ;;  %v6802_v10 = vsel %vm1475_vm3, %v6800_v47, %v6801_v16 }
 0x1e4   : > { %v14482_v57 = vpop.f32.mrf.mxu1  ;;  %14781 = vmatmul.mubr.msk.f32.gmra.mxu1 %vm239_vm1, %v6275_v43  ;;  %v2816_v26 = vadd.f32 %v21018_v3, %v21017_v53  ;;  %v12629_v43 = vld [vmem:[%s15501_s26 + $0x2d8] sm:$0x3f]  ;;  %21019 = vst [vmem:[#allocation29_spill] sm:$0xff] %v18278_v42  ;;  %14833 = vmatprep.mubr.msk.f32.mxu0 %vm239_vm1, %v6797_v11  ;;  %v18284_v53 = vrot.slane %v21021_v45, 4  ;;  %v6806_v28 = vrot.slane %v18268_v17, 2  ;;  %v6285_v47 = vsel %vm336_vm0, %v18232_v33, %v6284_v39  ;;  %v15401_v39 = vld [vmem:[%s15501_s26 + $0x188] sm:$0xff] }
 0x1e5   : > { %v4159_v32 = vadd.f32 %v4088_v15, %v3737_v14  ;;  %4275 = vrot.lane.b32.xlu1 %v4158_v52, %s15444_s12  ;;  %14783 = vmatprep.mubr.msk.f32.mxu1 %vm239_vm1, %v18247_v38  ;;  %v4098_v35 = vpop.f32.mrf.mxu0  ;;  %v21020_v62 = vld [vmem:[#allocation66_spill] sm:$0xff]  ;;  %v6805_v15 = vrot.slane %v18257_v13, 2  ;;  %v4160_v52 = vadd.f32 %v14529_v63, %v3738_v60  ;;  %v21022_v14 = vld [vmem:[#allocation68_spill] sm:$0xff]  ;;  %v6804_v63 = vsel %vm1475_vm3, %v6801_v16, %v6803_v55 }
 0x1e6   : > { %v3676_v36 = vpop.f32.mrf.mxu1  ;;  %v6286_v18 = vrot.slane %v21020_v62, 4  ;;  %v3740_v3 = vadd.f32 %v14482_v57, %v21022_v14  ;;  %v6289_v60 = vrot.slane %v12629_v43, 4  ;;  %v6808_v57 = vrot.slane %v18278_v42, 2  ;;  %v21025_v62 = vld [vmem:[#allocation72_spill] sm:$0xff] }
 0x1e7   : > { %v3739_v51 = vadd.f32 %v3676_v36, %v3333_v41  ;;  %4277 = vrot.lane.b32.xlu0 %v4159_v32, %s15444_s12  ;;  %v14535_v11 = vpop.f32.mrf.mxu0  ;;  %14834 = vmatmul.mubr.msk.f32.gmra.mxu0 %vm239_vm1, %v6799_v9  ;;  %v21023_v32 = vld [vmem:[#allocation70_spill] sm:$0xff]  ;;  %v21024_v36 = vld [vmem:[#allocation47_spill] sm:$0xff]  ;;  %v7558_v55 = vrot.slane %v15401_v39, 4 }
 0x1e8   : > { %v14485_v27 = vpop.f32.mrf.mxu1  ;;  %14784 = vmatmul.mubr.msk.f32.gmra.mxu1 %vm239_vm1, %v6280_v2  ;;  %v3335_v41 = vadd.f32 %v21023_v32, %v2816_v26  ;;  %v2818_v45 = vadd.f32 %v21025_v62, %v21024_v36  ;;  %14836 = vmatprep.mubr.msk.f32.mxu0 %vm239_vm1, %v6802_v10  ;;  %v18306_v16 = vsel %vm336_vm0, %v6286_v18, %v18284_v53  ;;  %v15402_v26 = vld [vmem:[%s15501_s26 + $0x190] sm:$0xff]  ;;  %v7561_v32 = vrot.slane %v12701_v49, 4 }
 0x1e9   : > { %v4161_v14 = vadd.f32 %v4098_v35, %v3739_v51  ;;  %4279 = vrot.lane.b32.xlu1 %v4160_v52, %s15444_s12  ;;  %14786 = vmatprep.mubr.msk.f32.mxu1 %vm239_vm1, %v18264_v59  ;;  %v4108_v9 = vpop.f32.mrf.mxu0  ;;  %v7559_v43 = vrot.slane %v15402_v26, 4  ;;  %v4162_v36 = vadd.f32 %v14532_v19, %v3740_v3  ;;  %v21026_v51 = vld [vmem:[#allocation71_spill] sm:$0xff]  ;;  %v6807_v62 = vsel %vm1475_vm3, %v6805_v15, %v6806_v28  ;;  %v12705_v15 = vld [vmem:[%s15501_s26 + $0x1b8] sm:$0x3f]  ;;  %v15404_v26 = vld [vmem:[%s15501_s26 + $0x1b0] sm:$0xff] }
 0x1ea   : > { %v3686_v2 = vpop.f32.mrf.mxu1  ;;  %v3742_v35 = vadd.f32 %v14485_v27, %v21026_v51  ;;  %v6290_v18 = vsel %vm336_vm0, %v18284_v53, %v6289_v60  ;;  %v6809_v49 = vsel %vm1475_vm3, %v6806_v28, %v6808_v57  ;;  %v3337_v19 = vadd.f32 %v17892_v56, %v2818_v45  ;;  %v21027_v27 = vld [vmem:[#allocation50_spill] sm:$0xff]  ;;  %v21028_v57 = vld [vmem:[#allocation7_spill] sm:$0xff] }
 0x1eb   : > { %v3741_v52 = vadd.f32 %v3686_v2, %v3335_v41  ;;  %4281 = vrot.lane.b32.xlu0 %v4161_v14, %s15444_s12  ;;  %v14538_v10 = vpop.f32.mrf.mxu0  ;;  %14837 = vmatmul.mubr.msk.f32.gmra.mxu0 %vm239_vm1, %v6804_v63  ;;  %v2820_v3 = vadd.f32 %v17924_v5, %v21027_v27  ;;  %v7560_v28 = vsel %vm336_vm0, %v7558_v55, %v7559_v43  ;;  %v15403_v14 = vld [vmem:[%s15501_s26 + $0x1a8] sm:$0xff]  ;;  %v7566_v55 = vrot.slane %v12705_v15, 4 }
 0x1ec   : > { %v14488_v42 = vpop.f32.mrf.mxu1  ;;  %14787 = vmatmul.mubr.msk.f32.gmra.mxu1 %vm239_vm1, %v6285_v47  ;;  %14839 = vmatprep.mubr.msk.f32.mxu0 %vm239_vm1, %v6807_v62  ;;  %v7562_v60 = vsel %vm336_vm0, %v7559_v43, %v7561_v32  ;;  %v4164_v56 = vadd.f32 %v14535_v11, %v3742_v35  ;;  %v7563_v2 = vrot.slane %v15403_v14, 4  ;;  %v7146_v43 = vrot.slane %v17902_v7, 7  ;;  %v21030_v35 = vld [vmem:[#allocation48_spill] sm:$0xff]  ;;  %v21032_v14 = vld [vmem:[#allocation13_spill] sm:$0xff] }
 0x1ed   : > { %v4163_v41 = vadd.f32 %v4108_v9, %v3741_v52  ;;  %4283 = vrot.lane.b32.xlu1 %v4162_v36, %s15444_s12  ;;  %14789 = vmatprep.mubr.msk.f32.mxu1 %vm239_vm1, %v18306_v16  ;;  %v4118_v63 = vpop.f32.mrf.mxu0  ;;  %v3744_v45 = vadd.f32 %v14488_v42, %v21028_v57  ;;  %v7564_v36 = vrot.slane %v15404_v26, 4  ;;  %v7147_v11 = vrot.slane %v17905_v21, 7  ;;  %v21029_v42 = vld [vmem:[#allocation8_spill] sm:$0xff] }
 0x1ee   : > { %v3696_v47 = vpop.f32.mrf.mxu1  ;;  %v3339_v32 = vadd.f32 %v21029_v42, %v2820_v3  ;;  %v7568_v52 = vrot.slane %v17905_v21, 4  ;;  %v7569_v62 = vrot.slane %v17922_v25, 4  ;;  %v7149_v3 = vrot.slane %v17922_v25, 7 }
 0x1ef   : > { %v3743_v5 = vadd.f32 %v3696_v47, %v3337_v19  ;;  %4285 = vrot.lane.b32.xlu0 %v4163_v41, %s15444_s12  ;;  %v14541_v39 = vpop.f32.mrf.mxu0  ;;  %14840 = vmatmul.mubr.msk.f32.gmra.mxu0 %vm239_vm1, %v6809_v49  ;;  %v4166_v7 = vadd.f32 %v14538_v10, %v3744_v45  ;;  %v7565_v21 = vsel %vm336_vm0, %v7563_v2, %v7564_v36  ;;  %v12713_v45 = vld [vmem:[%s15501_s26 + $0x1f8] sm:$0x3f]  ;;  %v7151_v2 = vrot.slane %v17937_v48, 7 }
 0x1f0   : > { %v14491_v9 = vpop.f32.mrf.mxu1  ;;  %14790 = vmatmul.mubr.msk.f32.gmra.mxu1 %vm239_vm1, %v6290_v18  ;;  %v12709_v18 = vld [vmem:[%s15501_s26 + $0x1d8] sm:$0x3f]  ;;  %14894 = vmatprep.mubr.msk.f32.mxu0 %vm239_vm1, %v7560_v28  ;;  %v7567_v28 = vsel %vm336_vm0, %v7564_v36, %v7566_v55  ;;  %v7148_v10 = vsel %vm792_vm2, %v7146_v43, %v7147_v11  ;;  %v7570_v25 = vsel %vm336_vm0, %v7568_v52, %v7569_v62  ;;  %v7573_v26 = vrot.slane %v17946_v40, 4  ;;  %v18376_v43 = vld [vmem:[%s20667_s3 + $0x48] sm:$0xf] }
 0x1f1   : > { %v4165_v51 = vadd.f32 %v4118_v63, %v3743_v5  ;;  %4287 = vrot.lane.b32.xlu1 %v4164_v56, %s15444_s12  ;;  %14844 = vmatprep.mubr.msk.f32.mxu1 %vm239_vm1, %v21030_v35  ;;  %v4128_v19 = vpop.f32.mrf.mxu0  ;;  %v3746_v27 = vadd.f32 %v14491_v9, %v17934_v44  ;;  %v21031_v63 = vld [vmem:[#allocation49_spill] sm:$0xff]  ;;  %v7571_v44 = vrot.slane %v12709_v18, 4  ;;  %v7152_v9 = vrot.slane %v17946_v40, 7  ;;  %v18387_v35 = vld [vmem:[%s20667_s3 + $0x4c] sm:$0xf] }
 0x1f2   : > { %v3706_v49 = vpop.f32.mrf.mxu1  ;;  %v7157_v18 = vrot.slane %v17980_v31, 7 }
 0x1f3   : > { %v3745_v41 = vadd.f32 %v3706_v49, %v3339_v32  ;;  %4289 = vrot.lane.b32.xlu0 %v4165_v51, %s15444_s12  ;;  %v14596_v47 = vpop.f32.mrf.mxu0  ;;  %14895 = vmatmul.mubr.msk.f32.vlgmr.msra.gmra.mxu0 %vm239_vm1, %v7562_v60  ;;  %v4168_v36 = vadd.f32 %v14541_v39, %v3746_v27  ;;  %v21033_v32 = vld [vmem:[#allocation3_spill] sm:$0xff]  ;;  %v7572_v40 = vsel %vm336_vm0, %v7569_v62, %v7571_v44  ;;  %v7154_v39 = vrot.slane %v17972_v24, 7  ;;  %v12717_v27 = vld [vmem:[%s15501_s26 + $0x218] sm:$0x3f] }
 0x1f4   : > { %v14546_v15 = vpop.f32.mrf.mxu1  ;;  %14845 = vmatmul.mubr.msk.f32.vlgmr.msra.gmra.mxu1 %vm239_vm1, %v21031_v63  ;;  %14993 = vmatpush3.msk.msra.mxu0 %vm336_vm0, %v17956_v54  ;;  %v7150_v54 = vsel %vm792_vm2, %v7147_v11, %v7149_v3  ;;  %v7576_v51 = vrot.slane %v12713_v45, 4  ;;  %v7156_v11 = vrot.slane %v17977_v58, 7  ;;  %v7578_v62 = vrot.slane %v17980_v31, 4 }
 0x1f5   : > { %v4167_v56 = vadd.f32 %v4128_v19, %v3745_v41  ;;  %v18353_v57 = vadd.f32 %v14596_v47, %v14546_v15  ;;  %14943 = vmatpush3.msk.msra.mxu1 %vm336_vm0, %v17951_v20  ;;  %4291 = vrot.lane.b32.xlu1 %v4166_v7, %s15444_s12  ;;  %v5096_v60 = vpop.f32.mrf.mxu0  ;;  %v7574_v20 = vrot.slane %v17972_v24, 4  ;;  %v7579_v24 = vrot.slane %v18000_v29, 4 }
 0x1f6   : > { %v4804_v5 = vpop.f32.mrf.mxu1  ;;  %14847 = vmatprep.mubr.msk.f32.mxu1 %vm239_vm1, %v21032_v14  ;;  %14897 = vmatprep.mubr.msk.f32.mxu0 %vm239_vm1, %v7565_v21  ;;  %v7153_v58 = vsel %vm792_vm2, %v7151_v2, %v7152_v9  ;;  %v7155_v15 = vsel %vm792_vm2, %v7152_v9, %v7154_v39  ;;  %v7159_v63 = vrot.slane %v18000_v29, 7  ;;  %v7581_v44 = vrot.slane %v12717_v27, 4  ;;  %v12721_v14 = vld [vmem:[%s15501_s26 + $0x238] sm:$0x3f]  ;;  %v15405_v39 = vld [vmem:[%s15501_s26 + $0x240] sm:$0xff] }
 0x1f7   : > { %v18368_v55 = vadd.f32 %v5096_v60, %v4804_v5  ;;  %4293 = vrot.lane.b32.xlu0 %v4167_v56, %s15444_s12  ;;  %v14599_v42 = vpop.f32.mrf.mxu0  ;;  %14898 = vmatmul.mubr.msk.f32.gmra.mxu0 %vm239_vm1, %v7567_v28  ;;  %v7575_v7 = vsel %vm336_vm0, %v7573_v26, %v7574_v20  ;;  %v7577_v47 = vsel %vm336_vm0, %v7574_v20, %v7576_v51  ;;  %v7161_v45 = vrot.slane %v18007_v0, 7 }
 0x1f8   : > { %v14549_v48 = vpop.f32.mrf.mxu1  ;;  %14848 = vmatmul.mubr.msk.f32.gmra.mxu1 %vm239_vm1, %v21033_v32  ;;  %14900 = vmatprep.mubr.msk.f32.mxu0 %vm239_vm1, %v7570_v25  ;;  %v7158_v28 = vsel %vm792_vm2, %v7156_v11, %v7157_v18  ;;  %v7162_v5 = vrot.slane %v18015_v30, 7  ;;  %v7583_v60 = vrot.slane %v18015_v30, 4  ;;  %v7584_v29 = vrot.slane %v18025_v23, 4  ;;  %v15406_v11 = vld [vmem:[%s15501_s26 + $0x248] sm:$0xff] }
 0x1f9   : > { %v18389_v52 = vadd.f32 %v14599_v42, %v14549_v48  ;;  %4295 = vrot.lane.b32.xlu1 %v4168_v36, %s15444_s12  ;;  %14850 = vmatprep.mubr.msk.f32.mxu1 %vm239_vm1, %v7148_v10  ;;  %v5106_v19 = vpop.f32.mrf.mxu0  ;;  %v7580_v10 = vsel %vm336_vm0, %v7578_v62, %v7579_v24  ;;  %v7160_v0 = vsel %vm792_vm2, %v7157_v18, %v7159_v63  ;;  %v7164_v36 = vrot.slane %v18025_v23, 7  ;;  %v12725_v62 = vld [vmem:[%s15501_s26 + $0x258] sm:$0x3f]  ;;  %v15407_v23 = vld [vmem:[%s15501_s26 + $0x250] sm:$0xff] }
 0x1fa   : > { %v4814_v49 = vpop.f32.mrf.mxu1  ;;  %15042 = vmatprep.subr.msk.mxu1 %vm336_vm0, %v18376_v43  ;;  %15092 = vmatprep.subr.msk.mxu0 %vm336_vm0, %v18387_v35  ;;  %v7582_v30 = vsel %vm336_vm0, %v7579_v24, %v7581_v44  ;;  %v7163_v32 = vsel %vm792_vm2, %v7161_v45, %v7162_v5  ;;  %v7166_v51 = vrot.slane %v15405_v39, 7  ;;  %v7167_v18 = vrot.slane %v15406_v11, 7  ;;  %v15409_v44 = vld [vmem:[%s15501_s26 + $0x268] sm:$0xff] }
 0x1fb   : > { %v18402_v41 = vadd.f32 %v5106_v19, %v4814_v49  ;;  %v14602_v3 = vpop.f32.mrf.mxu0  ;;  %14901 = vmatmul.mubr.msk.f32.gmra.mxu0 %vm239_vm1, %v7572_v40  ;;  %v7585_v40 = vsel %vm336_vm0, %v7583_v60, %v7584_v29  ;;  %v7165_v27 = vsel %vm792_vm2, %v7162_v5, %v7164_v36  ;;  %v12733_v36 = vld [vmem:[%s15501_s26 + $0x298] sm:$0x3f]  ;;  %v15412_v39 = vld [vmem:[%s15501_s26 + $0x288] sm:$0xff] }
 0x1fc   : > { %v14552_v31 = vpop.f32.mrf.mxu1  ;;  %14851 = vmatmul.mubr.msk.f32.gmra.mxu1 %vm239_vm1, %v7150_v54  ;;  %14903 = vmatprep.mubr.msk.f32.mxu0 %vm239_vm1, %v7575_v7  ;;  %v7586_v54 = vrot.slane %v12721_v14, 4  ;;  %v7168_v63 = vsel %vm792_vm2, %v7166_v51, %v7167_v18  ;;  %v7177_v51 = vrot.slane %v15412_v39, 7 }
 0x1fd   : > { %v18411_v21 = vadd.f32 %v14602_v3, %v14552_v31  ;;  %14853 = vmatprep.mubr.msk.f32.mxu1 %vm239_vm1, %v7153_v58  ;;  %v5116_v25 = vpop.f32.mrf.mxu0  ;;  %v7169_v58 = vrot.slane %v15407_v23, 7  ;;  %v7591_v3 = vrot.slane %v12725_v62, 4 }
 0x1fe   : > { %v4824_v56 = vpop.f32.mrf.mxu1  ;;  %v7587_v31 = vsel %vm336_vm0, %v7584_v29, %v7586_v54 }
 0x1ff   : > { %v18422_v2 = vadd.f32 %v5116_v25, %v4824_v56  ;;  %v14605_v26 = vpop.f32.mrf.mxu0  ;;  %14904 = vmatmul.mubr.msk.f32.gmra.mxu0 %vm239_vm1, %v7577_v47  ;;  %v7172_v56 = vrot.slane %v15409_v44, 7  ;;  %v12729_v25 = vld [vmem:[%s15501_s26 + $0x278] sm:$0x3f]  ;;  %v7170_v5 = vsel %vm792_vm2, %v7167_v18, %v7169_v58 }
 0x200   : > { %v14555_v9 = vpop.f32.mrf.mxu1  ;;  %14854 = vmatmul.mubr.msk.f32.gmra.mxu1 %vm239_vm1, %v7155_v15  ;;  %14906 = vmatprep.mubr.msk.f32.mxu0 %vm239_vm1, %v7580_v10 }
 0x201   : > { %v18427_v20 = vadd.f32 %v14605_v26, %v14555_v9  ;;  %14856 = vmatprep.mubr.msk.f32.mxu1 %vm239_vm1, %v7158_v28  ;;  %v5126_v42 = vpop.f32.mrf.mxu0  ;;  %v15408_v28 = vld [vmem:[%s15501_s26 + $0x260] sm:$0xff]  ;;  %v7592_v9 = vsel %vm336_vm0, %v18138_v6, %v7591_v3  ;;  %v15410_v26 = vld [vmem:[%s15501_s26 + $0x270] sm:$0xff] }
 0x202   : > { %v4834_v48 = vpop.f32.mrf.mxu1  ;;  %v7171_v10 = vrot.slane %v15408_v28, 7  ;;  %v15413_v6 = vld [vmem:[%s15501_s26 + $0x290] sm:$0xff] }
 0x203   : > { %v18438_v49 = vadd.f32 %v5126_v42, %v4834_v48  ;;  %v14608_v24 = vpop.f32.mrf.mxu0  ;;  %14907 = vmatmul.mubr.msk.f32.gmra.mxu0 %vm239_vm1, %v7582_v30  ;;  %v7596_v30 = vrot.slane %v12729_v25, 4  ;;  %v7179_v62 = vrot.slane %v15413_v6, 7 }
 0x204   : > { %v14558_v19 = vpop.f32.mrf.mxu1  ;;  %14857 = vmatmul.mubr.msk.f32.gmra.mxu1 %vm239_vm1, %v7160_v0  ;;  %14909 = vmatprep.mubr.msk.f32.mxu0 %vm239_vm1, %v7585_v40  ;;  %v7174_v0 = vrot.slane %v15410_v26, 7  ;;  %v7173_v42 = vsel %vm792_vm2, %v7171_v10, %v7172_v56  ;;  %v12737_v10 = vld [vmem:[%s15501_s26 + $0x2b8] sm:$0x3f]  ;;  %v15417_v26 = vld [vmem:[%s15501_s26 + $0x2c0] sm:$0xff] }
 0x205   : > { %v18443_v7 = vadd.f32 %v14608_v24, %v14558_v19  ;;  %14859 = vmatprep.mubr.msk.f32.mxu1 %vm239_vm1, %v7163_v32  ;;  %v5136_v47 = vpop.f32.mrf.mxu0  ;;  %v15411_v32 = vld [vmem:[%s15501_s26 + $0x280] sm:$0xff]  ;;  %v7601_v19 = vrot.slane %v12733_v36, 4  ;;  %v7597_v58 = vsel %vm336_vm0, %v18159_v37, %v7596_v30  ;;  %v7180_v37 = vsel %vm792_vm2, %v7177_v51, %v7179_v62  ;;  %v15418_v30 = vld [vmem:[%s15501_s26 + $0x2c8] sm:$0xff] }
 0x206   : > { %v4844_v15 = vpop.f32.mrf.mxu1  ;;  %v7176_v40 = vrot.slane %v15411_v32, 7  ;;  %v7175_v23 = vsel %vm792_vm2, %v7172_v56, %v7174_v0  ;;  %v7186_v0 = vrot.slane %v15417_v26, 7  ;;  %v7187_v36 = vrot.slane %v15418_v30, 7 }
 0x207   : > { %v18453_v45 = vadd.f32 %v5136_v47, %v4844_v15  ;;  %v14611_v14 = vpop.f32.mrf.mxu0  ;;  %14910 = vmatmul.mubr.msk.f32.gmra.mxu0 %vm239_vm1, %v7587_v31  ;;  %v15414_v15 = vld [vmem:[%s15501_s26 + $0x2a0] sm:$0xff]  ;;  %v7602_v25 = vsel %vm336_vm0, %v18214_v46, %v7601_v19 }
 0x208   : > { %v14561_v60 = vpop.f32.mrf.mxu1  ;;  %14860 = vmatmul.mubr.msk.f32.gmra.mxu1 %vm239_vm1, %v7165_v27  ;;  %14912 = vmatprep.mubr.msk.f32.mxu0 %vm239_vm1, %v18176_v12  ;;  %v7178_v3 = vsel %vm792_vm2, %v7176_v40, %v7177_v51  ;;  %v7181_v47 = vrot.slane %v15414_v15, 7  ;;  %v15419_v40 = vld [vmem:[%s15501_s26 + $0x2d0] sm:$0xff]  ;;  %v7188_v19 = vsel %vm792_vm2, %v7186_v0, %v7187_v36  ;;  %v7613_v15 = vrot.slane %v18117_v4, 4 }
 0x209   : > { %v18458_v29 = vadd.f32 %v14611_v14, %v14561_v60  ;;  %14862 = vmatprep.mubr.msk.f32.mxu1 %vm239_vm1, %v7168_v63  ;;  %v5146_v48 = vpop.f32.mrf.mxu0  ;;  %v15415_v63 = vld [vmem:[%s15501_s26 + $0x2a8] sm:$0xff]  ;;  %v15416_v60 = vld [vmem:[%s15501_s26 + $0x2b0] sm:$0xff]  ;;  %v7189_v39 = vrot.slane %v15419_v40, 7  ;;  %v7199_v0 = vrot.slane %v18170_v34, 7 }
 0x20a   : > { %v4854_v54 = vpop.f32.mrf.mxu1  ;;  %v7182_v28 = vrot.slane %v15415_v63, 7  ;;  %v7184_v14 = vrot.slane %v15416_v60, 7  ;;  %v7619_v60 = vrot.slane %v18170_v34, 4 }
 0x20b   : > { %v18470_v11 = vadd.f32 %v5146_v48, %v4854_v54  ;;  %v14614_v18 = vpop.f32.mrf.mxu0  ;;  %14913 = vmatmul.mubr.msk.f32.gmra.mxu0 %vm239_vm1, %v7592_v9  ;;  %v7606_v9 = vrot.slane %v12737_v10, 4  ;;  %v12741_v54 = vld [vmem:[%s15501_s26 + $0x2d8] sm:$0x3f]  ;;  %v7194_v10 = vrot.slane %v18121_v50, 7 }
 0x20c   : > { %v14564_v12 = vpop.f32.mrf.mxu1  ;;  %14863 = vmatmul.mubr.msk.f32.gmra.mxu1 %vm239_vm1, %v7170_v5  ;;  %14915 = vmatprep.mubr.msk.f32.mxu0 %vm239_vm1, %v18195_v61  ;;  %v7183_v46 = vsel %vm792_vm2, %v7181_v47, %v7182_v28  ;;  %v7614_v47 = vrot.slane %v18121_v50, 4 }
 0x20d   : > { %v18475_v24 = vadd.f32 %v14614_v18, %v14564_v12  ;;  %14865 = vmatprep.mubr.msk.f32.mxu1 %vm239_vm1, %v7173_v42  ;;  %v5156_v31 = vpop.f32.mrf.mxu0  ;;  %v7611_v18 = vrot.slane %v12741_v54, 4  ;;  %v7607_v62 = vsel %vm336_vm0, %v18232_v33, %v7606_v9 }
 0x20e   : > { %v4864_v27 = vpop.f32.mrf.mxu1 }
 0x20f   : > { %v18487_v44 = vadd.f32 %v5156_v31, %v4864_v27  ;;  %v14617_v56 = vpop.f32.mrf.mxu0  ;;  %14916 = vmatmul.mubr.msk.f32.gmra.mxu0 %vm239_vm1, %v7597_v58  ;;  %v7191_v31 = vrot.slane %v18112_v22, 7  ;;  %v7612_v22 = vsel %vm336_vm0, %v18284_v53, %v7611_v18 }
 0x210   : > { %v14567_v61 = vpop.f32.mrf.mxu1  ;;  %14866 = vmatmul.mubr.msk.f32.gmra.mxu1 %vm239_vm1, %v7175_v23  ;;  %14918 = vmatprep.mubr.msk.f32.mxu0 %vm239_vm1, %v18247_v38  ;;  %v7185_v38 = vsel %vm792_vm2, %v7182_v28, %v7184_v14  ;;  %v12745_v23 = vld [vmem:[%s15501_s26 + $0x2f8] sm:$0x3f] }
 0x211   : > { %v18495_v5 = vadd.f32 %v14617_v56, %v14567_v61  ;;  %14868 = vmatprep.mubr.msk.f32.mxu1 %vm239_vm1, %v7178_v3  ;;  %v5166_v42 = vpop.f32.mrf.mxu0  ;;  %v7192_v3 = vrot.slane %v18117_v4, 7  ;;  %v7616_v61 = vrot.slane %v12745_v23, 4  ;;  %v7196_v4 = vrot.slane %v18141_v1, 7  ;;  %v12749_v14 = vld [vmem:[%s15501_s26 + $0x318] sm:$0x3f] }
 0x212   : > { %v4874_v48 = vpop.f32.mrf.mxu1  ;;  %v7615_v1 = vsel %vm336_vm0, %v7613_v15, %v7614_v47  ;;  %v7621_v54 = vrot.slane %v12749_v14, 4 }
 0x213   : > { %v18504_v32 = vadd.f32 %v5166_v42, %v4874_v48  ;;  %v14620_v12 = vpop.f32.mrf.mxu0  ;;  %14919 = vmatmul.mubr.msk.f32.gmra.mxu0 %vm239_vm1, %v7602_v25  ;;  %v7618_v25 = vrot.slane %v18144_v8, 4  ;;  %v7193_v50 = vsel %vm792_vm2, %v7191_v31, %v7192_v3 }
 0x214   : > { %v14570_v51 = vpop.f32.mrf.mxu1  ;;  %14869 = vmatmul.mubr.msk.f32.gmra.mxu1 %vm239_vm1, %v7180_v37  ;;  %14921 = vmatprep.mubr.msk.f32.mxu0 %vm239_vm1, %v18264_v59  ;;  %v7190_v59 = vsel %vm792_vm2, %v7187_v36, %v7189_v39  ;;  %v7197_v37 = vrot.slane %v18144_v8, 7  ;;  %v7195_v8 = vsel %vm792_vm2, %v7192_v3, %v7194_v10  ;;  %v7617_v36 = vsel %vm336_vm0, %v7614_v47, %v7616_v61  ;;  %v21038_v10 = vld [vmem:[#allocation11_spill] sm:$0xff] }
 0x215   : > { %v18510_v6 = vadd.f32 %v14620_v12, %v14570_v51  ;;  %14871 = vmatprep.mubr.msk.f32.mxu1 %vm239_vm1, %v7183_v46  ;;  %v5176_v27 = vpop.f32.mrf.mxu0  ;;  %v7620_v34 = vsel %vm336_vm0, %v7618_v25, %v7619_v60  ;;  %v12753_v46 = vld [vmem:[%s15501_s26 + $0x338] sm:$0x3f]  ;;  %v21034_v51 = vld [vmem:[#allocation12_spill] sm:$0xff]  ;;  %v7622_v15 = vsel %vm336_vm0, %v7619_v60, %v7621_v54  ;;  %v7207_v61 = vrot.slane %v21038_v10, 7 }
 0x216   : > { %v4884_v58 = vpop.f32.mrf.mxu1  ;;  %v7198_v42 = vsel %vm792_vm2, %v7196_v4, %v7197_v37  ;;  %v7201_v12 = vrot.slane %v21034_v51, 7  ;;  %v7628_v4 = vrot.slane %v21038_v10, 4  ;;  %v7211_v51 = vrot.slane %v18257_v13, 7 }
 0x217   : > { %v18523_v63 = vadd.f32 %v5176_v27, %v4884_v58  ;;  %v14623_v33 = vpop.f32.mrf.mxu0  ;;  %14922 = vmatmul.mubr.msk.f32.gmra.mxu0 %vm239_vm1, %v7607_v62  ;;  %v7200_v27 = vsel %vm792_vm2, %v7197_v37, %v7199_v0  ;;  %v21039_v37 = vld [vmem:[#allocation14_spill] sm:$0xff] }
 0x218   : > { %v14573_v28 = vpop.f32.mrf.mxu1  ;;  %14872 = vmatmul.mubr.msk.f32.gmra.mxu1 %vm239_vm1, %v7185_v38  ;;  %14924 = vmatprep.mubr.msk.f32.mxu0 %vm239_vm1, %v18306_v16  ;;  %v21035_v38 = vld [vmem:[#allocation9_spill] sm:$0xff]  ;;  %v7629_v25 = vrot.slane %v21039_v37, 4 }
 0x219   : > { %v18532_v56 = vadd.f32 %v14623_v33, %v14573_v28  ;;  %14874 = vmatprep.mubr.msk.f32.mxu1 %vm239_vm1, %v7188_v19  ;;  %v5186_v9 = vpop.f32.mrf.mxu0  ;;  %v7202_v18 = vrot.slane %v21035_v38, 7  ;;  %v7623_v62 = vrot.slane %v21035_v38, 4  ;;  %v21036_v19 = vld [vmem:[#allocation17_spill] sm:$0xff]  ;;  %v21037_v28 = vld [vmem:[#allocation10_spill] sm:$0xff]  ;;  %v7633_v38 = vrot.slane %v18268_v17, 4 }
 0x21a   : > { %v4894_v53 = vpop.f32.mrf.mxu1  ;;  %v7624_v23 = vrot.slane %v21036_v19, 4  ;;  %v7204_v47 = vrot.slane %v21036_v19, 7  ;;  %v7206_v33 = vrot.slane %v21037_v28, 7  ;;  %v12761_v19 = vld [vmem:[%s15501_s26 + $0x378] sm:$0x3f] }
 0x21b   : > { %v18543_v26 = vadd.f32 %v5186_v9, %v4894_v53  ;;  %v14626_v16 = vpop.f32.mrf.mxu0  ;;  %14925 = vmatmul.mubr.msk.f32.gmra.mxu0 %vm239_vm1, %v7612_v22  ;;  %v7203_v60 = vsel %vm792_vm2, %v7201_v12, %v7202_v18  ;;  %v7212_v12 = vrot.slane %v18268_v17, 7  ;;  %v7636_v28 = vrot.slane %v12761_v19, 4 }
 0x21c   : > { %v14576_v30 = vpop.f32.mrf.mxu1  ;;  %14875 = vmatmul.mubr.msk.f32.gmra.mxu1 %vm239_vm1, %v7190_v59  ;;  %14927 = vmatprep.mubr.msk.f32.mxu0 %vm239_vm1, %v7615_v1  ;;  %v7626_v59 = vrot.slane %v12753_v46, 4  ;;  %v7625_v9 = vsel %vm336_vm0, %v7623_v62, %v7624_v23 }
 0x21d   : > { %v18550_v48 = vadd.f32 %v14626_v16, %v14576_v30  ;;  %14877 = vmatprep.mubr.msk.f32.mxu1 %vm239_vm1, %v7193_v50  ;;  %v5196_v39 = vpop.f32.mrf.mxu0  ;;  %v12757_v50 = vld [vmem:[%s15501_s26 + $0x358] sm:$0x3f]  ;;  %v7205_v16 = vsel %vm792_vm2, %v7202_v18, %v7204_v47  ;;  %v21040_v18 = vld [vmem:[#allocation29_spill] sm:$0xff] }
 0x21e   : > { %v4904_v40 = vpop.f32.mrf.mxu1  ;;  %v7631_v46 = vrot.slane %v12757_v50, 4  ;;  %v7634_v62 = vrot.slane %v21040_v18, 4 }
 0x21f   : > { %v18561_v58 = vadd.f32 %v5196_v39, %v4904_v40  ;;  %v14629_v3 = vpop.f32.mrf.mxu0  ;;  %14928 = vmatmul.mubr.msk.f32.gmra.mxu0 %vm239_vm1, %v7617_v36  ;;  %v7209_v36 = vrot.slane %v21039_v37, 7 }
 0x220   : > { %v14579_v31 = vpop.f32.mrf.mxu1  ;;  %14878 = vmatmul.mubr.msk.f32.gmra.mxu1 %vm239_vm1, %v7195_v8  ;;  %14930 = vmatprep.mubr.msk.f32.mxu0 %vm239_vm1, %v7620_v34  ;;  %v7627_v8 = vsel %vm336_vm0, %v7624_v23, %v7626_v59  ;;  %v7630_v34 = vsel %vm336_vm0, %v7628_v4, %v7629_v25  ;;  %v7632_v17 = vsel %vm336_vm0, %v7629_v25, %v7631_v46  ;;  %v7214_v59 = vrot.slane %v21040_v18, 7  ;;  %v18638_v18 = vld [vmem:[%s15501_s26 + $0x30] sm:$0xff] }
 0x221   : > { %v18569_v22 = vadd.f32 %v14629_v3, %v14579_v31  ;;  %14880 = vmatprep.mubr.msk.f32.mxu1 %vm239_vm1, %v7198_v42  ;;  %v5206_v53 = vpop.f32.mrf.mxu0  ;;  %v7208_v42 = vsel %vm792_vm2, %v7206_v33, %v7207_v61  ;;  %v18601_v31 = vld [vmem:[%s15501_s26 + $0x8] sm:$0xff]  ;;  %v7210_v13 = vsel %vm792_vm2, %v7207_v61, %v7209_v36  ;;  %v7213_v4 = vsel %vm792_vm2, %v7211_v51, %v7212_v12  ;;  %v4169_v51 = vld [vmem:[#allocation2] sm:$0xff] }
 0x222   : > { %v4914_v14 = vpop.f32.mrf.mxu1  ;;  %v7635_v37 = vsel %vm336_vm0, %v7633_v38, %v7634_v62 }
 0x223   : > { %v18579_v1 = vadd.f32 %v5206_v53, %v4914_v14  ;;  %v14632_v30 = vpop.f32.mrf.mxu0  ;;  %14931 = vmatmul.mubr.msk.f32.gmra.mxu0 %vm239_vm1, %v7622_v15  ;;  %v8304_v14 = vrot.slane %v18601_v31, 7  ;;  %v18616_v53 = vld [vmem:[%s15501_s26 + $0x10] sm:$0xff] }
 0x224   : > { %v14582_v0 = vpop.f32.mrf.mxu1  ;;  %14881 = vmatmul.mubr.msk.f32.gmra.mxu1 %vm239_vm1, %v7200_v27  ;;  %14933 = vmatprep.mubr.msk.f32.mxu0 %vm239_vm1, %v7625_v9  ;;  %v8189_v27 = vld [vmem:[%s15501_s26] sm:$0xff]  ;;  %v4170_v9 = vld [vmem:[#allocation2 + $0x8] sm:$0xff]  ;;  %v8306_v46 = vrot.slane %v18616_v53, 7 }
 0x225   : > { %v18586_v54 = vadd.f32 %v14632_v30, %v14582_v0  ;;  %14883 = vmatprep.mubr.msk.f32.mxu1 %vm239_vm1, %v7203_v60  ;;  %v5216_v39 = vpop.f32.mrf.mxu0  ;;  %v8303_v61 = vrot.slane %v8189_v27, 7 }
 0x226   : > { %v4924_v40 = vpop.f32.mrf.mxu1 }
 0x227   : > { %v18597_v23 = vadd.f32 %v5216_v39, %v4924_v40  ;;  %v14635_v15 = vpop.f32.mrf.mxu0  ;;  %14934 = vmatmul.mubr.msk.f32.gmra.mxu0 %vm239_vm1, %v7627_v8  ;;  %v18626_v8 = vld [vmem:[%s15501_s26 + $0x28] sm:$0xff]  ;;  %v8305_v38 = vsel %vm792_vm2, %v8303_v61, %v8304_v14  ;;  %v8307_v61 = vsel %vm792_vm2, %v8304_v14, %v8306_v46  ;;  %v18669_v46 = vld [vmem:[%s15501_s26 + $0x60] sm:$0xff] }
 0x228   : > { %v14585_v3 = vpop.f32.mrf.mxu1  ;;  %14884 = vmatmul.mubr.msk.f32.gmra.mxu1 %vm239_vm1, %v7205_v16  ;;  %14936 = vmatprep.mubr.msk.f32.mxu0 %vm239_vm1, %v7630_v34  ;;  %v18623_v16 = vld [vmem:[%s15501_s26 + $0x20] sm:$0xff]  ;;  %v7637_v34 = vsel %vm336_vm0, %v7634_v62, %v7636_v28  ;;  %v8309_v62 = vrot.slane %v18626_v8, 7 }
 0x229   : > { %v18606_v47 = vadd.f32 %v14635_v15, %v14585_v3  ;;  %14886 = vmatprep.mubr.msk.f32.mxu1 %vm239_vm1, %v7208_v42  ;;  %v5226_v10 = vpop.f32.mrf.mxu0  ;;  %v7215_v42 = vsel %vm792_vm2, %v7212_v12, %v7214_v59  ;;  %v4172_v3 = vld [vmem:[#allocation2 + $0x18] sm:$0xff]  ;;  %v8308_v12 = vrot.slane %v18623_v16, 7  ;;  %v18648_v59 = vld [vmem:[%s15501_s26 + $0x48] sm:$0xff] }
 0x22a   : > { %v4934_v33 = vpop.f32.mrf.mxu1 }
 0x22b   : > { %v18618_v60 = vadd.f32 %v5226_v10, %v4934_v33  ;;  %v4236_v25 = vpop.permute.xlu0 %4235  ;;  %v14638_v30 = vpop.f32.mrf.mxu0  ;;  %14937 = vmatmul.mubr.msk.f32.gmra.mxu0 %vm239_vm1, %v7632_v17  ;;  %v18645_v17 = vld [vmem:[%s15501_s26 + $0x40] sm:$0xff]  ;;  %v8310_v14 = vsel %vm792_vm2, %v8308_v12, %v8309_v62 }
 0x22c   : > { %v4330_v50 = vadd.f32 %v4236_v25, %v4170_v9  ;;  %v14588_v0 = vpop.f32.mrf.mxu1  ;;  %14887 = vmatmul.mubr.msk.f32.gmra.mxu1 %vm239_vm1, %v7210_v13  ;;  %14939 = vmatprep.mubr.msk.f32.mxu0 %vm239_vm1, %v7635_v37  ;;  %v8311_v9 = vrot.slane %v18638_v18, 7 }
 0x22d   : > { %v18628_v36 = vadd.f32 %v14638_v30, %v14588_v0  ;;  %14889 = vmatprep.mubr.msk.f32.mxu1 %vm239_vm1, %v7213_v4  ;;  %v5236_v39 = vpop.f32.mrf.mxu0  ;;  %v8313_v0 = vrot.slane %v18645_v17, 7  ;;  %v8314_v30 = vrot.slane %v18648_v59, 7 }
 0x22e   : > { %4363 = vst.msk [vmem:[#allocation2 + $0x8] sm:$0xff] %vm4361_vm5, %v4330_v50  ;;  %v4944_v40 = vpop.f32.mrf.mxu1 }
 0x22f   : > { %v18640_v19 = vadd.f32 %v5236_v39, %v4944_v40  ;;  %v4240_v15 = vpop.permute.xlu1 %4239  ;;  %v4234_v13 = vpop.permute.xlu0 %4233  ;;  %14940 = vmatmul.mubr.msk.f32.gmra.mxu0 %vm239_vm1, %v7637_v34  ;;  %v18672_v39 = vld [vmem:[%s15501_s26 + $0x68] sm:$0xff] }
 0x230   : > { %v4332_v28 = vadd.f32 %v4240_v15, %v4172_v3  ;;  %v4329_v33 = vadd.f32 %v4234_v13, %v4169_v51  ;;  %v14591_v10 = vpop.f32.mrf.mxu1  ;;  %v14641_v4 = vpop.f32.mrf.mxu0  ;;  %14890 = vmatmul.mubr.msk.f32.gmra.mxu1 %vm239_vm1, %v7215_v42  ;;  %14994 = vmatprep.mubr.msk.f32.mxu0 %vm239_vm1, %v8189_v27  ;;  %v18663_v42 = vld [vmem:[%s15501_s26 + $0x50] sm:$0xff] }
 0x231   : > { %v18652_v37 = vadd.f32 %v14641_v4, %v14591_v10  ;;  %14944 = vmatprep.mubr.msk.f32.mxu1 %vm239_vm1, %v8305_v38  ;;  %v4171_v27 = vld [vmem:[#allocation2 + $0x10] sm:$0xff]  ;;  %v8312_v10 = vsel %vm792_vm2, %v8309_v62, %v8311_v9  ;;  %v8316_v4 = vrot.slane %v18663_v42, 7  ;;  %v8319_v62 = vrot.slane %v18672_v39, 7 }
 0x232   : > { %4365 = vst.msk [vmem:[#allocation2 + $0x18] sm:$0xff] %vm4361_vm5, %v4332_v28  ;;  %4362 = vst.msk [vmem:[#allocation2] sm:$0xff] %vm4361_vm5, %v4329_v33  ;;  %v4954_v25 = vpop.f32.mrf.mxu1  ;;  %v5246_v50 = vpop.f32.mrf.mxu0  ;;  %v18680_v15 = vld [vmem:[%s20667_s3 + $0x50] sm:$0xf]  ;;  %v18685_v13 = vld [vmem:[%s20667_s3 + $0x54] sm:$0xf] }
 0x233   : > { %v18665_v34 = vadd.f32 %v5246_v50, %v4954_v25  ;;  %v4238_v40 = vpop.permute.xlu1 %4237  ;;  %14995 = vmatmul.mubr.msk.f32.vlgmr.msra.gmra.mxu0 %vm239_vm1, %v18601_v31  ;;  %v4173_v33 = vld [vmem:[#allocation2 + $0x20] sm:$0xff]  ;;  %v18702_v9 = vld [vmem:[%s15501_s26 + $0x70] sm:$0xff] }
 0x234   : > { %v4331_v51 = vadd.f32 %v4238_v40, %v4171_v27  ;;  %v14646_v38 = vpop.f32.mrf.mxu1  ;;  %v14696_v3 = vpop.f32.mrf.mxu0  ;;  %14945 = vmatmul.mubr.msk.f32.vlgmr.msra.gmra.mxu1 %vm239_vm1, %v8307_v61  ;;  %15093 = vmatpush3.msk.msra.mxu0 %vm336_vm0, %v18387_v35  ;;  %v8318_v35 = vrot.slane %v18669_v46, 7  ;;  %v4174_v27 = vld [vmem:[#allocation2 + $0x28] sm:$0xff] }
 0x235   : > { %v5646_v12 = vadd.f32 %v14646_v38, %v18353_v57  ;;  %15043 = vmatpush3.msk.msra.mxu1 %vm336_vm0, %v18376_v43  ;;  %v4242_v28 = vpop.permute.xlu0 %4241  ;;  %14947 = vmatprep.mubr.msk.f32.mxu1 %vm239_vm1, %v8310_v14  ;;  %v8315_v43 = vsel %vm792_vm2, %v8313_v0, %v8314_v30  ;;  %v18708_v38 = vld [vmem:[%s15501_s26 + $0x80] sm:$0xff]  ;;  %v18711_v14 = vld [vmem:[%s15501_s26 + $0x88] sm:$0xff] }
 0x236   : > { %4364 = vst.msk [vmem:[#allocation2 + $0x10] sm:$0xff] %vm4361_vm5, %v4331_v51  ;;  %v4333_v61 = vadd.f32 %v4242_v28, %v4173_v33  ;;  %v5486_v25 = vpop.f32.mrf.mxu1  ;;  %v6004_v57 = vpop.f32.mrf.mxu0  ;;  %14997 = vmatprep.mubr.msk.f32.mxu0 %vm239_vm1, %v18623_v16  ;;  %15142 = vmatprep.subr.msk.mxu1 %vm336_vm0, %v18680_v15  ;;  %v4175_v33 = vld [vmem:[#allocation2 + $0x30] sm:$0xff] }
 0x237   : > { %v18704_v50 = vadd.f32 %v14696_v3, %v5646_v12  ;;  %v5645_v40 = vadd.f32 %v5486_v25, %v18368_v55  ;;  %v4244_v51 = vpop.permute.xlu1 %4243  ;;  %15192 = vmatprep.subr.msk.mxu0 %vm336_vm0, %v18685_v13  ;;  %14998 = vmatmul.mubr.msk.f32.gmra.mxu0 %vm239_vm1, %v18626_v8 }
 0x238   : > { %4366 = vst.msk [vmem:[#allocation2 + $0x20] sm:$0xff] %vm4361_vm5, %v4333_v61  ;;  %v4334_v16 = vadd.f32 %v4244_v51, %v4174_v27  ;;  %v14649_v0 = vpop.f32.mrf.mxu1  ;;  %v14699_v3 = vpop.f32.mrf.mxu0  ;;  %14948 = vmatmul.mubr.msk.f32.gmra.mxu1 %vm239_vm1, %v8312_v10  ;;  %15000 = vmatprep.mubr.msk.f32.mxu0 %vm239_vm1, %v18645_v17  ;;  %v8317_v61 = vsel %vm792_vm2, %v8314_v30, %v8316_v4  ;;  %v8321_v10 = vrot.slane %v18702_v9, 7  ;;  %v8323_v27 = vrot.slane %v18708_v38, 7  ;;  %v18734_v51 = vld [vmem:[%s15501_s26 + $0x90] sm:$0xff]  ;;  %v4176_v30 = vld [vmem:[#allocation2 + $0x38] sm:$0xff] }
 0x239   : > { %21041 = vst [vmem:[#allocation5_spill] sm:$0xff] %v18704_v50  ;;  %v18721_v55 = vadd.f32 %v6004_v57, %v5645_v40  ;;  %v5648_v12 = vadd.f32 %v14649_v0, %v18389_v52  ;;  %v4246_v28 = vpop.permute.xlu0 %4245  ;;  %14950 = vmatprep.mubr.msk.f32.mxu1 %vm239_vm1, %v8315_v43  ;;  %v8320_v52 = vsel %vm792_vm2, %v8318_v35, %v8319_v62  ;;  %v8324_v43 = vrot.slane %v18711_v14, 7  ;;  %v18880_v50 = vld [vmem:[%s15501_s26 + $0x140] sm:$0xff] }
 0x23a   : > { %4367 = vst.msk [vmem:[#allocation2 + $0x28] sm:$0xff] %vm4361_vm5, %v4334_v16  ;;  %v4335_v25 = vadd.f32 %v4246_v28, %v4175_v33  ;;  %v5496_v57 = vpop.f32.mrf.mxu1  ;;  %v6014_v40 = vpop.f32.mrf.mxu0  ;;  %v18743_v16 = vld [vmem:[%s15501_s26 + $0xa8] sm:$0xff] }
 0x23b   : > { %21042 = vst [vmem:[#allocation26_spill] sm:$0xff] %v18721_v55  ;;  %v18736_v0 = vadd.f32 %v14699_v3, %v5648_v12  ;;  %v5647_v17 = vadd.f32 %v5496_v57, %v18402_v41  ;;  %v4248_v4 = vpop.permute.xlu1 %4247  ;;  %v18740_v55 = vld [vmem:[%s15501_s26 + $0xa0] sm:$0xff]  ;;  %15001 = vmatmul.mubr.msk.f32.gmra.mxu0 %vm239_vm1, %v18648_v59 }
 0x23c   : > { %4368 = vst.msk [vmem:[#allocation2 + $0x30] sm:$0xff] %vm4361_vm5, %v4335_v25  ;;  %v4336_v28 = vadd.f32 %v4248_v4, %v4176_v30  ;;  %v14652_v35 = vpop.f32.mrf.mxu1  ;;  %v14702_v33 = vpop.f32.mrf.mxu0  ;;  %14951 = vmatmul.mubr.msk.f32.gmra.mxu1 %vm239_vm1, %v8317_v61  ;;  %v4177_v57 = vld [vmem:[#allocation2 + $0x40] sm:$0xff]  ;;  %15003 = vmatprep.mubr.msk.f32.mxu0 %vm239_vm1, %v18669_v46  ;;  %v8322_v25 = vsel %vm792_vm2, %v8319_v62, %v8321_v10  ;;  %v8326_v61 = vrot.slane %v18734_v51, 7  ;;  %v8328_v4 = vrot.slane %v18740_v55, 7  ;;  %v4178_v62 = vld [vmem:[#allocation2 + $0x48] sm:$0xff] }
 0x23d   : > { %21043 = vst [vmem:[#allocation4_spill] sm:$0xff] %v18736_v0  ;;  %v18749_v3 = vadd.f32 %v6014_v40, %v5647_v17  ;;  %v5650_v41 = vadd.f32 %v14652_v35, %v18411_v21  ;;  %v4250_v12 = vpop.permute.xlu0 %4249  ;;  %14953 = vmatprep.mubr.msk.f32.mxu1 %vm239_vm1, %v8320_v52  ;;  %v8325_v21 = vsel %vm792_vm2, %v8323_v27, %v8324_v43  ;;  %v8329_v52 = vrot.slane %v18743_v16, 7  ;;  %v18762_v35 = vld [vmem:[%s15501_s26 + $0xb0] sm:$0xff]  ;;  %v18768_v0 = vld [vmem:[%s15501_s26 + $0xc0] sm:$0xff] }
 0x23e   : > { %4369 = vst.msk [vmem:[#allocation2 + $0x38] sm:$0xff] %vm4361_vm5, %v4336_v28  ;;  %v4337_v30 = vadd.f32 %v4250_v12, %v4177_v57  ;;  %v5506_v40 = vpop.f32.mrf.mxu1  ;;  %v6024_v17 = vpop.f32.mrf.mxu0  ;;  %v18771_v28 = vld [vmem:[%s15501_s26 + $0xc8] sm:$0xff] }
 0x23f   : > { %21044 = vst [vmem:[#allocation23_spill] sm:$0xff] %v18749_v3  ;;  %v18764_v3 = vadd.f32 %v14702_v33, %v5650_v41  ;;  %v5649_v46 = vadd.f32 %v5506_v40, %v18422_v2  ;;  %v4252_v10 = vpop.permute.xlu1 %4251  ;;  %15004 = vmatmul.mubr.msk.f32.gmra.mxu0 %vm239_vm1, %v18672_v39  ;;  %v4179_v40 = vld [vmem:[#allocation2 + $0x50] sm:$0xff] }
 0x240   : > { %4370 = vst.msk [vmem:[#allocation2 + $0x40] sm:$0xff] %vm4361_vm5, %v4337_v30  ;;  %v4338_v12 = vadd.f32 %v4252_v10, %v4178_v62  ;;  %v14655_v27 = vpop.f32.mrf.mxu1  ;;  %v14705_v57 = vpop.f32.mrf.mxu0  ;;  %14954 = vmatmul.mubr.msk.f32.gmra.mxu1 %vm239_vm1, %v8322_v25  ;;  %15006 = vmatprep.mubr.msk.f32.mxu0 %vm239_vm1, %v18708_v38  ;;  %v8327_v30 = vsel %vm792_vm2, %v8324_v43, %v8326_v61  ;;  %v8331_v25 = vrot.slane %v18762_v35, 7  ;;  %v8333_v10 = vrot.slane %v18768_v0, 7  ;;  %v4180_v43 = vld [vmem:[#allocation2 + $0x58] sm:$0xff] }
 0x241   : > { %21045 = vst [vmem:[#allocation15_spill] sm:$0xff] %v18764_v3  ;;  %v18777_v33 = vadd.f32 %v6024_v17, %v5649_v46  ;;  %v5652_v2 = vadd.f32 %v14655_v27, %v18427_v20  ;;  %v4254_v41 = vpop.permute.xlu0 %4253  ;;  %14956 = vmatprep.mubr.msk.f32.mxu1 %vm239_vm1, %v8325_v21  ;;  %v8330_v20 = vsel %vm792_vm2, %v8328_v4, %v8329_v52  ;;  %v8334_v21 = vrot.slane %v18771_v28, 7  ;;  %v18790_v27 = vld [vmem:[%s15501_s26 + $0xd0] sm:$0xff]  ;;  %v18796_v3 = vld [vmem:[%s15501_s26 + $0xe0] sm:$0xff] }
 0x242   : > { %4371 = vst.msk [vmem:[#allocation2 + $0x48] sm:$0xff] %vm4361_vm5, %v4338_v12  ;;  %v4339_v62 = vadd.f32 %v4254_v41, %v4179_v40  ;;  %v5516_v17 = vpop.f32.mrf.mxu1  ;;  %v6034_v46 = vpop.f32.mrf.mxu0  ;;  %v18799_v12 = vld [vmem:[%s15501_s26 + $0xe8] sm:$0xff] }
 0x243   : > { %21046 = vst [vmem:[#allocation33_spill] sm:$0xff] %v18777_v33  ;;  %v18792_v33 = vadd.f32 %v14705_v57, %v5652_v2  ;;  %v5651_v38 = vadd.f32 %v5516_v17, %v18438_v49  ;;  %v4256_v61 = vpop.permute.xlu1 %4255  ;;  %15007 = vmatmul.mubr.msk.f32.gmra.mxu0 %vm239_vm1, %v18711_v14  ;;  %v4181_v17 = vld [vmem:[#allocation2 + $0x60] sm:$0xff] }
 0x244   : > { %4372 = vst.msk [vmem:[#allocation2 + $0x50] sm:$0xff] %vm4361_vm5, %v4339_v62  ;;  %v4340_v41 = vadd.f32 %v4256_v61, %v4180_v43  ;;  %v14658_v4 = vpop.f32.mrf.mxu1  ;;  %v14708_v40 = vpop.f32.mrf.mxu0  ;;  %14957 = vmatmul.mubr.msk.f32.gmra.mxu1 %vm239_vm1, %v8327_v30  ;;  %15009 = vmatprep.mubr.msk.f32.mxu0 %vm239_vm1, %v18740_v55  ;;  %v8332_v62 = vsel %vm792_vm2, %v8329_v52, %v8331_v25  ;;  %v8336_v30 = vrot.slane %v18790_v27, 7  ;;  %v8338_v61 = vrot.slane %v18796_v3, 7  ;;  %v4182_v52 = vld [vmem:[#allocation2 + $0x68] sm:$0xff] }
 0x245   : > { %21047 = vst [vmem:[#allocation16_spill] sm:$0xff] %v18792_v33  ;;  %v18805_v57 = vadd.f32 %v6034_v46, %v5651_v38  ;;  %v5654_v49 = vadd.f32 %v14658_v4, %v18443_v7  ;;  %v4258_v2 = vpop.permute.xlu0 %4257  ;;  %14959 = vmatprep.mubr.msk.f32.mxu1 %vm239_vm1, %v8330_v20  ;;  %v8335_v7 = vsel %vm792_vm2, %v8333_v10, %v8334_v21  ;;  %v8339_v20 = vrot.slane %v18799_v12, 7  ;;  %v18818_v4 = vld [vmem:[%s15501_s26 + $0xf0] sm:$0xff]  ;;  %v18824_v33 = vld [vmem:[%s15501_s26 + $0x100] sm:$0xff] }
 0x246   : > { %4373 = vst.msk [vmem:[#allocation2 + $0x58] sm:$0xff] %vm4361_vm5, %v4340_v41  ;;  %v4341_v43 = vadd.f32 %v4258_v2, %v4181_v17  ;;  %v5526_v46 = vpop.f32.mrf.mxu1  ;;  %v6044_v38 = vpop.f32.mrf.mxu0  ;;  %v18827_v41 = vld [vmem:[%s15501_s26 + $0x108] sm:$0xff] }
 0x247   : > { %21048 = vst [vmem:[#allocation30_spill] sm:$0xff] %v18805_v57  ;;  %v18820_v57 = vadd.f32 %v14708_v40, %v5654_v49  ;;  %v5653_v55 = vadd.f32 %v5526_v46, %v18453_v45  ;;  %v4260_v25 = vpop.permute.xlu1 %4259  ;;  %15010 = vmatmul.mubr.msk.f32.gmra.mxu0 %vm239_vm1, %v18743_v16  ;;  %v4183_v46 = vld [vmem:[#allocation2 + $0x70] sm:$0xff] }
 0x248   : > { %4374 = vst.msk [vmem:[#allocation2 + $0x60] sm:$0xff] %vm4361_vm5, %v4341_v43  ;;  %v4342_v2 = vadd.f32 %v4260_v25, %v4182_v52  ;;  %v14661_v10 = vpop.f32.mrf.mxu1  ;;  %v14711_v17 = vpop.f32.mrf.mxu0  ;;  %14960 = vmatmul.mubr.msk.f32.gmra.mxu1 %vm239_vm1, %v8332_v62  ;;  %15012 = vmatprep.mubr.msk.f32.mxu0 %vm239_vm1, %v18768_v0  ;;  %v8337_v43 = vsel %vm792_vm2, %v8334_v21, %v8336_v30  ;;  %v8341_v62 = vrot.slane %v18818_v4, 7  ;;  %v8343_v25 = vrot.slane %v18824_v33, 7  ;;  %v4184_v21 = vld [vmem:[#allocation2 + $0x78] sm:$0xff] }
 0x249   : > { %21049 = vst [vmem:[#allocation6_spill] sm:$0xff] %v18820_v57  ;;  %v18833_v40 = vadd.f32 %v6044_v38, %v5653_v55  ;;  %v5656_v45 = vadd.f32 %v14661_v10, %v18458_v29  ;;  %v4262_v49 = vpop.permute.xlu0 %4261  ;;  %14962 = vmatprep.mubr.msk.f32.mxu1 %vm239_vm1, %v8335_v7  ;;  %v8340_v29 = vsel %vm792_vm2, %v8338_v61, %v8339_v20  ;;  %v8344_v7 = vrot.slane %v18827_v41, 7  ;;  %v18846_v10 = vld [vmem:[%s15501_s26 + $0x110] sm:$0xff]  ;;  %v18852_v57 = vld [vmem:[%s15501_s26 + $0x120] sm:$0xff] }
 0x24a   : > { %4375 = vst.msk [vmem:[#allocation2 + $0x68] sm:$0xff] %vm4361_vm5, %v4342_v2  ;;  %v4343_v52 = vadd.f32 %v4262_v49, %v4183_v46  ;;  %v5536_v38 = vpop.f32.mrf.mxu1  ;;  %v6054_v55 = vpop.f32.mrf.mxu0  ;;  %v18855_v2 = vld [vmem:[%s15501_s26 + $0x128] sm:$0xff] }
 0x24b   : > { %21050 = vst [vmem:[#allocation28_spill] sm:$0xff] %v18833_v40  ;;  %v18848_v40 = vadd.f32 %v14711_v17, %v5656_v45  ;;  %v5655_v0 = vadd.f32 %v5536_v38, %v18470_v11  ;;  %v4264_v30 = vpop.permute.xlu1 %4263  ;;  %15013 = vmatmul.mubr.msk.f32.gmra.mxu0 %vm239_vm1, %v18771_v28  ;;  %v4185_v45 = vld [vmem:[#allocation2 + $0x80] sm:$0xff] }
 0x24c   : > { %4376 = vst.msk [vmem:[#allocation2 + $0x70] sm:$0xff] %vm4361_vm5, %v4343_v52  ;;  %v4344_v49 = vadd.f32 %v4264_v30, %v4184_v21  ;;  %v14664_v61 = vpop.f32.mrf.mxu1  ;;  %v14714_v46 = vpop.f32.mrf.mxu0  ;;  %14963 = vmatmul.mubr.msk.f32.gmra.mxu1 %vm239_vm1, %v8337_v43  ;;  %15015 = vmatprep.mubr.msk.f32.mxu0 %vm239_vm1, %v18796_v3  ;;  %v8342_v52 = vsel %vm792_vm2, %v8339_v20, %v8341_v62  ;;  %v8346_v43 = vrot.slane %v18846_v10, 7  ;;  %v8348_v30 = vrot.slane %v18852_v57, 7  ;;  %v4186_v20 = vld [vmem:[#allocation2 + $0x88] sm:$0xff] }
 0x24d   : > { %21051 = vst [vmem:[#allocation20_spill] sm:$0xff] %v18848_v40  ;;  %v18861_v17 = vadd.f32 %v6054_v55, %v5655_v0  ;;  %v5658_v11 = vadd.f32 %v14664_v61, %v18475_v24  ;;  %v4266_v38 = vpop.permute.xlu0 %4265  ;;  %14965 = vmatprep.mubr.msk.f32.mxu1 %vm239_vm1, %v8340_v29  ;;  %v8345_v24 = vsel %vm792_vm2, %v8343_v25, %v8344_v7  ;;  %v8349_v29 = vrot.slane %v18855_v2, 7  ;;  %v18874_v61 = vld [vmem:[%s15501_s26 + $0x130] sm:$0xff] }
 0x24e   : > { %4377 = vst.msk [vmem:[#allocation2 + $0x78] sm:$0xff] %vm4361_vm5, %v4344_v49  ;;  %v4345_v21 = vadd.f32 %v4266_v38, %v4185_v45  ;;  %v5546_v55 = vpop.f32.mrf.mxu1  ;;  %v6064_v0 = vpop.f32.mrf.mxu0  ;;  %21053 = vst [vmem:[#allocation56_spill] sm:$0xff] %v18874_v61  ;;  %v18883_v49 = vld [vmem:[%s15501_s26 + $0x148] sm:$0xff] }
 0x24f   : > { %21052 = vst [vmem:[#allocation55_spill] sm:$0xff] %v18861_v17  ;;  %v18876_v17 = vadd.f32 %v14714_v46, %v5658_v11  ;;  %v5657_v40 = vadd.f32 %v5546_v55, %v18487_v44  ;;  %v4268_v62 = vpop.permute.xlu1 %4267  ;;  %15016 = vmatmul.mubr.msk.f32.gmra.mxu0 %vm239_vm1, %v18799_v12  ;;  %v4187_v11 = vld [vmem:[#allocation2 + $0x90] sm:$0xff] }
 0x250   : > { %4378 = vst.msk [vmem:[#allocation2 + $0x80] sm:$0xff] %vm4361_vm5, %v4345_v21  ;;  %v4346_v45 = vadd.f32 %v4268_v62, %v4186_v20  ;;  %v14667_v25 = vpop.f32.mrf.mxu1  ;;  %v14717_v38 = vpop.f32.mrf.mxu0  ;;  %14966 = vmatmul.mubr.msk.f32.gmra.mxu1 %vm239_vm1, %v8342_v52  ;;  %15018 = vmatprep.mubr.msk.f32.mxu0 %vm239_vm1, %v18824_v33  ;;  %v8347_v21 = vsel %vm792_vm2, %v8344_v7, %v8346_v43  ;;  %v8351_v52 = vrot.slane %v18874_v61, 7  ;;  %v8353_v62 = vrot.slane %v18880_v50, 7  ;;  %v4188_v7 = vld [vmem:[#allocation2 + $0x98] sm:$0xff]  ;;  %v18908_v61 = vld [vmem:[%s15501_s26 + $0x160] sm:$0xff] }
 0x251   : > { %21054 = vst [vmem:[#allocation18_spill] sm:$0xff] %v18876_v17  ;;  %v18889_v46 = vadd.f32 %v6064_v0, %v5657_v40  ;;  %v5660_v44 = vadd.f32 %v14667_v25, %v18495_v5  ;;  %v4270_v55 = vpop.permute.xlu0 %4269  ;;  %14968 = vmatprep.mubr.msk.f32.mxu1 %vm239_vm1, %v8345_v24  ;;  %v8350_v5 = vsel %vm792_vm2, %v8348_v30, %v8349_v29  ;;  %v8354_v24 = vrot.slane %v18883_v49, 7  ;;  %v18902_v25 = vld [vmem:[%s15501_s26 + $0x150] sm:$0xff] }
 0x252   : > { %4379 = vst.msk [vmem:[#allocation2 + $0x88] sm:$0xff] %vm4361_vm5, %v4346_v45  ;;  %v4347_v20 = vadd.f32 %v4270_v55, %v4187_v11  ;;  %v5556_v40 = vpop.f32.mrf.mxu1  ;;  %v6074_v0 = vpop.f32.mrf.mxu0  ;;  %21056 = vst [vmem:[#allocation31_spill] sm:$0xff] %v18902_v25  ;;  %v18911_v45 = vld [vmem:[%s15501_s26 + $0x168] sm:$0xff] }
 0x253   : > { %21055 = vst [vmem:[#allocation19_spill] sm:$0xff] %v18889_v46  ;;  %v18904_v46 = vadd.f32 %v14717_v38, %v5660_v44  ;;  %v5659_v17 = vadd.f32 %v5556_v40, %v18504_v32  ;;  %v4272_v43 = vpop.permute.xlu1 %4271  ;;  %15019 = vmatmul.mubr.msk.f32.gmra.mxu0 %vm239_vm1, %v18827_v41  ;;  %v4189_v44 = vld [vmem:[#allocation2 + $0xa0] sm:$0xff] }
 0x254   : > { %4380 = vst.msk [vmem:[#allocation2 + $0x90] sm:$0xff] %vm4361_vm5, %v4347_v20  ;;  %v4348_v11 = vadd.f32 %v4272_v43, %v4188_v7  ;;  %v14670_v30 = vpop.f32.mrf.mxu1  ;;  %v14720_v55 = vpop.f32.mrf.mxu0  ;;  %14969 = vmatmul.mubr.msk.f32.gmra.mxu1 %vm239_vm1, %v8347_v21  ;;  %15021 = vmatprep.mubr.msk.f32.mxu0 %vm239_vm1, %v18852_v57  ;;  %v8352_v20 = vsel %vm792_vm2, %v8349_v29, %v8351_v52  ;;  %v8356_v21 = vrot.slane %v18902_v25, 7  ;;  %v8358_v43 = vrot.slane %v18908_v61, 7  ;;  %v4190_v29 = vld [vmem:[#allocation2 + $0xa8] sm:$0xff]  ;;  %v18936_v25 = vld [vmem:[%s15501_s26 + $0x180] sm:$0xff] }
 0x255   : > { %21057 = vst [vmem:[#allocation21_spill] sm:$0xff] %v18904_v46  ;;  %v18917_v38 = vadd.f32 %v6074_v0, %v5659_v17  ;;  %v5662_v32 = vadd.f32 %v14670_v30, %v18510_v6  ;;  %v4274_v40 = vpop.permute.xlu0 %4273  ;;  %14971 = vmatprep.mubr.msk.f32.mxu1 %vm239_vm1, %v8350_v5  ;;  %v8355_v6 = vsel %vm792_vm2, %v8353_v62, %v8354_v24  ;;  %v8359_v5 = vrot.slane %v18911_v45, 7  ;;  %v18930_v30 = vld [vmem:[%s15501_s26 + $0x170] sm:$0xff] }
 0x256   : > { %4381 = vst.msk [vmem:[#allocation2 + $0x98] sm:$0xff] %vm4361_vm5, %v4348_v11  ;;  %v4349_v7 = vadd.f32 %v4274_v40, %v4189_v44  ;;  %v5566_v17 = vpop.f32.mrf.mxu1  ;;  %v6084_v0 = vpop.f32.mrf.mxu0  ;;  %21059 = vst [vmem:[#allocation60_spill] sm:$0xff] %v18930_v30  ;;  %v18939_v11 = vld [vmem:[%s15501_s26 + $0x188] sm:$0xff] }
 0x257   : > { %21058 = vst [vmem:[#allocation41_spill] sm:$0xff] %v18917_v38  ;;  %v18932_v38 = vadd.f32 %v14720_v55, %v5662_v32  ;;  %v5661_v46 = vadd.f32 %v5566_v17, %v18523_v63  ;;  %v4276_v52 = vpop.permute.xlu1 %4275  ;;  %15022 = vmatmul.mubr.msk.f32.gmra.mxu0 %vm239_vm1, %v18855_v2  ;;  %v4191_v32 = vld [vmem:[#allocation2 + $0xb0] sm:$0xff] }
 0x258   : > { %4382 = vst.msk [vmem:[#allocation2 + $0xa0] sm:$0xff] %vm4361_vm5, %v4349_v7  ;;  %v4350_v44 = vadd.f32 %v4276_v52, %v4190_v29  ;;  %v14673_v62 = vpop.f32.mrf.mxu1  ;;  %v14723_v40 = vpop.f32.mrf.mxu0  ;;  %14972 = vmatmul.mubr.msk.f32.gmra.mxu1 %vm239_vm1, %v8352_v20  ;;  %15024 = vmatprep.mubr.msk.f32.mxu0 %vm239_vm1, %v18880_v50  ;;  %v8357_v7 = vsel %vm792_vm2, %v8354_v24, %v8356_v21  ;;  %v8361_v20 = vrot.slane %v18930_v30, 7  ;;  %v8363_v52 = vrot.slane %v18936_v25, 7  ;;  %v4192_v24 = vld [vmem:[#allocation2 + $0xb8] sm:$0xff]  ;;  %v18964_v30 = vld [vmem:[%s15501_s26 + $0x1a0] sm:$0xff] }
 0x259   : > { %21060 = vst [vmem:[#allocation22_spill] sm:$0xff] %v18932_v38  ;;  %v18945_v55 = vadd.f32 %v6084_v0, %v5661_v46  ;;  %v5664_v63 = vadd.f32 %v14673_v62, %v18532_v56  ;;  %v4278_v17 = vpop.permute.xlu0 %4277  ;;  %14974 = vmatprep.mubr.msk.f32.mxu1 %vm239_vm1, %v8355_v6  ;;  %v8360_v56 = vsel %vm792_vm2, %v8358_v43, %v8359_v5  ;;  %v8364_v6 = vrot.slane %v18939_v11, 7  ;;  %v18958_v62 = vld [vmem:[%s15501_s26 + $0x190] sm:$0xff] }
 0x25a   : > { %4383 = vst.msk [vmem:[#allocation2 + $0xa8] sm:$0xff] %vm4361_vm5, %v4350_v44  ;;  %v4351_v29 = vadd.f32 %v4278_v17, %v4191_v32  ;;  %v5576_v46 = vpop.f32.mrf.mxu1  ;;  %v6094_v0 = vpop.f32.mrf.mxu0  ;;  %21062 = vst [vmem:[#allocation35_spill] sm:$0xff] %v18958_v62  ;;  %v18967_v44 = vld [vmem:[%s15501_s26 + $0x1a8] sm:$0xff] }
 0x25b   : > { %21061 = vst [vmem:[#allocation24_spill] sm:$0xff] %v18945_v55  ;;  %v18960_v55 = vadd.f32 %v14723_v40, %v5664_v63  ;;  %v5663_v38 = vadd.f32 %v5576_v46, %v18543_v26  ;;  %v4280_v21 = vpop.permute.xlu1 %4279  ;;  %15025 = vmatmul.mubr.msk.f32.gmra.mxu0 %vm239_vm1, %v18883_v49  ;;  %v4193_v63 = vld [vmem:[#allocation2 + $0xc0] sm:$0xff] }
 0x25c   : > { %4384 = vst.msk [vmem:[#allocation2 + $0xb0] sm:$0xff] %vm4361_vm5, %v4351_v29  ;;  %v4352_v32 = vadd.f32 %v4280_v21, %v4192_v24  ;;  %v14676_v43 = vpop.f32.mrf.mxu1  ;;  %v14726_v17 = vpop.f32.mrf.mxu0  ;;  %14975 = vmatmul.mubr.msk.f32.gmra.mxu1 %vm239_vm1, %v8357_v7  ;;  %15027 = vmatprep.mubr.msk.f32.mxu0 %vm239_vm1, %v18908_v61  ;;  %v8362_v29 = vsel %vm792_vm2, %v8359_v5, %v8361_v20  ;;  %v8366_v7 = vrot.slane %v18958_v62, 7  ;;  %v8368_v21 = vrot.slane %v18964_v30, 7  ;;  %v4194_v5 = vld [vmem:[#allocation2 + $0xc8] sm:$0xff]  ;;  %v18992_v62 = vld [vmem:[%s15501_s26 + $0x1c0] sm:$0xff] }
 0x25d   : > { %21063 = vst [vmem:[#allocation52_spill] sm:$0xff] %v18960_v55  ;;  %v18973_v40 = vadd.f32 %v6094_v0, %v5663_v38  ;;  %v5666_v26 = vadd.f32 %v14676_v43, %v18550_v48  ;;  %v4282_v46 = vpop.permute.xlu0 %4281  ;;  %14977 = vmatprep.mubr.msk.f32.mxu1 %vm239_vm1, %v8360_v56  ;;  %v8365_v48 = vsel %vm792_vm2, %v8363_v52, %v8364_v6  ;;  %v8369_v56 = vrot.slane %v18967_v44, 7  ;;  %v18986_v43 = vld [vmem:[%s15501_s26 + $0x1b0] sm:$0xff] }
 0x25e   : > { %4385 = vst.msk [vmem:[#allocation2 + $0xb8] sm:$0xff] %vm4361_vm5, %v4352_v32  ;;  %v4353_v24 = vadd.f32 %v4282_v46, %v4193_v63  ;;  %v5586_v38 = vpop.f32.mrf.mxu1  ;;  %v6104_v0 = vpop.f32.mrf.mxu0  ;;  %21065 = vst [vmem:[#allocation27_spill] sm:$0xff] %v18986_v43  ;;  %v18995_v32 = vld [vmem:[%s15501_s26 + $0x1c8] sm:$0xff] }
 0x25f   : > { %21064 = vst [vmem:[#allocation25_spill] sm:$0xff] %v18973_v40  ;;  %v18988_v40 = vadd.f32 %v14726_v17, %v5666_v26  ;;  %v5665_v55 = vadd.f32 %v5586_v38, %v18561_v58  ;;  %v4284_v20 = vpop.permute.xlu1 %4283  ;;  %21067 = vst [vmem:[#allocation38_spill] sm:$0xff] %v18992_v62  ;;  %15028 = vmatmul.mubr.msk.f32.gmra.mxu0 %vm239_vm1, %v18911_v45  ;;  %v4195_v26 = vld [vmem:[#allocation2 + $0xd0] sm:$0xff] }
 0x260   : > { %4386 = vst.msk [vmem:[#allocation2 + $0xc0] sm:$0xff] %vm4361_vm5, %v4353_v24  ;;  %v4354_v63 = vadd.f32 %v4284_v20, %v4194_v5  ;;  %v14679_v52 = vpop.f32.mrf.mxu1  ;;  %v14729_v46 = vpop.f32.mrf.mxu0  ;;  %14978 = vmatmul.mubr.msk.f32.gmra.mxu1 %vm239_vm1, %v8362_v29  ;;  %15030 = vmatprep.mubr.msk.f32.mxu0 %vm239_vm1, %v18936_v25  ;;  %v8367_v24 = vsel %vm792_vm2, %v8364_v6, %v8366_v7  ;;  %v8371_v29 = vrot.slane %v18986_v43, 7  ;;  %v4196_v6 = vld [vmem:[#allocation2 + $0xd8] sm:$0xff]  ;;  %v19020_v43 = vld [vmem:[%s15501_s26 + $0x1e0] sm:$0xff] }
 0x261   : > { %21066 = vst [vmem:[#allocation53_spill] sm:$0xff] %v18988_v40  ;;  %v19001_v17 = vadd.f32 %v6104_v0, %v5665_v55  ;;  %v5668_v58 = vadd.f32 %v14679_v52, %v18569_v22  ;;  %v4286_v38 = vpop.permute.xlu0 %4285  ;;  %14980 = vmatprep.mubr.msk.f32.mxu1 %vm239_vm1, %v8365_v48  ;;  %v8370_v22 = vsel %vm792_vm2, %v8368_v21, %v8369_v56  ;;  %v8374_v48 = vrot.slane %v18995_v32, 7  ;;  %v19014_v52 = vld [vmem:[%s15501_s26 + $0x1d0] sm:$0xff] }
 0x262   : > { %4387 = vst.msk [vmem:[#allocation2 + $0xc8] sm:$0xff] %vm4361_vm5, %v4354_v63  ;;  %v4355_v5 = vadd.f32 %v4286_v38, %v4195_v26  ;;  %v5596_v55 = vpop.f32.mrf.mxu1  ;;  %v6114_v0 = vpop.f32.mrf.mxu0  ;;  %v19023_v63 = vld [vmem:[%s15501_s26 + $0x1e8] sm:$0xff] }
 0x263   : > { %21068 = vst [vmem:[#allocation36_spill] sm:$0xff] %v19001_v17  ;;  %v19016_v17 = vadd.f32 %v14729_v46, %v5668_v58  ;;  %v5667_v40 = vadd.f32 %v5596_v55, %v18579_v1  ;;  %v4288_v7 = vpop.permute.xlu1 %4287  ;;  %15031 = vmatmul.mubr.msk.f32.gmra.mxu0 %vm239_vm1, %v18939_v11  ;;  %v4197_v58 = vld [vmem:[#allocation2 + $0xe0] sm:$0xff] }
 0x264   : > { %4388 = vst.msk [vmem:[#allocation2 + $0xd0] sm:$0xff] %vm4361_vm5, %v4355_v5  ;;  %v4356_v26 = vadd.f32 %v4288_v7, %v4196_v6  ;;  %v14682_v21 = vpop.f32.mrf.mxu1  ;;  %v14732_v38 = vpop.f32.mrf.mxu0  ;;  %14981 = vmatmul.mubr.msk.f32.gmra.mxu1 %vm239_vm1, %v8367_v24  ;;  %15033 = vmatprep.mubr.msk.f32.mxu0 %vm239_vm1, %v18964_v30  ;;  %v8372_v5 = vsel %vm792_vm2, %v8369_v56, %v8371_v29  ;;  %v8376_v6 = vrot.slane %v19014_v52, 7  ;;  %v4198_v29 = vld [vmem:[#allocation2 + $0xe8] sm:$0xff] }
 0x265   : > { %21069 = vst [vmem:[#allocation51_spill] sm:$0xff] %v19016_v17  ;;  %v19029_v46 = vadd.f32 %v6114_v0, %v5667_v40  ;;  %v5670_v1 = vadd.f32 %v14682_v21, %v18586_v54  ;;  %v4290_v55 = vpop.permute.xlu0 %4289  ;;  %14983 = vmatprep.mubr.msk.f32.mxu1 %vm239_vm1, %v8370_v22  ;;  %v21071_v40 = vrot.slane %v18992_v62, 7  ;;  %v8379_v22 = vrot.slane %v19023_v63, 7  ;;  %v19044_v21 = vld [vmem:[%s15501_s26 + $0x1f0] sm:$0xff] }
 0x266   : > { %4389 = vst.msk [vmem:[#allocation2 + $0xd8] sm:$0xff] %vm4361_vm5, %v4356_v26  ;;  %v4357_v24 = vadd.f32 %v4290_v55, %v4197_v58  ;;  %v5606_v7 = vpop.f32.mrf.mxu1  ;;  %v6124_v20 = vpop.f32.mrf.mxu0 }
 0x267   : > { %21070 = vst [vmem:[#allocation54_spill] sm:$0xff] %v19029_v46  ;;  %v8375_v54 = vsel %vm792_vm2, %v21071_v40, %v8374_v48  ;;  %v19046_v46 = vadd.f32 %v14732_v38, %v5670_v1  ;;  %v5669_v56 = vadd.f32 %v5606_v7, %v18597_v23  ;;  %v4292_v17 = vpop.permute.xlu1 %4291  ;;  %15034 = vmatmul.mubr.msk.f32.gmra.mxu0 %vm239_vm1, %v18967_v44  ;;  %v4199_v1 = vld [vmem:[#allocation2 + $0xf0] sm:$0xff] }
 0x268   : > { %4390 = vst.msk [vmem:[#allocation2 + $0xe0] sm:$0xff] %vm4361_vm5, %v4357_v24  ;;  %v4358_v26 = vadd.f32 %v4292_v17, %v4198_v29  ;;  %v14685_v58 = vpop.f32.mrf.mxu1  ;;  %v14735_v55 = vpop.f32.mrf.mxu0  ;;  %14984 = vmatmul.mubr.msk.f32.gmra.mxu1 %vm239_vm1, %v8372_v5  ;;  %15036 = vmatprep.mubr.msk.f32.mxu0 %vm239_vm1, %v18992_v62  ;;  %v8377_v23 = vsel %vm792_vm2, %v8374_v48, %v8376_v6  ;;  %v8381_v17 = vrot.slane %v19044_v21, 7  ;;  %v8192_v29 = vld [vmem:[%s15501_s26 + $0x18] sm:$0x3f] }
 0x269   : > { %21072 = vst [vmem:[#allocation32_spill] sm:$0xff] %v19046_v46  ;;  %v19053_v40 = vadd.f32 %v6124_v20, %v5669_v56  ;;  %v5672_v38 = vadd.f32 %v14685_v58, %v18606_v47  ;;  %v4294_v0 = vpop.permute.xlu0 %4293  ;;  %14986 = vmatprep.mubr.msk.f32.mxu1 %vm239_vm1, %v8375_v54  ;;  %v21074_v20 = vrot.slane %v19020_v43, 7  ;;  %v8986_v56 = vrot.slane %v18601_v31, 6  ;;  %v4200_v6 = vld [vmem:[#allocation2 + $0xf8] sm:$0xff]  ;;  %v21095_v46 = vld [vmem:[#allocation60_spill] sm:$0xff] }
 0x26a   : > { %4391 = vst.msk [vmem:[#allocation2 + $0xe8] sm:$0xff] %vm4361_vm5, %v4358_v26  ;;  %v4359_v5 = vadd.f32 %v4294_v0, %v4199_v1  ;;  %v5616_v24 = vpop.f32.mrf.mxu1  ;;  %v6134_v7 = vpop.f32.mrf.mxu0  ;;  %v8987_v54 = vrot.slane %v18616_v53, 6 }
 0x26b   : > { %21073 = vst [vmem:[#allocation57_spill] sm:$0xff] %v19053_v40  ;;  %v8380_v47 = vsel %vm792_vm2, %v21074_v20, %v8379_v22  ;;  %v19068_v58 = vadd.f32 %v14735_v55, %v5672_v38  ;;  %v5671_v48 = vadd.f32 %v5616_v24, %v18618_v60  ;;  %v4296_v40 = vpop.permute.xlu1 %4295  ;;  %15037 = vmatmul.mubr.msk.f32.gmra.mxu0 %vm239_vm1, %v18995_v32  ;;  %v8989_v55 = vrot.slane %v8192_v29, 6 }
 0x26c   : > { %4392 = vst.msk [vmem:[#allocation2 + $0xf0] sm:$0xff] %vm4361_vm5, %v4359_v5  ;;  %v4360_v0 = vadd.f32 %v4296_v40, %v4200_v6  ;;  %v14688_v26 = vpop.f32.mrf.mxu1  ;;  %v14738_v1 = vpop.f32.mrf.mxu0  ;;  %14987 = vmatmul.mubr.msk.f32.gmra.mxu1 %vm239_vm1, %v8377_v23  ;;  %15039 = vmatprep.mubr.msk.f32.mxu0 %vm239_vm1, %v19020_v43  ;;  %v8382_v60 = vsel %vm792_vm2, %v8379_v22, %v8381_v17  ;;  %v8196_v5 = vld [vmem:[%s15501_s26 + $0x38] sm:$0x3f]  ;;  %v8992_v20 = vrot.slane %v18638_v18, 6  ;;  %v8996_v29 = vrot.slane %v18648_v59, 6 }
 0x26d   : > { %21075 = vst [vmem:[#allocation34_spill] sm:$0xff] %v19068_v58  ;;  %v19075_v31 = vadd.f32 %v6134_v7, %v5671_v48  ;;  %v5674_v53 = vadd.f32 %v14688_v26, %v18628_v36  ;;  %14989 = vmatprep.mubr.msk.f32.mxu1 %vm239_vm1, %v8380_v47  ;;  %v8988_v23 = vsel %vm8985_vm6, %v8986_v56, %v8987_v54  ;;  %v8991_v36 = vrot.slane %v18626_v8, 6  ;;  %v19117_v59 = vld [vmem:[%s20667_s3 + $0x58] sm:$0xf] }
 0x26e   : > { %4393 = vst.msk [vmem:[#allocation2 + $0xf8] sm:$0xff] %vm4361_vm5, %v4360_v0  ;;  %v5626_v40 = vpop.f32.mrf.mxu1  ;;  %v6144_v38 = vpop.f32.mrf.mxu0  ;;  %v8990_v8 = vsel %vm8985_vm6, %v8987_v54, %v8989_v55  ;;  %v8997_v6 = vrot.slane %v18663_v42, 6  ;;  %v8200_v0 = vld [vmem:[%s15501_s26 + $0x58] sm:$0x3f] }
 0x26f   : > { %21076 = vst [vmem:[#allocation42_spill] sm:$0xff] %v19075_v31  ;;  %v19085_v24 = vadd.f32 %v14738_v1, %v5674_v53  ;;  %v5673_v7 = vadd.f32 %v5626_v40, %v18640_v19  ;;  %15040 = vmatmul.mubr.msk.f32.gmra.mxu0 %vm239_vm1, %v19023_v63  ;;  %v8994_v19 = vrot.slane %v8196_v5, 6  ;;  %v19122_v42 = vld [vmem:[%s20667_s3 + $0x5c] sm:$0xf]  ;;  %v8999_v54 = vrot.slane %v8200_v0, 6 }
 0x270   : > { %v14691_v47 = vpop.f32.mrf.mxu1  ;;  %v14741_v48 = vpop.f32.mrf.mxu0  ;;  %14990 = vmatmul.mubr.msk.f32.gmra.mxu1 %vm239_vm1, %v8382_v60  ;;  %15094 = vmatprep.mubr.msk.f32.mxu0 %vm239_vm1, %v18796_v3  ;;  %v8204_v5 = vld [vmem:[%s15501_s26 + $0x78] sm:$0x3f] }
 0x271   : > { %21077 = vst [vmem:[#allocation62_spill] sm:$0xff] %v19085_v24  ;;  %v19093_v22 = vadd.f32 %v6144_v38, %v5673_v7  ;;  %v5676_v17 = vadd.f32 %v14691_v47, %v18652_v37  ;;  %15044 = vmatprep.mubr.msk.f32.mxu1 %vm239_vm1, %v8988_v23  ;;  %v8993_v37 = vsel %vm8985_vm6, %v8991_v36, %v8992_v20  ;;  %v9001_v23 = vrot.slane %v18672_v39, 6  ;;  %v8212_v0 = vld [vmem:[%s15501_s26 + $0xb8] sm:$0x3f] }
 0x272   : > { %v5636_v18 = vpop.f32.mrf.mxu1  ;;  %v6154_v56 = vpop.f32.mrf.mxu0  ;;  %v8995_v3 = vsel %vm8985_vm6, %v8992_v20, %v8994_v19  ;;  %v8998_v38 = vsel %vm8985_vm6, %v8996_v29, %v8997_v6  ;;  %v9000_v39 = vsel %vm8985_vm6, %v8997_v6, %v8999_v54  ;;  %v9006_v47 = vrot.slane %v18711_v14, 6 }
 0x273   : > { %21078 = vst [vmem:[#allocation58_spill] sm:$0xff] %v19093_v22  ;;  %v19103_v26 = vadd.f32 %v14741_v48, %v5676_v17  ;;  %v5675_v1 = vadd.f32 %v5636_v18, %v18665_v34  ;;  %15095 = vmatmul.mubr.msk.f32.vlgmr.msra.gmra.mxu0 %vm239_vm1, %v18799_v12  ;;  %v9007_v48 = vrot.slane %v18734_v51, 6  ;;  %v8208_v17 = vld [vmem:[%s15501_s26 + $0x98] sm:$0x3f]  ;;  %v9011_v29 = vrot.slane %v18743_v16, 6 }
 0x274   : > { %v19107_v53 = vpop.f32.mrf.mxu1  ;;  %v19109_v60 = vpop.f32.mrf.mxu0  ;;  %15045 = vmatmul.mubr.msk.f32.vlgmr.msra.gmra.mxu1 %vm239_vm1, %v8990_v8  ;;  %15193 = vmatpush3.msk.msra.mxu0 %vm336_vm0, %v18685_v13  ;;  %v9012_v6 = vrot.slane %v18762_v35, 6  ;;  %v9014_v16 = vrot.slane %v8212_v0, 6  ;;  %v8232_v22 = vld [vmem:[%s15501_s26 + $0x158] sm:$0x3f] }
 0x275   : > { %21079 = vst [vmem:[#allocation63_spill] sm:$0xff] %v19103_v26  ;;  %v19124_v34 = vadd.f32 %v6154_v56, %v5675_v1  ;;  %15143 = vmatpush3.msk.msra.mxu1 %vm336_vm0, %v18680_v15  ;;  %15047 = vmatprep.mubr.msk.f32.mxu1 %vm239_vm1, %v8993_v37  ;;  %v9002_v15 = vrot.slane %v18702_v9, 6  ;;  %v9004_v9 = vrot.slane %v8204_v5, 6  ;;  %v9008_v56 = vsel %vm8985_vm6, %v9006_v47, %v9007_v48 }
 0x276   : > { %v19131_v55 = vpop.f32.mrf.mxu1  ;;  %v19133_v40 = vpop.f32.mrf.mxu0  ;;  %15097 = vmatprep.mubr.msk.f32.mxu0 %vm239_vm1, %v18824_v33  ;;  %15242 = vmatprep.subr.msk.mxu1 %vm336_vm0, %v19117_v59  ;;  %v9013_v54 = vsel %vm8985_vm6, %v9011_v29, %v9012_v6  ;;  %v20754_v47 = vrot.slane %v18799_v12, 6 }
 0x277   : > { %21080 = vst [vmem:[#allocation44_spill] sm:$0xff] %v19124_v34  ;;  %15292 = vmatprep.subr.msk.mxu0 %vm336_vm0, %v19122_v42  ;;  %15098 = vmatmul.mubr.msk.f32.gmra.mxu0 %vm239_vm1, %v18827_v41  ;;  %v9003_v20 = vsel %vm8985_vm6, %v9001_v23, %v9002_v15  ;;  %v9005_v14 = vsel %vm8985_vm6, %v9002_v15, %v9004_v9  ;;  %v9017_v23 = vrot.slane %v18790_v27, 6  ;;  %v8216_v15 = vld [vmem:[%s15501_s26 + $0xd8] sm:$0x3f]  ;;  %v19284_v34 = vld [vmem:[%s15501_s26 + $0x200] sm:$0xff] }
 0x278   : > { %v19146_v13 = vpop.f32.mrf.mxu1  ;;  %v19148_v7 = vpop.f32.mrf.mxu0  ;;  %15048 = vmatmul.mubr.msk.f32.gmra.mxu1 %vm239_vm1, %v8995_v3  ;;  %15100 = vmatprep.mubr.msk.f32.mxu0 %vm239_vm1, %v18852_v57  ;;  %v9009_v57 = vrot.slane %v8208_v17, 6  ;;  %v8220_v17 = vld [vmem:[%s15501_s26 + $0xf8] sm:$0x3f] }
 0x279   : > { %15050 = vmatprep.mubr.msk.f32.mxu1 %vm239_vm1, %v8998_v38  ;;  %v9016_v38 = vrot.slane %v18771_v28, 6  ;;  %v9015_v28 = vsel %vm8985_vm6, %v9012_v6, %v9014_v16  ;;  %v8224_v16 = vld [vmem:[%s15501_s26 + $0x118] sm:$0x3f] }
 0x27a   : > { %v19157_v33 = vpop.f32.mrf.mxu1  ;;  %v19159_v36 = vpop.f32.mrf.mxu0 }
 0x27b   : > { %15101 = vmatmul.mubr.msk.f32.gmra.mxu0 %vm239_vm1, %v18855_v2 }
 0x27c   : > { %v19165_v8 = vpop.f32.mrf.mxu1  ;;  %v19167_v19 = vpop.f32.mrf.mxu0  ;;  %15051 = vmatmul.mubr.msk.f32.gmra.mxu1 %vm239_vm1, %v9000_v39  ;;  %15103 = vmatprep.mubr.msk.f32.mxu0 %vm239_vm1, %v18880_v50  ;;  %v9010_v50 = vsel %vm8985_vm6, %v9007_v48, %v9009_v57  ;;  %v9022_v48 = vrot.slane %v18818_v4, 6  ;;  %v20755_v4 = vrot.slane %v18827_v41, 6 }
 0x27d   : > { %15053 = vmatprep.mubr.msk.f32.mxu1 %vm239_vm1, %v9003_v20  ;;  %v9018_v20 = vsel %vm8985_vm6, %v9016_v38, %v9017_v23 }
 0x27e   : > { %v19176_v18 = vpop.f32.mrf.mxu1  ;;  %v19178_v51 = vpop.f32.mrf.mxu0  ;;  %v9023_v0 = vsel %vm8985_vm6, %v20754_v47, %v9022_v48 }
 0x27f   : > { %15104 = vmatmul.mubr.msk.f32.gmra.mxu0 %vm239_vm1, %v18883_v49 }
 0x280   : > { %v19184_v1 = vpop.f32.mrf.mxu1  ;;  %v19186_v37 = vpop.f32.mrf.mxu0  ;;  %15054 = vmatmul.mubr.msk.f32.gmra.mxu1 %vm239_vm1, %v9005_v14  ;;  %15106 = vmatprep.mubr.msk.f32.mxu0 %vm239_vm1, %v18908_v61  ;;  %v9019_v61 = vrot.slane %v8216_v15, 6 }
 0x281   : > { %15056 = vmatprep.mubr.msk.f32.mxu1 %vm239_vm1, %v9008_v56  ;;  %v9024_v56 = vrot.slane %v8220_v17, 6 }
 0x282   : > { %v19195_v3 = vpop.f32.mrf.mxu1  ;;  %v19197_v35 = vpop.f32.mrf.mxu0 }
 0x283   : > { %15107 = vmatmul.mubr.msk.f32.gmra.mxu0 %vm239_vm1, %v18911_v45  ;;  %v9025_v38 = vsel %vm8985_vm6, %v9022_v48, %v9024_v56 }
 0x284   : > { %v19203_v5 = vpop.f32.mrf.mxu1  ;;  %v19205_v39 = vpop.f32.mrf.mxu0  ;;  %15057 = vmatmul.mubr.msk.f32.gmra.mxu1 %vm239_vm1, %v9010_v50  ;;  %15109 = vmatprep.mubr.msk.f32.mxu0 %vm239_vm1, %v18936_v25  ;;  %v9020_v25 = vsel %vm8985_vm6, %v9017_v23, %v9019_v61  ;;  %v9027_v50 = vrot.slane %v18846_v10, 6  ;;  %v9029_v23 = vrot.slane %v8224_v16, 6  ;;  %v20756_v10 = vrot.slane %v18855_v2, 6  ;;  %v19327_v16 = vld [vmem:[%s15501_s26 + $0x228] sm:$0xff] }
 0x285   : > { %15059 = vmatprep.mubr.msk.f32.mxu1 %vm239_vm1, %v9013_v54 }
 0x286   : > { %v19214_v9 = vpop.f32.mrf.mxu1  ;;  %v19216_v27 = vpop.f32.mrf.mxu0  ;;  %v9028_v61 = vsel %vm8985_vm6, %v20755_v4, %v9027_v50  ;;  %v9030_v48 = vsel %vm8985_vm6, %v9027_v50, %v9029_v23 }
 0x287   : > { %15110 = vmatmul.mubr.msk.f32.gmra.mxu0 %vm239_vm1, %v18939_v11 }
 0x288   : > { %v19222_v14 = vpop.f32.mrf.mxu1  ;;  %v19224_v57 = vpop.f32.mrf.mxu0  ;;  %15060 = vmatmul.mubr.msk.f32.gmra.mxu1 %vm239_vm1, %v9015_v28  ;;  %15112 = vmatprep.mubr.msk.f32.mxu0 %vm239_vm1, %v18964_v30 }
 0x289   : > { %15062 = vmatprep.mubr.msk.f32.mxu1 %vm239_vm1, %v9018_v20  ;;  %v21084_v20 = vld [vmem:[#allocation56_spill] sm:$0xff] }
 0x28a   : > { %v19234_v29 = vpop.f32.mrf.mxu1  ;;  %v19236_v6 = vpop.f32.mrf.mxu0  ;;  %v9032_v17 = vrot.slane %v21084_v20, 6 }
 0x28b   : > { %21081 = vst [vmem:[#allocation40_spill] sm:$0xff] %v19236_v6  ;;  %15113 = vmatmul.mubr.msk.f32.gmra.mxu0 %vm239_vm1, %v18967_v44 }
 0x28c   : > { %v19243_v54 = vpop.f32.mrf.mxu1  ;;  %v19245_v30 = vpop.f32.mrf.mxu0  ;;  %15063 = vmatmul.mubr.msk.f32.gmra.mxu1 %vm239_vm1, %v9020_v25  ;;  %15115 = vmatprep.mubr.msk.f32.mxu0 %vm239_vm1, %v18992_v62  ;;  %v8228_v25 = vld [vmem:[%s15501_s26 + $0x138] sm:$0x3f] }
 0x28d   : > { %21082 = vst [vmem:[#allocation59_spill] sm:$0xff] %v19245_v30  ;;  %15065 = vmatprep.mubr.msk.f32.mxu1 %vm239_vm1, %v9023_v0  ;;  %v9034_v56 = vrot.slane %v8228_v25, 6 }
 0x28e   : > { %v19255_v15 = vpop.f32.mrf.mxu1  ;;  %v19257_v28 = vpop.f32.mrf.mxu0 }
 0x28f   : > { %21083 = vst [vmem:[#allocation61_spill] sm:$0xff] %v19257_v28  ;;  %15116 = vmatmul.mubr.msk.f32.gmra.mxu0 %vm239_vm1, %v18995_v32  ;;  %v9035_v25 = vsel %vm8985_vm6, %v9032_v17, %v9034_v56  ;;  %v9057_v28 = vrot.slane %v19014_v52, 6  ;;  %v19408_v52 = vld [vmem:[%s15501_s26 + $0x288] sm:$0xff] }
 0x290   : > { %v19264_v0 = vpop.f32.mrf.mxu1  ;;  %v19266_v47 = vpop.f32.mrf.mxu0  ;;  %15066 = vmatmul.mubr.msk.f32.gmra.mxu1 %vm239_vm1, %v9025_v38  ;;  %15118 = vmatprep.mubr.msk.f32.mxu0 %vm239_vm1, %v19020_v43  ;;  %v9033_v38 = vsel %vm8985_vm6, %v20756_v10, %v9032_v17  ;;  %v19300_v10 = vld [vmem:[%s15501_s26 + $0x208] sm:$0xff]  ;;  %v8236_v17 = vld [vmem:[%s15501_s26 + $0x178] sm:$0x3f]  ;;  %21116 = vst [vmem:[#allocation9_spill] sm:$0xff] %v19408_v52 }
 0x291   : > { %21085 = vst [vmem:[#allocation37_spill] sm:$0xff] %v19264_v0  ;;  %21086 = vst [vmem:[#allocation39_spill] sm:$0xff] %v19266_v47  ;;  %15068 = vmatprep.mubr.msk.f32.mxu1 %vm239_vm1, %v9028_v61  ;;  %v21089_v61 = vld [vmem:[#allocation31_spill] sm:$0xff]  ;;  %v9062_v0 = vrot.slane %v19044_v21, 6 }
 0x292   : > { %v19276_v20 = vpop.f32.mrf.mxu1  ;;  %v19278_v4 = vpop.f32.mrf.mxu0  ;;  %v9037_v26 = vrot.slane %v21089_v61, 6  ;;  %v9039_v61 = vrot.slane %v8232_v22, 6  ;;  %v21107_v47 = vld [vmem:[#allocation27_spill] sm:$0xff] }
 0x293   : > { %21087 = vst [vmem:[#allocation64_spill] sm:$0xff] %v19276_v20  ;;  %21088 = vst [vmem:[#allocation43_spill] sm:$0xff] %v19278_v4  ;;  %15119 = vmatmul.mubr.msk.f32.gmra.mxu0 %vm239_vm1, %v19023_v63  ;;  %v9052_v20 = vrot.slane %v21107_v47, 6 }
 0x294   : > { %v19288_v50 = vpop.f32.mrf.mxu1  ;;  %v19290_v23 = vpop.f32.mrf.mxu0  ;;  %15069 = vmatmul.mubr.msk.f32.gmra.mxu1 %vm239_vm1, %v9030_v48  ;;  %15121 = vmatprep.mubr.msk.f32.mxu0 %vm239_vm1, %v19284_v34  ;;  %v21094_v48 = vrot.slane %v18883_v49, 6 }
 0x295   : > { %21090 = vst [vmem:[#allocation45_spill] sm:$0xff] %v19288_v50  ;;  %21091 = vst [vmem:[#allocation65_spill] sm:$0xff] %v19290_v23  ;;  %15071 = vmatprep.mubr.msk.f32.mxu1 %vm239_vm1, %v9033_v38  ;;  %v19311_v38 = vld [vmem:[%s15501_s26 + $0x220] sm:$0xff]  ;;  %v9042_v23 = vrot.slane %v21095_v46, 6  ;;  %v9044_v46 = vrot.slane %v8236_v17, 6 }
 0x296   : > { %v19303_v24 = vpop.f32.mrf.mxu1  ;;  %v19305_v31 = vpop.f32.mrf.mxu0  ;;  %v9038_v58 = vsel %vm8985_vm6, %v21094_v48, %v9037_v26  ;;  %v9040_v48 = vsel %vm8985_vm6, %v9037_v26, %v9039_v61  ;;  %v8240_v26 = vld [vmem:[%s15501_s26 + $0x198] sm:$0x3f] }
 0x297   : > { %21092 = vst [vmem:[#allocation46_spill] sm:$0xff] %v19303_v24  ;;  %21093 = vst [vmem:[#allocation69_spill] sm:$0xff] %v19305_v31  ;;  %15122 = vmatmul.mubr.msk.f32.gmra.mxu0 %vm239_vm1, %v19300_v10  ;;  %v21101_v24 = vld [vmem:[#allocation35_spill] sm:$0xff]  ;;  %v19354_v31 = vld [vmem:[%s15501_s26 + $0x248] sm:$0xff] }
 0x298   : > { %v19315_v56 = vpop.f32.mrf.mxu1  ;;  %v19317_v22 = vpop.f32.mrf.mxu0  ;;  %15072 = vmatmul.mubr.msk.f32.gmra.mxu1 %vm239_vm1, %v9035_v25  ;;  %15124 = vmatprep.mubr.msk.f32.mxu0 %vm239_vm1, %v19311_v38  ;;  %v21100_v25 = vrot.slane %v18911_v45, 6  ;;  %v9047_v50 = vrot.slane %v21101_v24, 6  ;;  %v9049_v24 = vrot.slane %v8240_v26, 6 }
 0x299   : > { %21096 = vst [vmem:[#allocation66_spill] sm:$0xff] %v19315_v56  ;;  %21097 = vst [vmem:[#allocation67_spill] sm:$0xff] %v19317_v22  ;;  %15074 = vmatprep.mubr.msk.f32.mxu1 %vm239_vm1, %v9038_v58  ;;  %v19338_v58 = vld [vmem:[%s15501_s26 + $0x240] sm:$0xff] }
 0x29a   : > { %v19330_v56 = vpop.f32.mrf.mxu1  ;;  %v19332_v22 = vpop.f32.mrf.mxu0  ;;  %v9043_v4 = vsel %vm8985_vm6, %v21100_v25, %v9042_v23  ;;  %v9045_v25 = vsel %vm8985_vm6, %v9042_v23, %v9044_v46  ;;  %v8244_v23 = vld [vmem:[%s15501_s26 + $0x1b8] sm:$0x3f] }
 0x29b   : > { %21098 = vst [vmem:[#allocation68_spill] sm:$0xff] %v19330_v56  ;;  %21099 = vst [vmem:[#allocation70_spill] sm:$0xff] %v19332_v22  ;;  %15125 = vmatmul.mubr.msk.f32.gmra.mxu0 %vm239_vm1, %v19327_v16  ;;  %v19381_v22 = vld [vmem:[%s15501_s26 + $0x268] sm:$0xff]  ;;  %v9054_v47 = vrot.slane %v8244_v23, 6 }
 0x29c   : > { %v19342_v61 = vpop.f32.mrf.mxu1  ;;  %v19344_v17 = vpop.f32.mrf.mxu0  ;;  %15075 = vmatmul.mubr.msk.f32.gmra.mxu1 %vm239_vm1, %v9040_v48  ;;  %15127 = vmatprep.mubr.msk.f32.mxu0 %vm239_vm1, %v19338_v58  ;;  %v21106_v48 = vrot.slane %v18939_v11, 6 }
 0x29d   : > { %21102 = vst [vmem:[#allocation47_spill] sm:$0xff] %v19342_v61  ;;  %21103 = vst [vmem:[#allocation72_spill] sm:$0xff] %v19344_v17  ;;  %15077 = vmatprep.mubr.msk.f32.mxu1 %vm239_vm1, %v9043_v4  ;;  %v19365_v4 = vld [vmem:[%s15501_s26 + $0x260] sm:$0xff] }
 0x29e   : > { %v19357_v61 = vpop.f32.mrf.mxu1  ;;  %v19359_v17 = vpop.f32.mrf.mxu0  ;;  %v9048_v56 = vsel %vm8985_vm6, %v21106_v48, %v9047_v50  ;;  %v9050_v48 = vsel %vm8985_vm6, %v9047_v50, %v9049_v24  ;;  %v8248_v50 = vld [vmem:[%s15501_s26 + $0x1d8] sm:$0x3f] }
 0x29f   : > { %21104 = vst [vmem:[#allocation71_spill] sm:$0xff] %v19357_v61  ;;  %21105 = vst [vmem:[#allocation50_spill] sm:$0xff] %v19359_v17  ;;  %15128 = vmatmul.mubr.msk.f32.gmra.mxu0 %vm239_vm1, %v19354_v31  ;;  %v9059_v17 = vrot.slane %v8248_v50, 6 }
 0x2a0   : > { %v19369_v46 = vpop.f32.mrf.mxu1  ;;  %v19371_v26 = vpop.f32.mrf.mxu0  ;;  %15078 = vmatmul.mubr.msk.f32.gmra.mxu1 %vm239_vm1, %v9045_v25  ;;  %15130 = vmatprep.mubr.msk.f32.mxu0 %vm239_vm1, %v19365_v4  ;;  %v21112_v25 = vrot.slane %v18967_v44, 6 }
 0x2a1   : > { %21108 = vst [vmem:[#allocation7_spill] sm:$0xff] %v19369_v46  ;;  %21109 = vst [vmem:[#allocation8_spill] sm:$0xff] %v19371_v26  ;;  %15080 = vmatprep.mubr.msk.f32.mxu1 %vm239_vm1, %v9048_v56  ;;  %v19392_v56 = vld [vmem:[%s15501_s26 + $0x280] sm:$0xff]  ;;  %v9060_v21 = vsel %vm8985_vm6, %v9057_v28, %v9059_v17  ;;  %v12972_v17 = vld [vmem:[%s15501_s26 + $0x110] sm:$0xff] }
 0x2a2   : > { %v19384_v46 = vpop.f32.mrf.mxu1  ;;  %v19386_v26 = vpop.f32.mrf.mxu0  ;;  %v9053_v61 = vsel %vm8985_vm6, %v21112_v25, %v9052_v20  ;;  %21113 = vst [vmem:[#allocation13_spill] sm:$0xff] %v19392_v56  ;;  %v9055_v25 = vsel %vm8985_vm6, %v9052_v20, %v9054_v47  ;;  %v8252_v20 = vld [vmem:[%s15501_s26 + $0x1f8] sm:$0x3f]  ;;  %v12968_v47 = vld [vmem:[%s15501_s26 + $0xf0] sm:$0xff] }
 0x2a3   : > { %21110 = vst [vmem:[#allocation48_spill] sm:$0xff] %v19384_v46  ;;  %21111 = vst [vmem:[#allocation49_spill] sm:$0xff] %v19386_v26  ;;  %15131 = vmatmul.mubr.msk.f32.gmra.mxu0 %vm239_vm1, %v19381_v22  ;;  %v9064_v26 = vrot.slane %v8252_v20, 6 }
 0x2a4   : > { %v19396_v24 = vpop.f32.mrf.mxu1  ;;  %v19398_v23 = vpop.f32.mrf.mxu0  ;;  %15081 = vmatmul.mubr.msk.f32.gmra.mxu1 %vm239_vm1, %v9050_v48  ;;  %15133 = vmatprep.mubr.msk.f32.mxu0 %vm239_vm1, %v19392_v56  ;;  %v21119_v48 = vrot.slane %v18995_v32, 6  ;;  %v9852_v56 = vrot.slane %v12972_v17, 6 }
 0x2a5   : > { %21114 = vst [vmem:[#allocation3_spill] sm:$0xff] %v19396_v24  ;;  %21115 = vst [vmem:[#allocation12_spill] sm:$0xff] %v19398_v23  ;;  %15083 = vmatprep.mubr.msk.f32.mxu1 %vm239_vm1, %v9053_v61  ;;  %v19419_v61 = vld [vmem:[%s15501_s26 + $0x2a0] sm:$0xff]  ;;  %v9065_v20 = vsel %vm8985_vm6, %v9062_v0, %v9064_v26 }
 0x2a6   : > { %v19411_v24 = vpop.f32.mrf.mxu1  ;;  %v19413_v23 = vpop.f32.mrf.mxu0  ;;  %v9058_v46 = vsel %vm8985_vm6, %v21119_v48, %v9057_v28  ;;  %21120 = vst [vmem:[#allocation11_spill] sm:$0xff] %v19419_v61  ;;  %v19436_v48 = vld [vmem:[%s15501_s26 + $0x2a8] sm:$0xff] }
 0x2a7   : > { %21117 = vst [vmem:[#allocation17_spill] sm:$0xff] %v19411_v24  ;;  %21118 = vst [vmem:[#allocation10_spill] sm:$0xff] %v19413_v23  ;;  %15134 = vmatmul.mubr.msk.f32.gmra.mxu0 %vm239_vm1, %v19408_v52  ;;  %v19446_v24 = vld [vmem:[%s15501_s26 + $0x2c0] sm:$0xff]  ;;  %v12969_v52 = vld [vmem:[%s15501_s26 + $0xf8] sm:$0x3f] }
 0x2a8   : > { %v19424_v50 = vpop.f32.mrf.mxu1  ;;  %v19426_v30 = vpop.f32.mrf.mxu0  ;;  %15084 = vmatmul.mubr.msk.f32.gmra.mxu1 %vm239_vm1, %v9055_v25  ;;  %15136 = vmatprep.mubr.msk.f32.mxu0 %vm239_vm1, %v19419_v61  ;;  %21123 = vst [vmem:[#allocation56_spill] sm:$0xff] %v19436_v48  ;;  %v21126_v25 = vrot.slane %v19023_v63, 6  ;;  %21127 = vst [vmem:[#allocation35_spill] sm:$0xff] %v19446_v24 }
 0x2a9   : > { %21121 = vst [vmem:[#allocation14_spill] sm:$0xff] %v19424_v50  ;;  %21122 = vst [vmem:[#allocation29_spill] sm:$0xff] %v19426_v30  ;;  %15086 = vmatprep.mubr.msk.f32.mxu1 %vm239_vm1, %v9058_v46  ;;  %v9847_v46 = vrot.slane %v12968_v47, 6  ;;  %v19462_v47 = vld [vmem:[%s15501_s26 + $0x2c8] sm:$0xff] }
 0x2aa   : > { %v19438_v23 = vpop.f32.mrf.mxu1  ;;  %v19440_v30 = vpop.f32.mrf.mxu0  ;;  %v9063_v50 = vsel %vm8985_vm6, %v21126_v25, %v9062_v0  ;;  %v9849_v25 = vrot.slane %v12969_v52, 6  ;;  %v21135_v52 = vld [vmem:[#allocation26_spill] sm:$0xff] }
 0x2ab   : > { %21124 = vst [vmem:[#allocation31_spill] sm:$0xff] %v19438_v23  ;;  %21125 = vst [vmem:[#allocation60_spill] sm:$0xff] %v19440_v30  ;;  %15137 = vmatmul.mubr.msk.f32.gmra.mxu0 %vm239_vm1, %v19436_v48  ;;  %v12973_v30 = vld [vmem:[%s15501_s26 + $0x118] sm:$0x3f]  ;;  %v21132_v48 = vld [vmem:[#allocation5_spill] sm:$0xff] }
 0x2ac   : > { %v19449_v61 = vpop.f32.mrf.mxu1  ;;  %v19451_v28 = vpop.f32.mrf.mxu0  ;;  %15087 = vmatmul.mubr.msk.f32.gmra.mxu1 %vm239_vm1, %v9060_v21  ;;  %15139 = vmatprep.mubr.msk.f32.mxu0 %vm239_vm1, %v19446_v24  ;;  %v21131_v21 = vrot.slane %v18799_v12, 6  ;;  %v12976_v24 = vld [vmem:[%s15501_s26 + $0x130] sm:$0xff]  ;;  %v9854_v26 = vrot.slane %v12973_v30, 6  ;;  %v6585_v12 = vadd.f32 %v19131_v55, %v21135_v52  ;;  %v21136_v30 = vld [vmem:[#allocation4_spill] sm:$0xff]  ;;  %v21137_v55 = vrot.slane %v18827_v41, 6 }
 0x2ad   : > { %21128 = vst [vmem:[#allocation27_spill] sm:$0xff] %v19449_v61  ;;  %21129 = vst [vmem:[#allocation73_spill] sm:$0xff] %v19451_v28  ;;  %15089 = vmatprep.mubr.msk.f32.mxu1 %vm239_vm1, %v9063_v50  ;;  %v6586_v50 = vadd.f32 %v19107_v53, %v21132_v48  ;;  %v9850_v53 = vsel %vm8985_vm6, %v9847_v46, %v9849_v25  ;;  %v12977_v48 = vld [vmem:[%s15501_s26 + $0x138] sm:$0x3f]  ;;  %v12980_v52 = vld [vmem:[%s15501_s26 + $0x150] sm:$0xff] }
 0x2ae   : > { %v19465_v61 = vpop.f32.mrf.mxu1  ;;  %v19467_v28 = vpop.f32.mrf.mxu0  ;;  %v9848_v23 = vsel %vm8985_vm6, %v21131_v21, %v9847_v46  ;;  %v9859_v46 = vrot.slane %v12977_v48, 6  ;;  %v21138_v25 = vld [vmem:[#allocation23_spill] sm:$0xff]  ;;  %v21141_v48 = vld [vmem:[#allocation33_spill] sm:$0xff] }
 0x2af   : > { %21130 = vst [vmem:[#allocation74_spill] sm:$0xff] %v19467_v28  ;;  %15140 = vmatmul.mubr.msk.f32.gmra.mxu0 %vm239_vm1, %v19462_v47  ;;  %v6588_v28 = vadd.f32 %v19146_v13, %v21136_v30  ;;  %v6587_v13 = vadd.f32 %v19157_v33, %v21138_v25  ;;  %v9862_v33 = vrot.slane %v12980_v52, 6 }
 0x2b0   : > { %v19475_v6 = vpop.f32.mrf.mxu1  ;;  %v19477_v0 = vpop.f32.mrf.mxu0  ;;  %15090 = vmatmul.mubr.msk.f32.gmra.mxu1 %vm239_vm1, %v9065_v20  ;;  %15194 = vmatprep.mubr.msk.f32.mxu0 %vm239_vm1, %v18992_v62  ;;  %v9857_v20 = vrot.slane %v12976_v24, 6  ;;  %v9855_v24 = vsel %vm8985_vm6, %v9852_v56, %v9854_v26 }
 0x2b1   : > { %21133 = vst [vmem:[#allocation5_spill] sm:$0xff] %v19475_v6  ;;  %21134 = vst [vmem:[#allocation75_spill] sm:$0xff] %v19477_v0  ;;  %15144 = vmatprep.mubr.msk.f32.mxu1 %vm239_vm1, %v9848_v23  ;;  %v7105_v0 = vadd.f32 %v19109_v60, %v6586_v50  ;;  %v9853_v23 = vsel %vm8985_vm6, %v21137_v55, %v9852_v56  ;;  %v7104_v60 = vadd.f32 %v19133_v40, %v6585_v12  ;;  %v12981_v50 = vld [vmem:[%s15501_s26 + $0x158] sm:$0x3f]  ;;  %v12984_v12 = vld [vmem:[%s15501_s26 + $0x170] sm:$0xff] }
 0x2b2   : > { %v19489_v17 = vpop.f32.mrf.mxu1  ;;  %v19491_v21 = vpop.f32.mrf.mxu0  ;;  %v21139_v40 = vrot.slane %v18855_v2, 6  ;;  %v6589_v55 = vadd.f32 %v19176_v18, %v21141_v48  ;;  %v9860_v2 = vsel %vm8985_vm6, %v9857_v20, %v9859_v46  ;;  %v12985_v18 = vld [vmem:[%s15501_s26 + $0x178] sm:$0x3f]  ;;  %v9867_v46 = vrot.slane %v12984_v12, 6 }
 0x2b3   : > { %15195 = vmatmul.mubr.msk.f32.vlgmr.msra.gmra.mxu0 %vm239_vm1, %v18995_v32  ;;  %v21145_v12 = vrot.slane %v18911_v45, 6 }
 0x2b4   : > { %v14846_v62 = vpop.f32.mrf.mxu1  ;;  %v14896_v6 = vpop.f32.mrf.mxu0  ;;  %15145 = vmatmul.mubr.msk.f32.vlgmr.msra.gmra.mxu1 %vm239_vm1, %v9850_v53  ;;  %15293 = vmatpush3.msk.msra.mxu0 %vm336_vm0, %v19122_v42  ;;  %v9858_v56 = vsel %vm8985_vm6, %v21139_v40, %v9857_v20  ;;  %v7108_v40 = vadd.f32 %v19178_v51, %v6589_v55  ;;  %v12989_v51 = vld [vmem:[%s15501_s26 + $0x198] sm:$0x3f] }
 0x2b5   : > { %v7511_v41 = vadd.f32 %v14846_v62, %v7105_v0  ;;  %15243 = vmatpush3.msk.msra.mxu1 %vm336_vm0, %v19117_v59  ;;  %15147 = vmatprep.mubr.msk.f32.mxu1 %vm239_vm1, %v9853_v23  ;;  %v7107_v62 = vadd.f32 %v19148_v7, %v6588_v28  ;;  %v21140_v0 = vld [vmem:[#allocation15_spill] sm:$0xff]  ;;  %v9864_v7 = vrot.slane %v12981_v50, 6  ;;  %v7106_v28 = vadd.f32 %v19159_v36, %v6587_v13  ;;  %v21143_v13 = vld [vmem:[#allocation16_spill] sm:$0xff]  ;;  %v21146_v55 = vld [vmem:[#allocation6_spill] sm:$0xff] }
 0x2b6   : > { %v7351_v53 = vpop.f32.mrf.mxu1  ;;  %v7773_v30 = vpop.f32.mrf.mxu0  ;;  %15197 = vmatprep.mubr.msk.f32.mxu0 %vm239_vm1, %v19020_v43  ;;  %v6590_v59 = vadd.f32 %v19165_v8, %v21140_v0 }
 0x2b7   : > { %v7933_v26 = vadd.f32 %v14896_v6, %v7511_v41  ;;  %v7510_v42 = vadd.f32 %v7351_v53, %v7104_v60  ;;  %15198 = vmatmul.mubr.msk.f32.gmra.mxu0 %vm239_vm1, %v19023_v63  ;;  %v6592_v41 = vadd.f32 %v19184_v1, %v21143_v13  ;;  %v21149_v13 = vld [vmem:[#allocation20_spill] sm:$0xff] }
 0x2b8   : > { %v14849_v23 = vpop.f32.mrf.mxu1  ;;  %v14899_v25 = vpop.f32.mrf.mxu0  ;;  %15148 = vmatmul.mubr.msk.f32.gmra.mxu1 %vm239_vm1, %v9855_v24  ;;  %15200 = vmatprep.mubr.msk.f32.mxu0 %vm239_vm1, %v19284_v34  ;;  %v21142_v24 = vrot.slane %v18883_v49, 6  ;;  %v7109_v36 = vadd.f32 %v19167_v19, %v6590_v59  ;;  %v9865_v49 = vsel %vm8985_vm6, %v9862_v33, %v9864_v7  ;;  %v9869_v19 = vrot.slane %v12985_v18, 6  ;;  %v12992_v7 = vld [vmem:[%s15501_s26 + $0x1b0] sm:$0xff] }
 0x2b9   : > { %v7932_v8 = vadd.f32 %v7773_v30, %v7510_v42  ;;  %v7513_v6 = vadd.f32 %v14849_v23, %v7107_v62  ;;  %8030 = vrot.lane.b32.xlu1 %v7933_v26, %s15445_s28  ;;  %15150 = vmatprep.mubr.msk.f32.mxu1 %vm239_vm1, %v9858_v56  ;;  %v12988_v30 = vld [vmem:[%s15501_s26 + $0x190] sm:$0xff]  ;;  %v21144_v62 = vld [vmem:[#allocation30_spill] sm:$0xff]  ;;  %v6594_v23 = vadd.f32 %v19203_v5, %v21146_v55 }
 0x2ba   : > { %v7361_v52 = vpop.f32.mrf.mxu1  ;;  %v7783_v60 = vpop.f32.mrf.mxu0  ;;  %v9863_v20 = vsel %vm8985_vm6, %v21142_v24, %v9862_v33  ;;  %v6591_v1 = vadd.f32 %v19195_v3, %v21144_v62  ;;  %v9868_v33 = vsel %vm8985_vm6, %v21145_v12, %v9867_v46  ;;  %v9872_v48 = vrot.slane %v12988_v30, 6  ;;  %v19582_v30 = vld [vmem:[%s15501_s26 + $0x1d0] sm:$0xff] }
 0x2bb   : > { %v7935_v50 = vadd.f32 %v14899_v25, %v7513_v6  ;;  %v7512_v53 = vadd.f32 %v7361_v52, %v7106_v28  ;;  %8028 = vrot.lane.b32.xlu0 %v7932_v8, %s15445_s28  ;;  %15201 = vmatmul.mubr.msk.f32.gmra.mxu0 %vm239_vm1, %v19300_v10  ;;  %v7111_v3 = vadd.f32 %v19186_v37, %v6592_v41  ;;  %v21147_v28 = vld [vmem:[#allocation28_spill] sm:$0xff]  ;;  %v9874_v37 = vrot.slane %v12989_v51, 6 }
 0x2bc   : > { %v14852_v56 = vpop.f32.mrf.mxu1  ;;  %v14902_v34 = vpop.f32.mrf.mxu0  ;;  %15151 = vmatmul.mubr.msk.f32.gmra.mxu1 %vm239_vm1, %v9860_v2  ;;  %15203 = vmatprep.mubr.msk.f32.mxu0 %vm239_vm1, %v19311_v38  ;;  %v6593_v8 = vadd.f32 %v19214_v9, %v21147_v28  ;;  %v9870_v45 = vsel %vm8985_vm6, %v9867_v46, %v9869_v19  ;;  %v7110_v5 = vadd.f32 %v19197_v35, %v6591_v1  ;;  %v12993_v9 = vld [vmem:[%s15501_s26 + $0x1b8] sm:$0x3f]  ;;  %v19600_v51 = vrot.slane %v19582_v30, 6 }
 0x2bd   : > { %v7934_v0 = vadd.f32 %v7783_v60, %v7512_v53  ;;  %v7515_v59 = vadd.f32 %v14852_v56, %v7109_v36  ;;  %8034 = vrot.lane.b32.xlu1 %v7935_v50, %s15445_s28  ;;  %15153 = vmatprep.mubr.msk.f32.mxu1 %vm239_vm1, %v9863_v20  ;;  %v21148_v20 = vrot.slane %v18939_v11, 6  ;;  %v9877_v36 = vrot.slane %v12992_v7, 6 }
 0x2be   : > { %v7371_v26 = vpop.f32.mrf.mxu1  ;;  %v7793_v42 = vpop.f32.mrf.mxu0  ;;  %v7113_v35 = vadd.f32 %v19205_v39, %v6594_v23  ;;  %v6596_v41 = vadd.f32 %v19222_v14, %v21149_v13  ;;  %v9875_v11 = vsel %vm8985_vm6, %v9872_v48, %v9874_v37  ;;  %v9879_v39 = vrot.slane %v12993_v9, 6  ;;  %v21150_v14 = vld [vmem:[#allocation55_spill] sm:$0xff]  ;;  %v21154_v23 = vld [vmem:[#allocation40_spill] sm:$0xff]  ;;  %v21159_v9 = vld [vmem:[#allocation37_spill] sm:$0xff] }
 0x2bf   : > { %v7937_v25 = vadd.f32 %v14902_v34, %v7515_v59  ;;  %v7514_v2 = vadd.f32 %v7371_v26, %v7108_v40  ;;  %8032 = vrot.lane.b32.xlu0 %v7934_v0, %s15445_s28  ;;  %15204 = vmatmul.mubr.msk.f32.gmra.mxu0 %vm239_vm1, %v19327_v16  ;;  %v9873_v46 = vsel %vm8985_vm6, %v21148_v20, %v9872_v48  ;;  %v21151_v0 = vrot.slane %v18967_v44, 6  ;;  %v21152_v26 = vld [vmem:[#allocation18_spill] sm:$0xff]  ;;  %v19607_v48 = vld [vmem:[%s15501_s26 + $0x1f0] sm:$0xff] }
 0x2c0   : > { %v14855_v38 = vpop.f32.mrf.mxu1  ;;  %v14905_v6 = vpop.f32.mrf.mxu0  ;;  %15154 = vmatmul.mubr.msk.f32.gmra.mxu1 %vm239_vm1, %v9865_v49  ;;  %15206 = vmatprep.mubr.msk.f32.mxu0 %vm239_vm1, %v19338_v58  ;;  %v7112_v40 = vadd.f32 %v19216_v27, %v6593_v8  ;;  %v6595_v34 = vadd.f32 %v19234_v29, %v21150_v14  ;;  %v12997_v27 = vld [vmem:[%s15501_s26 + $0x1d8] sm:$0x3f]  ;;  %v7115_v29 = vadd.f32 %v19224_v57, %v6596_v41  ;;  %v19626_v37 = vrot.slane %v19607_v48, 6  ;;  %v21161_v41 = vld [vmem:[#allocation9_spill] sm:$0xff] }
 0x2c1   : > { %v7936_v18 = vadd.f32 %v7793_v42, %v7514_v2  ;;  %v7517_v52 = vadd.f32 %v14855_v38, %v7111_v3  ;;  %8038 = vrot.lane.b32.xlu1 %v7937_v25, %s15445_s28  ;;  %15156 = vmatprep.mubr.msk.f32.mxu1 %vm239_vm1, %v9868_v33  ;;  %v9878_v59 = vsel %vm8985_vm6, %v21151_v0, %v9877_v36  ;;  %v21155_v38 = vld [vmem:[#allocation13_spill] sm:$0xff]  ;;  %v13005_v14 = vld [vmem:[%s15501_s26 + $0x218] sm:$0x3f] }
 0x2c2   : > { %v7381_v60 = vpop.f32.mrf.mxu1  ;;  %v7803_v24 = vpop.f32.mrf.mxu0  ;;  %v6598_v42 = vadd.f32 %v19243_v54, %v21152_v26  ;;  %v9880_v57 = vsel %vm8985_vm6, %v9877_v36, %v9879_v39  ;;  %v9884_v54 = vrot.slane %v12997_v27, 6  ;;  %v7114_v25 = vadd.f32 %v21154_v23, %v6595_v34  ;;  %v21160_v36 = vld [vmem:[#allocation61_spill] sm:$0xff]  ;;  %v21164_v27 = vld [vmem:[#allocation11_spill] sm:$0xff]  ;;  %v21167_v26 = vld [vmem:[#allocation22_spill] sm:$0xff] }
 0x2c3   : > { %v7939_v50 = vadd.f32 %v14905_v6, %v7517_v52  ;;  %v7516_v53 = vadd.f32 %v7381_v60, %v7110_v5  ;;  %8036 = vrot.lane.b32.xlu0 %v7936_v18, %s15445_s28  ;;  %15207 = vmatmul.mubr.msk.f32.gmra.mxu0 %vm239_vm1, %v19354_v31  ;;  %v21156_v6 = vrot.slane %v18995_v32, 6  ;;  %v21157_v5 = vld [vmem:[#allocation59_spill] sm:$0xff]  ;;  %v21158_v52 = vld [vmem:[#allocation21_spill] sm:$0xff]  ;;  %v9891_v34 = vrot.slane %v19300_v10, 6 }
 0x2c4   : > { %v14858_v58 = vpop.f32.mrf.mxu1  ;;  %v14908_v56 = vpop.f32.mrf.mxu0  ;;  %15157 = vmatmul.mubr.msk.f32.gmra.mxu1 %vm239_vm1, %v9870_v45  ;;  %15209 = vmatprep.mubr.msk.f32.mxu0 %vm239_vm1, %v19365_v4  ;;  %v21153_v4 = vld [vmem:[#allocation19_spill] sm:$0xff]  ;;  %v7117_v18 = vadd.f32 %v21157_v5, %v6598_v42  ;;  %v6600_v60 = vadd.f32 %v21159_v9, %v21158_v52  ;;  %v21168_v42 = vld [vmem:[#allocation45_spill] sm:$0xff] }
 0x2c5   : > { %v7938_v49 = vadd.f32 %v7803_v24, %v7516_v53  ;;  %v7519_v19 = vadd.f32 %v14858_v58, %v7113_v35  ;;  %8042 = vrot.lane.b32.xlu1 %v7939_v50, %s15445_s28  ;;  %15159 = vmatprep.mubr.msk.f32.mxu1 %vm239_vm1, %v9873_v46  ;;  %v6597_v44 = vadd.f32 %v19255_v15, %v21153_v4  ;;  %v13001_v15 = vld [vmem:[%s15501_s26 + $0x1f8] sm:$0x3f]  ;;  %v19633_v46 = vld [vmem:[%s15501_s26 + $0x210] sm:$0xff]  ;;  %v21163_v58 = vld [vmem:[#allocation64_spill] sm:$0xff] }
 0x2c6   : > { %v7391_v62 = vpop.f32.mrf.mxu1  ;;  %v7813_v1 = vpop.f32.mrf.mxu0  ;;  %v9883_v45 = vsel %vm8985_vm6, %v21156_v6, %v19600_v51  ;;  %v9885_v50 = vsel %vm8985_vm6, %v19600_v51, %v9884_v54  ;;  %v9889_v53 = vrot.slane %v13001_v15, 6  ;;  %v19654_v0 = vrot.slane %v19633_v46, 6  ;;  %v19661_v4 = vld [vmem:[%s15501_s26 + $0x230] sm:$0xff]  ;;  %v21171_v54 = vld [vmem:[#allocation56_spill] sm:$0xff]  ;;  %v21173_v5 = vld [vmem:[#allocation35_spill] sm:$0xff] }
 0x2c7   : > { %v7941_v12 = vadd.f32 %v14908_v56, %v7519_v19  ;;  %v7518_v33 = vadd.f32 %v7391_v62, %v7112_v40  ;;  %8040 = vrot.lane.b32.xlu0 %v7938_v49, %s15445_s28  ;;  %15210 = vmatmul.mubr.msk.f32.gmra.mxu0 %vm239_vm1, %v19381_v22  ;;  %v7116_v35 = vadd.f32 %v21160_v36, %v6597_v44  ;;  %v21162_v40 = vld [vmem:[#allocation41_spill] sm:$0xff]  ;;  %v21165_v62 = vrot.slane %v19023_v63, 6  ;;  %v21169_v44 = vld [vmem:[#allocation24_spill] sm:$0xff] }
 0x2c8   : > { %v14861_v3 = vpop.f32.mrf.mxu1  ;;  %v14911_v55 = vpop.f32.mrf.mxu0  ;;  %15160 = vmatmul.mubr.msk.f32.gmra.mxu1 %vm239_vm1, %v9875_v11  ;;  %15212 = vmatprep.mubr.msk.f32.mxu0 %vm239_vm1, %v21155_v38  ;;  %v6599_v56 = vadd.f32 %v21163_v58, %v21162_v40  ;;  %v9890_v23 = vsel %vm8985_vm6, %v19626_v37, %v9889_v53  ;;  %v9896_v38 = vrot.slane %v19327_v16, 6  ;;  %v19680_v52 = vrot.slane %v19661_v4, 6  ;;  %v21174_v9 = vld [vmem:[#allocation65_spill] sm:$0xff]  ;;  %v19687_v16 = vld [vmem:[%s15501_s26 + $0x2e0] sm:$0xff] }
 0x2c9   : > { %v7940_v2 = vadd.f32 %v7813_v1, %v7518_v33  ;;  %v7521_v7 = vadd.f32 %v14861_v3, %v7115_v29  ;;  %8046 = vrot.lane.b32.xlu1 %v7941_v12, %s15445_s28  ;;  %15162 = vmatprep.mubr.msk.f32.mxu1 %vm239_vm1, %v9878_v59  ;;  %v9888_v1 = vsel %vm8985_vm6, %v21165_v62, %v19626_v37  ;;  %v21166_v59 = vld [vmem:[#allocation39_spill] sm:$0xff]  ;;  %v21170_v3 = vld [vmem:[#allocation46_spill] sm:$0xff] }
 0x2ca   : > { %v7401_v28 = vpop.f32.mrf.mxu1  ;;  %v7823_v8 = vpop.f32.mrf.mxu0  ;;  %v7119_v29 = vadd.f32 %v21166_v59, %v6600_v60  ;;  %v6602_v12 = vadd.f32 %v21168_v42, %v21167_v26  ;;  %v6601_v63 = vadd.f32 %v21170_v3, %v21169_v44  ;;  %v13013_v62 = vld [vmem:[%s15501_s26 + $0x258] sm:$0x3f]  ;;  %v9898_v26 = vsel %vm8985_vm6, %v9896_v38, %v19680_v52  ;;  %v21182_v44 = vld [vmem:[#allocation47_spill] sm:$0xff] }
 0x2cb   : > { %v7943_v24 = vadd.f32 %v14911_v55, %v7521_v7  ;;  %v7520_v20 = vadd.f32 %v7401_v28, %v7114_v25  ;;  %8044 = vrot.lane.b32.xlu0 %v7940_v2, %s15445_s28  ;;  %15213 = vmatmul.mubr.msk.f32.gmra.mxu0 %vm239_vm1, %v21161_v41  ;;  %v9894_v25 = vrot.slane %v13005_v14, 6  ;;  %v21172_v2 = vld [vmem:[#allocation43_spill] sm:$0xff]  ;;  %v21179_v14 = vld [vmem:[#allocation68_spill] sm:$0xff]  ;;  %v21185_v38 = vld [vmem:[#allocation70_spill] sm:$0xff] }
 0x2cc   : > { %v14864_v32 = vpop.f32.mrf.mxu1  ;;  %v14914_v13 = vpop.f32.mrf.mxu0  ;;  %15163 = vmatmul.mubr.msk.f32.gmra.mxu1 %vm239_vm1, %v9880_v57  ;;  %15215 = vmatprep.mubr.msk.f32.mxu0 %vm239_vm1, %v21164_v27  ;;  %v7118_v7 = vadd.f32 %v21172_v2, %v6599_v56  ;;  %v7121_v60 = vadd.f32 %v21174_v9, %v6602_v12  ;;  %v19703_v27 = vld [vmem:[%s15501_s26 + $0x2e8] sm:$0xff]  ;;  %v21180_v12 = vld [vmem:[#allocation67_spill] sm:$0xff]  ;;  %v13017_v9 = vld [vmem:[%s15501_s26 + $0x278] sm:$0x3f] }
 0x2cd   : > { %v7942_v11 = vadd.f32 %v7823_v8, %v7520_v20  ;;  %v7523_v39 = vadd.f32 %v14864_v32, %v7117_v18  ;;  %8050 = vrot.lane.b32.xlu1 %v7943_v24, %s15445_s28  ;;  %15165 = vmatprep.mubr.msk.f32.mxu1 %vm239_vm1, %v9883_v45  ;;  %v13009_v8 = vld [vmem:[%s15501_s26 + $0x238] sm:$0x3f]  ;;  %v9893_v18 = vsel %vm8985_vm6, %v9891_v34, %v19654_v0  ;;  %v21175_v24 = vld [vmem:[#allocation52_spill] sm:$0xff] }
 0x2ce   : > { %v7411_v49 = vpop.f32.mrf.mxu1  ;;  %v7833_v19 = vpop.f32.mrf.mxu0  ;;  %v21176_v20 = vld [vmem:[#allocation66_spill] sm:$0xff]  ;;  %v9895_v56 = vsel %vm8985_vm6, %v19654_v0, %v9894_v25  ;;  %v21184_v25 = vld [vmem:[#allocation71_spill] sm:$0xff] }
 0x2cf   : > { %v7945_v33 = vadd.f32 %v14914_v13, %v7523_v39  ;;  %v7522_v10 = vadd.f32 %v7411_v49, %v7116_v35  ;;  %8048 = vrot.lane.b32.xlu0 %v7942_v11, %s15445_s28  ;;  %15216 = vmatmul.mubr.msk.f32.gmra.mxu0 %vm239_vm1, %v21171_v54  ;;  %v6604_v36 = vadd.f32 %v21176_v20, %v21175_v24  ;;  %v19690_v13 = vld [vmem:[%s15501_s26 + $0x250] sm:$0xff]  ;;  %v9899_v11 = vrot.slane %v13009_v8, 6 }
 0x2d0   : > { %v14867_v55 = vpop.f32.mrf.mxu1  ;;  %v14917_v57 = vpop.f32.mrf.mxu0  ;;  %15166 = vmatmul.mubr.msk.f32.gmra.mxu1 %vm239_vm1, %v9885_v50  ;;  %15218 = vmatprep.mubr.msk.f32.mxu0 %vm239_vm1, %v21173_v5  ;;  %v21177_v50 = vld [vmem:[#allocation69_spill] sm:$0xff]  ;;  %v19712_v42 = vrot.slane %v19690_v13, 6  ;;  %v9904_v8 = vrot.slane %v13013_v62, 6 }
 0x2d1   : > { %v7944_v15 = vadd.f32 %v7833_v19, %v7522_v10  ;;  %v7525_v28 = vadd.f32 %v14867_v55, %v7119_v29  ;;  %8054 = vrot.lane.b32.xlu1 %v7945_v33, %s15445_s28  ;;  %15168 = vmatprep.mubr.msk.f32.mxu1 %vm239_vm1, %v9888_v1  ;;  %v7120_v53 = vadd.f32 %v21177_v50, %v6601_v63  ;;  %v21178_v39 = vld [vmem:[#allocation25_spill] sm:$0xff]  ;;  %v9901_v1 = vrot.slane %v19354_v31, 6  ;;  %v19719_v31 = vld [vmem:[%s15501_s26 + $0x300] sm:$0xff] }
 0x2d2   : > { %v7421_v6 = vpop.f32.mrf.mxu1  ;;  %v7843_v45 = vpop.f32.mrf.mxu0  ;;  %v6603_v34 = vadd.f32 %v21179_v14, %v21178_v39  ;;  %v7123_v33 = vadd.f32 %v21180_v12, %v6604_v36  ;;  %v21181_v10 = vld [vmem:[#allocation53_spill] sm:$0xff]  ;;  %v21189_v14 = vld [vmem:[#allocation50_spill] sm:$0xff]  ;;  %v9905_v62 = vsel %vm8985_vm6, %v19712_v42, %v9904_v8 }
 0x2d3   : > { %v7947_v35 = vadd.f32 %v14917_v57, %v7525_v28  ;;  %v7524_v32 = vadd.f32 %v7421_v6, %v7118_v7  ;;  %8052 = vrot.lane.b32.xlu0 %v7944_v15, %s15445_s28  ;;  %15219 = vmatmul.mubr.msk.f32.gmra.mxu0 %vm239_vm1, %v19462_v47  ;;  %v6606_v3 = vadd.f32 %v21182_v44, %v21181_v10  ;;  %v19722_v57 = vld [vmem:[%s15501_s26 + $0x270] sm:$0xff]  ;;  %v19767_v10 = vld [vmem:[%s15501_s26 + $0x328] sm:$0xff]  ;;  %v13021_v44 = vld [vmem:[%s15501_s26 + $0x298] sm:$0x3f] }
 0x2d4   : > { %v14870_v40 = vpop.f32.mrf.mxu1  ;;  %v14920_v58 = vpop.f32.mrf.mxu0  ;;  %15169 = vmatmul.mubr.msk.f32.gmra.mxu1 %vm239_vm1, %v9890_v23  ;;  %15221 = vmatprep.mubr.msk.f32.mxu0 %vm239_vm1, %v19687_v16  ;;  %v21183_v23 = vld [vmem:[#allocation36_spill] sm:$0xff]  ;;  %v9900_v28 = vsel %vm8985_vm6, %v19680_v52, %v9899_v11  ;;  %v7122_v6 = vadd.f32 %v21185_v38, %v6603_v34  ;;  %v9903_v36 = vsel %vm8985_vm6, %v9901_v1, %v19712_v42  ;;  %v19754_v39 = vld [vmem:[%s15501_s26 + $0x290] sm:$0xff]  ;;  %v9909_v1 = vrot.slane %v13017_v9, 6 }
 0x2d5   : > { %v7946_v49 = vadd.f32 %v7843_v45, %v7524_v32  ;;  %v7527_v19 = vadd.f32 %v14870_v40, %v7121_v60  ;;  %8058 = vrot.lane.b32.xlu1 %v7947_v35, %s15445_s28  ;;  %15171 = vmatprep.mubr.msk.f32.mxu1 %vm239_vm1, %v9893_v18  ;;  %v6605_v2 = vadd.f32 %v21184_v25, %v21183_v23  ;;  %v19735_v18 = vld [vmem:[%s15501_s26 + $0x308] sm:$0xff]  ;;  %v9906_v60 = vrot.slane %v19381_v22, 6  ;;  %v21188_v40 = vld [vmem:[#allocation7_spill] sm:$0xff]  ;;  %v21196_v9 = vld [vmem:[#allocation17_spill] sm:$0xff] }
 0x2d6   : > { %v7431_v59 = vpop.f32.mrf.mxu1  ;;  %v7853_v29 = vpop.f32.mrf.mxu0  ;;  %v19744_v35 = vrot.slane %v19722_v57, 6  ;;  %v21186_v32 = vld [vmem:[#allocation72_spill] sm:$0xff]  ;;  %v19751_v22 = vld [vmem:[%s15501_s26 + $0x320] sm:$0xff]  ;;  %v19776_v25 = vrot.slane %v19754_v39, 6 }
 0x2d7   : > { %v7949_v63 = vadd.f32 %v14920_v58, %v7527_v19  ;;  %v7526_v55 = vadd.f32 %v7431_v59, %v7120_v53  ;;  %8056 = vrot.lane.b32.xlu0 %v7946_v49, %s15445_s28  ;;  %15222 = vmatmul.mubr.msk.f32.gmra.mxu0 %vm239_vm1, %v19703_v27  ;;  %v7125_v50 = vadd.f32 %v21186_v32, %v6606_v3  ;;  %v21187_v53 = vld [vmem:[#allocation51_spill] sm:$0xff]  ;;  %v21190_v59 = vld [vmem:[#allocation54_spill] sm:$0xff]  ;;  %v9911_v3 = vrot.slane %v21161_v41, 6 }
 0x2d8   : > { %v14873_v7 = vpop.f32.mrf.mxu1  ;;  %v14923_v15 = vpop.f32.mrf.mxu0  ;;  %15172 = vmatmul.mubr.msk.f32.gmra.mxu1 %vm239_vm1, %v9895_v56  ;;  %15224 = vmatprep.mubr.msk.f32.mxu0 %vm239_vm1, %v19719_v31  ;;  %v6608_v58 = vadd.f32 %v21188_v40, %v21187_v53  ;;  %v7124_v34 = vadd.f32 %v21189_v14, %v6605_v2  ;;  %v9908_v23 = vsel %vm8985_vm6, %v9906_v60, %v19744_v35  ;;  %v21192_v2 = vld [vmem:[#allocation8_spill] sm:$0xff]  ;;  %v19783_v41 = vld [vmem:[%s15501_s26 + $0x340] sm:$0xff]  ;;  %v9914_v32 = vrot.slane %v13021_v44, 6 }
 0x2d9   : > { %v7948_v45 = vadd.f32 %v7853_v29, %v7526_v55  ;;  %v7529_v5 = vadd.f32 %v14873_v7, %v7123_v33  ;;  %8062 = vrot.lane.b32.xlu1 %v7949_v63, %s15445_s28  ;;  %15174 = vmatprep.mubr.msk.f32.mxu1 %vm239_vm1, %v9898_v26  ;;  %v21191_v29 = vld [vmem:[#allocation48_spill] sm:$0xff]  ;;  %v9916_v14 = vrot.slane %v21171_v54, 6  ;;  %v19815_v54 = vld [vmem:[%s15501_s26 + $0x360] sm:$0xff] }
 0x2da   : > { %v7441_v24 = vpop.f32.mrf.mxu1  ;;  %v7863_v20 = vpop.f32.mrf.mxu0  ;;  %v6607_v26 = vadd.f32 %v21191_v29, %v21190_v59  ;;  %v7127_v7 = vadd.f32 %v21192_v2, %v6608_v58  ;;  %v21199_v29 = vld [vmem:[#allocation34_spill] sm:$0xff] }
 0x2db   : > { %v7951_v56 = vadd.f32 %v14923_v15, %v7529_v5  ;;  %v7528_v11 = vadd.f32 %v7441_v24, %v7122_v6  ;;  %8060 = vrot.lane.b32.xlu0 %v7948_v45, %s15445_s28  ;;  %15225 = vmatmul.mubr.msk.f32.gmra.mxu0 %vm239_vm1, %v19735_v18  ;;  %v21193_v15 = vld [vmem:[#allocation32_spill] sm:$0xff]  ;;  %v19786_v45 = vld [vmem:[%s15501_s26 + $0x2b0] sm:$0xff] }
 0x2dc   : > { %v14876_v49 = vpop.f32.mrf.mxu1  ;;  %v14926_v19 = vpop.f32.mrf.mxu0  ;;  %15175 = vmatmul.mubr.msk.f32.gmra.mxu1 %vm239_vm1, %v9900_v28  ;;  %15227 = vmatprep.mubr.msk.f32.mxu0 %vm239_vm1, %v19751_v22  ;;  %v21194_v28 = vld [vmem:[#allocation3_spill] sm:$0xff]  ;;  %v21195_v5 = vld [vmem:[#allocation57_spill] sm:$0xff] }
 0x2dd   : > { %v7950_v12 = vadd.f32 %v7863_v20, %v7528_v11  ;;  %v7531_v33 = vadd.f32 %v14876_v49, %v7125_v50  ;;  %8066 = vrot.lane.b32.xlu1 %v7951_v56, %s15445_s28  ;;  %15177 = vmatprep.mubr.msk.f32.mxu1 %vm239_vm1, %v9903_v36  ;;  %v6610_v8 = vadd.f32 %v21194_v28, %v21193_v15  ;;  %v21197_v50 = vld [vmem:[#allocation49_spill] sm:$0xff]  ;;  %v19799_v56 = vld [vmem:[%s15501_s26 + $0x348] sm:$0xff]  ;;  %v13025_v11 = vld [vmem:[%s15501_s26 + $0x2b8] sm:$0x3f] }
 0x2de   : > { %v7451_v63 = vpop.f32.mrf.mxu1  ;;  %v7873_v55 = vpop.f32.mrf.mxu0  ;;  %v6609_v60 = vadd.f32 %v21196_v9, %v21195_v5  ;;  %v9910_v36 = vsel %vm8985_vm6, %v19744_v35, %v9909_v1  ;;  %v7126_v53 = vadd.f32 %v21197_v50, %v6607_v26  ;;  %v21198_v1 = vld [vmem:[#allocation12_spill] sm:$0xff]  ;;  %v21200_v26 = vld [vmem:[#allocation14_spill] sm:$0xff]  ;;  %v9919_v15 = vrot.slane %v13025_v11, 6  ;;  %v21206_v11 = vld [vmem:[#allocation27_spill] sm:$0xff] }
 0x2df   : > { %v7953_v38 = vadd.f32 %v14926_v19, %v7531_v33  ;;  %v7530_v6 = vadd.f32 %v7451_v63, %v7124_v34  ;;  %8064 = vrot.lane.b32.xlu0 %v7950_v12, %s15445_s28  ;;  %15228 = vmatmul.mubr.msk.f32.gmra.mxu0 %vm239_vm1, %v19767_v10  ;;  %v9913_v19 = vsel %vm8985_vm6, %v9911_v3, %v19776_v25  ;;  %v19818_v63 = vld [vmem:[%s15501_s26 + $0x2d0] sm:$0xff]  ;;  %v21202_v28 = vld [vmem:[#allocation42_spill] sm:$0xff]  ;;  %v19831_v9 = vld [vmem:[%s15501_s26 + $0x368] sm:$0xff] }
 0x2e0   : > { %v14879_v24 = vpop.f32.mrf.mxu1  ;;  %v14929_v20 = vpop.f32.mrf.mxu0  ;;  %15178 = vmatmul.mubr.msk.f32.gmra.mxu1 %vm239_vm1, %v9905_v62  ;;  %15230 = vmatprep.mubr.msk.f32.mxu0 %vm239_vm1, %v19783_v41  ;;  %v19808_v62 = vrot.slane %v19786_v45, 6  ;;  %v7129_v59 = vadd.f32 %v21198_v1, %v6610_v8  ;;  %v6612_v12 = vadd.f32 %v21200_v26, %v21199_v29  ;;  %v21203_v8 = vld [vmem:[#allocation31_spill] sm:$0xff]  ;;  %v19840_v50 = vrot.slane %v19818_v63, 6  ;;  %v21207_v1 = vld [vmem:[#allocation58_spill] sm:$0xff] }
 0x2e1   : > { %v7952_v40 = vadd.f32 %v7873_v55, %v7530_v6  ;;  %v7533_v58 = vadd.f32 %v14879_v24, %v7127_v7  ;;  %8070 = vrot.lane.b32.xlu1 %v7953_v38, %s15445_s28  ;;  %15180 = vmatprep.mubr.msk.f32.mxu1 %vm239_vm1, %v9908_v23  ;;  %v21201_v55 = vld [vmem:[#allocation10_spill] sm:$0xff]  ;;  %v9915_v7 = vsel %vm8985_vm6, %v19776_v25, %v9914_v32  ;;  %v9921_v24 = vrot.slane %v19462_v47, 6  ;;  %v19847_v47 = vld [vmem:[%s15501_s26 + $0x380] sm:$0xff] }
 0x2e2   : > { %v7461_v34 = vpop.f32.mrf.mxu1  ;;  %v7883_v49 = vpop.f32.mrf.mxu0  ;;  %v7128_v3 = vadd.f32 %v21201_v55, %v6609_v60  ;;  %v6611_v38 = vadd.f32 %v21203_v8, %v21202_v28  ;;  %v13029_v60 = vld [vmem:[%s15501_s26 + $0x2d8] sm:$0x3f]  ;;  %v9918_v32 = vsel %vm8985_vm6, %v9916_v14, %v19808_v62  ;;  %v9920_v26 = vsel %vm8985_vm6, %v19808_v62, %v9919_v15  ;;  %v15420_v28 = vld [vmem:[%s15501_s26 + $0x1c8] sm:$0xff] }
 0x2e3   : > { %v7955_v33 = vadd.f32 %v14929_v20, %v7533_v58  ;;  %v7532_v44 = vadd.f32 %v7461_v34, %v7126_v53  ;;  %8068 = vrot.lane.b32.xlu0 %v7952_v40, %s15445_s28  ;;  %15231 = vmatmul.mubr.msk.f32.gmra.mxu0 %vm239_vm1, %v19799_v56  ;;  %v21204_v53 = vld [vmem:[#allocation29_spill] sm:$0xff]  ;;  %v21205_v58 = vld [vmem:[#allocation62_spill] sm:$0xff]  ;;  %v9923_v15 = vsel %vm8985_vm6, %v9921_v24, %v19840_v50  ;;  %v10692_v8 = vrot.slane %v15420_v28, 7 }
 0x2e4   : > { %v14882_v23 = vpop.f32.mrf.mxu1  ;;  %v14932_v2 = vpop.f32.mrf.mxu0  ;;  %15181 = vmatmul.mubr.msk.f32.gmra.mxu1 %vm239_vm1, %v9910_v36  ;;  %15233 = vmatprep.mubr.msk.f32.mxu0 %vm239_vm1, %v19815_v54  ;;  %v7131_v40 = vadd.f32 %v21204_v53, %v6612_v12  ;;  %v6614_v34 = vadd.f32 %v21206_v11, %v21205_v58  ;;  %v9924_v12 = vrot.slane %v13029_v60, 6  ;;  %v21210_v60 = vld [vmem:[#allocation63_spill] sm:$0xff]  ;;  %v21212_v58 = vld [vmem:[#allocation74_spill] sm:$0xff] }
 0x2e5   : > { %v7954_v6 = vadd.f32 %v7883_v49, %v7532_v44  ;;  %v7535_v5 = vadd.f32 %v14882_v23, %v7129_v59  ;;  %8074 = vrot.lane.b32.xlu1 %v7955_v33, %s15445_s28  ;;  %15183 = vmatprep.mubr.msk.f32.mxu1 %vm239_vm1, %v9913_v19  ;;  %v6613_v59 = vadd.f32 %v19465_v61, %v21207_v1  ;;  %v21208_v33 = vld [vmem:[#allocation60_spill] sm:$0xff]  ;;  %v13101_v23 = vld [vmem:[%s15501_s26 + $0x1d8] sm:$0x3f] }
 0x2e6   : > { %v7471_v20 = vpop.f32.mrf.mxu1  ;;  %v7893_v36 = vpop.f32.mrf.mxu0  ;;  %v7130_v44 = vadd.f32 %v21208_v33, %v6611_v38  ;;  %v19860_v61 = vld [vmem:[%s15501_s26 + $0x388] sm:$0xff]  ;;  %v11113_v38 = vrot.slane %v15420_v28, 6  ;;  %v9925_v24 = vsel %vm8985_vm6, %v19840_v50, %v9924_v12  ;;  %v11116_v1 = vrot.slane %v13101_v23, 6  ;;  %v21214_v12 = vld [vmem:[#allocation38_spill] sm:$0xff]  ;;  %v21216_v28 = vld [vmem:[#allocation75_spill] sm:$0xff] }
 0x2e7   : > { %v7957_v49 = vadd.f32 %v14932_v2, %v7535_v5  ;;  %v7534_v19 = vadd.f32 %v7471_v20, %v7128_v3  ;;  %8072 = vrot.lane.b32.xlu0 %v7954_v6, %s15445_s28  ;;  %15234 = vmatmul.mubr.msk.f32.gmra.mxu0 %vm239_vm1, %v19831_v9  ;;  %v21209_v6 = vld [vmem:[#allocation73_spill] sm:$0xff]  ;;  %v7132_v11 = vadd.f32 %v21212_v58, %v6613_v59  ;;  %v15421_v23 = vld [vmem:[%s15501_s26 + $0x1e8] sm:$0xff] }
 0x2e8   : > { %v14885_v14 = vpop.f32.mrf.mxu1  ;;  %v14935_v29 = vpop.f32.mrf.mxu0  ;;  %15184 = vmatmul.mubr.msk.f32.gmra.mxu1 %vm239_vm1, %v9915_v7  ;;  %15236 = vmatprep.mubr.msk.f32.mxu0 %vm239_vm1, %v19847_v47  ;;  %v7133_v5 = vadd.f32 %v21209_v6, %v6614_v34  ;;  %v21211_v20 = vld [vmem:[#allocation5_spill] sm:$0xff]  ;;  %v10694_v34 = vrot.slane %v19582_v30, 7 }
 0x2e9   : > { %v7956_v55 = vadd.f32 %v7893_v36, %v7534_v19  ;;  %v7537_v3 = vadd.f32 %v14885_v14, %v7131_v40  ;;  %8078 = vrot.lane.b32.xlu1 %v7957_v49, %s15445_s28  ;;  %15186 = vmatprep.mubr.msk.f32.mxu1 %vm239_vm1, %v9918_v32  ;;  %v6616_v36 = vadd.f32 %v21211_v20, %v21210_v60  ;;  %v19873_v40 = vld [vmem:[%s15501_s26 + $0x3a0] sm:$0xff]  ;;  %v21213_v14 = vld [vmem:[#allocation44_spill] sm:$0xff]  ;;  %v11118_v60 = vrot.slane %v15421_v23, 6 }
 0x2ea   : > { %v7481_v2 = vpop.f32.mrf.mxu1  ;;  %v7903_v7 = vpop.f32.mrf.mxu0 }
 0x2eb   : > { %v7959_v32 = vadd.f32 %v14935_v29, %v7537_v3  ;;  %v7536_v53 = vadd.f32 %v7481_v2, %v7130_v44  ;;  %8076 = vrot.lane.b32.xlu0 %v7956_v55, %s15445_s28  ;;  %15237 = vmatmul.mubr.msk.f32.gmra.mxu0 %vm239_vm1, %v19860_v61  ;;  %v6615_v29 = vadd.f32 %v19489_v17, %v21213_v14  ;;  %v21215_v3 = vrot.slane %v21214_v12, 7  ;;  %v15424_v12 = vld [vmem:[%s15501_s26 + $0x220] sm:$0xff] }
 0x2ec   : > { %v14888_v49 = vpop.f32.mrf.mxu1  ;;  %v14938_v19 = vpop.f32.mrf.mxu0  ;;  %15187 = vmatmul.mubr.msk.f32.gmra.mxu1 %vm239_vm1, %v9920_v26  ;;  %v19887_v26 = vld [vmem:[%s15501_s26 + $0x3a8] sm:$0xff]  ;;  %15239 = vmatprep.mubr.msk.f32.mxu0 %vm239_vm1, %v19873_v40  ;;  %v11115_v17 = vsel %vm8985_vm6, %v11113_v38, %v19600_v51  ;;  %v10697_v2 = vrot.slane %v15421_v23, 7  ;;  %v7135_v6 = vadd.f32 %v21216_v28, %v6616_v36  ;;  %v10695_v38 = vsel %vm792_vm2, %v10692_v8, %v10694_v34 }
 0x2ed   : > { %v7958_v33 = vadd.f32 %v7903_v7, %v7536_v53  ;;  %v7539_v59 = vadd.f32 %v14888_v49, %v7133_v5  ;;  %8082 = vrot.lane.b32.xlu1 %v7959_v32, %s15445_s28  ;;  %15189 = vmatprep.mubr.msk.f32.mxu1 %vm239_vm1, %v9923_v15  ;;  %v10693_v30 = vsel %vm792_vm2, %v21215_v3, %v10692_v8  ;;  %v13105_v7 = vld [vmem:[%s15501_s26 + $0x1f8] sm:$0x3f]  ;;  %v10699_v36 = vrot.slane %v19607_v48, 7  ;;  %v15423_v34 = vld [vmem:[%s15501_s26 + $0x208] sm:$0xff] }
 0x2ee   : > { %v7491_v44 = vpop.f32.mrf.mxu1  ;;  %v7913_v55 = vpop.f32.mrf.mxu0  ;;  %v11117_v53 = vsel %vm8985_vm6, %v19600_v51, %v11116_v1  ;;  %v7134_v58 = vadd.f32 %v19491_v21, %v6615_v29  ;;  %v21217_v51 = vrot.slane %v19020_v43, 7  ;;  %v10702_v21 = vrot.slane %v15423_v34, 7  ;;  %v13109_v29 = vld [vmem:[%s15501_s26 + $0x218] sm:$0x3f] }
 0x2ef   : > { %v7961_v15 = vadd.f32 %v14938_v19, %v7539_v59  ;;  %v7538_v5 = vadd.f32 %v7491_v44, %v7132_v11  ;;  %8080 = vrot.lane.b32.xlu0 %v7958_v33, %s15445_s28  ;;  %15240 = vmatmul.mubr.msk.f32.gmra.mxu0 %vm239_vm1, %v19887_v26  ;;  %v11121_v19 = vrot.slane %v13105_v7, 6  ;;  %v11123_v1 = vrot.slane %v15423_v34, 6 }
 0x2f0   : > { %v14891_v20 = vpop.f32.mrf.mxu1  ;;  %v14941_v32 = vpop.f32.mrf.mxu0  ;;  %15190 = vmatmul.mubr.msk.f32.gmra.mxu1 %vm239_vm1, %v9925_v24  ;;  %v15422_v24 = vld [vmem:[%s15501_s26 + $0x200] sm:$0xff]  ;;  %15294 = vmatprep.mubr.msk.f32.mxu0 %vm239_vm1, %v11115_v17  ;;  %v10698_v48 = vsel %vm792_vm2, %v21217_v51, %v10697_v2  ;;  %v10706_v3 = vrot.slane %v15424_v12, 7  ;;  %v10700_v43 = vsel %vm792_vm2, %v10697_v2, %v10699_v36  ;;  %v10704_v17 = vrot.slane %v19633_v46, 7 }
 0x2f1   : > { %v7960_v11 = vadd.f32 %v7913_v55, %v7538_v5  ;;  %v7541_v49 = vadd.f32 %v14891_v20, %v7135_v6  ;;  %8086 = vrot.lane.b32.xlu1 %v7961_v15, %s15445_s28  ;;  %15244 = vmatprep.mubr.msk.f32.mxu1 %vm239_vm1, %v10693_v30  ;;  %v10701_v14 = vrot.slane %v15422_v24, 7  ;;  %v11120_v55 = vsel %vm8985_vm6, %v11118_v60, %v19626_v37  ;;  %v15425_v20 = vld [vmem:[%s15501_s26 + $0x228] sm:$0xff]  ;;  %v15428_v12 = vld [vmem:[%s15501_s26 + $0x260] sm:$0xff] }
 0x2f2   : > { %v7501_v33 = vpop.f32.mrf.mxu1  ;;  %v7923_v8 = vpop.f32.mrf.mxu0  ;;  %v11122_v6 = vsel %vm8985_vm6, %v19626_v37, %v11121_v19  ;;  %v11126_v15 = vrot.slane %v13109_v29, 6  ;;  %v11125_v46 = vsel %vm8985_vm6, %v11123_v1, %v19654_v0  ;;  %v10705_v19 = vsel %vm792_vm2, %v10702_v21, %v10704_v17  ;;  %v15427_v1 = vld [vmem:[%s15501_s26 + $0x248] sm:$0xff] }
 0x2f3   : > { %v7963_v59 = vadd.f32 %v14941_v32, %v7541_v49  ;;  %v7540_v44 = vadd.f32 %v7501_v33, %v7134_v58  ;;  %8084 = vrot.lane.b32.xlu0 %v7960_v11, %s15445_s28  ;;  %15295 = vmatmul.mubr.msk.f32.vlgmr.msra.gmra.mxu0 %vm239_vm1, %v11117_v53  ;;  %v10703_v2 = vsel %vm792_vm2, %v10701_v14, %v10702_v21  ;;  %v10707_v32 = vrot.slane %v15425_v20, 7  ;;  %v13113_v53 = vld [vmem:[%s15501_s26 + $0x238] sm:$0x3f]  ;;  %v15426_v58 = vld [vmem:[%s15501_s26 + $0x240] sm:$0xff] }
 0x2f4   : > { %v14946_v30 = vpop.f32.mrf.mxu1  ;;  %v14996_v23 = vpop.f32.mrf.mxu0  ;;  %15245 = vmatmul.mubr.msk.f32.vlgmr.msra.gmra.mxu1 %vm239_vm1, %v10695_v38  ;;  %15297 = vmatprep.mubr.msk.f32.mxu0 %vm239_vm1, %v11120_v55  ;;  %v11128_v38 = vrot.slane %v15425_v20, 6  ;;  %v10711_v37 = vrot.slane %v15426_v58, 7  ;;  %v11127_v14 = vsel %vm8985_vm6, %v19654_v0, %v11126_v15  ;;  %v10709_v33 = vrot.slane %v19661_v4, 7  ;;  %v13121_v20 = vld [vmem:[%s15501_s26 + $0x278] sm:$0x3f] }
 0x2f5   : > { %v7962_v7 = vadd.f32 %v7923_v8, %v7540_v44  ;;  %v19925_v28 = vadd.f32 %v14996_v23, %v14946_v30  ;;  %8090 = vrot.lane.b32.xlu1 %v7963_v59, %s15445_s28  ;;  %15247 = vmatprep.mubr.msk.f32.mxu1 %vm239_vm1, %v10698_v48  ;;  %v11131_v8 = vrot.slane %v13113_v53, 6  ;;  %v10708_v34 = vsel %vm792_vm2, %v10706_v3, %v10707_v32  ;;  %v13117_v44 = vld [vmem:[%s15501_s26 + $0x258] sm:$0x3f]  ;;  %v15430_v53 = vld [vmem:[%s15501_s26 + $0x280] sm:$0xff] }
 0x2f6   : > { %v8518_v5 = vpop.f32.mrf.mxu1  ;;  %v8810_v60 = vpop.f32.mrf.mxu0  ;;  %v11130_v21 = vsel %vm8985_vm6, %v11128_v38, %v19680_v52  ;;  %v10712_v29 = vrot.slane %v15427_v1, 7  ;;  %v11133_v59 = vrot.slane %v15427_v1, 6  ;;  %v10716_v30 = vrot.slane %v15428_v12, 7 }
 0x2f7   : > { %v19937_v36 = vadd.f32 %v8810_v60, %v8518_v5  ;;  %8088 = vrot.lane.b32.xlu0 %v7962_v7, %s15445_s28  ;;  %15298 = vmatmul.mubr.msk.f32.gmra.mxu0 %vm239_vm1, %v11122_v6  ;;  %v10714_v4 = vrot.slane %v19690_v13, 7  ;;  %v11132_v17 = vsel %vm8985_vm6, %v19680_v52, %v11131_v8  ;;  %v11136_v7 = vrot.slane %v13117_v44, 6  ;;  %v15429_v60 = vld [vmem:[%s15501_s26 + $0x268] sm:$0xff]  ;;  %v15432_v44 = vld [vmem:[%s15501_s26 + $0x2a0] sm:$0xff] }
 0x2f8   : > { %v14949_v11 = vpop.f32.mrf.mxu1  ;;  %v14999_v49 = vpop.f32.mrf.mxu0  ;;  %15248 = vmatmul.mubr.msk.f32.gmra.mxu1 %vm239_vm1, %v10700_v43  ;;  %15300 = vmatprep.mubr.msk.f32.mxu0 %vm239_vm1, %v11125_v46  ;;  %v10710_v43 = vsel %vm792_vm2, %v10707_v32, %v10709_v33  ;;  %v10713_v5 = vsel %vm792_vm2, %v10711_v37, %v10712_v29  ;;  %v11135_v13 = vsel %vm8985_vm6, %v11133_v59, %v19712_v42  ;;  %v11138_v46 = vrot.slane %v15429_v60, 6 }
 0x2f9   : > { %v19944_v24 = vadd.f32 %v14999_v49, %v14949_v11  ;;  %15250 = vmatprep.mubr.msk.f32.mxu1 %vm239_vm1, %v10703_v2  ;;  %v10717_v2 = vrot.slane %v15429_v60, 7  ;;  %v10721_v58 = vrot.slane %v15430_v53, 7  ;;  %v10715_v52 = vsel %vm792_vm2, %v10712_v29, %v10714_v4  ;;  %v13125_v29 = vld [vmem:[%s15501_s26 + $0x298] sm:$0x3f] }
 0x2fa   : > { %v8528_v51 = vpop.f32.mrf.mxu1  ;;  %v8820_v48 = vpop.f32.mrf.mxu0  ;;  %v11137_v49 = vsel %vm8985_vm6, %v19712_v42, %v11136_v7  ;;  %v10726_v12 = vrot.slane %v15432_v44, 7  ;;  %v13129_v60 = vld [vmem:[%s15501_s26 + $0x2b8] sm:$0x3f] }
 0x2fb   : > { %v19956_v55 = vadd.f32 %v8820_v48, %v8528_v51  ;;  %15301 = vmatmul.mubr.msk.f32.gmra.mxu0 %vm239_vm1, %v11127_v14  ;;  %v11141_v14 = vrot.slane %v13121_v20, 6  ;;  %v10718_v51 = vsel %vm792_vm2, %v10716_v30, %v10717_v2  ;;  %v11140_v48 = vsel %vm8985_vm6, %v11138_v46, %v19744_v35  ;;  %v15434_v20 = vld [vmem:[%s15501_s26 + $0x2c0] sm:$0xff] }
 0x2fc   : > { %v14952_v0 = vpop.f32.mrf.mxu1  ;;  %v15002_v23 = vpop.f32.mrf.mxu0  ;;  %15251 = vmatmul.mubr.msk.f32.gmra.mxu1 %vm239_vm1, %v10705_v19  ;;  %15303 = vmatprep.mubr.msk.f32.mxu0 %vm239_vm1, %v11130_v21  ;;  %v10719_v19 = vrot.slane %v19722_v57, 7  ;;  %v10724_v57 = vrot.slane %v19754_v39, 7 }
 0x2fd   : > { %v19962_v3 = vadd.f32 %v15002_v23, %v14952_v0  ;;  %15253 = vmatprep.mubr.msk.f32.mxu1 %vm239_vm1, %v10708_v34  ;;  %v15431_v34 = vld [vmem:[%s15501_s26 + $0x288] sm:$0xff]  ;;  %v11142_v4 = vsel %vm8985_vm6, %v19744_v35, %v11141_v14 }
 0x2fe   : > { %v8538_v6 = vpop.f32.mrf.mxu1  ;;  %v8830_v15 = vpop.f32.mrf.mxu0  ;;  %v10722_v21 = vrot.slane %v15431_v34, 7  ;;  %v11143_v1 = vrot.slane %v15431_v34, 6  ;;  %v10720_v23 = vsel %vm792_vm2, %v10717_v2, %v10719_v19  ;;  %v10731_v2 = vrot.slane %v15434_v20, 7  ;;  %v15435_v19 = vld [vmem:[%s15501_s26 + $0x2c8] sm:$0xff]  ;;  %v13133_v34 = vld [vmem:[%s15501_s26 + $0x2d8] sm:$0x3f] }
 0x2ff   : > { %v19974_v38 = vadd.f32 %v8830_v15, %v8538_v6  ;;  %15304 = vmatmul.mubr.msk.f32.gmra.mxu0 %vm239_vm1, %v11132_v17  ;;  %v15433_v15 = vld [vmem:[%s15501_s26 + $0x2a8] sm:$0xff]  ;;  %v10732_v14 = vrot.slane %v15435_v19, 7 }
 0x300   : > { %v14955_v32 = vpop.f32.mrf.mxu1  ;;  %v15005_v11 = vpop.f32.mrf.mxu0  ;;  %15254 = vmatmul.mubr.msk.f32.gmra.mxu1 %vm239_vm1, %v10710_v43  ;;  %15306 = vmatprep.mubr.msk.f32.mxu0 %vm239_vm1, %v11135_v13  ;;  %v11146_v43 = vrot.slane %v13125_v29, 6  ;;  %v10723_v6 = vsel %vm792_vm2, %v10721_v58, %v10722_v21  ;;  %v11145_v39 = vsel %vm8985_vm6, %v11143_v1, %v19776_v25  ;;  %v11148_v13 = vrot.slane %v15433_v15, 6  ;;  %v13136_v1 = vld [vmem:[%s15501_s26 + $0x2f0] sm:$0xff] }
 0x301   : > { %v19980_v37 = vadd.f32 %v15005_v11, %v14955_v32  ;;  %15256 = vmatprep.mubr.msk.f32.mxu1 %vm239_vm1, %v10713_v5  ;;  %v10727_v5 = vrot.slane %v15433_v15, 7  ;;  %v10725_v35 = vsel %vm792_vm2, %v10722_v21, %v10724_v57  ;;  %v10729_v58 = vrot.slane %v19786_v45, 7 }
 0x302   : > { %v8548_v33 = vpop.f32.mrf.mxu1  ;;  %v8840_v8 = vpop.f32.mrf.mxu0  ;;  %v11153_v45 = vrot.slane %v15435_v19, 6  ;;  %v10736_v29 = vrot.slane %v19687_v16, 7  ;;  %v10733_v57 = vsel %vm792_vm2, %v10731_v2, %v10732_v14  ;;  %v10739_v2 = vrot.slane %v13136_v1, 7 }
 0x303   : > { %v19992_v59 = vadd.f32 %v8840_v8, %v8548_v33  ;;  %15307 = vmatmul.mubr.msk.f32.gmra.mxu0 %vm239_vm1, %v11137_v49  ;;  %v11151_v49 = vrot.slane %v13129_v60, 6  ;;  %v11163_v19 = vrot.slane %v19735_v18, 6 }
 0x304   : > { %v14958_v42 = vpop.f32.mrf.mxu1  ;;  %v15008_v0 = vpop.f32.mrf.mxu0  ;;  %15257 = vmatmul.mubr.msk.f32.gmra.mxu1 %vm239_vm1, %v10715_v52  ;;  %15309 = vmatprep.mubr.msk.f32.mxu0 %vm239_vm1, %v11140_v48  ;;  %v11147_v52 = vsel %vm8985_vm6, %v19776_v25, %v11146_v43  ;;  %v11150_v48 = vsel %vm8985_vm6, %v11148_v13, %v19808_v62  ;;  %v10730_v25 = vsel %vm792_vm2, %v10727_v5, %v10729_v58  ;;  %v10741_v13 = vrot.slane %v19719_v31, 7 }
 0x305   : > { %v19998_v30 = vadd.f32 %v15008_v0, %v14958_v42  ;;  %15259 = vmatprep.mubr.msk.f32.mxu1 %vm239_vm1, %v10718_v51  ;;  %v10728_v51 = vsel %vm792_vm2, %v10726_v12, %v10727_v5  ;;  %v10734_v12 = vrot.slane %v19818_v63, 7  ;;  %v11152_v16 = vsel %vm8985_vm6, %v19808_v62, %v11151_v49  ;;  %v13140_v5 = vld [vmem:[%s15501_s26 + $0x310] sm:$0xff] }
 0x306   : > { %v8558_v17 = vpop.f32.mrf.mxu1  ;;  %v8850_v7 = vpop.f32.mrf.mxu0  ;;  %v11158_v63 = vrot.slane %v19703_v27, 6 }
 0x307   : > { %v20010_v46 = vadd.f32 %v8850_v7, %v8558_v17  ;;  %15310 = vmatmul.mubr.msk.f32.gmra.mxu0 %vm239_vm1, %v11142_v4  ;;  %v11155_v17 = vsel %vm8985_vm6, %v11153_v45, %v19840_v50  ;;  %v10737_v7 = vrot.slane %v19703_v27, 7  ;;  %v10735_v20 = vsel %vm792_vm2, %v10732_v14, %v10734_v12 }
 0x308   : > { %v14961_v53 = vpop.f32.mrf.mxu1  ;;  %v15011_v32 = vpop.f32.mrf.mxu0  ;;  %15260 = vmatmul.mubr.msk.f32.gmra.mxu1 %vm239_vm1, %v10720_v23  ;;  %15312 = vmatprep.mubr.msk.f32.mxu0 %vm239_vm1, %v11145_v39  ;;  %v11156_v23 = vrot.slane %v13133_v34, 6  ;;  %v13137_v39 = vld [vmem:[%s15501_s26 + $0x2f8] sm:$0x3f]  ;;  %v11164_v14 = vrot.slane %v13140_v5, 6 }
 0x309   : > { %v20017_v11 = vadd.f32 %v15011_v32, %v14961_v53  ;;  %15262 = vmatprep.mubr.msk.f32.mxu1 %vm239_vm1, %v10723_v6  ;;  %v11159_v6 = vrot.slane %v13136_v1, 6  ;;  %v11161_v31 = vrot.slane %v13137_v39, 6  ;;  %v10742_v32 = vrot.slane %v19735_v18, 7 }
 0x30a   : > { %v8568_v33 = vpop.f32.mrf.mxu1  ;;  %v8860_v8 = vpop.f32.mrf.mxu0  ;;  %v11157_v27 = vsel %vm8985_vm6, %v19840_v50, %v11156_v23  ;;  %v10740_v34 = vsel %vm792_vm2, %v10737_v7, %v10739_v2  ;;  %v10744_v1 = vrot.slane %v13140_v5, 7  ;;  %v11165_v12 = vsel %vm8985_vm6, %v11163_v19, %v11164_v14 }
 0x30b   : > { %v20028_v21 = vadd.f32 %v8860_v8, %v8568_v33  ;;  %15313 = vmatmul.mubr.msk.f32.gmra.mxu0 %vm239_vm1, %v11147_v52  ;;  %v10738_v52 = vsel %vm792_vm2, %v10736_v29, %v10737_v7  ;;  %v11160_v49 = vsel %vm8985_vm6, %v11158_v63, %v11159_v6  ;;  %v13141_v33 = vld [vmem:[%s15501_s26 + $0x318] sm:$0x3f]  ;;  %v11162_v18 = vsel %vm8985_vm6, %v11159_v6, %v11161_v31 }
 0x30c   : > { %v14964_v44 = vpop.f32.mrf.mxu1  ;;  %v15014_v42 = vpop.f32.mrf.mxu0  ;;  %15263 = vmatmul.mubr.msk.f32.gmra.mxu1 %vm239_vm1, %v10725_v35  ;;  %15315 = vmatprep.mubr.msk.f32.mxu0 %vm239_vm1, %v11150_v48  ;;  %v10746_v48 = vrot.slane %v19751_v22, 7  ;;  %v10743_v22 = vsel %vm792_vm2, %v10741_v13, %v10742_v32  ;;  %v10751_v7 = vrot.slane %v19783_v41, 7  ;;  %v10745_v39 = vsel %vm792_vm2, %v10742_v32, %v10744_v1 }
 0x30d   : > { %v20036_v0 = vadd.f32 %v15014_v42, %v14964_v44  ;;  %15265 = vmatprep.mubr.msk.f32.mxu1 %vm239_vm1, %v10728_v51  ;;  %v13144_v51 = vld [vmem:[%s15501_s26 + $0x330] sm:$0xff]  ;;  %v11166_v44 = vrot.slane %v13141_v33, 6  ;;  %v11173_v31 = vrot.slane %v19799_v56, 6 }
 0x30e   : > { %v8578_v4 = vpop.f32.mrf.mxu1  ;;  %v8870_v43 = vpop.f32.mrf.mxu0  ;;  %v11169_v23 = vrot.slane %v13144_v51, 6  ;;  %v10749_v5 = vrot.slane %v13144_v51, 7 }
 0x30f   : > { %v20048_v15 = vadd.f32 %v8870_v43, %v8578_v4  ;;  %15316 = vmatmul.mubr.msk.f32.gmra.mxu0 %vm239_vm1, %v11152_v16  ;;  %v10747_v16 = vrot.slane %v19767_v10, 7  ;;  %v13145_v4 = vld [vmem:[%s15501_s26 + $0x338] sm:$0x3f] }
 0x310   : > { %v14967_v62 = vpop.f32.mrf.mxu1  ;;  %v15017_v60 = vpop.f32.mrf.mxu0  ;;  %15266 = vmatmul.mubr.msk.f32.gmra.mxu1 %vm239_vm1, %v10730_v25  ;;  %15318 = vmatprep.mubr.msk.f32.mxu0 %vm239_vm1, %v11155_v17  ;;  %v13148_v17 = vld [vmem:[%s15501_s26 + $0x350] sm:$0xff]  ;;  %v11171_v41 = vrot.slane %v13145_v4, 6 }
 0x311   : > { %v20055_v53 = vadd.f32 %v15017_v60, %v14967_v62  ;;  %15268 = vmatprep.mubr.msk.f32.mxu1 %vm239_vm1, %v10733_v57  ;;  %v11168_v57 = vrot.slane %v19767_v10, 6  ;;  %v11167_v10 = vsel %vm8985_vm6, %v11164_v14, %v11166_v44  ;;  %v10752_v62 = vrot.slane %v19799_v56, 7 }
 0x312   : > { %v8588_v35 = vpop.f32.mrf.mxu1  ;;  %v8880_v58 = vpop.f32.mrf.mxu0  ;;  %v10748_v2 = vsel %vm792_vm2, %v10746_v48, %v10747_v16  ;;  %v11174_v32 = vrot.slane %v13148_v17, 6  ;;  %v10750_v33 = vsel %vm792_vm2, %v10747_v16, %v10749_v5  ;;  %v10754_v51 = vrot.slane %v13148_v17, 7 }
 0x313   : > { %v20066_v8 = vadd.f32 %v8880_v58, %v8588_v35  ;;  %15319 = vmatmul.mubr.msk.f32.gmra.mxu0 %vm239_vm1, %v11157_v27  ;;  %v11170_v27 = vsel %vm8985_vm6, %v11168_v57, %v11169_v23  ;;  %v13149_v35 = vld [vmem:[%s15501_s26 + $0x358] sm:$0x3f]  ;;  %v11172_v56 = vsel %vm8985_vm6, %v11169_v23, %v11171_v41  ;;  %v10761_v16 = vrot.slane %v19847_v47, 7 }
 0x314   : > { %v14970_v45 = vpop.f32.mrf.mxu1  ;;  %v15020_v50 = vpop.f32.mrf.mxu0  ;;  %15269 = vmatmul.mubr.msk.f32.gmra.mxu1 %vm239_vm1, %v10735_v20  ;;  %15321 = vmatprep.mubr.msk.f32.mxu0 %vm239_vm1, %v11160_v49  ;;  %v10756_v49 = vrot.slane %v19815_v54, 7  ;;  %v10753_v54 = vsel %vm792_vm2, %v10751_v7, %v10752_v62  ;;  %v11175_v1 = vsel %vm8985_vm6, %v11173_v31, %v11174_v32  ;;  %v10755_v4 = vsel %vm792_vm2, %v10752_v62, %v10754_v51 }
 0x315   : > { %v20073_v29 = vadd.f32 %v15020_v50, %v14970_v45  ;;  %15271 = vmatprep.mubr.msk.f32.mxu1 %vm239_vm1, %v10738_v52  ;;  %v13152_v52 = vld [vmem:[%s15501_s26 + $0x370] sm:$0xff]  ;;  %v11176_v45 = vrot.slane %v13149_v35, 6  ;;  %v11183_v41 = vrot.slane %v19860_v61, 6 }
 0x316   : > { %v8598_v42 = vpop.f32.mrf.mxu1  ;;  %v8890_v25 = vpop.f32.mrf.mxu0  ;;  %v11179_v44 = vrot.slane %v13152_v52, 6  ;;  %v10759_v17 = vrot.slane %v13152_v52, 7 }
 0x317   : > { %v20083_v43 = vadd.f32 %v8890_v25, %v8598_v42  ;;  %15322 = vmatmul.mubr.msk.f32.gmra.mxu0 %vm239_vm1, %v11162_v18  ;;  %v10757_v18 = vrot.slane %v19831_v9, 7  ;;  %v13153_v42 = vld [vmem:[%s15501_s26 + $0x378] sm:$0x3f] }
 0x318   : > { %v14973_v63 = vpop.f32.mrf.mxu1  ;;  %v15023_v6 = vpop.f32.mrf.mxu0  ;;  %15272 = vmatmul.mubr.msk.f32.gmra.mxu1 %vm239_vm1, %v10740_v34  ;;  %15324 = vmatprep.mubr.msk.f32.mxu0 %vm239_vm1, %v11165_v12  ;;  %v13156_v12 = vld [vmem:[%s15501_s26 + $0x390] sm:$0xff]  ;;  %v11181_v47 = vrot.slane %v13153_v42, 6 }
 0x319   : > { %v20090_v13 = vadd.f32 %v15023_v6, %v14973_v63  ;;  %15274 = vmatprep.mubr.msk.f32.mxu1 %vm239_vm1, %v10743_v22  ;;  %v11178_v22 = vrot.slane %v19831_v9, 6  ;;  %v11177_v9 = vsel %vm8985_vm6, %v11174_v32, %v11176_v45  ;;  %v10762_v63 = vrot.slane %v19860_v61, 7 }
 0x31a   : > { %v8608_v60 = vpop.f32.mrf.mxu1  ;;  %v8900_v20 = vpop.f32.mrf.mxu0  ;;  %v10758_v5 = vsel %vm792_vm2, %v10756_v49, %v10757_v18  ;;  %v11184_v62 = vrot.slane %v13156_v12, 6  ;;  %v10760_v35 = vsel %vm792_vm2, %v10757_v18, %v10759_v17  ;;  %v10764_v52 = vrot.slane %v13156_v12, 7 }
 0x31b   : > { %v20100_v58 = vadd.f32 %v8900_v20, %v8608_v60  ;;  %15325 = vmatmul.mubr.msk.f32.gmra.mxu0 %vm239_vm1, %v11167_v10  ;;  %v11180_v10 = vsel %vm8985_vm6, %v11178_v22, %v11179_v44  ;;  %v13157_v60 = vld [vmem:[%s15501_s26 + $0x398] sm:$0x3f]  ;;  %v11182_v61 = vsel %vm8985_vm6, %v11179_v44, %v11181_v47 }
 0x31c   : > { %v14976_v19 = vpop.f32.mrf.mxu1  ;;  %v15026_v14 = vpop.f32.mrf.mxu0  ;;  %15275 = vmatmul.mubr.msk.f32.gmra.mxu1 %vm239_vm1, %v10745_v39  ;;  %15327 = vmatprep.mubr.msk.f32.mxu0 %vm239_vm1, %v11170_v27  ;;  %v10766_v27 = vrot.slane %v19873_v40, 7  ;;  %v10763_v40 = vsel %vm792_vm2, %v10761_v16, %v10762_v63  ;;  %v11185_v51 = vsel %vm8985_vm6, %v11183_v41, %v11184_v62  ;;  %v10765_v22 = vsel %vm792_vm2, %v10762_v63, %v10764_v52  ;;  %v7964_v41 = vld [vmem:[#allocation2] sm:$0xff] }
 0x31d   : > { %v20107_v48 = vadd.f32 %v15026_v14, %v14976_v19  ;;  %15277 = vmatprep.mubr.msk.f32.mxu1 %vm239_vm1, %v10748_v2  ;;  %v13160_v2 = vld [vmem:[%s15501_s26 + $0x3b0] sm:$0xff]  ;;  %v11186_v19 = vrot.slane %v13157_v60, 6 }
 0x31e   : > { %v8618_v50 = vpop.f32.mrf.mxu1  ;;  %v8910_v34 = vpop.f32.mrf.mxu0  ;;  %v11189_v45 = vrot.slane %v13160_v2, 6  ;;  %v10769_v42 = vrot.slane %v13160_v2, 7 }
 0x31f   : > { %v20117_v25 = vadd.f32 %v8910_v34, %v8618_v50  ;;  %15328 = vmatmul.mubr.msk.f32.gmra.mxu0 %vm239_vm1, %v11172_v56  ;;  %v10767_v56 = vrot.slane %v19887_v26, 7  ;;  %v13161_v50 = vld [vmem:[%s15501_s26 + $0x3b8] sm:$0x3f]  ;;  %s15446_s26 = smov 12  }
 0x320   : > { %v14979_v57 = vpop.f32.mrf.mxu1  ;;  %v15029_v23 = vpop.f32.mrf.mxu0  ;;  %15278 = vmatmul.mubr.msk.f32.gmra.mxu1 %vm239_vm1, %v10750_v33  ;;  %15330 = vmatprep.mubr.msk.f32.mxu0 %vm239_vm1, %v11175_v1  ;;  %v11191_v12 = vrot.slane %v13161_v50, 6 }
 0x321   : > { %v20124_v7 = vadd.f32 %v15029_v23, %v14979_v57  ;;  %15280 = vmatprep.mubr.msk.f32.mxu1 %vm239_vm1, %v10753_v54  ;;  %v11188_v54 = vrot.slane %v19887_v26, 6  ;;  %v11187_v26 = vsel %vm8985_vm6, %v11184_v62, %v11186_v19  ;;  %v10768_v23 = vsel %vm792_vm2, %v10766_v27, %v10767_v56 }
 0x322   : > { %v8628_v6 = vpop.f32.mrf.mxu1  ;;  %v8920_v39 = vpop.f32.mrf.mxu0  ;;  %v10770_v62 = vsel %vm792_vm2, %v10767_v56, %v10769_v42  ;;  %v11192_v60 = vsel %vm8985_vm6, %v11189_v45, %v11191_v12 }
 0x323   : > { %v20134_v20 = vadd.f32 %v8920_v39, %v8628_v6  ;;  %15331 = vmatmul.mubr.msk.f32.gmra.mxu0 %vm239_vm1, %v11177_v9  ;;  %v7965_v9 = vld [vmem:[#allocation2 + $0x8] sm:$0xff] }
 0x324   : > { %v14982_v31 = vpop.f32.mrf.mxu1  ;;  %v15032_v32 = vpop.f32.mrf.mxu0  ;;  %15281 = vmatmul.mubr.msk.f32.gmra.mxu1 %vm239_vm1, %v10755_v4  ;;  %15333 = vmatprep.mubr.msk.f32.mxu0 %vm239_vm1, %v11180_v10  ;;  %v11190_v4 = vsel %vm8985_vm6, %v11188_v54, %v11189_v45 }
 0x325   : > { %v20141_v49 = vadd.f32 %v15032_v32, %v14982_v31  ;;  %15283 = vmatprep.mubr.msk.f32.mxu1 %vm239_vm1, %v10758_v5 }
 0x326   : > { %v8638_v14 = vpop.f32.mrf.mxu1  ;;  %v8930_v33 = vpop.f32.mrf.mxu0 }
 0x327   : > { %v20151_v34 = vadd.f32 %v8930_v33, %v8638_v14  ;;  %15334 = vmatmul.mubr.msk.f32.gmra.mxu0 %vm239_vm1, %v11182_v61 }
 0x328   : > { %v14985_v1 = vpop.f32.mrf.mxu1  ;;  %v15035_v18 = vpop.f32.mrf.mxu0  ;;  %15284 = vmatmul.mubr.msk.f32.gmra.mxu1 %vm239_vm1, %v10760_v35  ;;  %15336 = vmatprep.mubr.msk.f32.mxu0 %vm239_vm1, %v11185_v51  ;;  %v7967_v35 = vld [vmem:[#allocation2 + $0x18] sm:$0xff]  ;;  %v7966_v51 = vld [vmem:[#allocation2 + $0x10] sm:$0xff] }
 0x329   : > { %v20156_v44 = vadd.f32 %v15035_v18, %v14985_v1  ;;  %15286 = vmatprep.mubr.msk.f32.mxu1 %vm239_vm1, %v10763_v40  ;;  %v7969_v1 = vld [vmem:[#allocation2 + $0x28] sm:$0xff] }
 0x32a   : > { %v8648_v16 = vpop.f32.mrf.mxu1  ;;  %v8940_v57 = vpop.f32.mrf.mxu0 }
 0x32b   : > { %v20163_v17 = vadd.f32 %v8940_v57, %v8648_v16  ;;  %v8031_v47 = vpop.permute.xlu1 %8030  ;;  %15337 = vmatmul.mubr.msk.f32.gmra.mxu0 %vm239_vm1, %v11187_v26  ;;  %v7968_v57 = vld [vmem:[#allocation2 + $0x20] sm:$0xff] }
 0x32c   : > { %v8125_v63 = vadd.f32 %v8031_v47, %v7965_v9  ;;  %v14988_v6 = vpop.f32.mrf.mxu1  ;;  %v15038_v39 = vpop.f32.mrf.mxu0  ;;  %15287 = vmatmul.mubr.msk.f32.gmra.mxu1 %vm239_vm1, %v10765_v22  ;;  %15339 = vmatprep.mubr.msk.f32.mxu0 %vm239_vm1, %v11190_v4 }
 0x32d   : > { %v20167_v5 = vadd.f32 %v15038_v39, %v14988_v6  ;;  %v8029_v10 = vpop.permute.xlu0 %8028  ;;  %15289 = vmatprep.mubr.msk.f32.mxu1 %vm239_vm1, %v10768_v23  ;;  %v7971_v6 = vld [vmem:[#allocation2 + $0x38] sm:$0xff] }
 0x32e   : > { %8158 = vst.msk [vmem:[#allocation2 + $0x8] sm:$0xff] %vm8156_vm7, %v8125_v63  ;;  %v8124_v2 = vadd.f32 %v8029_v10, %v7964_v41  ;;  %v8658_v27 = vpop.f32.mrf.mxu1  ;;  %v8950_v31 = vpop.f32.mrf.mxu0 }
 0x32f   : > { %v20174_v32 = vadd.f32 %v8950_v31, %v8658_v27  ;;  %v8035_v52 = vpop.permute.xlu1 %8034  ;;  %15340 = vmatmul.mubr.msk.f32.gmra.mxu0 %vm239_vm1, %v11192_v60  ;;  %v7970_v27 = vld [vmem:[#allocation2 + $0x30] sm:$0xff] }
 0x330   : > { %8157 = vst.msk [vmem:[#allocation2] sm:$0xff] %vm8156_vm7, %v8124_v2  ;;  %v8127_v61 = vadd.f32 %v8035_v52, %v7967_v35  ;;  %v14991_v40 = vpop.f32.mrf.mxu1  ;;  %v15041_v19 = vpop.f32.mrf.mxu0  ;;  %15290 = vmatmul.mubr.msk.f32.gmra.mxu1 %vm239_vm1, %v10770_v62 }
 0x331   : > { %v20179_v14 = vadd.f32 %v15041_v19, %v14991_v40  ;;  %v8033_v33 = vpop.permute.xlu0 %8032  ;;  %v7973_v40 = vld [vmem:[#allocation2 + $0x48] sm:$0xff] }
 0x332   : > { %8160 = vst.msk [vmem:[#allocation2 + $0x18] sm:$0xff] %vm8156_vm7, %v8127_v61  ;;  %v8126_v56 = vadd.f32 %v8033_v33, %v7966_v51  ;;  %v8668_v54 = vpop.f32.mrf.mxu1  ;;  %v8960_v45 = vpop.f32.mrf.mxu0 }
 0x333   : > { %v20182_v50 = vadd.f32 %v8960_v45, %v8668_v54  ;;  %v8039_v18 = vpop.permute.xlu1 %8038 }
 0x334   : > { %8159 = vst.msk [vmem:[#allocation2 + $0x10] sm:$0xff] %vm8156_vm7, %v8126_v56  ;;  %v8129_v22 = vadd.f32 %v8039_v18, %v7969_v1  ;;  %v15046_v26 = vpop.f32.mrf.mxu1  ;;  %v15096_v42 = vpop.f32.mrf.mxu0  ;;  %v7972_v1 = vld [vmem:[#allocation2 + $0x40] sm:$0xff] }
 0x335   : > { %v9361_v12 = vadd.f32 %v15046_v26, %v19925_v28  ;;  %v8037_v16 = vpop.permute.xlu0 %8036 }
 0x336   : > { %8162 = vst.msk [vmem:[#allocation2 + $0x28] sm:$0xff] %vm8156_vm7, %v8129_v22  ;;  %v8128_v23 = vadd.f32 %v8037_v16, %v7968_v57  ;;  %v9201_v4 = vpop.f32.mrf.mxu1  ;;  %v9623_v9 = vpop.f32.mrf.mxu0 }
 0x337   : > { %v20187_v47 = vadd.f32 %v15096_v42, %v9361_v12  ;;  %v9360_v63 = vadd.f32 %v9201_v4, %v19937_v36  ;;  %v8043_v39 = vpop.permute.xlu1 %8042  ;;  %v7975_v12 = vld [vmem:[#allocation2 + $0x58] sm:$0xff] }
 0x338   : > { %8161 = vst.msk [vmem:[#allocation2 + $0x20] sm:$0xff] %vm8156_vm7, %v8128_v23  ;;  %v8131_v10 = vadd.f32 %v8043_v39, %v7971_v6  ;;  %v15049_v41 = vpop.f32.mrf.mxu1  ;;  %v15099_v62 = vpop.f32.mrf.mxu0  ;;  %v7974_v6 = vld [vmem:[#allocation2 + $0x50] sm:$0xff] }
 0x339   : > { %v20191_v60 = vadd.f32 %v9623_v9, %v9360_v63  ;;  %v9363_v28 = vadd.f32 %v15049_v41, %v19944_v24  ;;  %v8041_v2 = vpop.permute.xlu0 %8040 }
 0x33a   : > { %8164 = vst.msk [vmem:[#allocation2 + $0x38] sm:$0xff] %vm8156_vm7, %v8131_v10  ;;  %v8130_v31 = vadd.f32 %v8041_v2, %v7970_v27  ;;  %v9211_v35 = vpop.f32.mrf.mxu1  ;;  %v9633_v52 = vpop.f32.mrf.mxu0 }
 0x33b   : > { %v20195_v61 = vadd.f32 %v15099_v62, %v9363_v28  ;;  %v9362_v36 = vadd.f32 %v9211_v35, %v19956_v55  ;;  %v8047_v19 = vpop.permute.xlu1 %8046  ;;  %v7977_v28 = vld [vmem:[#allocation2 + $0x68] sm:$0xff] }
 0x33c   : > { %8163 = vst.msk [vmem:[#allocation2 + $0x30] sm:$0xff] %vm8156_vm7, %v8130_v31  ;;  %v8133_v33 = vadd.f32 %v8047_v19, %v7973_v40  ;;  %v15052_v51 = vpop.f32.mrf.mxu1  ;;  %v15102_v56 = vpop.f32.mrf.mxu0  ;;  %v7976_v40 = vld [vmem:[#allocation2 + $0x60] sm:$0xff] }
 0x33d   : > { %v20199_v54 = vadd.f32 %v9633_v52, %v9362_v36  ;;  %v9365_v24 = vadd.f32 %v15052_v51, %v19962_v3  ;;  %v8045_v45 = vpop.permute.xlu0 %8044 }
 0x33e   : > { %8166 = vst.msk [vmem:[#allocation2 + $0x48] sm:$0xff] %vm8156_vm7, %v8133_v33  ;;  %v8132_v18 = vadd.f32 %v8045_v45, %v7972_v1  ;;  %v9221_v22 = vpop.f32.mrf.mxu1  ;;  %v9643_v26 = vpop.f32.mrf.mxu0 }
 0x33f   : > { %v20203_v42 = vadd.f32 %v15102_v56, %v9365_v24  ;;  %v9364_v55 = vadd.f32 %v9221_v22, %v19974_v38  ;;  %v8051_v16 = vpop.permute.xlu1 %8050  ;;  %v7979_v24 = vld [vmem:[#allocation2 + $0x78] sm:$0xff] }
 0x340   : > { %8165 = vst.msk [vmem:[#allocation2 + $0x40] sm:$0xff] %vm8156_vm7, %v8132_v18  ;;  %v8135_v57 = vadd.f32 %v8051_v16, %v7975_v12  ;;  %v15055_v23 = vpop.f32.mrf.mxu1  ;;  %v15105_v4 = vpop.f32.mrf.mxu0  ;;  %v7978_v12 = vld [vmem:[#allocation2 + $0x70] sm:$0xff] }
 0x341   : > { %v20207_v9 = vadd.f32 %v9643_v26, %v9364_v55  ;;  %v9367_v3 = vadd.f32 %v15055_v23, %v19980_v37  ;;  %v8049_v63 = vpop.permute.xlu0 %8048 }
 0x342   : > { %8168 = vst.msk [vmem:[#allocation2 + $0x58] sm:$0xff] %vm8156_vm7, %v8135_v57  ;;  %v8134_v39 = vadd.f32 %v8049_v63, %v7974_v6  ;;  %v9231_v10 = vpop.f32.mrf.mxu1  ;;  %v9653_v41 = vpop.f32.mrf.mxu0 }
 0x343   : > { %v20211_v62 = vadd.f32 %v15105_v4, %v9367_v3  ;;  %v9366_v38 = vadd.f32 %v9231_v10, %v19992_v59  ;;  %v8055_v2 = vpop.permute.xlu1 %8054  ;;  %v7981_v3 = vld [vmem:[#allocation2 + $0x88] sm:$0xff] }
 0x344   : > { %8167 = vst.msk [vmem:[#allocation2 + $0x50] sm:$0xff] %vm8156_vm7, %v8134_v39  ;;  %v8137_v27 = vadd.f32 %v8055_v2, %v7977_v28  ;;  %v15058_v31 = vpop.f32.mrf.mxu1  ;;  %v15108_v35 = vpop.f32.mrf.mxu0 }
 0x345   : > { %v20215_v52 = vadd.f32 %v9653_v41, %v9366_v38  ;;  %v9369_v37 = vadd.f32 %v15058_v31, %v19998_v30  ;;  %v8053_v36 = vpop.permute.xlu0 %8052  ;;  %v7980_v38 = vld [vmem:[#allocation2 + $0x80] sm:$0xff] }
 0x346   : > { %8170 = vst.msk [vmem:[#allocation2 + $0x68] sm:$0xff] %vm8156_vm7, %v8137_v27  ;;  %v8136_v19 = vadd.f32 %v8053_v36, %v7976_v40  ;;  %v9241_v33 = vpop.f32.mrf.mxu1  ;;  %v9663_v51 = vpop.f32.mrf.mxu0 }
 0x347   : > { %v20219_v56 = vadd.f32 %v15108_v35, %v9369_v37  ;;  %v9368_v59 = vadd.f32 %v9241_v33, %v20010_v46  ;;  %v8059_v45 = vpop.permute.xlu1 %8058  ;;  %v7983_v37 = vld [vmem:[#allocation2 + $0x98] sm:$0xff] }
 0x348   : > { %8169 = vst.msk [vmem:[#allocation2 + $0x60] sm:$0xff] %vm8156_vm7, %v8136_v19  ;;  %v8139_v1 = vadd.f32 %v8059_v45, %v7979_v24  ;;  %v15061_v18 = vpop.f32.mrf.mxu1  ;;  %v15111_v22 = vpop.f32.mrf.mxu0 }
 0x349   : > { %v20223_v26 = vadd.f32 %v9663_v51, %v9368_v59  ;;  %v9371_v30 = vadd.f32 %v15061_v18, %v20017_v11  ;;  %v8057_v55 = vpop.permute.xlu0 %8056  ;;  %v7982_v59 = vld [vmem:[#allocation2 + $0x90] sm:$0xff] }
 0x34a   : > { %8172 = vst.msk [vmem:[#allocation2 + $0x78] sm:$0xff] %vm8156_vm7, %v8139_v1  ;;  %v8138_v16 = vadd.f32 %v8057_v55, %v7978_v12  ;;  %v9251_v57 = vpop.f32.mrf.mxu1  ;;  %v9673_v23 = vpop.f32.mrf.mxu0 }
 0x34b   : > { %v20227_v4 = vadd.f32 %v15111_v22, %v9371_v30  ;;  %v9370_v46 = vadd.f32 %v9251_v57, %v20028_v21  ;;  %v8063_v63 = vpop.permute.xlu1 %8062  ;;  %v7985_v30 = vld [vmem:[#allocation2 + $0xa8] sm:$0xff] }
 0x34c   : > { %8171 = vst.msk [vmem:[#allocation2 + $0x70] sm:$0xff] %vm8156_vm7, %v8138_v16  ;;  %v8141_v6 = vadd.f32 %v8063_v63, %v7981_v3  ;;  %v15064_v39 = vpop.f32.mrf.mxu1  ;;  %v15114_v10 = vpop.f32.mrf.mxu0 }
 0x34d   : > { %v20231_v41 = vadd.f32 %v9673_v23, %v9370_v46  ;;  %v9373_v11 = vadd.f32 %v15064_v39, %v20036_v0  ;;  %v8061_v28 = vpop.permute.xlu0 %8060  ;;  %v7984_v46 = vld [vmem:[#allocation2 + $0xa0] sm:$0xff] }
 0x34e   : > { %8174 = vst.msk [vmem:[#allocation2 + $0x88] sm:$0xff] %vm8156_vm7, %v8141_v6  ;;  %v8140_v2 = vadd.f32 %v8061_v28, %v7980_v38  ;;  %v9261_v27 = vpop.f32.mrf.mxu1  ;;  %v9683_v31 = vpop.f32.mrf.mxu0 }
 0x34f   : > { %v20235_v35 = vadd.f32 %v15114_v10, %v9373_v11  ;;  %v9372_v21 = vadd.f32 %v9261_v27, %v20048_v15  ;;  %v8067_v36 = vpop.permute.xlu1 %8066  ;;  %v7987_v11 = vld [vmem:[#allocation2 + $0xb8] sm:$0xff] }
 0x350   : > { %8173 = vst.msk [vmem:[#allocation2 + $0x80] sm:$0xff] %vm8156_vm7, %v8140_v2  ;;  %v8143_v40 = vadd.f32 %v8067_v36, %v7983_v37  ;;  %v15067_v19 = vpop.f32.mrf.mxu1  ;;  %v15117_v33 = vpop.f32.mrf.mxu0 }
 0x351   : > { %v20239_v51 = vadd.f32 %v9683_v31, %v9372_v21  ;;  %v9375_v0 = vadd.f32 %v15067_v19, %v20055_v53  ;;  %v8065_v24 = vpop.permute.xlu0 %8064  ;;  %v7986_v21 = vld [vmem:[#allocation2 + $0xb0] sm:$0xff] }
 0x352   : > { %8176 = vst.msk [vmem:[#allocation2 + $0x98] sm:$0xff] %vm8156_vm7, %v8143_v40  ;;  %v8142_v45 = vadd.f32 %v8065_v24, %v7982_v59  ;;  %v9271_v1 = vpop.f32.mrf.mxu1  ;;  %v9693_v18 = vpop.f32.mrf.mxu0 }
 0x353   : > { %v20243_v22 = vadd.f32 %v15117_v33, %v9375_v0  ;;  %v9374_v15 = vadd.f32 %v9271_v1, %v20066_v8  ;;  %v8071_v55 = vpop.permute.xlu1 %8070  ;;  %v7989_v0 = vld [vmem:[#allocation2 + $0xc8] sm:$0xff] }
 0x354   : > { %8175 = vst.msk [vmem:[#allocation2 + $0x90] sm:$0xff] %vm8156_vm7, %v8142_v45  ;;  %v8145_v12 = vadd.f32 %v8071_v55, %v7985_v30  ;;  %v15070_v16 = vpop.f32.mrf.mxu1  ;;  %v15120_v57 = vpop.f32.mrf.mxu0 }
 0x355   : > { %v20247_v23 = vadd.f32 %v9693_v18, %v9374_v15  ;;  %v9377_v53 = vadd.f32 %v15070_v16, %v20073_v29  ;;  %v8069_v3 = vpop.permute.xlu0 %8068  ;;  %v7988_v15 = vld [vmem:[#allocation2 + $0xc0] sm:$0xff] }
 0x356   : > { %8178 = vst.msk [vmem:[#allocation2 + $0xa8] sm:$0xff] %vm8156_vm7, %v8145_v12  ;;  %v8144_v63 = vadd.f32 %v8069_v3, %v7984_v46  ;;  %v9281_v6 = vpop.f32.mrf.mxu1  ;;  %v9703_v39 = vpop.f32.mrf.mxu0 }
 0x357   : > { %v20251_v10 = vadd.f32 %v15120_v57, %v9377_v53  ;;  %v9376_v8 = vadd.f32 %v9281_v6, %v20083_v43  ;;  %v8075_v38 = vpop.permute.xlu1 %8074  ;;  %v7991_v53 = vld [vmem:[#allocation2 + $0xd8] sm:$0xff] }
 0x358   : > { %8177 = vst.msk [vmem:[#allocation2 + $0xa0] sm:$0xff] %vm8156_vm7, %v8144_v63  ;;  %v8147_v28 = vadd.f32 %v8075_v38, %v7987_v11  ;;  %v15073_v2 = vpop.f32.mrf.mxu1  ;;  %v15123_v27 = vpop.f32.mrf.mxu0 }
 0x359   : > { %v20255_v31 = vadd.f32 %v9703_v39, %v9376_v8  ;;  %v9379_v29 = vadd.f32 %v15073_v2, %v20090_v13  ;;  %v8073_v37 = vpop.permute.xlu0 %8072  ;;  %v7990_v8 = vld [vmem:[#allocation2 + $0xd0] sm:$0xff] }
 0x35a   : > { %8180 = vst.msk [vmem:[#allocation2 + $0xb8] sm:$0xff] %vm8156_vm7, %v8147_v28  ;;  %v8146_v36 = vadd.f32 %v8073_v37, %v7986_v21  ;;  %v9291_v40 = vpop.f32.mrf.mxu1  ;;  %v9713_v19 = vpop.f32.mrf.mxu0 }
 0x35b   : > { %v20259_v33 = vadd.f32 %v15123_v27, %v9379_v29  ;;  %v9378_v43 = vadd.f32 %v9291_v40, %v20100_v58  ;;  %v8079_v59 = vpop.permute.xlu1 %8078  ;;  %v7993_v29 = vld [vmem:[#allocation2 + $0xe8] sm:$0xff] }
 0x35c   : > { %8179 = vst.msk [vmem:[#allocation2 + $0xb0] sm:$0xff] %vm8156_vm7, %v8146_v36  ;;  %v8149_v24 = vadd.f32 %v8079_v59, %v7989_v0  ;;  %v15076_v45 = vpop.f32.mrf.mxu1  ;;  %v15126_v1 = vpop.f32.mrf.mxu0 }
 0x35d   : > { %21218 = vst [vmem:[#allocation26_spill] sm:$0xff] %v20259_v33  ;;  %v20263_v18 = vadd.f32 %v9713_v19, %v9378_v43  ;;  %v9381_v13 = vadd.f32 %v15076_v45, %v20107_v48  ;;  %v8077_v30 = vpop.permute.xlu0 %8076  ;;  %v7992_v43 = vld [vmem:[#allocation2 + $0xe0] sm:$0xff] }
 0x35e   : > { %8182 = vst.msk [vmem:[#allocation2 + $0xc8] sm:$0xff] %vm8156_vm7, %v8149_v24  ;;  %v8148_v55 = vadd.f32 %v8077_v30, %v7988_v15  ;;  %v9301_v12 = vpop.f32.mrf.mxu1  ;;  %v9723_v16 = vpop.f32.mrf.mxu0 }
 0x35f   : > { %21219 = vst [vmem:[#allocation4_spill] sm:$0xff] %v20263_v18  ;;  %v20267_v57 = vadd.f32 %v15126_v1, %v9381_v13  ;;  %v9380_v58 = vadd.f32 %v9301_v12, %v20117_v25  ;;  %v8083_v46 = vpop.permute.xlu1 %8082  ;;  %v7995_v13 = vld [vmem:[#allocation2 + $0xf8] sm:$0xff] }
 0x360   : > { %8181 = vst.msk [vmem:[#allocation2 + $0xc0] sm:$0xff] %vm8156_vm7, %v8148_v55  ;;  %v8151_v3 = vadd.f32 %v8083_v46, %v7991_v53  ;;  %v15079_v63 = vpop.f32.mrf.mxu1  ;;  %v15129_v6 = vpop.f32.mrf.mxu0 }
 0x361   : > { %21220 = vst [vmem:[#allocation23_spill] sm:$0xff] %v20267_v57  ;;  %v20271_v39 = vadd.f32 %v9723_v16, %v9380_v58  ;;  %v9383_v48 = vadd.f32 %v15079_v63, %v20124_v7  ;;  %v8081_v11 = vpop.permute.xlu0 %8080  ;;  %v7994_v58 = vld [vmem:[#allocation2 + $0xf0] sm:$0xff] }
 0x362   : > { %8184 = vst.msk [vmem:[#allocation2 + $0xd8] sm:$0xff] %vm8156_vm7, %v8151_v3  ;;  %v8150_v38 = vadd.f32 %v8081_v11, %v7990_v8  ;;  %v9311_v28 = vpop.f32.mrf.mxu1  ;;  %v9733_v2 = vpop.f32.mrf.mxu0 }
 0x363   : > { %21221 = vst [vmem:[#allocation15_spill] sm:$0xff] %v20271_v39  ;;  %v20275_v27 = vadd.f32 %v15129_v6, %v9383_v48  ;;  %v9382_v25 = vadd.f32 %v9311_v28, %v20134_v20  ;;  %v8087_v21 = vpop.permute.xlu1 %8086 }
 0x364   : > { %8183 = vst.msk [vmem:[#allocation2 + $0xd0] sm:$0xff] %vm8156_vm7, %v8150_v38  ;;  %v8153_v37 = vadd.f32 %v8087_v21, %v7993_v29  ;;  %v15082_v36 = vpop.f32.mrf.mxu1  ;;  %v15132_v40 = vpop.f32.mrf.mxu0 }
 0x365   : > { %21222 = vst [vmem:[#allocation33_spill] sm:$0xff] %v20275_v27  ;;  %v20279_v19 = vadd.f32 %v9733_v2, %v9382_v25  ;;  %v9385_v7 = vadd.f32 %v15082_v36, %v20141_v49  ;;  %v8085_v0 = vpop.permute.xlu0 %8084 }
 0x366   : > { %8186 = vst.msk [vmem:[#allocation2 + $0xe8] sm:$0xff] %vm8156_vm7, %v8153_v37  ;;  %v8152_v59 = vadd.f32 %v8085_v0, %v7992_v43  ;;  %v9321_v24 = vpop.f32.mrf.mxu1  ;;  %v9743_v45 = vpop.f32.mrf.mxu0 }
 0x367   : > { %21223 = vst [vmem:[#allocation16_spill] sm:$0xff] %v20279_v19  ;;  %v20283_v1 = vadd.f32 %v15132_v40, %v9385_v7  ;;  %v9384_v20 = vadd.f32 %v9321_v24, %v20151_v34  ;;  %v8091_v15 = vpop.permute.xlu1 %8090 }
 0x368   : > { %8185 = vst.msk [vmem:[#allocation2 + $0xe0] sm:$0xff] %vm8156_vm7, %v8152_v59  ;;  %v8155_v30 = vadd.f32 %v8091_v15, %v7995_v13  ;;  %v15085_v55 = vpop.f32.mrf.mxu1  ;;  %v15135_v12 = vpop.f32.mrf.mxu0 }
 0x369   : > { %21224 = vst [vmem:[#allocation30_spill] sm:$0xff] %v20283_v1  ;;  %v20287_v16 = vadd.f32 %v9743_v45, %v9384_v20  ;;  %v9387_v49 = vadd.f32 %v15085_v55, %v20156_v44  ;;  %v8089_v53 = vpop.permute.xlu0 %8088 }
 0x36a   : > { %8188 = vst.msk [vmem:[#allocation2 + $0xf8] sm:$0xff] %vm8156_vm7, %v8155_v30  ;;  %v8154_v46 = vadd.f32 %v8089_v53, %v7994_v58  ;;  %v9331_v3 = vpop.f32.mrf.mxu1  ;;  %v9753_v63 = vpop.f32.mrf.mxu0 }
 0x36b   : > { %21225 = vst [vmem:[#allocation6_spill] sm:$0xff] %v20287_v16  ;;  %v20291_v6 = vadd.f32 %v15135_v12, %v9387_v49  ;;  %v9386_v34 = vadd.f32 %v9331_v3, %v20163_v17 }
 0x36c   : > { %8187 = vst.msk [vmem:[#allocation2 + $0xf0] sm:$0xff] %vm8156_vm7, %v8154_v46  ;;  %v15088_v48 = vpop.f32.mrf.mxu1  ;;  %v15138_v8 = vpop.f32.mrf.mxu0 }
 0x36d   : > { %21226 = vst [vmem:[#allocation28_spill] sm:$0xff] %v20291_v6  ;;  %v20295_v11 = vadd.f32 %v9753_v63, %v9386_v34  ;;  %v9389_v38 = vadd.f32 %v15088_v48, %v20167_v5 }
 0x36e   : > { %v9341_v44 = vpop.f32.mrf.mxu1  ;;  %v9763_v28 = vpop.f32.mrf.mxu0 }
 0x36f   : > { %21227 = vst [vmem:[#allocation20_spill] sm:$0xff] %v20295_v11  ;;  %v20298_v2 = vadd.f32 %v15138_v8, %v9389_v38  ;;  %v9388_v25 = vadd.f32 %v9341_v44, %v20174_v32 }
 0x370   : > { %v15091_v29 = vpop.f32.mrf.mxu1  ;;  %v15141_v21 = vpop.f32.mrf.mxu0 }
 0x371   : > { %21228 = vst [vmem:[#allocation55_spill] sm:$0xff] %v20298_v2  ;;  %v20301_v37 = vadd.f32 %v9763_v28, %v9388_v25  ;;  %v9391_v17 = vadd.f32 %v15091_v29, %v20179_v14 }
 0x372   : > { %v9351_v36 = vpop.f32.mrf.mxu1  ;;  %v9773_v40 = vpop.f32.mrf.mxu0 }
 0x373   : > { %21229 = vst [vmem:[#allocation18_spill] sm:$0xff] %v20301_v37  ;;  %v20304_v7 = vadd.f32 %v15141_v21, %v9391_v17  ;;  %v9390_v43 = vadd.f32 %v9351_v36, %v20182_v50 }
 0x374   : > { %v15146_v0 = vpop.f32.mrf.mxu1  ;;  %v20307_v5 = vpop.f32.mrf.mxu0 }
 0x375   : > { %21230 = vst [vmem:[#allocation19_spill] sm:$0xff] %v20304_v7  ;;  %v20309_v59 = vadd.f32 %v9773_v40, %v9390_v43 }
 0x376   : > { %v10061_v24 = vpop.f32.mrf.mxu1  ;;  %v20311_v45 = vpop.f32.mrf.mxu0 }
 0x377   : > { %21231 = vst [vmem:[#allocation40_spill] sm:$0xff] %v20309_v59 }
 0x378   : > { %v20313_v32 = vpop.f32.mrf.mxu1  ;;  %v20315_v20 = vpop.f32.mrf.mxu0 }
 0x37a   : > { %v20317_v13 = vpop.f32.mrf.mxu1  ;;  %v20319_v14 = vpop.f32.mrf.mxu0 }
 0x37c   : > { %v20321_v15 = vpop.f32.mrf.mxu1  ;;  %v20323_v30 = vpop.f32.mrf.mxu0 }
 0x37e   : > { %v20325_v50 = vpop.f32.mrf.mxu1  ;;  %v20327_v55 = vpop.f32.mrf.mxu0 }
 0x380   : > { %v20329_v12 = vpop.f32.mrf.mxu1  ;;  %v20331_v49 = vpop.f32.mrf.mxu0 }
 0x382   : > { %v20333_v58 = vpop.f32.mrf.mxu1  ;;  %v20335_v53 = vpop.f32.mrf.mxu0 }
 0x384   : > { %v20337_v46 = vpop.f32.mrf.mxu1  ;;  %v20339_v3 = vpop.f32.mrf.mxu0 }
 0x386   : > { %v20341_v63 = vpop.f32.mrf.mxu1  ;;  %v20343_v34 = vpop.f32.mrf.mxu0 }
 0x388   : > { %v20345_v48 = vpop.f32.mrf.mxu1  ;;  %v20347_v8 = vpop.f32.mrf.mxu0 }
 0x38a   : > { %v20349_v38 = vpop.f32.mrf.mxu1  ;;  %v20351_v44 = vpop.f32.mrf.mxu0 }
 0x38c   : > { %v20353_v28 = vpop.f32.mrf.mxu1  ;;  %v20355_v25 = vpop.f32.mrf.mxu0 }
 0x38e   : > { %v20357_v29 = vpop.f32.mrf.mxu1  ;;  %v20359_v21 = vpop.f32.mrf.mxu0 }
 0x390   : > { %v20361_v17 = vpop.f32.mrf.mxu1  ;;  %v20363_v36 = vpop.f32.mrf.mxu0 }
 0x392   : > { %v20365_v40 = vpop.f32.mrf.mxu1  ;;  %v20367_v43 = vpop.f32.mrf.mxu0 }
 0x394   : > { %v20369_v59 = vpop.f32.mrf.mxu1  ;;  %v20371_v7 = vpop.f32.mrf.mxu0 }
 0x396   : > { %v20373_v37 = vpop.f32.mrf.mxu1  ;;  %v20375_v2 = vpop.f32.mrf.mxu0 }
 0x397   : > { %21232 = vst [vmem:[#allocation13_spill] sm:$0xff] %v20375_v2 }
 0x398   : > { %v20377_v11 = vpop.f32.mrf.mxu1  ;;  %v20379_v6 = vpop.f32.mrf.mxu0 }
 0x399   : > { %21233 = vst [vmem:[#allocation59_spill] sm:$0xff] %v20377_v11  ;;  %21234 = vst [vmem:[#allocation21_spill] sm:$0xff] %v20379_v6 }
 0x39a   : > { %v20381_v16 = vpop.f32.mrf.mxu1  ;;  %v20383_v1 = vpop.f32.mrf.mxu0 }
 0x39b   : > { %21235 = vst [vmem:[#allocation37_spill] sm:$0xff] %v20381_v16  ;;  %21236 = vst [vmem:[#allocation61_spill] sm:$0xff] %v20383_v1 }
 0x39c   : > { %v20385_v19 = vpop.f32.mrf.mxu1  ;;  %v20387_v27 = vpop.f32.mrf.mxu0 }
 0x39d   : > { %21237 = vst [vmem:[#allocation9_spill] sm:$0xff] %v20385_v19  ;;  %21238 = vst [vmem:[#allocation41_spill] sm:$0xff] %v20387_v27 }
 0x39e   : > { %v20389_v39 = vpop.f32.mrf.mxu1  ;;  %v20391_v57 = vpop.f32.mrf.mxu0 }
 0x39f   : > { %21239 = vst [vmem:[#allocation64_spill] sm:$0xff] %v20389_v39  ;;  %21240 = vst [vmem:[#allocation11_spill] sm:$0xff] %v20391_v57 }
 0x3a0   : > { %v20393_v18 = vpop.f32.mrf.mxu1  ;;  %v20395_v33 = vpop.f32.mrf.mxu0 }
 0x3a1   : > { %21241 = vst [vmem:[#allocation39_spill] sm:$0xff] %v20393_v18  ;;  %21242 = vst [vmem:[#allocation22_spill] sm:$0xff] %v20395_v33 }
 0x3a2   : > { %v20397_v2 = vpop.f32.mrf.mxu1  ;;  %v20399_v11 = vpop.f32.mrf.mxu0 }
 0x3a3   : > { %21243 = vst [vmem:[#allocation45_spill] sm:$0xff] %v20397_v2  ;;  %21244 = vst [vmem:[#allocation24_spill] sm:$0xff] %v20399_v11 }
 0x3a4   : > { %v20401_v6 = vpop.f32.mrf.mxu1  ;;  %v20403_v16 = vpop.f32.mrf.mxu0 }
 0x3a5   : > { %21245 = vst [vmem:[#allocation46_spill] sm:$0xff] %v20401_v6  ;;  %21246 = vst [vmem:[#allocation56_spill] sm:$0xff] %v20403_v16  ;;  %v10221_v16 = vadd.f32 %v15146_v0, %v20187_v47  ;;  %v10222_v47 = vadd.f32 %v20317_v13, %v20199_v54 }
 0x3a6   : > { %v20405_v1 = vpop.f32.mrf.mxu1  ;;  %v20407_v19 = vpop.f32.mrf.mxu0 }
 0x3a7   : > { %21247 = vst [vmem:[#allocation43_spill] sm:$0xff] %v20405_v1  ;;  %21248 = vst [vmem:[#allocation35_spill] sm:$0xff] %v20407_v19 }
 0x3a8   : > { %v20409_v27 = vpop.f32.mrf.mxu1  ;;  %v20411_v39 = vpop.f32.mrf.mxu0 }
 0x3a9   : > { %21249 = vst [vmem:[#allocation65_spill] sm:$0xff] %v20409_v27  ;;  %21250 = vst [vmem:[#allocation52_spill] sm:$0xff] %v20411_v39  ;;  %v10220_v39 = vadd.f32 %v10061_v24, %v20191_v60  ;;  %v10225_v24 = vadd.f32 %v20321_v15, %v20203_v42  ;;  %v10227_v42 = vadd.f32 %v20329_v12, %v20211_v62 }
 0x3aa   : > { %v20413_v57 = vpop.f32.mrf.mxu1  ;;  %v20415_v18 = vpop.f32.mrf.mxu0  ;;  %v10229_v62 = vadd.f32 %v20337_v46, %v20219_v56  ;;  %v10231_v56 = vadd.f32 %v20345_v48, %v20227_v4  ;;  %v10233_v4 = vadd.f32 %v20353_v28, %v20235_v35  ;;  %v10235_v35 = vadd.f32 %v20361_v17, %v20243_v22 }
 0x3ab   : > { %21251 = vst [vmem:[#allocation66_spill] sm:$0xff] %v20413_v57  ;;  %21252 = vst [vmem:[#allocation69_spill] sm:$0xff] %v20415_v18  ;;  %v10644_v18 = vadd.f32 %v20307_v5, %v10221_v16  ;;  %v10650_v15 = vadd.f32 %v20331_v49, %v10227_v42  ;;  %v10237_v22 = vadd.f32 %v20369_v59, %v20251_v10  ;;  %v21261_v10 = vld [vmem:[#allocation26_spill] sm:$0xff]  ;;  %v21262_v59 = vld [vmem:[#allocation59_spill] sm:$0xff] }
 0x3ac   : > { %v20417_v33 = vpop.f32.mrf.mxu1  ;;  %v20419_v2 = vpop.f32.mrf.mxu0 }
 0x3ad   : > { %21253 = vst [vmem:[#allocation25_spill] sm:$0xff] %v20417_v33  ;;  %21254 = vst [vmem:[#allocation68_spill] sm:$0xff] %v20419_v2  ;;  %v10223_v2 = vadd.f32 %v20313_v32, %v20195_v61  ;;  %v10645_v61 = vadd.f32 %v20319_v14, %v10222_v47 }
 0x3ae   : > { %v20421_v11 = vpop.f32.mrf.mxu1  ;;  %v20423_v6 = vpop.f32.mrf.mxu0 }
 0x3af   : > { %21255 = vst [vmem:[#allocation67_spill] sm:$0xff] %v20421_v11  ;;  %21256 = vst [vmem:[#allocation53_spill] sm:$0xff] %v20423_v6  ;;  %v10643_v6 = vadd.f32 %v20311_v45, %v10220_v39  ;;  %v10646_v60 = vadd.f32 %v20315_v20, %v10223_v2  ;;  %v10224_v39 = vadd.f32 %v20325_v50, %v20207_v9 }
 0x3b0   : > { %v20426_v1 = vpop.f32.mrf.mxu1  ;;  %v20428_v19 = vpop.f32.mrf.mxu0 }
 0x3b1   : > { %21257 = vst [vmem:[#allocation47_spill] sm:$0xff] %v20426_v1  ;;  %21258 = vst [vmem:[#allocation36_spill] sm:$0xff] %v20428_v19  ;;  %v10647_v9 = vadd.f32 %v20327_v55, %v10224_v39 }
 0x3b2   : > { %v20431_v27 = vpop.f32.mrf.mxu1  ;;  %v20433_v57 = vpop.f32.mrf.mxu0 }
 0x3b3   : > { %21259 = vst [vmem:[#allocation71_spill] sm:$0xff] %v20431_v27  ;;  %21260 = vst [vmem:[#allocation70_spill] sm:$0xff] %v20433_v57 }
 0x3b4   : > { %v15246_v11 = vpop.f32.mrf.mxu1  ;;  %v15296_v33 = vpop.f32.mrf.mxu0 }
 0x3b5   : > { %v11066_v0 = vadd.f32 %v15246_v11, %v10644_v18  ;;  %v10648_v11 = vadd.f32 %v20323_v30, %v10225_v24 }
 0x3b6   : > { %v10906_v19 = vpop.f32.mrf.mxu1  ;;  %v11328_v1 = vpop.f32.mrf.mxu0 }
 0x3b7   : > { %v11488_v57 = vadd.f32 %v15296_v33, %v11066_v0  ;;  %v11065_v16 = vadd.f32 %v10906_v19, %v10643_v6 }
 0x3b8   : > { %v15249_v5 = vpop.f32.mrf.mxu1  ;;  %v15299_v27 = vpop.f32.mrf.mxu0 }
 0x3b9   : > { %v11487_v45 = vadd.f32 %v11328_v1, %v11065_v16  ;;  %v11068_v32 = vadd.f32 %v15249_v5, %v10646_v60  ;;  %11585 = vrot.lane.b32.xlu1 %v11488_v57, %s15446_s26  ;;  %v10226_v1 = vadd.f32 %v20333_v58, %v20215_v52  ;;  %v10228_v52 = vadd.f32 %v20341_v63, %v20223_v26 }
 0x3ba   : > { %v10916_v54 = vpop.f32.mrf.mxu1  ;;  %v11338_v18 = vpop.f32.mrf.mxu0  ;;  %v10652_v60 = vadd.f32 %v20339_v3, %v10229_v62  ;;  %v10230_v26 = vadd.f32 %v20349_v38, %v20231_v41  ;;  %v10232_v41 = vadd.f32 %v20357_v29, %v20239_v51  ;;  %v10234_v51 = vadd.f32 %v20365_v40, %v20247_v23 }
 0x3bb   : > { %v11490_v33 = vadd.f32 %v15299_v27, %v11068_v32  ;;  %v11067_v19 = vadd.f32 %v10916_v54, %v10645_v61  ;;  %11583 = vrot.lane.b32.xlu0 %v11487_v45, %s15446_s26  ;;  %v10649_v12 = vadd.f32 %v20335_v53, %v10226_v1  ;;  %v10651_v5 = vadd.f32 %v20343_v34, %v10228_v52  ;;  %v21263_v52 = vld [vmem:[#allocation13_spill] sm:$0xff] }
 0x3bc   : > { %v15252_v6 = vpop.f32.mrf.mxu1  ;;  %v15302_v2 = vpop.f32.mrf.mxu0  ;;  %v10654_v45 = vadd.f32 %v20347_v8, %v10231_v56  ;;  %v10236_v23 = vadd.f32 %v20373_v37, %v20255_v31  ;;  %v21264_v31 = vld [vmem:[#allocation4_spill] sm:$0xff]  ;;  %v21265_v37 = vld [vmem:[#allocation37_spill] sm:$0xff] }
 0x3bd   : > { %v11489_v20 = vadd.f32 %v11338_v18, %v11067_v19  ;;  %v11070_v57 = vadd.f32 %v15252_v6, %v10648_v11  ;;  %11589 = vrot.lane.b32.xlu1 %v11490_v33, %s15446_s26  ;;  %v10653_v18 = vadd.f32 %v20351_v44, %v10230_v26  ;;  %v10656_v33 = vadd.f32 %v20355_v25, %v10233_v4  ;;  %v21266_v56 = vld [vmem:[#allocation21_spill] sm:$0xff]  ;;  %v21271_v4 = vld [vmem:[#allocation64_spill] sm:$0xff] }
 0x3be   : > { %v10926_v13 = vpop.f32.mrf.mxu1  ;;  %v11348_v14 = vpop.f32.mrf.mxu0 }
 0x3bf   : > { %v11492_v27 = vadd.f32 %v15302_v2, %v11070_v57  ;;  %v11069_v30 = vadd.f32 %v10926_v13, %v10647_v9  ;;  %11587 = vrot.lane.b32.xlu0 %v11489_v20, %s15446_s26  ;;  %v10655_v2 = vadd.f32 %v20359_v21, %v10232_v41  ;;  %v10658_v20 = vadd.f32 %v20363_v36, %v10235_v35  ;;  %v21272_v41 = vld [vmem:[#allocation41_spill] sm:$0xff] }
 0x3c0   : > { %v15255_v50 = vpop.f32.mrf.mxu1  ;;  %v15305_v55 = vpop.f32.mrf.mxu0 }
 0x3c1   : > { %v11491_v58 = vadd.f32 %v11348_v14, %v11069_v30  ;;  %v11072_v47 = vadd.f32 %v15255_v50, %v10650_v15  ;;  %11593 = vrot.lane.b32.xlu1 %v11492_v27, %s15446_s26  ;;  %v10657_v14 = vadd.f32 %v20367_v43, %v10234_v51  ;;  %v10660_v27 = vadd.f32 %v20371_v7, %v10237_v22  ;;  %v21277_v51 = vld [vmem:[#allocation45_spill] sm:$0xff]  ;;  %v21278_v22 = vld [vmem:[#allocation22_spill] sm:$0xff] }
 0x3c2   : > { %v10936_v0 = vpop.f32.mrf.mxu1  ;;  %v11358_v49 = vpop.f32.mrf.mxu0  ;;  %v10239_v30 = vadd.f32 %v21262_v59, %v21261_v10  ;;  %v21283_v10 = vld [vmem:[#allocation43_spill] sm:$0xff] }
 0x3c3   : > { %v11494_v46 = vadd.f32 %v15305_v55, %v11072_v47  ;;  %v11071_v24 = vadd.f32 %v10936_v0, %v10649_v12  ;;  %11591 = vrot.lane.b32.xlu0 %v11491_v58, %s15446_s26  ;;  %v10659_v58 = vadd.f32 %v21263_v52, %v10236_v23  ;;  %v10238_v47 = vadd.f32 %v21265_v37, %v21264_v31  ;;  %v21286_v31 = vld [vmem:[#allocation65_spill] sm:$0xff] }
 0x3c4   : > { %v15258_v16 = vpop.f32.mrf.mxu1  ;;  %v15308_v53 = vpop.f32.mrf.mxu0 }
 0x3c5   : > { %v11493_v63 = vadd.f32 %v11358_v49, %v11071_v24  ;;  %v11074_v61 = vadd.f32 %v15258_v16, %v10652_v60  ;;  %11597 = vrot.lane.b32.xlu1 %v11494_v46, %s15446_s26  ;;  %v10662_v46 = vadd.f32 %v21266_v56, %v10239_v30  ;;  %v21267_v24 = vld [vmem:[#allocation23_spill] sm:$0xff]  ;;  %v21268_v16 = vld [vmem:[#allocation9_spill] sm:$0xff] }
 0x3c6   : > { %v10946_v39 = vpop.f32.mrf.mxu1  ;;  %v11368_v3 = vpop.f32.mrf.mxu0 }
 0x3c7   : > { %v11496_v48 = vadd.f32 %v15308_v53, %v11074_v61  ;;  %v11073_v32 = vadd.f32 %v10946_v39, %v10651_v5  ;;  %11595 = vrot.lane.b32.xlu0 %v11493_v63, %s15446_s26  ;;  %v10241_v53 = vadd.f32 %v21268_v16, %v21267_v24  ;;  %v21269_v39 = vld [vmem:[#allocation61_spill] sm:$0xff]  ;;  %v21289_v24 = vld [vmem:[#allocation66_spill] sm:$0xff] }
 0x3c8   : > { %v15261_v54 = vpop.f32.mrf.mxu1  ;;  %v15311_v34 = vpop.f32.mrf.mxu0 }
 0x3c9   : > { %v11495_v38 = vadd.f32 %v11368_v3, %v11073_v32  ;;  %v11076_v11 = vadd.f32 %v15261_v54, %v10654_v45  ;;  %11601 = vrot.lane.b32.xlu1 %v11496_v48, %s15446_s26  ;;  %v10661_v3 = vadd.f32 %v21269_v39, %v10238_v47  ;;  %v21270_v45 = vld [vmem:[#allocation15_spill] sm:$0xff] }
 0x3ca   : > { %v10956_v42 = vpop.f32.mrf.mxu1  ;;  %v11378_v8 = vpop.f32.mrf.mxu0  ;;  %v10240_v48 = vadd.f32 %v21271_v4, %v21270_v45  ;;  %v21292_v45 = vld [vmem:[#allocation25_spill] sm:$0xff] }
 0x3cb   : > { %v11498_v28 = vadd.f32 %v15311_v34, %v11076_v11  ;;  %v11075_v19 = vadd.f32 %v10956_v42, %v10653_v18  ;;  %11599 = vrot.lane.b32.xlu0 %v11495_v38, %s15446_s26  ;;  %v10664_v38 = vadd.f32 %v21272_v41, %v10241_v53  ;;  %v21273_v11 = vld [vmem:[#allocation33_spill] sm:$0xff]  ;;  %v21274_v42 = vld [vmem:[#allocation39_spill] sm:$0xff] }
 0x3cc   : > { %v15264_v6 = vpop.f32.mrf.mxu1  ;;  %v15314_v44 = vpop.f32.mrf.mxu0 }
 0x3cd   : > { %v11497_v29 = vadd.f32 %v11378_v8, %v11075_v19  ;;  %v11078_v9 = vadd.f32 %v15264_v6, %v10656_v33  ;;  %11605 = vrot.lane.b32.xlu1 %v11498_v28, %s15446_s26  ;;  %v10243_v8 = vadd.f32 %v21274_v42, %v21273_v11  ;;  %v21275_v6 = vld [vmem:[#allocation11_spill] sm:$0xff] }
 0x3ce   : > { %v10966_v1 = vpop.f32.mrf.mxu1  ;;  %v11388_v25 = vpop.f32.mrf.mxu0  ;;  %v21295_v11 = vld [vmem:[#allocation67_spill] sm:$0xff] }
 0x3cf   : > { %v11500_v17 = vadd.f32 %v15314_v44, %v11078_v9  ;;  %v11077_v57 = vadd.f32 %v10966_v1, %v10655_v2  ;;  %11603 = vrot.lane.b32.xlu0 %v11497_v29, %s15446_s26  ;;  %v10663_v44 = vadd.f32 %v21275_v6, %v10240_v48  ;;  %v21276_v2 = vld [vmem:[#allocation16_spill] sm:$0xff] }
 0x3d0   : > { %v15267_v13 = vpop.f32.mrf.mxu1  ;;  %v15317_v21 = vpop.f32.mrf.mxu0  ;;  %v10242_v29 = vadd.f32 %v21277_v51, %v21276_v2  ;;  %v21298_v2 = vld [vmem:[#allocation47_spill] sm:$0xff] }
 0x3d1   : > { %v11499_v40 = vadd.f32 %v11388_v25, %v11077_v57  ;;  %v11080_v15 = vadd.f32 %v15267_v13, %v10658_v20  ;;  %11609 = vrot.lane.b32.xlu1 %v11500_v17, %s15446_s26  ;;  %v10666_v17 = vadd.f32 %v21278_v22, %v10243_v8  ;;  %v21279_v57 = vld [vmem:[#allocation30_spill] sm:$0xff] }
 0x3d2   : > { %v10976_v62 = vpop.f32.mrf.mxu1  ;;  %v11398_v36 = vpop.f32.mrf.mxu0  ;;  %v21280_v13 = vld [vmem:[#allocation46_spill] sm:$0xff] }
 0x3d3   : > { %v11502_v50 = vadd.f32 %v15317_v21, %v11080_v15  ;;  %v11079_v55 = vadd.f32 %v10976_v62, %v10657_v14  ;;  %11607 = vrot.lane.b32.xlu0 %v11499_v40, %s15446_s26  ;;  %v10245_v21 = vadd.f32 %v21280_v13, %v21279_v57  ;;  %v21281_v62 = vld [vmem:[#allocation24_spill] sm:$0xff]  ;;  %v21301_v57 = vld [vmem:[#allocation71_spill] sm:$0xff] }
 0x3d4   : > { %v15270_v12 = vpop.f32.mrf.mxu1  ;;  %v15320_v43 = vpop.f32.mrf.mxu0 }
 0x3d5   : > { %v11501_v0 = vadd.f32 %v11398_v36, %v11079_v55  ;;  %v11082_v49 = vadd.f32 %v15270_v12, %v10660_v27  ;;  %11613 = vrot.lane.b32.xlu1 %v11502_v50, %s15446_s26  ;;  %v10665_v36 = vadd.f32 %v21281_v62, %v10242_v29  ;;  %v21282_v27 = vld [vmem:[#allocation6_spill] sm:$0xff] }
 0x3d6   : > { %v10986_v60 = vpop.f32.mrf.mxu1  ;;  %v11408_v7 = vpop.f32.mrf.mxu0  ;;  %v10244_v59 = vadd.f32 %v21283_v10, %v21282_v27 }
 0x3d7   : > { %v11504_v5 = vadd.f32 %v15320_v43, %v11082_v49  ;;  %v11081_v26 = vadd.f32 %v10986_v60, %v10659_v58  ;;  %11611 = vrot.lane.b32.xlu0 %v11501_v0, %s15446_s26  ;;  %v21284_v43 = vld [vmem:[#allocation56_spill] sm:$0xff] }
 0x3d8   : > { %v15273_v63 = vpop.f32.mrf.mxu1  ;;  %v15323_v61 = vpop.f32.mrf.mxu0  ;;  %v10668_v52 = vadd.f32 %v21284_v43, %v10245_v21  ;;  %v21285_v58 = vld [vmem:[#allocation28_spill] sm:$0xff] }
 0x3d9   : > { %v11503_v32 = vadd.f32 %v11408_v7, %v11081_v26  ;;  %v11084_v54 = vadd.f32 %v15273_v63, %v10662_v46  ;;  %11617 = vrot.lane.b32.xlu1 %v11504_v5, %s15446_s26  ;;  %v10247_v37 = vadd.f32 %v21286_v31, %v21285_v58  ;;  %v21287_v7 = vld [vmem:[#allocation35_spill] sm:$0xff]  ;;  %v21288_v46 = vld [vmem:[#allocation20_spill] sm:$0xff] }
 0x3da   : > { %v10996_v34 = vpop.f32.mrf.mxu1  ;;  %v11418_v18 = vpop.f32.mrf.mxu0  ;;  %v10667_v56 = vadd.f32 %v21287_v7, %v10244_v59  ;;  %v10246_v16 = vadd.f32 %v21289_v24, %v21288_v46  ;;  %v11519_v7 = vld [vmem:[#allocation2] sm:$0xff]  ;;  %v11522_v46 = vld [vmem:[#allocation2 + $0x18] sm:$0xff] }
 0x3db   : > { %v11506_v33 = vadd.f32 %v15323_v61, %v11084_v54  ;;  %v11083_v35 = vadd.f32 %v10996_v34, %v10661_v3  ;;  %11615 = vrot.lane.b32.xlu0 %v11503_v32, %s15446_s26  ;;  %v21290_v61 = vld [vmem:[#allocation52_spill] sm:$0xff]  ;;  %v21291_v3 = vld [vmem:[#allocation55_spill] sm:$0xff] }
 0x3dc   : > { %v15276_v28 = vpop.f32.mrf.mxu1  ;;  %v15326_v19 = vpop.f32.mrf.mxu0  ;;  %v10670_v39 = vadd.f32 %v21290_v61, %v10247_v37  ;;  %v10249_v4 = vadd.f32 %v21292_v45, %v21291_v3 }
 0x3dd   : > { %v11505_v9 = vadd.f32 %v11418_v18, %v11083_v35  ;;  %v11086_v1 = vadd.f32 %v15276_v28, %v10664_v38  ;;  %11621 = vrot.lane.b32.xlu1 %v11506_v33, %s15446_s26  ;;  %v21293_v18 = vld [vmem:[#allocation69_spill] sm:$0xff]  ;;  %v21294_v38 = vld [vmem:[#allocation18_spill] sm:$0xff] }
 0x3de   : > { %v11006_v25 = vpop.f32.mrf.mxu1  ;;  %v11428_v20 = vpop.f32.mrf.mxu0  ;;  %v10669_v41 = vadd.f32 %v21293_v18, %v10246_v16  ;;  %v10248_v42 = vadd.f32 %v21295_v11, %v21294_v38  ;;  %v11525_v11 = vld [vmem:[#allocation2 + $0x30] sm:$0xff] }
 0x3df   : > { %v11508_v14 = vadd.f32 %v15326_v19, %v11086_v1  ;;  %v11085_v23 = vadd.f32 %v11006_v25, %v10663_v44  ;;  %11619 = vrot.lane.b32.xlu0 %v11505_v9, %s15446_s26  ;;  %v21296_v19 = vld [vmem:[#allocation68_spill] sm:$0xff]  ;;  %v21297_v44 = vld [vmem:[#allocation19_spill] sm:$0xff] }
 0x3e0   : > { %v15279_v40 = vpop.f32.mrf.mxu1  ;;  %v15329_v15 = vpop.f32.mrf.mxu0  ;;  %v10672_v6 = vadd.f32 %v21296_v19, %v10249_v4  ;;  %v10251_v51 = vadd.f32 %v21298_v2, %v21297_v44  ;;  %v11523_v4 = vld [vmem:[#allocation2 + $0x20] sm:$0xff] }
 0x3e1   : > { %v11507_v30 = vadd.f32 %v11428_v20, %v11085_v23  ;;  %v11088_v50 = vadd.f32 %v15279_v40, %v10666_v17  ;;  %11625 = vrot.lane.b32.xlu1 %v11508_v14, %s15446_s26  ;;  %v21299_v20 = vld [vmem:[#allocation53_spill] sm:$0xff]  ;;  %v21300_v17 = vld [vmem:[#allocation40_spill] sm:$0xff]  ;;  %v11527_v44 = vld [vmem:[#allocation2 + $0x40] sm:$0xff] }
 0x3e2   : > { %v11016_v55 = vpop.f32.mrf.mxu1  ;;  %v11438_v12 = vpop.f32.mrf.mxu0  ;;  %v10671_v22 = vadd.f32 %v21299_v20, %v10248_v42  ;;  %v10250_v13 = vadd.f32 %v21301_v57, %v21300_v17 }
 0x3e3   : > { %v11510_v47 = vadd.f32 %v15329_v15, %v11088_v50  ;;  %v11087_v0 = vadd.f32 %v11016_v55, %v10665_v36  ;;  %11623 = vrot.lane.b32.xlu0 %v11507_v30, %s15446_s26  ;;  %v21302_v15 = vld [vmem:[#allocation36_spill] sm:$0xff]  ;;  %v21303_v30 = vld [vmem:[#allocation70_spill] sm:$0xff] }
 0x3e4   : > { %v15282_v49 = vpop.f32.mrf.mxu1  ;;  %v15332_v60 = vpop.f32.mrf.mxu0  ;;  %v10674_v62 = vadd.f32 %v21302_v15, %v10251_v51  ;;  %v10673_v50 = vadd.f32 %v21303_v30, %v10250_v13  ;;  %v11532_v13 = vld [vmem:[#allocation2 + $0x68] sm:$0xff]  ;;  %v11531_v15 = vld [vmem:[#allocation2 + $0x60] sm:$0xff] }
 0x3e5   : > { %v11509_v53 = vadd.f32 %v11438_v12, %v11087_v0  ;;  %v11090_v5 = vadd.f32 %v15282_v49, %v10668_v52  ;;  %11629 = vrot.lane.b32.xlu1 %v11510_v47, %s15446_s26  ;;  %v11520_v47 = vld [vmem:[#allocation2 + $0x8] sm:$0xff] }
 0x3e6   : > { %v11026_v26 = vpop.f32.mrf.mxu1  ;;  %v11448_v63 = vpop.f32.mrf.mxu0 }
 0x3e7   : > { %v11512_v48 = vadd.f32 %v15332_v60, %v11090_v5  ;;  %v11089_v32 = vadd.f32 %v11026_v26, %v10667_v56  ;;  %11627 = vrot.lane.b32.xlu0 %v11509_v53, %s15446_s26  ;;  %v11521_v5 = vld [vmem:[#allocation2 + $0x10] sm:$0xff] }
 0x3e8   : > { %v15285_v54 = vpop.f32.mrf.mxu1  ;;  %v15335_v34 = vpop.f32.mrf.mxu0 }
 0x3e9   : > { %v11511_v8 = vadd.f32 %v11448_v63, %v11089_v32  ;;  %v11092_v33 = vadd.f32 %v15285_v54, %v10670_v39  ;;  %11633 = vrot.lane.b32.xlu1 %v11512_v48, %s15446_s26  ;;  %v11524_v63 = vld [vmem:[#allocation2 + $0x28] sm:$0xff]  ;;  %v11526_v54 = vld [vmem:[#allocation2 + $0x38] sm:$0xff] }
 0x3ea   : > { %v11036_v35 = vpop.f32.mrf.mxu1  ;;  %v11458_v28 = vpop.f32.mrf.mxu0 }
 0x3eb   : > { %v11514_v29 = vadd.f32 %v15335_v34, %v11092_v33  ;;  %v11091_v9 = vadd.f32 %v11036_v35, %v10669_v41  ;;  %11631 = vrot.lane.b32.xlu0 %v11511_v8, %s15446_s26  ;;  %v11528_v33 = vld [vmem:[#allocation2 + $0x48] sm:$0xff] }
 0x3ec   : > { %v15288_v1 = vpop.f32.mrf.mxu1  ;;  %v15338_v25 = vpop.f32.mrf.mxu0 }
 0x3ed   : > { %v11513_v21 = vadd.f32 %v11458_v28, %v11091_v9  ;;  %v11094_v14 = vadd.f32 %v15288_v1, %v10672_v6  ;;  %11637 = vrot.lane.b32.xlu1 %v11514_v29, %s15446_s26  ;;  %v11530_v29 = vld [vmem:[#allocation2 + $0x58] sm:$0xff] }
 0x3ee   : > { %v11046_v23 = vpop.f32.mrf.mxu1  ;;  %v11468_v40 = vpop.f32.mrf.mxu0 }
 0x3ef   : > { %v11516_v36 = vadd.f32 %v15338_v25, %v11094_v14  ;;  %v11093_v27 = vadd.f32 %v11046_v23, %v10671_v22  ;;  %11635 = vrot.lane.b32.xlu0 %v11513_v21, %s15446_s26  ;;  %v11529_v22 = vld [vmem:[#allocation2 + $0x50] sm:$0xff] }
 0x3f0   : > { %v15291_v10 = vpop.f32.mrf.mxu1  ;;  %v15341_v59 = vpop.f32.mrf.mxu0 }
 0x3f1   : > { %v11515_v55 = vadd.f32 %v11468_v40, %v11093_v27  ;;  %v11096_v12 = vadd.f32 %v15291_v10, %v10674_v62  ;;  %11641 = vrot.lane.b32.xlu1 %v11516_v36, %s15446_s26  ;;  %v11534_v27 = vld [vmem:[#allocation2 + $0x78] sm:$0xff] }
 0x3f2   : > { %v11056_v43 = vpop.f32.mrf.mxu1  ;;  %v11478_v31 = vpop.f32.mrf.mxu0 }
 0x3f3   : > { %v11518_v52 = vadd.f32 %v15341_v59, %v11096_v12  ;;  %v11095_v58 = vadd.f32 %v11056_v43, %v10673_v50  ;;  %11639 = vrot.lane.b32.xlu0 %v11515_v55, %s15446_s26  ;;  %v11533_v55 = vld [vmem:[#allocation2 + $0x70] sm:$0xff] }
 0x3f5   : > { %v11517_v37 = vadd.f32 %v11478_v31, %v11095_v58  ;;  %11645 = vrot.lane.b32.xlu1 %v11518_v52, %s15446_s26  ;;  %v11536_v52 = vld [vmem:[#allocation2 + $0x88] sm:$0xff] }
 0x3f7   : > { %11643 = vrot.lane.b32.xlu0 %v11517_v37, %s15446_s26 }
 0x42b   : > { %v11586_v0 = vpop.permute.xlu1 %11585 }
 0x42c   : > { %v11680_v49 = vadd.f32 %v11586_v0, %v11520_v47  ;;  %v11535_v47 = vld [vmem:[#allocation2 + $0x80] sm:$0xff] }
 0x42d   : > { %v11584_v60 = vpop.permute.xlu0 %11583 }
 0x42e   : > { %11713 = vst.msk [vmem:[#allocation2 + $0x8] sm:$0xff] %vm11711_vm8, %v11680_v49  ;;  %v11679_v56 = vadd.f32 %v11584_v60, %v11519_v7  ;;  %v11538_v7 = vld [vmem:[#allocation2 + $0x98] sm:$0xff] }
 0x42f   : > { %v11590_v24 = vpop.permute.xlu1 %11589 }
 0x430   : > { %11712 = vst.msk [vmem:[#allocation2] sm:$0xff] %vm11711_vm8, %v11679_v56  ;;  %v11682_v16 = vadd.f32 %v11590_v24, %v11522_v46 }
 0x431   : > { %v11588_v53 = vpop.permute.xlu0 %11587 }
 0x432   : > { %11715 = vst.msk [vmem:[#allocation2 + $0x18] sm:$0xff] %vm11711_vm8, %v11682_v16  ;;  %v11681_v26 = vadd.f32 %v11588_v53, %v11521_v5  ;;  %v11537_v16 = vld [vmem:[#allocation2 + $0x90] sm:$0xff] }
 0x433   : > { %v11594_v61 = vpop.permute.xlu1 %11593 }
 0x434   : > { %11714 = vst.msk [vmem:[#allocation2 + $0x10] sm:$0xff] %vm11711_vm8, %v11681_v26  ;;  %v11684_v39 = vadd.f32 %v11594_v61, %v11524_v63  ;;  %v11540_v63 = vld [vmem:[#allocation2 + $0xa8] sm:$0xff] }
 0x435   : > { %v11745_v3 = vld [vmem:[#allocation2 + $0x8] sm:$0xff]  ;;  %v11592_v45 = vpop.permute.xlu0 %11591 }
 0x436   : > { %11777 = vst.msk [vmem:[%s20566_s6 + $0x8] sm:$0xff] %vm565_vm4, %v11745_v3  ;;  %v11683_v48 = vadd.f32 %v11592_v45, %v11523_v4  ;;  %v11539_v45 = vld [vmem:[#allocation2 + $0xa0] sm:$0xff] }
 0x437   : > { %11717 = vst.msk [vmem:[#allocation2 + $0x28] sm:$0xff] %vm11711_vm8, %v11684_v39  ;;  %v11744_v32 = vld [vmem:[#allocation2] sm:$0xff]  ;;  %v11598_v34 = vpop.permute.xlu1 %11597 }
 0x438   : > { %11776 = vst.msk [vmem:[%s20566_s6] sm:$0xff] %vm565_vm4, %v11744_v32  ;;  %v11686_v18 = vadd.f32 %v11598_v34, %v11526_v54  ;;  %v11542_v54 = vld [vmem:[#allocation2 + $0xb8] sm:$0xff] }
 0x439   : > { %11716 = vst.msk [vmem:[#allocation2 + $0x20] sm:$0xff] %vm11711_vm8, %v11683_v48  ;;  %v11747_v41 = vld [vmem:[#allocation2 + $0x18] sm:$0xff]  ;;  %v11596_v38 = vpop.permute.xlu0 %11595 }
 0x43a   : > { %11779 = vst.msk [vmem:[%s20566_s6 + $0x18] sm:$0xff] %vm565_vm4, %v11747_v41  ;;  %v11685_v42 = vadd.f32 %v11596_v38, %v11525_v11  ;;  %v11541_v38 = vld [vmem:[#allocation2 + $0xb0] sm:$0xff] }
 0x43b   : > { %11719 = vst.msk [vmem:[#allocation2 + $0x38] sm:$0xff] %vm11711_vm8, %v11686_v18  ;;  %v11746_v8 = vld [vmem:[#allocation2 + $0x10] sm:$0xff]  ;;  %v11602_v35 = vpop.permute.xlu1 %11601 }
 0x43c   : > { %11778 = vst.msk [vmem:[%s20566_s6 + $0x10] sm:$0xff] %vm565_vm4, %v11746_v8  ;;  %v11688_v28 = vadd.f32 %v11602_v35, %v11528_v33  ;;  %v11544_v33 = vld [vmem:[#allocation2 + $0xc8] sm:$0xff] }
 0x43d   : > { %11718 = vst.msk [vmem:[#allocation2 + $0x30] sm:$0xff] %vm11711_vm8, %v11685_v42  ;;  %v11600_v6 = vpop.permute.xlu0 %11599 }
 0x43e   : > { %v11749_v19 = vld [vmem:[#allocation2 + $0x28] sm:$0xff]  ;;  %11721 = vst.msk [vmem:[#allocation2 + $0x48] sm:$0xff] %vm11711_vm8, %v11688_v28  ;;  %v11687_v2 = vadd.f32 %v11600_v6, %v11527_v44  ;;  %v11543_v6 = vld [vmem:[#allocation2 + $0xc0] sm:$0xff] }
 0x43f   : > { %11781 = vst.msk [vmem:[%s20566_s6 + $0x28] sm:$0xff] %vm565_vm4, %v11749_v19  ;;  %v11606_v9 = vpop.permute.xlu1 %11605 }
 0x440   : > { %v11748_v51 = vld [vmem:[#allocation2 + $0x20] sm:$0xff]  ;;  %11720 = vst.msk [vmem:[#allocation2 + $0x40] sm:$0xff] %vm11711_vm8, %v11687_v2  ;;  %v11690_v1 = vadd.f32 %v11606_v9, %v11530_v29  ;;  %v11546_v29 = vld [vmem:[#allocation2 + $0xd8] sm:$0xff] }
 0x441   : > { %11780 = vst.msk [vmem:[%s20566_s6 + $0x20] sm:$0xff] %vm565_vm4, %v11748_v51  ;;  %v11604_v20 = vpop.permute.xlu0 %11603 }
 0x442   : > { %v11751_v25 = vld [vmem:[#allocation2 + $0x38] sm:$0xff]  ;;  %11723 = vst.msk [vmem:[#allocation2 + $0x58] sm:$0xff] %vm11711_vm8, %v11690_v1  ;;  %v11689_v17 = vadd.f32 %v11604_v20, %v11529_v22  ;;  %v11545_v20 = vld [vmem:[#allocation2 + $0xd0] sm:$0xff] }
 0x443   : > { %11783 = vst.msk [vmem:[%s20566_s6 + $0x38] sm:$0xff] %vm565_vm4, %v11751_v25  ;;  %v11610_v21 = vpop.permute.xlu1 %11609 }
 0x444   : > { %v11750_v57 = vld [vmem:[#allocation2 + $0x30] sm:$0xff]  ;;  %11722 = vst.msk [vmem:[#allocation2 + $0x50] sm:$0xff] %vm11711_vm8, %v11689_v17  ;;  %v11692_v14 = vadd.f32 %v11610_v21, %v11532_v13  ;;  %v11548_v13 = vld [vmem:[#allocation2 + $0xe8] sm:$0xff] }
 0x445   : > { %11782 = vst.msk [vmem:[%s20566_s6 + $0x30] sm:$0xff] %vm565_vm4, %v11750_v57  ;;  %v11753_v23 = vld [vmem:[#allocation2 + $0x48] sm:$0xff]  ;;  %v11608_v40 = vpop.permute.xlu0 %11607 }
 0x446   : > { %11785 = vst.msk [vmem:[%s20566_s6 + $0x48] sm:$0xff] %vm565_vm4, %v11753_v23  ;;  %v11691_v62 = vadd.f32 %v11608_v40, %v11531_v15  ;;  %v11547_v40 = vld [vmem:[#allocation2 + $0xe0] sm:$0xff] }
 0x447   : > { %11725 = vst.msk [vmem:[#allocation2 + $0x68] sm:$0xff] %vm11711_vm8, %v11692_v14  ;;  %v11752_v36 = vld [vmem:[#allocation2 + $0x40] sm:$0xff]  ;;  %v11614_v10 = vpop.permute.xlu1 %11613 }
 0x448   : > { %11784 = vst.msk [vmem:[%s20566_s6 + $0x40] sm:$0xff] %vm565_vm4, %v11752_v36  ;;  %v11694_v59 = vadd.f32 %v11614_v10, %v11534_v27  ;;  %v11550_v27 = vld [vmem:[#allocation2 + $0xf8] sm:$0xff] }
 0x449   : > { %11724 = vst.msk [vmem:[#allocation2 + $0x60] sm:$0xff] %vm11711_vm8, %v11691_v62  ;;  %v11755_v30 = vld [vmem:[#allocation2 + $0x58] sm:$0xff]  ;;  %v11612_v50 = vpop.permute.xlu0 %11611 }
 0x44a   : > { %11787 = vst.msk [vmem:[%s20566_s6 + $0x58] sm:$0xff] %vm565_vm4, %v11755_v30  ;;  %v11693_v12 = vadd.f32 %v11612_v50, %v11533_v55  ;;  %v11549_v50 = vld [vmem:[#allocation2 + $0xf0] sm:$0xff] }
 0x44b   : > { %11727 = vst.msk [vmem:[#allocation2 + $0x78] sm:$0xff] %vm11711_vm8, %v11694_v59  ;;  %v11754_v43 = vld [vmem:[#allocation2 + $0x50] sm:$0xff]  ;;  %v11618_v58 = vpop.permute.xlu1 %11617 }
 0x44c   : > { %11786 = vst.msk [vmem:[%s20566_s6 + $0x50] sm:$0xff] %vm565_vm4, %v11754_v43  ;;  %v11696_v31 = vadd.f32 %v11618_v58, %v11536_v52 }
 0x44d   : > { %11726 = vst.msk [vmem:[#allocation2 + $0x70] sm:$0xff] %vm11711_vm8, %v11693_v12  ;;  %v11616_v0 = vpop.permute.xlu0 %11615 }
 0x44e   : > { %v11757_v37 = vld [vmem:[#allocation2 + $0x68] sm:$0xff]  ;;  %11729 = vst.msk [vmem:[#allocation2 + $0x88] sm:$0xff] %vm11711_vm8, %v11696_v31  ;;  %v11695_v49 = vadd.f32 %v11616_v0, %v11535_v47 }
 0x44f   : > { %11789 = vst.msk [vmem:[%s20566_s6 + $0x68] sm:$0xff] %vm565_vm4, %v11757_v37  ;;  %v11622_v56 = vpop.permute.xlu1 %11621 }
 0x450   : > { %v11756_v60 = vld [vmem:[#allocation2 + $0x60] sm:$0xff]  ;;  %11728 = vst.msk [vmem:[#allocation2 + $0x80] sm:$0xff] %vm11711_vm8, %v11695_v49  ;;  %v11698_v46 = vadd.f32 %v11622_v56, %v11538_v7 }
 0x451   : > { %11788 = vst.msk [vmem:[%s20566_s6 + $0x60] sm:$0xff] %vm565_vm4, %v11756_v60  ;;  %v11620_v53 = vpop.permute.xlu0 %11619 }
 0x452   : > { %v11759_v24 = vld [vmem:[#allocation2 + $0x78] sm:$0xff]  ;;  %11731 = vst.msk [vmem:[#allocation2 + $0x98] sm:$0xff] %vm11711_vm8, %v11698_v46  ;;  %v11697_v5 = vadd.f32 %v11620_v53, %v11537_v16 }
 0x453   : > { %11791 = vst.msk [vmem:[%s20566_s6 + $0x78] sm:$0xff] %vm565_vm4, %v11759_v24  ;;  %v11626_v61 = vpop.permute.xlu1 %11625 }
 0x454   : > { %v11758_v26 = vld [vmem:[#allocation2 + $0x70] sm:$0xff]  ;;  %11730 = vst.msk [vmem:[#allocation2 + $0x90] sm:$0xff] %vm11711_vm8, %v11697_v5  ;;  %v11700_v39 = vadd.f32 %v11626_v61, %v11540_v63 }
 0x455   : > { %11790 = vst.msk [vmem:[%s20566_s6 + $0x70] sm:$0xff] %vm565_vm4, %v11758_v26  ;;  %v11761_v3 = vld [vmem:[#allocation2 + $0x88] sm:$0xff]  ;;  %v11624_v4 = vpop.permute.xlu0 %11623 }
 0x456   : > { %11793 = vst.msk [vmem:[%s20566_s6 + $0x88] sm:$0xff] %vm565_vm4, %v11761_v3  ;;  %v11699_v48 = vadd.f32 %v11624_v4, %v11539_v45 }
 0x457   : > { %11733 = vst.msk [vmem:[#allocation2 + $0xa8] sm:$0xff] %vm11711_vm8, %v11700_v39  ;;  %v11760_v32 = vld [vmem:[#allocation2 + $0x80] sm:$0xff]  ;;  %v11630_v34 = vpop.permute.xlu1 %11629 }
 0x458   : > { %11792 = vst.msk [vmem:[%s20566_s6 + $0x80] sm:$0xff] %vm565_vm4, %v11760_v32  ;;  %v11702_v18 = vadd.f32 %v11630_v34, %v11542_v54 }
 0x459   : > { %11732 = vst.msk [vmem:[#allocation2 + $0xa0] sm:$0xff] %vm11711_vm8, %v11699_v48  ;;  %v11763_v41 = vld [vmem:[#allocation2 + $0x98] sm:$0xff]  ;;  %v11628_v11 = vpop.permute.xlu0 %11627 }
 0x45a   : > { %11795 = vst.msk [vmem:[%s20566_s6 + $0x98] sm:$0xff] %vm565_vm4, %v11763_v41  ;;  %v11701_v42 = vadd.f32 %v11628_v11, %v11541_v38 }
 0x45b   : > { %11735 = vst.msk [vmem:[#allocation2 + $0xb8] sm:$0xff] %vm11711_vm8, %v11702_v18  ;;  %v11762_v8 = vld [vmem:[#allocation2 + $0x90] sm:$0xff]  ;;  %v11634_v35 = vpop.permute.xlu1 %11633 }
 0x45c   : > { %11794 = vst.msk [vmem:[%s20566_s6 + $0x90] sm:$0xff] %vm565_vm4, %v11762_v8  ;;  %v11704_v28 = vadd.f32 %v11634_v35, %v11544_v33 }
 0x45d   : > { %11734 = vst.msk [vmem:[#allocation2 + $0xb0] sm:$0xff] %vm11711_vm8, %v11701_v42  ;;  %v11632_v44 = vpop.permute.xlu0 %11631 }
 0x45e   : > { %v11765_v19 = vld [vmem:[#allocation2 + $0xa8] sm:$0xff]  ;;  %11737 = vst.msk [vmem:[#allocation2 + $0xc8] sm:$0xff] %vm11711_vm8, %v11704_v28  ;;  %v11703_v2 = vadd.f32 %v11632_v44, %v11543_v6 }
 0x45f   : > { %11797 = vst.msk [vmem:[%s20566_s6 + $0xa8] sm:$0xff] %vm565_vm4, %v11765_v19  ;;  %v11638_v9 = vpop.permute.xlu1 %11637 }
 0x460   : > { %v11764_v51 = vld [vmem:[#allocation2 + $0xa0] sm:$0xff]  ;;  %11736 = vst.msk [vmem:[#allocation2 + $0xc0] sm:$0xff] %vm11711_vm8, %v11703_v2  ;;  %v11706_v1 = vadd.f32 %v11638_v9, %v11546_v29 }
 0x461   : > { %11796 = vst.msk [vmem:[%s20566_s6 + $0xa0] sm:$0xff] %vm565_vm4, %v11764_v51  ;;  %v11636_v22 = vpop.permute.xlu0 %11635 }
 0x462   : > { %v11767_v25 = vld [vmem:[#allocation2 + $0xb8] sm:$0xff]  ;;  %11739 = vst.msk [vmem:[#allocation2 + $0xd8] sm:$0xff] %vm11711_vm8, %v11706_v1  ;;  %v11705_v17 = vadd.f32 %v11636_v22, %v11545_v20 }
 0x463   : > { %11799 = vst.msk [vmem:[%s20566_s6 + $0xb8] sm:$0xff] %vm565_vm4, %v11767_v25  ;;  %v11642_v21 = vpop.permute.xlu1 %11641 }
 0x464   : > { %v11766_v57 = vld [vmem:[#allocation2 + $0xb0] sm:$0xff]  ;;  %11738 = vst.msk [vmem:[#allocation2 + $0xd0] sm:$0xff] %vm11711_vm8, %v11705_v17  ;;  %v11708_v14 = vadd.f32 %v11642_v21, %v11548_v13 }
 0x465   : > { %11798 = vst.msk [vmem:[%s20566_s6 + $0xb0] sm:$0xff] %vm565_vm4, %v11766_v57  ;;  %v11769_v23 = vld [vmem:[#allocation2 + $0xc8] sm:$0xff]  ;;  %v11640_v15 = vpop.permute.xlu0 %11639 }
 0x466   : > { %11801 = vst.msk [vmem:[%s20566_s6 + $0xc8] sm:$0xff] %vm565_vm4, %v11769_v23  ;;  %v11707_v62 = vadd.f32 %v11640_v15, %v11547_v40 }
 0x467   : > { %11741 = vst.msk [vmem:[#allocation2 + $0xe8] sm:$0xff] %vm11711_vm8, %v11708_v14  ;;  %v11768_v36 = vld [vmem:[#allocation2 + $0xc0] sm:$0xff]  ;;  %v11646_v10 = vpop.permute.xlu1 %11645 }
 0x468   : > { %11800 = vst.msk [vmem:[%s20566_s6 + $0xc0] sm:$0xff] %vm565_vm4, %v11768_v36  ;;  %v11710_v59 = vadd.f32 %v11646_v10, %v11550_v27 }
 0x469   : > { %11740 = vst.msk [vmem:[#allocation2 + $0xe0] sm:$0xff] %vm11711_vm8, %v11707_v62  ;;  %v11771_v30 = vld [vmem:[#allocation2 + $0xd8] sm:$0xff]  ;;  %v11644_v55 = vpop.permute.xlu0 %11643 }
 0x46a   : > { %11803 = vst.msk [vmem:[%s20566_s6 + $0xd8] sm:$0xff] %vm565_vm4, %v11771_v30  ;;  %v11709_v12 = vadd.f32 %v11644_v55, %v11549_v50 }
 0x46b   : > { %11743 = vst.msk [vmem:[#allocation2 + $0xf8] sm:$0xff] %vm11711_vm8, %v11710_v59  ;;  %v11770_v43 = vld [vmem:[#allocation2 + $0xd0] sm:$0xff] }
 0x46c   : > { %11802 = vst.msk [vmem:[%s20566_s6 + $0xd0] sm:$0xff] %vm565_vm4, %v11770_v43 }
 0x46d   : > { %11742 = vst.msk [vmem:[#allocation2 + $0xf0] sm:$0xff] %vm11711_vm8, %v11709_v12 }
 0x46e   : > { %v11773_v52 = vld [vmem:[#allocation2 + $0xe8] sm:$0xff] }
 0x46f   : > { %11805 = vst.msk [vmem:[%s20566_s6 + $0xe8] sm:$0xff] %vm565_vm4, %v11773_v52 }
 0x470   : > { %v11772_v58 = vld [vmem:[#allocation2 + $0xe0] sm:$0xff] }
 0x471   : > { %11804 = vst.msk [vmem:[%s20566_s6 + $0xe0] sm:$0xff] %vm565_vm4, %v11772_v58 }
 0x472   : > { %v11775_v31 = vld [vmem:[#allocation2 + $0xf8] sm:$0xff] }
 0x473   : > { %11807 = vst.msk [vmem:[%s20566_s6 + $0xf8] sm:$0xff] %vm565_vm4, %v11775_v31 }
 0x474   : > { %v11774_v37 = vld [vmem:[#allocation2 + $0xf0] sm:$0xff] }
 0x475   : > { %11806 = vst.msk [vmem:[%s20566_s6 + $0xf0] sm:$0xff] %vm565_vm4, %v11774_v37 }
 0x476 PF: > { %s14_s15 = sadd.s32 1, %s15442_s15  }
 0x477   : > { %p11_p4 = scmp.ge.s32.totalorder %s14_s15, 4  }
 0x479   :  { %13 = sbr.rel (!%p11_p4) target bundleno = 1 (0x1), region = 95 }

</bundles_post_ra>
